<compile_context>
chip_gen: v5e
topology: v5e:2x2
jax: 0.10.0
libtpu: 0.0.40
codegen_flags: <defaults>
</compile_context>

<pallas_src>
import numpy as np
import jax
import jax.numpy as jnp
from jax.experimental import pallas as pl
from jax.experimental.pallas import tpu as pltpu


# ----------------------------------------------------------------------------
# Fused kernel: the whole network for B images per grid step.
# ----------------------------------------------------------------------------

def _net_kernel(x_ref, wb1_ref, b1_ref, wb2_ref, b2_ref, wb3_ref, b3_ref,
                w1_ref, fb1_ref, w2_ref, fb2_ref, w3_ref, fb3_ref,
                w4_ref, fb4_ref, out_ref):
    f32, bf16 = jnp.float32, jnp.bfloat16
    rows = x_ref.shape[0]          # B * 32 input rows in this block
    B16 = rows // 2                # B * 16
    B = rows // 32

    def mm(a, w):
        # bf16 MXU operands, f32 accumulation.
        return jnp.dot(a.astype(bf16), w.astype(bf16),
                       preferred_element_type=f32)

    def up(v, s):
        # Shift rows up by s (with wrap).  Downstream only consumes rows r with
        # r + s < 16 inside each per-image 16-row block, so the wrapped tail
        # rows are harmless finite garbage.
        return v if s == 0 else jnp.concatenate([v[s:], v[:s]], axis=0)

    # Even / odd input rows of every image, straight from the VMEM block.
    xe = x_ref[pl.ds(0, B16, stride=2), :]            # (B*16, 96)
    xo = x_ref[pl.ds(1, B16, stride=2), :]            # (B*16, 96)
    xx = jnp.concatenate([xe, xo], axis=0)            # (2*B*16, 96)

    # ---- conv1 (3->7, 5x5) + ReLU + 2x2 max-pool (parity decomposition) ----
    pe, po = [], []
    for ki in range(5):
        prod = mm(xx, wb1_ref[ki])                    # (2*B*16, 196)
        pe.append(prod[:B16])                         # even-input-row products
        po.append(prod[B16:])                         # odd-input-row products
    # even conv rows (oh = 2r): taps use xe/xo shifted by 0,0,1,1,2
    acc_e = (pe[0] + po[1]) + up(pe[2] + po[3], 1) + up(pe[4], 2)
    # odd conv rows (oh = 2r+1): taps use xo/xe shifted by 0,1,1,2,2
    acc_o = po[0] + up(pe[1] + po[2], 1) + up(pe[3] + po[4], 2)
    # lanes [:98] = even conv cols, [98:] = odd conv cols -> 2x2 pool = max of 4
    pooled = jnp.maximum(jnp.maximum(acc_e[:, :98], acc_e[:, 98:]),
                         jnp.maximum(acc_o[:, :98], acc_o[:, 98:]))
    act1 = jnp.maximum(pooled + b1_ref[...], 0.0)     # (B*16, 98); rows 0..13 valid

    # ---- conv2 (7->12, 5x5) + ReLU: 5 taps fused along K --------------------
    win2 = jnp.concatenate([up(act1, k) for k in range(5)], axis=-1)  # (B*16, 490)
    act2 = jnp.maximum(mm(win2, wb2_ref[...]) + b2_ref[...], 0.0)     # rows 0..9 valid

    # ---- conv3 (12->17, 5x5) + ReLU -----------------------------------------
    win3 = jnp.concatenate([up(act2, k) for k in range(5)], axis=-1)  # (B*16, 600)
    act3 = jnp.maximum(mm(win3, wb3_ref[...]) + b3_ref[...], 0.0)     # rows 0..5 valid

    # ---- torch .view(-1, 612): gather the 6 valid conv3 rows of every image
    # into lanes with tiny one-hot selection matmuls (keeps everything 2-D). --
    col = jax.lax.broadcasted_iota(jnp.int32, (B, B16), 1)
    base = jax.lax.broadcasted_iota(jnp.int32, (B, B16), 0) * 16
    feat = jnp.concatenate(
        [mm((col == base + h).astype(f32), act3) for h in range(6)],
        axis=-1)                                                      # (B, 612)

    # ---- fc1..fc4 (batch block stacked in M) --------------------------------
    h = jnp.maximum(mm(feat, w1_ref[...]) + fb1_ref[...], 0.0)        # (B, 200)
    h = jnp.maximum(mm(h, w2_ref[...]) + fb2_ref[...], 0.0)           # (B, 150)
    h = jnp.maximum(mm(h, w3_ref[...]) + fb3_ref[...], 0.0)           # (B, 50)
    out_ref[...] = (mm(h, w4_ref[...]) + fb4_ref[...]).astype(out_ref.dtype)


# ----------------------------------------------------------------------------
# pallas_call wrapper
# ----------------------------------------------------------------------------

def _const_spec(shape):
    nd = len(shape)
    return pl.BlockSpec(shape, lambda i, _nd=nd: (0,) * _nd)


def net_forward(x, kp, block_b=8):
    """x: (N, 3, 32, 32) float32 NCHW (PyTorch layout) -> (N, 10) logits."""
    assert block_b % 8 == 0, "block_b must be a multiple of 8"
    N = x.shape[0]
    B = block_b
    nb = -(-N // B)
    Np = nb * B

    # One-time layout prep: rows = n*32 + h, lanes = w*3 + c  (no im2col).
    xl = jnp.transpose(x, (0, 2, 3, 1)).reshape(N * 32, 96)
    if Np != N:
        xl = jnp.pad(xl, ((0, (Np - N) * 32), (0, 0)))

    weights = (kp["wb1"], kp["b1"],
               kp["wb2"], kp["b2"],
               kp["wb3"], kp["b3"],
               kp["w1"], kp["fb1"],
               kp["w2"], kp["fb2"],
               kp["w3"], kp["fb3"],
               kp["w4"], kp["fb4"])

    in_specs = [pl.BlockSpec((B * 32, 96), lambda i: (i, 0))]
    in_specs += [_const_spec(w.shape) for w in weights]

    out = pl.pallas_call(
        _net_kernel,
        out_shape=jax.ShapeDtypeStruct((Np, 10), jnp.float32),
        grid=(nb,),
        in_specs=in_specs,
        out_specs=pl.BlockSpec((B, 10), lambda i: (i, 0)),
        compiler_params=pltpu.CompilerParams(
            dimension_semantics=("parallel",)),
    )(xl, *weights)
    return out[:N]


# ----------------------------------------------------------------------------
# Parameters: PyTorch layout + one-time host-side repack into kernel layout
# ----------------------------------------------------------------------------

def init_torch_params(key):
    """Parameters in the exact PyTorch nn.Module layout / init distribution."""
    def uni(k, shape, fan_in):
        bound = 1.0 / np.sqrt(float(fan_in))
        return jax.random.uniform(k, shape, jnp.float32, -bound, bound)

    ks = jax.random.split(key, 14)
    p = {}
    p["c1w"] = uni(ks[0], (7, 3, 5, 5), 3 * 5 * 5)
    p["c1b"] = uni(ks[1], (7,), 3 * 5 * 5)
    p["c2w"] = uni(ks[2], (12, 7, 5, 5), 7 * 5 * 5)
    p["c2b"] = uni(ks[3], (12,), 7 * 5 * 5)
    p["c3w"] = uni(ks[4], (17, 12, 5, 5), 12 * 5 * 5)
    p["c3b"] = uni(ks[5], (17,), 12 * 5 * 5)
    p["f1w"] = uni(ks[6], (200, 17 * 6 * 6), 17 * 6 * 6)
    p["f1b"] = uni(ks[7], (200,), 17 * 6 * 6)
    p["f2w"] = uni(ks[8], (150, 200), 200)
    p["f2b"] = uni(ks[9], (150,), 200)
    p["f3w"] = uni(ks[10], (50, 150), 150)
    p["f3b"] = uni(ks[11], (50,), 150)
    p["f4w"] = uni(ks[12], (10, 50), 50)
    p["f4b"] = uni(ks[13], (10,), 50)
    return p


def _conv_band(w, in_w, out_cols):
    """Block-banded weight for a KHxKW valid conv in the (H, W*C) layout.

    w: (OC, C, KH, KW) torch-layout conv weight (numpy).
    Returns (KH, in_w*C, len(out_cols)*OC) with
      band[ki][wi*C + c, s*OC + oc] = w[oc, c, ki, wi - out_cols[s]]
    so that  y[oh, s*OC + oc] = sum_ki (x_row[oh + ki] @ band[ki])[s*OC + oc].
    """
    OC, C, KH, KW = w.shape
    band = np.zeros((KH, in_w * C, len(out_cols) * OC), np.float32)
    for ki in range(KH):
        for s, ow in enumerate(out_cols):
            for kj in range(KW):
                wi = ow + kj
                band[ki, wi * C:(wi + 1) * C, s * OC:(s + 1) * OC] = \
                    w[:, :, ki, kj].T
    return band


def prepare_kernel_params(p):
    """Host-side, one-time repack of PyTorch-layout params into kernel layout."""
    f = lambda a: np.asarray(a, np.float32)
    bf = jnp.bfloat16
    c1w, c2w, c3w = f(p["c1w"]), f(p["c2w"]), f(p["c3w"])

    wb1e = _conv_band(c1w, 32, range(0, 28, 2))          # (5, 96, 98) even cols
    wb1o = _conv_band(c1w, 32, range(1, 28, 2))          # (5, 96, 98) odd cols
    wb1 = np.concatenate([wb1e, wb1o], axis=-1)          # (5, 96, 196)
    wb2 = _conv_band(c2w, 14, range(10))                 # (5, 98, 120)
    wb3 = _conv_band(c3w, 10, range(6))                  # (5, 120, 102)

    kp = {
        "wb1": jnp.asarray(wb1, bf),
        "b1": jnp.asarray(np.tile(f(p["c1b"]), 14).reshape(1, 98)),
        "wb2": jnp.asarray(wb2.reshape(5 * 98, 120), bf),        # K-fused
        "b2": jnp.asarray(np.tile(f(p["c2b"]), 10).reshape(1, 120)),
        "wb3": jnp.asarray(wb3.reshape(5 * 120, 102), bf),       # K-fused
        "b3": jnp.asarray(np.tile(f(p["c3b"]), 6).reshape(1, 102)),
        # fc1: fold the torch NCHW flatten (idx = c*36 + h*6 + w) into the
        # kernel's (h, w*17 + c) feature order.
        "w1": jnp.asarray(f(p["f1w"]).reshape(200, 17, 6, 6)
                          .transpose(2, 3, 1, 0).reshape(612, 200), bf),
        "fb1": jnp.asarray(f(p["f1b"]).reshape(1, 200)),
        "w2": jnp.asarray(f(p["f2w"]).T, bf),                    # (200, 150)
        "fb2": jnp.asarray(f(p["f2b"]).reshape(1, 150)),
        "w3": jnp.asarray(f(p["f3w"]).T, bf),                    # (150, 50)
        "fb3": jnp.asarray(f(p["f3b"]).reshape(1, 50)),
        "w4": jnp.asarray(f(p["f4w"]).T, bf),                    # (50, 10)
        "fb4": jnp.asarray(f(p["f4b"]).reshape(1, 10)),
    }
    return kp


# ----------------------------------------------------------------------------
# Pure-NumPy reference of the original PyTorch module (for self-check)
# ----------------------------------------------------------------------------

def reference_forward_np(x, p):
    x = np.asarray(x, np.float64)
    g = lambda k: np.asarray(p[k], np.float64)

    def conv2d(a, w, b):
        n, c, hh, ww = a.shape
        oc, _, kh, kw = w.shape
        oh, ow = hh - kh + 1, ww - kw + 1
        out = np.zeros((n, oc, oh, ow), np.float64)
        for ki in range(kh):
            for kj in range(kw):
                patch = a[:, :, ki:ki + oh, kj:kj + ow]
                out += np.einsum("nchw,oc->nohw", patch, w[:, :, ki, kj])
        return out + b[None, :, None, None]

    relu = lambda a: np.maximum(a, 0.0)
    pool = lambda a: np.maximum(
        np.maximum(a[:, :, 0::2, 0::2], a[:, :, 0::2, 1::2]),
        np.maximum(a[:, :, 1::2, 0::2], a[:, :, 1::2, 1::2]))

    a = pool(relu(conv2d(x, g("c1w"), g("c1b"))))
    a = relu(conv2d(a, g("c2w"), g("c2b")))
    a = relu(conv2d(a, g("c3w"), g("c3b")))
    a = a.reshape(a.shape[0], -1)
    a = relu(a @ g("f1w").T + g("f1b"))
    a = relu(a @ g("f2w").T + g("f2b"))
    a = relu(a @ g("f3w").T + g("f3b"))
    return a @ g("f4w").T + g("f4b")


# ----------------------------------------------------------------------------

if __name__ == "__main__":
    key = jax.random.PRNGKey(0)
    kx, kparam = jax.random.split(key)
    # 3x32x32 input is forced by fc1's 17*6*6 fan-in; batch = 16 so the
    # batch-blocked grid (B = 8) has two steps.
    x = jax.random.normal(kx, (16, 3, 32, 32), jnp.float32)

    torch_params = init_torch_params(kparam)
    kernel_params = prepare_kernel_params(torch_params)

    fwd = jax.jit(net_forward)
    out = jax.block_until_ready(fwd(x, kernel_params))

    assert out.shape == (16, 10), out.shape
    assert out.dtype == jnp.float32

    ref = reference_forward_np(np.asarray(x), torch_params)
    err = np.max(np.abs(np.asarray(out, np.float64) - ref))
    # Tolerance accounts for bf16 MXU operands (f32 accumulation).
    if not np.allclose(np.asarray(out, np.float64), ref, rtol=5e-2, atol=2e-2):
        raise AssertionError(f"mismatch vs NumPy reference: max abs err {err}")
    print("KERNEL_OK")
</pallas_src>

<mosaic_0001>
module attributes {stable_mosaic.version = 11 : i64} {
  func.func @_net_kernel(%arg0: i32, %arg1: memref<256x96xf32, #tpu.memory_space<vmem>>, %arg2: memref<5x96x196xbf16, #tpu.memory_space<vmem>>, %arg3: memref<1x98xf32, #tpu.memory_space<vmem>>, %arg4: memref<490x120xbf16, #tpu.memory_space<vmem>>, %arg5: memref<1x120xf32, #tpu.memory_space<vmem>>, %arg6: memref<600x102xbf16, #tpu.memory_space<vmem>>, %arg7: memref<1x102xf32, #tpu.memory_space<vmem>>, %arg8: memref<612x200xbf16, #tpu.memory_space<vmem>>, %arg9: memref<1x200xf32, #tpu.memory_space<vmem>>, %arg10: memref<200x150xbf16, #tpu.memory_space<vmem>>, %arg11: memref<1x150xf32, #tpu.memory_space<vmem>>, %arg12: memref<150x50xbf16, #tpu.memory_space<vmem>>, %arg13: memref<1x50xf32, #tpu.memory_space<vmem>>, %arg14: memref<50x10xbf16, #tpu.memory_space<vmem>>, %arg15: memref<1x10xf32, #tpu.memory_space<vmem>>, %arg16: memref<8x10xf32, #tpu.memory_space<vmem>>) attributes {dimension_semantics = [#tpu.dimension_semantics<parallel>], iteration_bounds = array<i64: 2>, scalar_prefetch = 0 : i64, scratch_operands = 0 : i64, tpu.core_type = #tpu.core_type<tc>, window_params = [{transform_indices = @transform_0, window_bounds = array<i64: 256, 96>}, {pipeline_mode = #tpu.pipeline_mode<synchronous>, transform_indices = @transform_1, window_bounds = array<i64: 5, 96, 196>}, {pipeline_mode = #tpu.pipeline_mode<synchronous>, transform_indices = @transform_2, window_bounds = array<i64: 1, 98>}, {pipeline_mode = #tpu.pipeline_mode<synchronous>, transform_indices = @transform_3, window_bounds = array<i64: 490, 120>}, {pipeline_mode = #tpu.pipeline_mode<synchronous>, transform_indices = @transform_4, window_bounds = array<i64: 1, 120>}, {pipeline_mode = #tpu.pipeline_mode<synchronous>, transform_indices = @transform_5, window_bounds = array<i64: 600, 102>}, {pipeline_mode = #tpu.pipeline_mode<synchronous>, transform_indices = @transform_6, window_bounds = array<i64: 1, 102>}, {pipeline_mode = #tpu.pipeline_mode<synchronous>, transform_indices = @transform_7, window_bounds = array<i64: 612, 200>}, {pipeline_mode = #tpu.pipeline_mode<synchronous>, transform_indices = @transform_8, window_bounds = array<i64: 1, 200>}, {pipeline_mode = #tpu.pipeline_mode<synchronous>, transform_indices = @transform_9, window_bounds = array<i64: 200, 150>}, {pipeline_mode = #tpu.pipeline_mode<synchronous>, transform_indices = @transform_10, window_bounds = array<i64: 1, 150>}, {pipeline_mode = #tpu.pipeline_mode<synchronous>, transform_indices = @transform_11, window_bounds = array<i64: 150, 50>}, {pipeline_mode = #tpu.pipeline_mode<synchronous>, transform_indices = @transform_12, window_bounds = array<i64: 1, 50>}, {pipeline_mode = #tpu.pipeline_mode<synchronous>, transform_indices = @transform_13, window_bounds = array<i64: 50, 10>}, {pipeline_mode = #tpu.pipeline_mode<synchronous>, transform_indices = @transform_14, window_bounds = array<i64: 1, 10>}, {transform_indices = @transform_15, window_bounds = array<i64: 8, 10>}]} {
    %c0 = arith.constant 0 : index
    %c0_0 = arith.constant 0 : index
    %0 = tpu.strided_load %arg1[%c0, %c0_0] {strides = array<i32: 2, 1>} : memref<256x96xf32, #tpu.memory_space<vmem>>, vector<128x96xf32>
    %c1 = arith.constant 1 : index
    %c0_1 = arith.constant 0 : index
    %1 = tpu.strided_load %arg1[%c1, %c0_1] {strides = array<i32: 2, 1>} : memref<256x96xf32, #tpu.memory_space<vmem>>, vector<128x96xf32>
    %2 = tpu.concatenate %0, %1 in 0 : vector<128x96xf32>, vector<128x96xf32> -> vector<256x96xf32>
    %c0_2 = arith.constant 0 : index
    %c0_3 = arith.constant 0 : index
    %c0_4 = arith.constant 0 : index
    %3 = vector.load %arg2[%c0_2, %c0_3, %c0_4] : memref<5x96x196xbf16, #tpu.memory_space<vmem>>, vector<1x96x196xbf16>
    %4 = vector.shape_cast %3 : vector<1x96x196xbf16> to vector<96x196xbf16>
    %5 = arith.truncf %2 : vector<256x96xf32> to vector<256x96xbf16>
    %cst = arith.constant dense<0.000000e+00> : vector<256x196xf32>
    %6 = tpu.matmul %5, %4, %cst {dimension_numbers = #tpu.dot_dimension_numbers<[1], [0], [0], [1], [0, 0, 1, 1], [], []>} : vector<256x96xbf16>, vector<96x196xbf16>, vector<256x196xf32> -> vector<256x196xf32>
    %7 = vector.extract_strided_slice %6 {offsets = [0, 0], sizes = [128, 196], strides = [1, 1]} : vector<256x196xf32> to vector<128x196xf32>
    %8 = vector.extract_strided_slice %6 {offsets = [128, 0], sizes = [128, 196], strides = [1, 1]} : vector<256x196xf32> to vector<128x196xf32>
    %c1_5 = arith.constant 1 : index
    %c0_6 = arith.constant 0 : index
    %c0_7 = arith.constant 0 : index
    %9 = vector.load %arg2[%c1_5, %c0_6, %c0_7] : memref<5x96x196xbf16, #tpu.memory_space<vmem>>, vector<1x96x196xbf16>
    %10 = vector.shape_cast %9 : vector<1x96x196xbf16> to vector<96x196xbf16>
    %11 = arith.truncf %2 : vector<256x96xf32> to vector<256x96xbf16>
    %cst_8 = arith.constant dense<0.000000e+00> : vector<256x196xf32>
    %12 = tpu.matmul %11, %10, %cst_8 {dimension_numbers = #tpu.dot_dimension_numbers<[1], [0], [0], [1], [0, 0, 1, 1], [], []>} : vector<256x96xbf16>, vector<96x196xbf16>, vector<256x196xf32> -> vector<256x196xf32>
    %13 = vector.extract_strided_slice %12 {offsets = [0, 0], sizes = [128, 196], strides = [1, 1]} : vector<256x196xf32> to vector<128x196xf32>
    %14 = vector.extract_strided_slice %12 {offsets = [128, 0], sizes = [128, 196], strides = [1, 1]} : vector<256x196xf32> to vector<128x196xf32>
    %c2 = arith.constant 2 : index
    %c0_9 = arith.constant 0 : index
    %c0_10 = arith.constant 0 : index
    %15 = vector.load %arg2[%c2, %c0_9, %c0_10] : memref<5x96x196xbf16, #tpu.memory_space<vmem>>, vector<1x96x196xbf16>
    %16 = vector.shape_cast %15 : vector<1x96x196xbf16> to vector<96x196xbf16>
    %17 = arith.truncf %2 : vector<256x96xf32> to vector<256x96xbf16>
    %cst_11 = arith.constant dense<0.000000e+00> : vector<256x196xf32>
    %18 = tpu.matmul %17, %16, %cst_11 {dimension_numbers = #tpu.dot_dimension_numbers<[1], [0], [0], [1], [0, 0, 1, 1], [], []>} : vector<256x96xbf16>, vector<96x196xbf16>, vector<256x196xf32> -> vector<256x196xf32>
    %19 = vector.extract_strided_slice %18 {offsets = [0, 0], sizes = [128, 196], strides = [1, 1]} : vector<256x196xf32> to vector<128x196xf32>
    %20 = vector.extract_strided_slice %18 {offsets = [128, 0], sizes = [128, 196], strides = [1, 1]} : vector<256x196xf32> to vector<128x196xf32>
    %c3 = arith.constant 3 : index
    %c0_12 = arith.constant 0 : index
    %c0_13 = arith.constant 0 : index
    %21 = vector.load %arg2[%c3, %c0_12, %c0_13] : memref<5x96x196xbf16, #tpu.memory_space<vmem>>, vector<1x96x196xbf16>
    %22 = vector.shape_cast %21 : vector<1x96x196xbf16> to vector<96x196xbf16>
    %23 = arith.truncf %2 : vector<256x96xf32> to vector<256x96xbf16>
    %cst_14 = arith.constant dense<0.000000e+00> : vector<256x196xf32>
    %24 = tpu.matmul %23, %22, %cst_14 {dimension_numbers = #tpu.dot_dimension_numbers<[1], [0], [0], [1], [0, 0, 1, 1], [], []>} : vector<256x96xbf16>, vector<96x196xbf16>, vector<256x196xf32> -> vector<256x196xf32>
    %25 = vector.extract_strided_slice %24 {offsets = [0, 0], sizes = [128, 196], strides = [1, 1]} : vector<256x196xf32> to vector<128x196xf32>
    %26 = vector.extract_strided_slice %24 {offsets = [128, 0], sizes = [128, 196], strides = [1, 1]} : vector<256x196xf32> to vector<128x196xf32>
    %c4 = arith.constant 4 : index
    %c0_15 = arith.constant 0 : index
    %c0_16 = arith.constant 0 : index
    %27 = vector.load %arg2[%c4, %c0_15, %c0_16] : memref<5x96x196xbf16, #tpu.memory_space<vmem>>, vector<1x96x196xbf16>
    %28 = vector.shape_cast %27 : vector<1x96x196xbf16> to vector<96x196xbf16>
    %29 = arith.truncf %2 : vector<256x96xf32> to vector<256x96xbf16>
    %cst_17 = arith.constant dense<0.000000e+00> : vector<256x196xf32>
    %30 = tpu.matmul %29, %28, %cst_17 {dimension_numbers = #tpu.dot_dimension_numbers<[1], [0], [0], [1], [0, 0, 1, 1], [], []>} : vector<256x96xbf16>, vector<96x196xbf16>, vector<256x196xf32> -> vector<256x196xf32>
    %31 = vector.extract_strided_slice %30 {offsets = [0, 0], sizes = [128, 196], strides = [1, 1]} : vector<256x196xf32> to vector<128x196xf32>
    %32 = vector.extract_strided_slice %30 {offsets = [128, 0], sizes = [128, 196], strides = [1, 1]} : vector<256x196xf32> to vector<128x196xf32>
    %33 = arith.addf %7, %14 : vector<128x196xf32>
    %34 = arith.addf %19, %26 : vector<128x196xf32>
    %35 = vector.extract_strided_slice %34 {offsets = [1, 0], sizes = [127, 196], strides = [1, 1]} : vector<128x196xf32> to vector<127x196xf32>
    %36 = vector.extract_strided_slice %34 {offsets = [0, 0], sizes = [1, 196], strides = [1, 1]} : vector<128x196xf32> to vector<1x196xf32>
    %37 = tpu.concatenate %35, %36 in 0 : vector<127x196xf32>, vector<1x196xf32> -> vector<128x196xf32>
    %38 = arith.addf %33, %37 : vector<128x196xf32>
    %39 = vector.extract_strided_slice %31 {offsets = [2, 0], sizes = [126, 196], strides = [1, 1]} : vector<128x196xf32> to vector<126x196xf32>
    %40 = vector.extract_strided_slice %31 {offsets = [0, 0], sizes = [2, 196], strides = [1, 1]} : vector<128x196xf32> to vector<2x196xf32>
    %41 = tpu.concatenate %39, %40 in 0 : vector<126x196xf32>, vector<2x196xf32> -> vector<128x196xf32>
    %42 = arith.addf %38, %41 : vector<128x196xf32>
    %43 = arith.addf %13, %20 : vector<128x196xf32>
    %44 = vector.extract_strided_slice %43 {offsets = [1, 0], sizes = [127, 196], strides = [1, 1]} : vector<128x196xf32> to vector<127x196xf32>
    %45 = vector.extract_strided_slice %43 {offsets = [0, 0], sizes = [1, 196], strides = [1, 1]} : vector<128x196xf32> to vector<1x196xf32>
    %46 = tpu.concatenate %44, %45 in 0 : vector<127x196xf32>, vector<1x196xf32> -> vector<128x196xf32>
    %47 = arith.addf %8, %46 : vector<128x196xf32>
    %48 = arith.addf %25, %32 : vector<128x196xf32>
    %49 = vector.extract_strided_slice %48 {offsets = [2, 0], sizes = [126, 196], strides = [1, 1]} : vector<128x196xf32> to vector<126x196xf32>
    %50 = vector.extract_strided_slice %48 {offsets = [0, 0], sizes = [2, 196], strides = [1, 1]} : vector<128x196xf32> to vector<2x196xf32>
    %51 = tpu.concatenate %49, %50 in 0 : vector<126x196xf32>, vector<2x196xf32> -> vector<128x196xf32>
    %52 = arith.addf %47, %51 : vector<128x196xf32>
    %53 = vector.extract_strided_slice %42 {offsets = [0, 0], sizes = [128, 98], strides = [1, 1]} : vector<128x196xf32> to vector<128x98xf32>
    %54 = vector.extract_strided_slice %42 {offsets = [0, 98], sizes = [128, 98], strides = [1, 1]} : vector<128x196xf32> to vector<128x98xf32>
    %55 = arith.maximumf %53, %54 : vector<128x98xf32>
    %56 = vector.extract_strided_slice %52 {offsets = [0, 0], sizes = [128, 98], strides = [1, 1]} : vector<128x196xf32> to vector<128x98xf32>
    %57 = vector.extract_strided_slice %52 {offsets = [0, 98], sizes = [128, 98], strides = [1, 1]} : vector<128x196xf32> to vector<128x98xf32>
    %58 = arith.maximumf %56, %57 : vector<128x98xf32>
    %59 = arith.maximumf %55, %58 : vector<128x98xf32>
    %c0_18 = arith.constant 0 : index
    %c0_19 = arith.constant 0 : index
    %60 = vector.load %arg3[%c0_18, %c0_19] : memref<1x98xf32, #tpu.memory_space<vmem>>, vector<1x98xf32>
    %61 = vector.broadcast %60 : vector<1x98xf32> to vector<128x98xf32>
    %62 = arith.addf %59, %61 : vector<128x98xf32>
    %cst_20 = arith.constant 0.000000e+00 : f32
    %63 = vector.broadcast %cst_20 : f32 to vector<128x98xf32>
    %64 = arith.maximumf %62, %63 : vector<128x98xf32>
    %65 = vector.extract_strided_slice %64 {offsets = [1, 0], sizes = [127, 98], strides = [1, 1]} : vector<128x98xf32> to vector<127x98xf32>
    %66 = vector.extract_strided_slice %64 {offsets = [0, 0], sizes = [1, 98], strides = [1, 1]} : vector<128x98xf32> to vector<1x98xf32>
    %67 = tpu.concatenate %65, %66 in 0 : vector<127x98xf32>, vector<1x98xf32> -> vector<128x98xf32>
    %68 = vector.extract_strided_slice %64 {offsets = [2, 0], sizes = [126, 98], strides = [1, 1]} : vector<128x98xf32> to vector<126x98xf32>
    %69 = vector.extract_strided_slice %64 {offsets = [0, 0], sizes = [2, 98], strides = [1, 1]} : vector<128x98xf32> to vector<2x98xf32>
    %70 = tpu.concatenate %68, %69 in 0 : vector<126x98xf32>, vector<2x98xf32> -> vector<128x98xf32>
    %71 = vector.extract_strided_slice %64 {offsets = [3, 0], sizes = [125, 98], strides = [1, 1]} : vector<128x98xf32> to vector<125x98xf32>
    %72 = vector.extract_strided_slice %64 {offsets = [0, 0], sizes = [3, 98], strides = [1, 1]} : vector<128x98xf32> to vector<3x98xf32>
    %73 = tpu.concatenate %71, %72 in 0 : vector<125x98xf32>, vector<3x98xf32> -> vector<128x98xf32>
    %74 = vector.extract_strided_slice %64 {offsets = [4, 0], sizes = [124, 98], strides = [1, 1]} : vector<128x98xf32> to vector<124x98xf32>
    %75 = vector.extract_strided_slice %64 {offsets = [0, 0], sizes = [4, 98], strides = [1, 1]} : vector<128x98xf32> to vector<4x98xf32>
    %76 = tpu.concatenate %74, %75 in 0 : vector<124x98xf32>, vector<4x98xf32> -> vector<128x98xf32>
    %77 = tpu.concatenate %64, %67, %70, %73, %76 in 1 : vector<128x98xf32>, vector<128x98xf32>, vector<128x98xf32>, vector<128x98xf32>, vector<128x98xf32> -> vector<128x490xf32>
    %c0_21 = arith.constant 0 : index
    %c0_22 = arith.constant 0 : index
    %78 = vector.load %arg4[%c0_21, %c0_22] : memref<490x120xbf16, #tpu.memory_space<vmem>>, vector<490x120xbf16>
    %79 = arith.truncf %77 : vector<128x490xf32> to vector<128x490xbf16>
    %cst_23 = arith.constant dense<0.000000e+00> : vector<128x120xf32>
    %80 = tpu.matmul %79, %78, %cst_23 {dimension_numbers = #tpu.dot_dimension_numbers<[1], [0], [0], [1], [0, 0, 1, 1], [], []>} : vector<128x490xbf16>, vector<490x120xbf16>, vector<128x120xf32> -> vector<128x120xf32>
    %c0_24 = arith.constant 0 : index
    %c0_25 = arith.constant 0 : index
    %81 = vector.load %arg5[%c0_24, %c0_25] : memref<1x120xf32, #tpu.memory_space<vmem>>, vector<1x120xf32>
    %82 = vector.broadcast %81 : vector<1x120xf32> to vector<128x120xf32>
    %83 = arith.addf %80, %82 : vector<128x120xf32>
    %cst_26 = arith.constant 0.000000e+00 : f32
    %84 = vector.broadcast %cst_26 : f32 to vector<128x120xf32>
    %85 = arith.maximumf %83, %84 : vector<128x120xf32>
    %86 = vector.extract_strided_slice %85 {offsets = [1, 0], sizes = [127, 120], strides = [1, 1]} : vector<128x120xf32> to vector<127x120xf32>
    %87 = vector.extract_strided_slice %85 {offsets = [0, 0], sizes = [1, 120], strides = [1, 1]} : vector<128x120xf32> to vector<1x120xf32>
    %88 = tpu.concatenate %86, %87 in 0 : vector<127x120xf32>, vector<1x120xf32> -> vector<128x120xf32>
    %89 = vector.extract_strided_slice %85 {offsets = [2, 0], sizes = [126, 120], strides = [1, 1]} : vector<128x120xf32> to vector<126x120xf32>
    %90 = vector.extract_strided_slice %85 {offsets = [0, 0], sizes = [2, 120], strides = [1, 1]} : vector<128x120xf32> to vector<2x120xf32>
    %91 = tpu.concatenate %89, %90 in 0 : vector<126x120xf32>, vector<2x120xf32> -> vector<128x120xf32>
    %92 = vector.extract_strided_slice %85 {offsets = [3, 0], sizes = [125, 120], strides = [1, 1]} : vector<128x120xf32> to vector<125x120xf32>
    %93 = vector.extract_strided_slice %85 {offsets = [0, 0], sizes = [3, 120], strides = [1, 1]} : vector<128x120xf32> to vector<3x120xf32>
    %94 = tpu.concatenate %92, %93 in 0 : vector<125x120xf32>, vector<3x120xf32> -> vector<128x120xf32>
    %95 = vector.extract_strided_slice %85 {offsets = [4, 0], sizes = [124, 120], strides = [1, 1]} : vector<128x120xf32> to vector<124x120xf32>
    %96 = vector.extract_strided_slice %85 {offsets = [0, 0], sizes = [4, 120], strides = [1, 1]} : vector<128x120xf32> to vector<4x120xf32>
    %97 = tpu.concatenate %95, %96 in 0 : vector<124x120xf32>, vector<4x120xf32> -> vector<128x120xf32>
    %98 = tpu.concatenate %85, %88, %91, %94, %97 in 1 : vector<128x120xf32>, vector<128x120xf32>, vector<128x120xf32>, vector<128x120xf32>, vector<128x120xf32> -> vector<128x600xf32>
    %c0_27 = arith.constant 0 : index
    %c0_28 = arith.constant 0 : index
    %99 = vector.load %arg6[%c0_27, %c0_28] : memref<600x102xbf16, #tpu.memory_space<vmem>>, vector<600x102xbf16>
    %100 = arith.truncf %98 : vector<128x600xf32> to vector<128x600xbf16>
    %cst_29 = arith.constant dense<0.000000e+00> : vector<128x102xf32>
    %101 = tpu.matmul %100, %99, %cst_29 {dimension_numbers = #tpu.dot_dimension_numbers<[1], [0], [0], [1], [0, 0, 1, 1], [], []>} : vector<128x600xbf16>, vector<600x102xbf16>, vector<128x102xf32> -> vector<128x102xf32>
    %c0_30 = arith.constant 0 : index
    %c0_31 = arith.constant 0 : index
    %102 = vector.load %arg7[%c0_30, %c0_31] : memref<1x102xf32, #tpu.memory_space<vmem>>, vector<1x102xf32>
    %103 = vector.broadcast %102 : vector<1x102xf32> to vector<128x102xf32>
    %104 = arith.addf %101, %103 : vector<128x102xf32>
    %cst_32 = arith.constant 0.000000e+00 : f32
    %105 = vector.broadcast %cst_32 : f32 to vector<128x102xf32>
    %106 = arith.maximumf %104, %105 : vector<128x102xf32>
    %107 = tpu.iota {dimensions = array<i32: 1>} : vector<8x128xi32>
    %108 = tpu.iota {dimensions = array<i32: 0>} : vector<8x128xi32>
    %c16_i32 = arith.constant 16 : i32
    %109 = vector.broadcast %c16_i32 : i32 to vector<8x128xi32>
    %110 = arith.muli %108, %109 : vector<8x128xi32>
    %c0_i32 = arith.constant 0 : i32
    %111 = vector.broadcast %c0_i32 : i32 to vector<8x128xi32>
    %112 = arith.addi %110, %111 : vector<8x128xi32>
    %113 = arith.cmpi eq, %107, %112 : vector<8x128xi32>
    %114 = arith.extui %113 : vector<8x128xi1> to vector<8x128xi32>
    %115 = arith.sitofp %114 : vector<8x128xi32> to vector<8x128xf32>
    %116 = arith.truncf %115 : vector<8x128xf32> to vector<8x128xbf16>
    %117 = arith.truncf %106 : vector<128x102xf32> to vector<128x102xbf16>
    %cst_33 = arith.constant dense<0.000000e+00> : vector<8x102xf32>
    %118 = tpu.matmul %116, %117, %cst_33 {dimension_numbers = #tpu.dot_dimension_numbers<[1], [0], [0], [1], [0, 0, 1, 1], [], []>} : vector<8x128xbf16>, vector<128x102xbf16>, vector<8x102xf32> -> vector<8x102xf32>
    %c1_i32 = arith.constant 1 : i32
    %119 = vector.broadcast %c1_i32 : i32 to vector<8x128xi32>
    %120 = arith.addi %110, %119 : vector<8x128xi32>
    %121 = arith.cmpi eq, %107, %120 : vector<8x128xi32>
    %122 = arith.extui %121 : vector<8x128xi1> to vector<8x128xi32>
    %123 = arith.sitofp %122 : vector<8x128xi32> to vector<8x128xf32>
    %124 = arith.truncf %123 : vector<8x128xf32> to vector<8x128xbf16>
    %125 = arith.truncf %106 : vector<128x102xf32> to vector<128x102xbf16>
    %cst_34 = arith.constant dense<0.000000e+00> : vector<8x102xf32>
    %126 = tpu.matmul %124, %125, %cst_34 {dimension_numbers = #tpu.dot_dimension_numbers<[1], [0], [0], [1], [0, 0, 1, 1], [], []>} : vector<8x128xbf16>, vector<128x102xbf16>, vector<8x102xf32> -> vector<8x102xf32>
    %c2_i32 = arith.constant 2 : i32
    %127 = vector.broadcast %c2_i32 : i32 to vector<8x128xi32>
    %128 = arith.addi %110, %127 : vector<8x128xi32>
    %129 = arith.cmpi eq, %107, %128 : vector<8x128xi32>
    %130 = arith.extui %129 : vector<8x128xi1> to vector<8x128xi32>
    %131 = arith.sitofp %130 : vector<8x128xi32> to vector<8x128xf32>
    %132 = arith.truncf %131 : vector<8x128xf32> to vector<8x128xbf16>
    %133 = arith.truncf %106 : vector<128x102xf32> to vector<128x102xbf16>
    %cst_35 = arith.constant dense<0.000000e+00> : vector<8x102xf32>
    %134 = tpu.matmul %132, %133, %cst_35 {dimension_numbers = #tpu.dot_dimension_numbers<[1], [0], [0], [1], [0, 0, 1, 1], [], []>} : vector<8x128xbf16>, vector<128x102xbf16>, vector<8x102xf32> -> vector<8x102xf32>
    %c3_i32 = arith.constant 3 : i32
    %135 = vector.broadcast %c3_i32 : i32 to vector<8x128xi32>
    %136 = arith.addi %110, %135 : vector<8x128xi32>
    %137 = arith.cmpi eq, %107, %136 : vector<8x128xi32>
    %138 = arith.extui %137 : vector<8x128xi1> to vector<8x128xi32>
    %139 = arith.sitofp %138 : vector<8x128xi32> to vector<8x128xf32>
    %140 = arith.truncf %139 : vector<8x128xf32> to vector<8x128xbf16>
    %141 = arith.truncf %106 : vector<128x102xf32> to vector<128x102xbf16>
    %cst_36 = arith.constant dense<0.000000e+00> : vector<8x102xf32>
    %142 = tpu.matmul %140, %141, %cst_36 {dimension_numbers = #tpu.dot_dimension_numbers<[1], [0], [0], [1], [0, 0, 1, 1], [], []>} : vector<8x128xbf16>, vector<128x102xbf16>, vector<8x102xf32> -> vector<8x102xf32>
    %c4_i32 = arith.constant 4 : i32
    %143 = vector.broadcast %c4_i32 : i32 to vector<8x128xi32>
    %144 = arith.addi %110, %143 : vector<8x128xi32>
    %145 = arith.cmpi eq, %107, %144 : vector<8x128xi32>
    %146 = arith.extui %145 : vector<8x128xi1> to vector<8x128xi32>
    %147 = arith.sitofp %146 : vector<8x128xi32> to vector<8x128xf32>
    %148 = arith.truncf %147 : vector<8x128xf32> to vector<8x128xbf16>
    %149 = arith.truncf %106 : vector<128x102xf32> to vector<128x102xbf16>
    %cst_37 = arith.constant dense<0.000000e+00> : vector<8x102xf32>
    %150 = tpu.matmul %148, %149, %cst_37 {dimension_numbers = #tpu.dot_dimension_numbers<[1], [0], [0], [1], [0, 0, 1, 1], [], []>} : vector<8x128xbf16>, vector<128x102xbf16>, vector<8x102xf32> -> vector<8x102xf32>
    %c5_i32 = arith.constant 5 : i32
    %151 = vector.broadcast %c5_i32 : i32 to vector<8x128xi32>
    %152 = arith.addi %110, %151 : vector<8x128xi32>
    %153 = arith.cmpi eq, %107, %152 : vector<8x128xi32>
    %154 = arith.extui %153 : vector<8x128xi1> to vector<8x128xi32>
    %155 = arith.sitofp %154 : vector<8x128xi32> to vector<8x128xf32>
    %156 = arith.truncf %155 : vector<8x128xf32> to vector<8x128xbf16>
    %157 = arith.truncf %106 : vector<128x102xf32> to vector<128x102xbf16>
    %cst_38 = arith.constant dense<0.000000e+00> : vector<8x102xf32>
    %158 = tpu.matmul %156, %157, %cst_38 {dimension_numbers = #tpu.dot_dimension_numbers<[1], [0], [0], [1], [0, 0, 1, 1], [], []>} : vector<8x128xbf16>, vector<128x102xbf16>, vector<8x102xf32> -> vector<8x102xf32>
    %159 = tpu.concatenate %118, %126, %134, %142, %150, %158 in 1 : vector<8x102xf32>, vector<8x102xf32>, vector<8x102xf32>, vector<8x102xf32>, vector<8x102xf32>, vector<8x102xf32> -> vector<8x612xf32>
    %c0_39 = arith.constant 0 : index
    %c0_40 = arith.constant 0 : index
    %160 = vector.load %arg8[%c0_39, %c0_40] : memref<612x200xbf16, #tpu.memory_space<vmem>>, vector<612x200xbf16>
    %161 = arith.truncf %159 : vector<8x612xf32> to vector<8x612xbf16>
    %cst_41 = arith.constant dense<0.000000e+00> : vector<8x200xf32>
    %162 = tpu.matmul %161, %160, %cst_41 {dimension_numbers = #tpu.dot_dimension_numbers<[1], [0], [0], [1], [0, 0, 1, 1], [], []>} : vector<8x612xbf16>, vector<612x200xbf16>, vector<8x200xf32> -> vector<8x200xf32>
    %c0_42 = arith.constant 0 : index
    %c0_43 = arith.constant 0 : index
    %163 = vector.load %arg9[%c0_42, %c0_43] : memref<1x200xf32, #tpu.memory_space<vmem>>, vector<1x200xf32>
    %164 = vector.broadcast %163 : vector<1x200xf32> to vector<8x200xf32>
    %165 = arith.addf %162, %164 : vector<8x200xf32>
    %cst_44 = arith.constant 0.000000e+00 : f32
    %166 = vector.broadcast %cst_44 : f32 to vector<8x200xf32>
    %167 = arith.maximumf %165, %166 : vector<8x200xf32>
    %c0_45 = arith.constant 0 : index
    %c0_46 = arith.constant 0 : index
    %168 = vector.load %arg10[%c0_45, %c0_46] : memref<200x150xbf16, #tpu.memory_space<vmem>>, vector<200x150xbf16>
    %169 = arith.truncf %167 : vector<8x200xf32> to vector<8x200xbf16>
    %cst_47 = arith.constant dense<0.000000e+00> : vector<8x150xf32>
    %170 = tpu.matmul %169, %168, %cst_47 {dimension_numbers = #tpu.dot_dimension_numbers<[1], [0], [0], [1], [0, 0, 1, 1], [], []>} : vector<8x200xbf16>, vector<200x150xbf16>, vector<8x150xf32> -> vector<8x150xf32>
    %c0_48 = arith.constant 0 : index
    %c0_49 = arith.constant 0 : index
    %171 = vector.load %arg11[%c0_48, %c0_49] : memref<1x150xf32, #tpu.memory_space<vmem>>, vector<1x150xf32>
    %172 = vector.broadcast %171 : vector<1x150xf32> to vector<8x150xf32>
    %173 = arith.addf %170, %172 : vector<8x150xf32>
    %cst_50 = arith.constant 0.000000e+00 : f32
    %174 = vector.broadcast %cst_50 : f32 to vector<8x150xf32>
    %175 = arith.maximumf %173, %174 : vector<8x150xf32>
    %c0_51 = arith.constant 0 : index
    %c0_52 = arith.constant 0 : index
    %176 = vector.load %arg12[%c0_51, %c0_52] : memref<150x50xbf16, #tpu.memory_space<vmem>>, vector<150x50xbf16>
    %177 = arith.truncf %175 : vector<8x150xf32> to vector<8x150xbf16>
    %cst_53 = arith.constant dense<0.000000e+00> : vector<8x50xf32>
    %178 = tpu.matmul %177, %176, %cst_53 {dimension_numbers = #tpu.dot_dimension_numbers<[1], [0], [0], [1], [0, 0, 1, 1], [], []>} : vector<8x150xbf16>, vector<150x50xbf16>, vector<8x50xf32> -> vector<8x50xf32>
    %c0_54 = arith.constant 0 : index
    %c0_55 = arith.constant 0 : index
    %179 = vector.load %arg13[%c0_54, %c0_55] : memref<1x50xf32, #tpu.memory_space<vmem>>, vector<1x50xf32>
    %180 = vector.broadcast %179 : vector<1x50xf32> to vector<8x50xf32>
    %181 = arith.addf %178, %180 : vector<8x50xf32>
    %cst_56 = arith.constant 0.000000e+00 : f32
    %182 = vector.broadcast %cst_56 : f32 to vector<8x50xf32>
    %183 = arith.maximumf %181, %182 : vector<8x50xf32>
    %c0_57 = arith.constant 0 : index
    %c0_58 = arith.constant 0 : index
    %184 = vector.load %arg14[%c0_57, %c0_58] : memref<50x10xbf16, #tpu.memory_space<vmem>>, vector<50x10xbf16>
    %185 = arith.truncf %183 : vector<8x50xf32> to vector<8x50xbf16>
    %cst_59 = arith.constant dense<0.000000e+00> : vector<8x10xf32>
    %186 = tpu.matmul %185, %184, %cst_59 {dimension_numbers = #tpu.dot_dimension_numbers<[1], [0], [0], [1], [0, 0, 1, 1], [], []>} : vector<8x50xbf16>, vector<50x10xbf16>, vector<8x10xf32> -> vector<8x10xf32>
    %c0_60 = arith.constant 0 : index
    %c0_61 = arith.constant 0 : index
    %187 = vector.load %arg15[%c0_60, %c0_61] : memref<1x10xf32, #tpu.memory_space<vmem>>, vector<1x10xf32>
    %188 = vector.broadcast %187 : vector<1x10xf32> to vector<8x10xf32>
    %189 = arith.addf %186, %188 : vector<8x10xf32>
    %c0_62 = arith.constant 0 : index
    %c0_63 = arith.constant 0 : index
    %190 = vector.load %arg16[%c0_62, %c0_63] : memref<8x10xf32, #tpu.memory_space<vmem>>, vector<8x10xf32>
    tpu.vector_store %arg16[%c0_62, %c0_63], %189 {strides = array<i32>} : memref<8x10xf32, #tpu.memory_space<vmem>>, vector<8x10xf32>,
    return
  }
  func.func @transform_0(%arg0: i32) -> (i32, i32) {
    %c0_i32 = arith.constant 0 : i32
    %c0_i32_0 = arith.constant 0 : i32
    return %arg0, %c0_i32 : i32, i32
  }
  func.func @transform_1(%arg0: i32) -> (i32, i32, i32) {
    %c0_i32 = arith.constant 0 : i32
    %c0_i32_0 = arith.constant 0 : i32
    %c0_i32_1 = arith.constant 0 : i32
    %c0_i32_2 = arith.constant 0 : i32
    return %c0_i32, %c0_i32_0, %c0_i32_1 : i32, i32, i32
  }
  func.func @transform_2(%arg0: i32) -> (i32, i32) {
    %c0_i32 = arith.constant 0 : i32
    %c0_i32_0 = arith.constant 0 : i32
    %c0_i32_1 = arith.constant 0 : i32
    return %c0_i32, %c0_i32_0 : i32, i32
  }
  func.func @transform_3(%arg0: i32) -> (i32, i32) {
    %c0_i32 = arith.constant 0 : i32
    %c0_i32_0 = arith.constant 0 : i32
    %c0_i32_1 = arith.constant 0 : i32
    return %c0_i32, %c0_i32_0 : i32, i32
  }
  func.func @transform_4(%arg0: i32) -> (i32, i32) {
    %c0_i32 = arith.constant 0 : i32
    %c0_i32_0 = arith.constant 0 : i32
    %c0_i32_1 = arith.constant 0 : i32
    return %c0_i32, %c0_i32_0 : i32, i32
  }
  func.func @transform_5(%arg0: i32) -> (i32, i32) {
    %c0_i32 = arith.constant 0 : i32
    %c0_i32_0 = arith.constant 0 : i32
    %c0_i32_1 = arith.constant 0 : i32
    return %c0_i32, %c0_i32_0 : i32, i32
  }
  func.func @transform_6(%arg0: i32) -> (i32, i32) {
    %c0_i32 = arith.constant 0 : i32
    %c0_i32_0 = arith.constant 0 : i32
    %c0_i32_1 = arith.constant 0 : i32
    return %c0_i32, %c0_i32_0 : i32, i32
  }
  func.func @transform_7(%arg0: i32) -> (i32, i32) {
    %c0_i32 = arith.constant 0 : i32
    %c0_i32_0 = arith.constant 0 : i32
    %c0_i32_1 = arith.constant 0 : i32
    return %c0_i32, %c0_i32_0 : i32, i32
  }
  func.func @transform_8(%arg0: i32) -> (i32, i32) {
    %c0_i32 = arith.constant 0 : i32
    %c0_i32_0 = arith.constant 0 : i32
    %c0_i32_1 = arith.constant 0 : i32
    return %c0_i32, %c0_i32_0 : i32, i32
  }
  func.func @transform_9(%arg0: i32) -> (i32, i32) {
    %c0_i32 = arith.constant 0 : i32
    %c0_i32_0 = arith.constant 0 : i32
    %c0_i32_1 = arith.constant 0 : i32
    return %c0_i32, %c0_i32_0 : i32, i32
  }
  func.func @transform_10(%arg0: i32) -> (i32, i32) {
    %c0_i32 = arith.constant 0 : i32
    %c0_i32_0 = arith.constant 0 : i32
    %c0_i32_1 = arith.constant 0 : i32
    return %c0_i32, %c0_i32_0 : i32, i32
  }
  func.func @transform_11(%arg0: i32) -> (i32, i32) {
    %c0_i32 = arith.constant 0 : i32
    %c0_i32_0 = arith.constant 0 : i32
    %c0_i32_1 = arith.constant 0 : i32
    return %c0_i32, %c0_i32_0 : i32, i32
  }
  func.func @transform_12(%arg0: i32) -> (i32, i32) {
    %c0_i32 = arith.constant 0 : i32
    %c0_i32_0 = arith.constant 0 : i32
    %c0_i32_1 = arith.constant 0 : i32
    return %c0_i32, %c0_i32_0 : i32, i32
  }
  func.func @transform_13(%arg0: i32) -> (i32, i32) {
    %c0_i32 = arith.constant 0 : i32
    %c0_i32_0 = arith.constant 0 : i32
    %c0_i32_1 = arith.constant 0 : i32
    return %c0_i32, %c0_i32_0 : i32, i32
  }
  func.func @transform_14(%arg0: i32) -> (i32, i32) {
    %c0_i32 = arith.constant 0 : i32
    %c0_i32_0 = arith.constant 0 : i32
    %c0_i32_1 = arith.constant 0 : i32
    return %c0_i32, %c0_i32_0 : i32, i32
  }
  func.func @transform_15(%arg0: i32) -> (i32, i32) {
    %c0_i32 = arith.constant 0 : i32
    %c0_i32_0 = arith.constant 0 : i32
    return %arg0, %c0_i32 : i32, i32
  }
}

</mosaic_0001>

<bundles_post_ra>
// kernel: net_forward.1
= control target key start
LH: loop header
LB: loop body
LE: loop exit
PB: predicated region body
PF: predicated region fallthrough
CT: control target
= control target key end

     0   :  { %s12492_s0 = inlined_call_operand.vmem [shape: f32[512,96], index: 0, kind: input, shape index: {}]   ;;  %s12493_s1 = inlined_call_operand.vmem [shape: bf16[5,96,196], index: 1, kind: input, shape index: {}]   ;;  %s12494_s2 = inlined_call_operand.vmem [shape: f32[1,98], index: 2, kind: input, shape index: {}]   ;;  %s12495_s3 = inlined_call_operand.vmem [shape: bf16[490,120], index: 3, kind: input, shape index: {}]   ;;  %s12496_s4 = inlined_call_operand.vmem [shape: f32[1,120], index: 4, kind: input, shape index: {}]   ;;  %s12497_s5 = inlined_call_operand.vmem [shape: bf16[600,102], index: 5, kind: input, shape index: {}]   ;;  %s12498_s6 = inlined_call_operand.vmem [shape: f32[1,102], index: 6, kind: input, shape index: {}]   ;;  %s12499_s7 = inlined_call_operand.vmem [shape: bf16[612,200], index: 7, kind: input, shape index: {}]   ;;  %s12500_s8 = inlined_call_operand.vmem [shape: f32[1,200], index: 8, kind: input, shape index: {}]   ;;  %s12501_s9 = inlined_call_operand.vmem [shape: bf16[200,150], index: 9, kind: input, shape index: {}]   ;;  %s12502_s10 = inlined_call_operand.vmem [shape: f32[1,150], index: 10, kind: input, shape index: {}]   ;;  %s12503_s11 = inlined_call_operand.vmem [shape: bf16[150,50], index: 11, kind: input, shape index: {}]   ;;  %s12504_s12 = inlined_call_operand.vmem [shape: f32[1,50], index: 12, kind: input, shape index: {}]   ;;  %s12505_s13 = inlined_call_operand.vmem [shape: bf16[50,10], index: 13, kind: input, shape index: {}]   ;;  %s12506_s14 = inlined_call_operand.vmem [shape: f32[1,10], index: 14, kind: input, shape index: {}]   ;;  %s12507_s15 = inlined_call_operand.hbm [shape: f32[16,10], index: 15, kind: output, shape index: {}]  }
   0x1   :  { %12568 = sst [smem:[#allocation194_spill]] %s12492_s0 }
   0x2   :  { %12569 = sst [smem:[#allocation195_spill]] %s12493_s1 }
   0x3   :  { %20 = vsyncpa [#allocation3], 0 }
   0x4   :  { %22 = vsyncpa [#allocation3 + $0x1], 0  ;;  %s8249_s18 = smov 0   ;;  %s8251_s19 = smov 0  }
   0x5   :  { %s8253_s20 = smov 0   ;;  %s8255_s21 = smov 0  }
   0x6 LB: > { %12570 = sst [smem:[#allocation5_spill]] %s8140_s18  ;;  %s8270_s22 = sadd.s32 4294967295, %s8152_s21   ;;  %s8152_s21 = sphi %s8255_s21, %s12996_s21   ;;  %s8148_s20 = sphi %s8253_s20, %s12998_s20   ;;  %s8144_s19 = sphi %s8251_s19, %s13000_s19   ;;  %s8140_s18 = sphi %s8249_s18, %s12999_s18  }
   0x7   : > { %12571 = sst [smem:[#allocation6_spill]] %s8148_s20  ;;  %s6221_s23 = sadd.s32 4294967294, %s8152_s21  }
   0x8   : > { %s8274_s24 = sadd.s32 1, %s8152_s21   ;;  %s355_s25 = sadd.s32 1, %s8148_s20 }
   0x9   : > { %12572 = sst [smem:[#allocation7_spill]] %s8274_s24  ;;  %s352_s26 = ssub.s32 %s8152_s21, %s8274_s24 }
   0xa   : > { %p365_p0 = scmp.ne.s32.totalorder %s8148_s20, %s8144_s19  ;;  %p353_p1 = scmp.eq.s32.totalorder %s352_s26, 0 }
   0xb   : > { %p366_p2 = scmp.eq.s32.totalorder %s8270_s22, 1  ;;  %p371_p3 = scmp.ne.s32.totalorder %s8144_s19, %s8140_s18 }
   0xc   : > { %p372_p4 = scmp.eq.s32.totalorder %s6221_s23, 1  ;;  %p6224_p7 = scmp.ge.s32.totalorder %s8152_s21, 1 }
   0xd   : > { %s8285_s27 = scalar_select %p353_p1, %s8148_s20, %s355_s25  }
   0xe   : > { %p8287_p5 = por %p366_p2, %p365_p0  ;;  %p8291_p6 = por %p372_p4, %p371_p3 }
   0xf   : > { %12573 = sst [smem:[#allocation8_spill]] %s8285_s27  ;;  %p441_p8 = scmp.lt.s32.totalorder %s8152_s21, 3 }
  0x10   : > { %s12575_s29 = scalar_select %p8291_p6, 1, 0 }
  0x11   : > { %p442_p9 = pnand %p6224_p7, %p441_p8 }
  0x12   : > { %12576 = sst [smem:[#allocation9_spill]] %s12575_s29 }
  0x13   : > { %445 = sbr.rel (%p442_p9) target bundleno = 2870 (0xb36), region = 80 }
  0x18   : > { %s12577_s1 = sld [smem:[#allocation195_spill]]  ;;  %s6226_s25 = sshll.u32 %s8270_s22, 5  ;;  %vm647_vm0 = vcmask 785408   ;;  %vm1974_vm1 = vcmask 1046528   ;;  %vm2137_vm2 = vcmask 1045504   ;;  %vm2752_vm3 = vcmask 244736  }
  0x19   : > { %p490_p10 = scmp.lt.s32.totalorder %s6226_s25, 63  ;;  %s12578_s0 = sld [smem:[#allocation194_spill]]  ;;  %vm3347_vm4 = vcmask 801792   ;;  %vm3364_vm5 = vcmask 556032   ;;  %vm3081_vm6 = vcmask 1044480   ;;  %vm3116_vm7 = vcmask 1043456  }
  0x1a   : > { %s8154_s30 = smov 30   ;;  %s8156_s20 = smov 68   ;;  %vm3381_vm8 = vcmask 310272   ;;  %vm3398_vm9 = vcmask 64512   ;;  %vm3698_vm10 = vcmask 867328   ;;  %vm4286_vm11 = vcmask 982016  }
  0x1b   : > { %s13002_s25 = smov (!%p490_p10, %s6226_s25), 63  ;;  %s8157_s17 = smov 38   ;;  %vm4303_vm12 = vcmask 916480   ;;  %vm4320_vm13 = vcmask 850944   ;;  %vm4697_vm14 = vcmask 719872  }
  0x1c   : > { %s6227_s18 = sshll.u32 %s13002_s25, 3  ;;  %s12566_s25 = smov 98  }
  0x1d   : > { %s8158_s23 = smov 8   ;;  %s8159_s26 = smov 120  }
  0x1e   : > { %v6301_v0 = vld [vmem:[%s12577_s1 + $0x50] sm:$0xf]  ;;  %v7482_v1 = vld [vmem:[%s12577_s1 + $0x54] sm:$0xf0]  ;;  %v7481_v2 = vld [vmem:[%s12577_s1 + $0x54] sm:$0xf] }
  0x1f   : > { %v6302_v3 = vor.u32 %v7482_v1, %v6301_v0  ;;  %v6303_v4 = vld [vmem:[%s12577_s1 + $0x58] sm:$0xf0]  ;;  %v6393_v5 = vld [vmem:[%s12577_s1 + $0xb0] sm:$0xf]  ;;  %v7494_v6 = vld [vmem:[%s12577_s1 + $0xb4] sm:$0xf0]  ;;  %s8445_s16 = scalar_lea.vmem %s12578_s0, %s6227_s18 }
  0x20   : > { %v6306_v7 = vor.u32 %v7481_v2, %v6303_v4  ;;  %v6394_v8 = vor.u32 %v7494_v6, %v6393_v5  ;;  %v7493_v9 = vld [vmem:[%s12577_s1 + $0xb4] sm:$0xf]  ;;  %v6395_v10 = vld [vmem:[%s12577_s1 + $0xb8] sm:$0xf0]  ;;  %v6293_v11 = vld [vmem:[%s12577_s1 + $0x40] sm:$0xf] }
  0x21   : > { %698 = vmatpush.bf16.msra.mxu0 %v6302_v3  ;;  %v6398_v12 = vor.u32 %v7493_v9, %v6395_v10  ;;  %v7480_v13 = vld [vmem:[%s12577_s1 + $0x44] sm:$0xf0]  ;;  %v7479_v14 = vld [vmem:[%s12577_s1 + $0x44] sm:$0xf]  ;;  %v6295_v15 = vld [vmem:[%s12577_s1 + $0x48] sm:$0xf0] }
  0x22   : > { %787 = vmatpush.bf16.msra.mxu1 %v6306_v7  ;;  %949 = vmatpush.bf16.msra.mxu2 %v6394_v8  ;;  %v6294_v16 = vor.u32 %v7480_v13, %v6293_v11  ;;  %v6298_v17 = vor.u32 %v7479_v14, %v6295_v15  ;;  %v6385_v18 = vld [vmem:[%s12577_s1 + $0xa0] sm:$0xf]  ;;  %v7492_v19 = vld [vmem:[%s12577_s1 + $0xa4] sm:$0xf0]  ;;  %v7491_v20 = vld [vmem:[%s12577_s1 + $0xa4] sm:$0xf] }
  0x23   : > { %1038 = vmatpush.bf16.msra.mxu3 %v6398_v12  ;;  %v6386_v21 = vor.u32 %v7492_v19, %v6385_v18  ;;  %v6387_v22 = vld [vmem:[%s12577_s1 + $0xa8] sm:$0xf0]  ;;  %v6285_v23 = vld [vmem:[%s12577_s1 + $0x30] sm:$0xf]  ;;  %v7478_v24 = vld [vmem:[%s12577_s1 + $0x34] sm:$0xf0] }
  0x24   : > { %v6390_v25 = vor.u32 %v7491_v20, %v6387_v22  ;;  %v7477_v26 = vld [vmem:[%s12577_s1 + $0x34] sm:$0xf]  ;;  %v6287_v27 = vld [vmem:[%s12577_s1 + $0x38] sm:$0xf0]  ;;  %v6377_v28 = vld [vmem:[%s12577_s1 + $0x90] sm:$0xf]  ;;  %v6286_v29 = vor.u32 %v7478_v24, %v6285_v23 }
  0x25   : > { %699 = vmatpush.bf16.msra.mxu0 %v6294_v16  ;;  %v7490_v30 = vld [vmem:[%s12577_s1 + $0x94] sm:$0xf0]  ;;  %v7489_v31 = vld [vmem:[%s12577_s1 + $0x94] sm:$0xf]  ;;  %v6379_v32 = vld [vmem:[%s12577_s1 + $0x98] sm:$0xf0]  ;;  %v6290_v33 = vor.u32 %v7477_v26, %v6287_v27 }
  0x26   : > { %788 = vmatpush.bf16.msra.mxu1 %v6298_v17  ;;  %950 = vmatpush.bf16.msra.mxu2 %v6386_v21  ;;  %v6378_v34 = vor.u32 %v7490_v30, %v6377_v28  ;;  %v6277_v35 = vld [vmem:[%s12577_s1 + $0x20] sm:$0xf]  ;;  %v7476_v36 = vld [vmem:[%s12577_s1 + $0x24] sm:$0xf0]  ;;  %v7475_v37 = vld [vmem:[%s12577_s1 + $0x24] sm:$0xf]  ;;  %v6382_v38 = vor.u32 %v7489_v31, %v6379_v32 }
  0x27   : > { %1039 = vmatpush.bf16.msra.mxu3 %v6390_v25  ;;  %v6279_v39 = vld [vmem:[%s12577_s1 + $0x28] sm:$0xf0]  ;;  %v6369_v40 = vld [vmem:[%s12577_s1 + $0x80] sm:$0xf]  ;;  %v7488_v41 = vld [vmem:[%s12577_s1 + $0x84] sm:$0xf0]  ;;  %v6278_v44 = vor.u32 %v7476_v36, %v6277_v35 }
  0x28   : > { %v7487_v42 = vld [vmem:[%s12577_s1 + $0x84] sm:$0xf]  ;;  %v6371_v43 = vld [vmem:[%s12577_s1 + $0x88] sm:$0xf0]  ;;  %v6269_v45 = vld [vmem:[%s12577_s1 + $0x10] sm:$0xf]  ;;  %v6282_v46 = vor.u32 %v7475_v37, %v6279_v39  ;;  %v6370_v47 = vor.u32 %v7488_v41, %v6369_v40 }
  0x29   : > { %700 = vmatpush.bf16.msra.mxu0 %v6286_v29  ;;  %v7474_v48 = vld [vmem:[%s12577_s1 + $0x14] sm:$0xf0]  ;;  %v7473_v49 = vld [vmem:[%s12577_s1 + $0x14] sm:$0xf]  ;;  %v6271_v50 = vld [vmem:[%s12577_s1 + $0x18] sm:$0xf0]  ;;  %v6374_v51 = vor.u32 %v7487_v42, %v6371_v43 }
  0x2a   : > { %789 = vmatpush.bf16.msra.mxu1 %v6290_v33  ;;  %951 = vmatpush.bf16.msra.mxu2 %v6378_v34  ;;  %v6361_v52 = vld [vmem:[%s12577_s1 + $0x70] sm:$0xf]  ;;  %v7486_v53 = vld [vmem:[%s12577_s1 + $0x74] sm:$0xf0]  ;;  %v7485_v54 = vld [vmem:[%s12577_s1 + $0x74] sm:$0xf]  ;;  %v6270_v58 = vor.u32 %v7474_v48, %v6269_v45  ;;  %v6274_v63 = vor.u32 %v7473_v49, %v6271_v50 }
  0x2b   : > { %1040 = vmatpush.bf16.msra.mxu3 %v6382_v38  ;;  %v6363_v55 = vld [vmem:[%s12577_s1 + $0x78] sm:$0xf0]  ;;  %v6261_v56 = vld [vmem:[%s12577_s1] sm:$0xf]  ;;  %v7472_v57 = vld [vmem:[%s12577_s1 + $0x4] sm:$0xf0]  ;;  %v6362_v0 = vor.u32 %v7486_v53, %v6361_v52 }
  0x2c   : > { %v7471_v59 = vld [vmem:[%s12577_s1 + $0x4] sm:$0xf]  ;;  %v6263_v60 = vld [vmem:[%s12577_s1 + $0x8] sm:$0xf0]  ;;  %v6353_v61 = vld [vmem:[%s12577_s1 + $0x60] sm:$0xf]  ;;  %v6366_v1 = vor.u32 %v7485_v54, %v6363_v55  ;;  %v6262_v4 = vor.u32 %v7472_v57, %v6261_v56 }
  0x2d   : > { %701 = vmatpush.bf16.msra.mxu0 %v6278_v44  ;;  %v7484_v62 = vld [vmem:[%s12577_s1 + $0x64] sm:$0xf0]  ;;  %v7483_v2 = vld [vmem:[%s12577_s1 + $0x64] sm:$0xf]  ;;  %v6355_v3 = vld [vmem:[%s12577_s1 + $0x68] sm:$0xf0]  ;;  %v6266_v5 = vor.u32 %v7471_v59, %v6263_v60 }
  0x2e   : > { %790 = vmatpush.bf16.msra.mxu1 %v6282_v46  ;;  %952 = vmatpush.bf16.msra.mxu2 %v6370_v47  ;;  %v6354_v6 = vor.u32 %v7484_v62, %v6353_v61  ;;  %v6358_v7 = vor.u32 %v7483_v2, %v6355_v3  ;;  %v496_v8 = vld [vmem:[%s8445_s16] ss:$2 sm:$0xff]  ;;  %v6228_v9 = vld [vmem:[%s8445_s16 + $0x10] ss:$2 sm:$0xff]  ;;  %v6243_v44 = vld [vmem:[%s8445_s16 + $0x1] ss:$2 sm:$0xff] }
  0x2f   : > { %1041 = vmatpush.bf16.msra.mxu3 %v6374_v51  ;;  %v8449_v10 = vpack.c.bf16 %v6228_v9, %v496_v8  ;;  %v6229_v11 = vld [vmem:[%s8445_s16 + $0x20] ss:$2 sm:$0xff]  ;;  %v6230_v12 = vld [vmem:[%s8445_s16 + $0x30] ss:$2 sm:$0xff]  ;;  %v6244_v45 = vld [vmem:[%s8445_s16 + $0x11] ss:$2 sm:$0xff] }
  0x30   : > { %v8461_v13 = vpack.c.bf16 %v6230_v12, %v6229_v11  ;;  %v6231_v14 = vld [vmem:[%s8445_s16 + $0x40] ss:$2 sm:$0xff]  ;;  %v6232_v15 = vld [vmem:[%s8445_s16 + $0x50] ss:$2 sm:$0xff]  ;;  %v8569_v46 = vpack.c.bf16 %v6244_v45, %v6243_v44  ;;  %v6245_v53 = vld [vmem:[%s8445_s16 + $0x21] ss:$2 sm:$0xff] }
  0x31   : > { %702 = vmatpush.bf16.msra.mxu0 %v6270_v58  ;;  %v8473_v16 = vpack.c.bf16 %v6232_v15, %v6231_v14  ;;  %v6233_v17 = vld [vmem:[%s8445_s16 + $0x60] ss:$2 sm:$0xff]  ;;  %v6234_v18 = vld [vmem:[%s8445_s16 + $0x70] ss:$2 sm:$0xff]  ;;  %v6246_v54 = vld [vmem:[%s8445_s16 + $0x31] ss:$2 sm:$0xff] }
  0x32   : > { %791 = vmatpush.bf16.msra.mxu1 %v6274_v63  ;;  %953 = vmatpush.bf16.msra.mxu2 %v6362_v0  ;;  %v8485_v19 = vpack.c.bf16 %v6234_v18, %v6233_v17  ;;  %v6235_v20 = vld [vmem:[%s8445_s16 + $0x80] ss:$2 sm:$0xff]  ;;  %v6236_v21 = vld [vmem:[%s8445_s16 + $0x90] ss:$2 sm:$0xff]  ;;  %v8595_v56 = vpack.c.bf16 %v6246_v54, %v6245_v53  ;;  %s8161_s27 = smov 104   ;;  %s8164_s18 = smov 102  }
  0x33   : > { %1042 = vmatpush.bf16.msra.mxu3 %v6366_v1  ;;  %v8497_v22 = vpack.c.bf16 %v6236_v21, %v6235_v20  ;;  %v6485_v23 = vld [vmem:[%s12577_s1 + $0x110] sm:$0xf]  ;;  %v7506_v24 = vld [vmem:[%s12577_s1 + $0x114] sm:$0xf0]  ;;  %v7505_v25 = vld [vmem:[%s12577_s1 + $0x114] sm:$0xf] }
  0x34   : > { %v6486_v26 = vor.u32 %v7506_v24, %v6485_v23  ;;  %v6487_v27 = vld [vmem:[%s12577_s1 + $0x118] sm:$0xf0]  ;;  %v6237_v29 = vld [vmem:[%s8445_s16 + $0xa0] ss:$2 sm:$0xff]  ;;  %12585 = vst [vmem:[#allocation16_spill] sm:$0xff] %v8595_v56  ;;  %s7468_s24 = sshll.u32 %s8270_s22, 3 }
  0x35   : > { %703 = vmatpush.bf16.msra.mxu0 %v6262_v4  ;;  %v6490_v28 = vor.u32 %v7505_v25, %v6487_v27  ;;  %v6238_v30 = vld [vmem:[%s8445_s16 + $0xb0] ss:$2 sm:$0xff]  ;;  %v6239_v32 = vld [vmem:[%s8445_s16 + $0xc0] ss:$2 sm:$0xff]  ;;  %v6249_v21 = vld [vmem:[%s8445_s16 + $0x61] ss:$2 sm:$0xff] }
  0x36   : > { %792 = vmatpush.bf16.msra.mxu1 %v6266_v5  ;;  %954 = vmatpush.bf16.msra.mxu2 %v6354_v6  ;;  %v8521_v31 = vpack.c.bf16 %v6238_v30, %v6237_v29  ;;  %v6240_v33 = vld [vmem:[%s8445_s16 + $0xd0] ss:$2 sm:$0xff]  ;;  %v6241_v35 = vld [vmem:[%s8445_s16 + $0xe0] ss:$2 sm:$0xff]  ;;  %v6247_v6 = vld [vmem:[%s8445_s16 + $0x41] ss:$2 sm:$0xff] }
  0x37   : > { %1043 = vmatpush.bf16.msra.mxu3 %v6358_v7  ;;  %v8533_v34 = vpack.c.bf16 %v6240_v33, %v6239_v32  ;;  %v6242_v36 = vld [vmem:[%s8445_s16 + $0xf0] ss:$2 sm:$0xff]  ;;  %v6477_v38 = vld [vmem:[%s12577_s1 + $0x100] sm:$0xf]  ;;  %v7504_v39 = vld [vmem:[%s12577_s1 + $0x104] sm:$0xf0] }
  0x38   : > { %6307 = vmatmul.msk.bf16.vlgmr.msra.gmra.mxu0 %vm647_vm0, %v8449_v10  ;;  %v8545_v37 = vpack.c.bf16 %v6242_v36, %v6241_v35  ;;  %v7503_v40 = vld [vmem:[%s12577_s1 + $0x104] sm:$0xf]  ;;  %v6478_v41 = vor.u32 %v7504_v39, %v6477_v38  ;;  %v6479_v42 = vld [vmem:[%s12577_s1 + $0x108] sm:$0xf0]  ;;  %v6469_v0 = vld [vmem:[%s12577_s1 + $0xf0] sm:$0xf] }
  0x39   : > { %6323 = vmatmul.msk.bf16.vlgmr.msra.gmra.mxu1 %vm647_vm0, %v8449_v10  ;;  %6399 = vmatmul.msk.bf16.vlgmr.msra.gmra.mxu2 %vm647_vm0, %v8449_v10  ;;  %v6482_v43 = vor.u32 %v7503_v40, %v6479_v42  ;;  %v7502_v1 = vld [vmem:[%s12577_s1 + $0xf4] sm:$0xf0]  ;;  %v7501_v2 = vld [vmem:[%s12577_s1 + $0xf4] sm:$0xf]  ;;  %v6471_v4 = vld [vmem:[%s12577_s1 + $0xf8] sm:$0xf0] }
  0x3a   : > { %6415 = vmatmul.msk.bf16.vlgmr.msra.gmra.mxu3 %vm647_vm0, %v8449_v10  ;;  %1200 = vmatpush.bf16.msrb.mxu0 %v6486_v26  ;;  %v6470_v3 = vor.u32 %v7502_v1, %v6469_v0  ;;  %v6474_v5 = vor.u32 %v7501_v2, %v6471_v4  ;;  %v6248_v7 = vld [vmem:[%s8445_s16 + $0x51] ss:$2 sm:$0xff]  ;;  %v6251_v35 = vld [vmem:[%s8445_s16 + $0x81] ss:$2 sm:$0xff] }
  0x3b   : > { %1289 = vmatpush.bf16.msrb.mxu1 %v6490_v28  ;;  %v8635_v9 = vpack.c.bf16 %v6248_v7, %v6247_v6  ;;  %v6250_v23 = vld [vmem:[%s8445_s16 + $0x71] ss:$2 sm:$0xff]  ;;  %v7500_v44 = vld [vmem:[%s12577_s1 + $0xe4] sm:$0xf0]  ;;  %v7499_v45 = vld [vmem:[%s12577_s1 + $0xe4] sm:$0xf] }
  0x3c   : > { %v8663_v25 = vpack.c.bf16 %v6250_v23, %v6249_v21  ;;  %v6252_v36 = vld [vmem:[%s8445_s16 + $0x91] ss:$2 sm:$0xff]  ;;  %v6463_v54 = vld [vmem:[%s12577_s1 + $0xe8] sm:$0xf0] }
  0x3d   : > { %12590 = vst [vmem:[#allocation21_spill] sm:$0xff] %v8635_v9  ;;  %v8691_v39 = vpack.c.bf16 %v6252_v36, %v6251_v35  ;;  %v6466_v1 = vor.u32 %v7499_v45, %v6463_v54  ;;  %v7518_v6 = vld [vmem:[%s12577_s1 + $0x174] sm:$0xf0]  ;;  %v7517_v7 = vld [vmem:[%s12577_s1 + $0x174] sm:$0xf] }
  0x3e   : > { %1201 = vmatpush.bf16.msrb.mxu0 %v6478_v41  ;;  %12595 = vst [vmem:[#allocation26_spill] sm:$0xff] %v8663_v25  ;;  %v6579_v23 = vld [vmem:[%s12577_s1 + $0x178] sm:$0xf0]  ;;  %v6253_v36 = vld [vmem:[%s8445_s16 + $0xa1] ss:$2 sm:$0xff] }
  0x3f   : > { %1290 = vmatpush.bf16.msrb.mxu1 %v6482_v43  ;;  %12600 = vst [vmem:[#allocation31_spill] sm:$0xff] %v8691_v39  ;;  %v6461_v43 = vld [vmem:[%s12577_s1 + $0xe0] sm:$0xf]  ;;  %v6582_v35 = vor.u32 %v7517_v7, %v6579_v23  ;;  %v7516_v54 = vld [vmem:[%s12577_s1 + $0x164] sm:$0xf0] }
  0x40   : > { %v6462_v53 = vor.u32 %v7500_v44, %v6461_v43  ;;  %v6254_v43 = vld [vmem:[%s8445_s16 + $0xb1] ss:$2 sm:$0xff] }
  0x41   : > { %1540 = vmatpush.bf16.msrb.mxu3 %v6582_v35  ;;  %v8743_v45 = vpack.c.bf16 %v6254_v43, %v6253_v36  ;;  %v6561_v36 = vld [vmem:[%s12577_s1 + $0x150] sm:$0xf]  ;;  %v7514_v43 = vld [vmem:[%s12577_s1 + $0x154] sm:$0xf0] }
  0x42   : > { %1202 = vmatpush.bf16.msrb.mxu0 %v6470_v3 }
  0x43   : > { %1291 = vmatpush.bf16.msrb.mxu1 %v6474_v5  ;;  %v6577_v5 = vld [vmem:[%s12577_s1 + $0x170] sm:$0xf]  ;;  %12605 = vst [vmem:[#allocation36_spill] sm:$0xff] %v8743_v45 }
  0x44   : > { %v6578_v21 = vor.u32 %v7518_v6, %v6577_v5 }
  0x46   : > { %1203 = vmatpush.bf16.msrb.mxu0 %v6462_v53  ;;  %1451 = vmatpush.bf16.msrb.mxu2 %v6578_v21  ;;  %v6569_v53 = vld [vmem:[%s12577_s1 + $0x160] sm:$0xf]  ;;  %v6571_v21 = vld [vmem:[%s12577_s1 + $0x168] sm:$0xf0] }
  0x47   : > { %1292 = vmatpush.bf16.msrb.mxu1 %v6466_v1  ;;  %v7515_v1 = vld [vmem:[%s12577_s1 + $0x164] sm:$0xf]  ;;  %v6570_v7 = vor.u32 %v7516_v54, %v6569_v53  ;;  %v7513_v53 = vld [vmem:[%s12577_s1 + $0x154] sm:$0xf]  ;;  %v6562_v54 = vor.u32 %v7514_v43, %v6561_v36  ;;  %v7512_v36 = vld [vmem:[%s12577_s1 + $0x144] sm:$0xf0] }
  0x48   : > { %6308 = vmatmul.msk.bf16.gmra.mxu0 %vm647_vm0, %v8461_v13  ;;  %v6574_v35 = vor.u32 %v7515_v1, %v6571_v21  ;;  %v6563_v1 = vld [vmem:[%s12577_s1 + $0x158] sm:$0xf0]  ;;  %v7511_v43 = vld [vmem:[%s12577_s1 + $0x144] sm:$0xf] }
  0x49   : > { %6324 = vmatmul.msk.bf16.gmra.mxu1 %vm647_vm0, %v8461_v13  ;;  %6400 = vmatmul.msk.bf16.gmra.mxu2 %vm647_vm0, %v8461_v13 }
  0x4a   : > { %6416 = vmatmul.msk.bf16.gmra.mxu3 %vm647_vm0, %v8461_v13  ;;  %1452 = vmatpush.bf16.msrb.mxu2 %v6570_v7  ;;  %v6566_v7 = vor.u32 %v7513_v53, %v6563_v1 }
  0x4b   : > { %1541 = vmatpush.bf16.msrb.mxu3 %v6574_v35  ;;  %v6553_v35 = vld [vmem:[%s12577_s1 + $0x140] sm:$0xf] }
  0x4c   : > { %v6554_v53 = vor.u32 %v7512_v36, %v6553_v35  ;;  %v7497_v35 = vld [vmem:[%s12577_s1 + $0xd4] sm:$0xf] }
  0x4e   : > { %1453 = vmatpush.bf16.msrb.mxu2 %v6562_v54  ;;  %v6555_v54 = vld [vmem:[%s12577_s1 + $0x148] sm:$0xf0] }
  0x4f   : > { %1542 = vmatpush.bf16.msrb.mxu3 %v6566_v7  ;;  %v6558_v7 = vor.u32 %v7511_v43, %v6555_v54  ;;  %v6545_v43 = vld [vmem:[%s12577_s1 + $0x130] sm:$0xf]  ;;  %v7510_v54 = vld [vmem:[%s12577_s1 + $0x134] sm:$0xf0] }
  0x52   : > { %1454 = vmatpush.bf16.msrb.mxu2 %v6554_v53  ;;  %v7509_v53 = vld [vmem:[%s12577_s1 + $0x134] sm:$0xf] }
  0x53   : > { %1543 = vmatpush.bf16.msrb.mxu3 %v6558_v7  ;;  %v7496_v7 = vld [vmem:[%s12577_s1 + $0xc4] sm:$0xf0] }
  0x58   : > { %6309 = vmatmul.msk.bf16.gmra.mxu0 %vm647_vm0, %v8473_v16 }
  0x59   : > { %6325 = vmatmul.msk.bf16.gmra.mxu1 %vm647_vm0, %v8473_v16  ;;  %6401 = vmatmul.msk.bf16.gmra.mxu2 %vm647_vm0, %v8473_v16 }
  0x5a   : > { %6417 = vmatmul.msk.bf16.gmra.mxu3 %vm647_vm0, %v8473_v16 }
  0x68   : > { %6310 = vmatmul.msk.bf16.gmra.mxu0 %vm647_vm0, %v8485_v19 }
  0x69   : > { %6326 = vmatmul.msk.bf16.gmra.mxu1 %vm647_vm0, %v8485_v19  ;;  %6402 = vmatmul.msk.bf16.gmra.mxu2 %vm647_vm0, %v8485_v19 }
  0x6a   : > { %6418 = vmatmul.msk.bf16.gmra.mxu3 %vm647_vm0, %v8485_v19 }
  0x78   : > { %6311 = vmatmul.msk.bf16.gmra.mxu0 %vm647_vm0, %v8497_v22 }
  0x79   : > { %6327 = vmatmul.msk.bf16.gmra.mxu1 %vm647_vm0, %v8497_v22  ;;  %6403 = vmatmul.msk.bf16.gmra.mxu2 %vm647_vm0, %v8497_v22 }
  0x7a   : > { %6419 = vmatmul.msk.bf16.gmra.mxu3 %vm647_vm0, %v8497_v22 }
  0x88   : > { %6312 = vmatmul.msk.bf16.gmra.mxu0 %vm647_vm0, %v8521_v31 }
  0x89   : > { %6328 = vmatmul.msk.bf16.gmra.mxu1 %vm647_vm0, %v8521_v31  ;;  %6404 = vmatmul.msk.bf16.gmra.mxu2 %vm647_vm0, %v8521_v31 }
  0x8a   : > { %6420 = vmatmul.msk.bf16.gmra.mxu3 %vm647_vm0, %v8521_v31 }
  0x98   : > { %6313 = vmatmul.msk.bf16.gmra.mxu0 %vm647_vm0, %v8533_v34 }
  0x99   : > { %6329 = vmatmul.msk.bf16.gmra.mxu1 %vm647_vm0, %v8533_v34  ;;  %6405 = vmatmul.msk.bf16.gmra.mxu2 %vm647_vm0, %v8533_v34 }
  0x9a   : > { %6421 = vmatmul.msk.bf16.gmra.mxu3 %vm647_vm0, %v8533_v34 }
  0xa8   : > { %6314 = vmatmul.msk.bf16.gmra.mxu0 %vm647_vm0, %v8545_v37 }
  0xa9   : > { %6330 = vmatmul.msk.bf16.gmra.mxu1 %vm647_vm0, %v8545_v37  ;;  %6406 = vmatmul.msk.bf16.gmra.mxu2 %vm647_vm0, %v8545_v37 }
  0xaa   : > { %6422 = vmatmul.msk.bf16.gmra.mxu3 %vm647_vm0, %v8545_v37 }
  0xb5   : > { %v8571_v47 = vpop.f32.mrf.mxu0 }
  0xb6   : > { %12579 = vst [vmem:[#allocation10_spill] sm:$0xff] %v8571_v47  ;;  %v8573_v48 = vpop.f32.mrf.mxu1 }
  0xb7   : > { %12580 = vst [vmem:[#allocation11_spill] sm:$0xff] %v8573_v48 }
  0xb8   : > { %6315 = vmatmul.msk.bf16.gmra.mxu0 %vm647_vm0, %v8569_v46 }
  0xb9   : > { %6331 = vmatmul.msk.bf16.gmra.mxu1 %vm647_vm0, %v8569_v46  ;;  %6407 = vmatmul.msk.bf16.gmra.mxu2 %vm647_vm0, %v8569_v46 }
  0xba   : > { %6423 = vmatmul.msk.bf16.gmra.mxu3 %vm647_vm0, %v8569_v46 }
  0xbc   : > { %v8583_v49 = vpop.f32.mrf.mxu2 }
  0xbd   : > { %12581 = vst [vmem:[#allocation12_spill] sm:$0xff] %v8583_v49  ;;  %v8585_v50 = vpop.f32.mrf.mxu3  ;;  %v8587_v51 = vpop.f32.mrf.mxu0 }
  0xbe   : > { %12582 = vst [vmem:[#allocation13_spill] sm:$0xff] %v8585_v50  ;;  %v8589_v52 = vpop.f32.mrf.mxu1 }
  0xbf   : > { %12583 = vst [vmem:[#allocation14_spill] sm:$0xff] %v8587_v51 }
  0xc0   : > { %12584 = vst [vmem:[#allocation15_spill] sm:$0xff] %v8589_v52 }
  0xc4   : > { %v8593_v55 = vpop.f32.mrf.mxu2 }
  0xc5   : > { %v8597_v57 = vpop.f32.mrf.mxu3  ;;  %v8599_v58 = vpop.f32.mrf.mxu0 }
  0xc6   : > { %12586 = vst [vmem:[#allocation17_spill] sm:$0xff] %v8599_v58  ;;  %v8601_v59 = vpop.f32.mrf.mxu1 }
  0xc7   : > { %12587 = vst [vmem:[#allocation18_spill] sm:$0xff] %v8601_v59 }
  0xc8   : > { %6316 = vmatmul.msk.bf16.gmra.mxu0 %vm647_vm0, %v8595_v56 }
  0xc9   : > { %6332 = vmatmul.msk.bf16.gmra.mxu1 %vm647_vm0, %v8595_v56  ;;  %6408 = vmatmul.msk.bf16.gmra.mxu2 %vm647_vm0, %v8595_v56 }
  0xca   : > { %6424 = vmatmul.msk.bf16.gmra.mxu3 %vm647_vm0, %v8595_v56 }
  0xcc   : > { %v8611_v60 = vpop.f32.mrf.mxu2 }
  0xcd   : > { %v8613_v61 = vpop.f32.mrf.mxu3  ;;  %v8615_v62 = vpop.f32.mrf.mxu0 }
  0xce   : > { %12588 = vst [vmem:[#allocation19_spill] sm:$0xff] %v8615_v62  ;;  %v8617_v63 = vpop.f32.mrf.mxu1 }
  0xcf   : > { %12589 = vst [vmem:[#allocation20_spill] sm:$0xff] %v8617_v63 }
  0xd4   : > { %v8633_v8 = vpop.f32.mrf.mxu2 }
  0xd5   : > { %v8637_v11 = vpop.f32.mrf.mxu3  ;;  %v8639_v12 = vpop.f32.mrf.mxu0 }
  0xd6   : > { %12591 = vst [vmem:[#allocation22_spill] sm:$0xff] %v8639_v12  ;;  %v8641_v14 = vpop.f32.mrf.mxu1 }
  0xd7   : > { %12592 = vst [vmem:[#allocation23_spill] sm:$0xff] %v8641_v14 }
  0xd8   : > { %6317 = vmatmul.msk.bf16.gmra.mxu0 %vm647_vm0, %v8635_v9 }
  0xd9   : > { %6333 = vmatmul.msk.bf16.gmra.mxu1 %vm647_vm0, %v8635_v9  ;;  %6409 = vmatmul.msk.bf16.gmra.mxu2 %vm647_vm0, %v8635_v9 }
  0xda   : > { %6425 = vmatmul.msk.bf16.gmra.mxu3 %vm647_vm0, %v8635_v9 }
  0xdc   : > { %v8651_v15 = vpop.f32.mrf.mxu2 }
  0xdd   : > { %v8653_v17 = vpop.f32.mrf.mxu3  ;;  %v8655_v18 = vpop.f32.mrf.mxu0 }
  0xde   : > { %12593 = vst [vmem:[#allocation24_spill] sm:$0xff] %v8655_v18  ;;  %v8657_v20 = vpop.f32.mrf.mxu1 }
  0xdf   : > { %12594 = vst [vmem:[#allocation25_spill] sm:$0xff] %v8657_v20 }
  0xe4   : > { %v8661_v24 = vpop.f32.mrf.mxu2 }
  0xe5   : > { %v8665_v26 = vpop.f32.mrf.mxu3  ;;  %v8667_v27 = vpop.f32.mrf.mxu0 }
  0xe6   : > { %12596 = vst [vmem:[#allocation27_spill] sm:$0xff] %v8667_v27  ;;  %v8669_v28 = vpop.f32.mrf.mxu1 }
  0xe7   : > { %12597 = vst [vmem:[#allocation28_spill] sm:$0xff] %v8669_v28 }
  0xe8   : > { %6318 = vmatmul.msk.bf16.gmra.mxu0 %vm647_vm0, %v8663_v25 }
  0xe9   : > { %6334 = vmatmul.msk.bf16.gmra.mxu1 %vm647_vm0, %v8663_v25  ;;  %6410 = vmatmul.msk.bf16.gmra.mxu2 %vm647_vm0, %v8663_v25 }
  0xea   : > { %6426 = vmatmul.msk.bf16.gmra.mxu3 %vm647_vm0, %v8663_v25 }
  0xec   : > { %v8679_v29 = vpop.f32.mrf.mxu2 }
  0xed   : > { %v8681_v30 = vpop.f32.mrf.mxu3  ;;  %v8683_v32 = vpop.f32.mrf.mxu0 }
  0xee   : > { %12598 = vst [vmem:[#allocation29_spill] sm:$0xff] %v8683_v32  ;;  %v8685_v33 = vpop.f32.mrf.mxu1 }
  0xef   : > { %12599 = vst [vmem:[#allocation30_spill] sm:$0xff] %v8685_v33 }
  0xf4   : > { %v8689_v38 = vpop.f32.mrf.mxu2 }
  0xf5   : > { %v8693_v40 = vpop.f32.mrf.mxu3  ;;  %v8695_v41 = vpop.f32.mrf.mxu0 }
  0xf6   : > { %12601 = vst [vmem:[#allocation32_spill] sm:$0xff] %v8695_v41  ;;  %v8697_v42 = vpop.f32.mrf.mxu1 }
  0xf7   : > { %12602 = vst [vmem:[#allocation33_spill] sm:$0xff] %v8697_v42 }
  0xf8   : > { %6319 = vmatmul.msk.bf16.gmra.mxu0 %vm647_vm0, %v8691_v39 }
  0xf9   : > { %6335 = vmatmul.msk.bf16.gmra.mxu1 %vm647_vm0, %v8691_v39  ;;  %6411 = vmatmul.msk.bf16.gmra.mxu2 %vm647_vm0, %v8691_v39 }
  0xfa   : > { %6427 = vmatmul.msk.bf16.gmra.mxu3 %vm647_vm0, %v8691_v39 }
  0xfc   : > { %v8719_v0 = vpop.f32.mrf.mxu2 }
  0xfd   : > { %v8721_v2 = vpop.f32.mrf.mxu3  ;;  %v8723_v3 = vpop.f32.mrf.mxu0 }
  0xfe   : > { %12603 = vst [vmem:[#allocation34_spill] sm:$0xff] %v8723_v3  ;;  %v8725_v4 = vpop.f32.mrf.mxu1  ;;  %v6256_v3 = vld [vmem:[%s8445_s16 + $0xd1] ss:$2 sm:$0xff] }
  0xff   : > { %12604 = vst [vmem:[#allocation35_spill] sm:$0xff] %v8725_v4  ;;  %v6546_v4 = vor.u32 %v7510_v54, %v6545_v43  ;;  %v7508_v43 = vld [vmem:[%s12577_s1 + $0x124] sm:$0xf0] }
 0x101   : > { %1455 = vmatpush.bf16.msrb.mxu2 %v6546_v4 }
 0x104   : > { %v8741_v44 = vpop.f32.mrf.mxu2 }
 0x105   : > { %v8754_v5 = vpop.f32.mrf.mxu3  ;;  %v8756_v6 = vpop.f32.mrf.mxu0 }
 0x106   : > { %12606 = vst [vmem:[#allocation37_spill] sm:$0xff] %v8756_v6  ;;  %v8761_v23 = vpop.f32.mrf.mxu1  ;;  %v7498_v6 = vld [vmem:[%s12577_s1 + $0xd4] sm:$0xf0] }
 0x107   : > { %12607 = vst [vmem:[#allocation38_spill] sm:$0xff] %v8761_v23  ;;  %v6453_v23 = vld [vmem:[%s12577_s1 + $0xd0] sm:$0xf] }
 0x108   : > { %6320 = vmatmul.msk.bf16.gmra.mxu0 %vm647_vm0, %v8743_v45  ;;  %v6454_v36 = vor.u32 %v7498_v6, %v6453_v23  ;;  %v6547_v6 = vld [vmem:[%s12577_s1 + $0x138] sm:$0xf0]  ;;  %v6255_v23 = vld [vmem:[%s8445_s16 + $0xc1] ss:$2 sm:$0xff] }
 0x109   : > { %6336 = vmatmul.msk.bf16.gmra.mxu1 %vm647_vm0, %v8743_v45  ;;  %6412 = vmatmul.msk.bf16.gmra.mxu2 %vm647_vm0, %v8743_v45  ;;  %v6550_v42 = vor.u32 %v7509_v53, %v6547_v6  ;;  %v8831_v33 = vpack.c.bf16 %v6256_v3, %v6255_v23  ;;  %v6537_v3 = vld [vmem:[%s12577_s1 + $0x120] sm:$0xf]  ;;  %v7507_v23 = vld [vmem:[%s12577_s1 + $0x124] sm:$0xf] }
 0x10a   : > { %6428 = vmatmul.msk.bf16.gmra.mxu3 %vm647_vm0, %v8743_v45  ;;  %1204 = vmatpush.bf16.msrb.mxu0 %v6454_v36  ;;  %v6538_v6 = vor.u32 %v7508_v43, %v6537_v3  ;;  %v6257_v43 = vld [vmem:[%s8445_s16 + $0xe1] ss:$2 sm:$0xff] }
 0x10b   : > { %12610 = vst [vmem:[#allocation41_spill] sm:$0xff] %v8831_v33  ;;  %1544 = vmatpush.bf16.msrb.mxu3 %v6550_v42  ;;  %v6447_v42 = vld [vmem:[%s12577_s1 + $0xc8] sm:$0xf0] }
 0x10c   : > { %v8783_v21 = vpop.f32.mrf.mxu2  ;;  %1456 = vmatpush.bf16.msrb.mxu2 %v6538_v6 }
 0x10d   : > { %v8794_v49 = vpop.f32.mrf.mxu3  ;;  %v8796_v50 = vpop.f32.mrf.mxu0 }
 0x10e   : > { %12608 = vst [vmem:[#allocation39_spill] sm:$0xff] %v8796_v50  ;;  %v8801_v1 = vpop.f32.mrf.mxu1 }
 0x10f   : > { %12609 = vst [vmem:[#allocation40_spill] sm:$0xff] %v8801_v1  ;;  %v6455_v1 = vld [vmem:[%s12577_s1 + $0xd8] sm:$0xf0] }
 0x110   : > { %v6458_v50 = vor.u32 %v7497_v35, %v6455_v1  ;;  %v6445_v1 = vld [vmem:[%s12577_s1 + $0xc0] sm:$0xf]  ;;  %v7495_v35 = vld [vmem:[%s12577_s1 + $0xc4] sm:$0xf] }
 0x111   : > { %v6446_v4 = vor.u32 %v7496_v7, %v6445_v1  ;;  %v6450_v53 = vor.u32 %v7495_v35, %v6447_v42  ;;  %v6539_v1 = vld [vmem:[%s12577_s1 + $0x128] sm:$0xf0] }
 0x112   : > { %1293 = vmatpush.bf16.msrb.mxu1 %v6458_v50  ;;  %v6542_v7 = vor.u32 %v7507_v23, %v6539_v1 }
 0x113   : > { %1205 = vmatpush.bf16.msrb.mxu0 %v6446_v4 }
 0x114   : > { %v8829_v41 = vpop.f32.mrf.mxu2  ;;  %1545 = vmatpush.bf16.msrb.mxu3 %v6542_v7 }
 0x115   : > { %v8842_v36 = vpop.f32.mrf.mxu3  ;;  %v8844_v50 = vpop.f32.mrf.mxu0 }
 0x116   : > { %v8855_v54 = vpop.f32.mrf.mxu1  ;;  %1294 = vmatpush.bf16.msrb.mxu1 %v6450_v53  ;;  %v6258_v53 = vld [vmem:[%s8445_s16 + $0xf1] ss:$2 sm:$0xff] }
 0x117   : > { %v8883_v1 = vpack.c.bf16 %v6258_v53, %v6257_v43 }
 0x118   : > { %6321 = vmatmul.msk.bf16.gmra.mxu0 %vm647_vm0, %v8831_v33 }
 0x119   : > { %6337 = vmatmul.msk.bf16.gmra.mxu1 %vm647_vm0, %v8831_v33  ;;  %6413 = vmatmul.msk.bf16.gmra.mxu2 %vm647_vm0, %v8831_v33  ;;  %12612 = vst [vmem:[#allocation43_spill] sm:$0xff] %v8883_v1 }
 0x11a   : > { %6429 = vmatmul.msk.bf16.gmra.mxu3 %vm647_vm0, %v8831_v33 }
 0x11c   : > { %v8871_v35 = vpop.f32.mrf.mxu2 }
 0x11d   : > { %v8873_v42 = vpop.f32.mrf.mxu3  ;;  %v8875_v4 = vpop.f32.mrf.mxu0 }
 0x11e   : > { %v8877_v3 = vpop.f32.mrf.mxu1 }
 0x11f   : > { %12611 = vst [vmem:[#allocation42_spill] sm:$0xff] %v8877_v3 }
 0x124   : > { %v8881_v23 = vpop.f32.mrf.mxu2 }
 0x125   : > { %v8885_v32 = vpop.f32.mrf.mxu3  ;;  %v8887_v28 = vpop.f32.mrf.mxu0 }
 0x126   : > { %12613 = vst [vmem:[#allocation44_spill] sm:$0xff] %v8887_v28  ;;  %v8889_v6 = vpop.f32.mrf.mxu1 }
 0x127   : > { %12614 = vst [vmem:[#allocation45_spill] sm:$0xff] %v8889_v6 }
 0x128   : > { %6322 = vmatmul.msk.bf16.gmra.mxu0 %vm647_vm0, %v8883_v1 }
 0x129   : > { %6338 = vmatmul.msk.bf16.gmra.mxu1 %vm647_vm0, %v8883_v1  ;;  %6414 = vmatmul.msk.bf16.gmra.mxu2 %vm647_vm0, %v8883_v1 }
 0x12a   : > { %6430 = vmatmul.msk.bf16.gmra.mxu3 %vm647_vm0, %v8883_v1 }
 0x12c   : > { %v8899_v7 = vpop.f32.mrf.mxu2 }
 0x12d   : > { %v8901_v43 = vpop.f32.mrf.mxu3  ;;  %v8903_v53 = vpop.f32.mrf.mxu0 }
 0x12e   : > { %12615 = vst [vmem:[#allocation46_spill] sm:$0xff] %v8903_v53  ;;  %v8905_v28 = vpop.f32.mrf.mxu1 }
 0x12f   : > { %12616 = vst [vmem:[#allocation47_spill] sm:$0xff] %v8905_v28 }
 0x134   : > { %v8907_v6 = vpop.f32.mrf.mxu2 }
 0x135   : > { %v8909_v3 = vpop.f32.mrf.mxu3  ;;  %v8911_v27 = vpop.f32.mrf.mxu0 }
 0x136   : > { %12617 = vst [vmem:[#allocation48_spill] sm:$0xff] %v8911_v27  ;;  %v8913_v20 = vpop.f32.mrf.mxu1 }
 0x137   : > { %12618 = vst [vmem:[#allocation49_spill] sm:$0xff] %v8913_v20 }
 0x138   : > { %6491 = vmatmul.msk.bf16.vlgmr.msrb.gmra.mxu0 %vm647_vm0, %v8449_v10 }
 0x139   : > { %6507 = vmatmul.msk.bf16.vlgmr.msrb.gmra.mxu1 %vm647_vm0, %v8449_v10  ;;  %6583 = vmatmul.msk.bf16.vlgmr.msrb.gmra.mxu2 %vm647_vm0, %v8449_v10 }
 0x13a   : > { %6599 = vmatmul.msk.bf16.vlgmr.msrb.gmra.mxu3 %vm647_vm0, %v8449_v10 }
 0x13c   : > { %v8923_v28 = vpop.f32.mrf.mxu2 }
 0x13d   : > { %12619 = vst [vmem:[#allocation50_spill] sm:$0xff] %v8923_v28  ;;  %v8925_v53 = vpop.f32.mrf.mxu3  ;;  %v8927_v18 = vpop.f32.mrf.mxu0 }
 0x13e   : > { %12620 = vst [vmem:[#allocation51_spill] sm:$0xff] %v8925_v53  ;;  %v8929_v27 = vpop.f32.mrf.mxu1 }
 0x13f   : > { %12621 = vst [vmem:[#allocation52_spill] sm:$0xff] %v8927_v18 }
 0x140   : > { %12622 = vst [vmem:[#allocation53_spill] sm:$0xff] %v8929_v27 }
 0x144   : > { %v8931_v20 = vpop.f32.mrf.mxu2 }
 0x145   : > { %12623 = vst [vmem:[#allocation54_spill] sm:$0xff] %v8931_v20  ;;  %v8933_v14 = vpop.f32.mrf.mxu3  ;;  %v8935_v12 = vpop.f32.mrf.mxu0 }
 0x146   : > { %12624 = vst [vmem:[#allocation55_spill] sm:$0xff] %v8933_v14  ;;  %v8937_v63 = vpop.f32.mrf.mxu1 }
 0x147   : > { %12625 = vst [vmem:[#allocation56_spill] sm:$0xff] %v8935_v12 }
 0x148   : > { %12626 = vst [vmem:[#allocation57_spill] sm:$0xff] %v8937_v63  ;;  %6492 = vmatmul.msk.bf16.gmra.mxu0 %vm647_vm0, %v8461_v13 }
 0x149   : > { %6508 = vmatmul.msk.bf16.gmra.mxu1 %vm647_vm0, %v8461_v13  ;;  %6584 = vmatmul.msk.bf16.gmra.mxu2 %vm647_vm0, %v8461_v13 }
 0x14a   : > { %6600 = vmatmul.msk.bf16.gmra.mxu3 %vm647_vm0, %v8461_v13 }
 0x14c   : > { %v8947_v18 = vpop.f32.mrf.mxu2 }
 0x14d   : > { %12627 = vst [vmem:[#allocation58_spill] sm:$0xff] %v8947_v18  ;;  %v8949_v27 = vpop.f32.mrf.mxu3  ;;  %v8951_v62 = vpop.f32.mrf.mxu0 }
 0x14e   : > { %12628 = vst [vmem:[#allocation59_spill] sm:$0xff] %v8949_v27  ;;  %v8953_v12 = vpop.f32.mrf.mxu1 }
 0x14f   : > { %12629 = vst [vmem:[#allocation60_spill] sm:$0xff] %v8951_v62 }
 0x150   : > { %12630 = vst [vmem:[#allocation61_spill] sm:$0xff] %v8953_v12 }
 0x154   : > { %v8955_v63 = vpop.f32.mrf.mxu2 }
 0x155   : > { %12631 = vst [vmem:[#allocation62_spill] sm:$0xff] %v8955_v63  ;;  %v8957_v59 = vpop.f32.mrf.mxu3  ;;  %v8959_v58 = vpop.f32.mrf.mxu0 }
 0x156   : > { %12632 = vst [vmem:[#allocation63_spill] sm:$0xff] %v8957_v59  ;;  %v8961_v14 = vpop.f32.mrf.mxu1 }
 0x157   : > { %12633 = vst [vmem:[#allocation64_spill] sm:$0xff] %v8959_v58 }
 0x158   : > { %12634 = vst [vmem:[#allocation65_spill] sm:$0xff] %v8961_v14  ;;  %6493 = vmatmul.msk.bf16.gmra.mxu0 %vm647_vm0, %v8473_v16 }
 0x159   : > { %6509 = vmatmul.msk.bf16.gmra.mxu1 %vm647_vm0, %v8473_v16  ;;  %6585 = vmatmul.msk.bf16.gmra.mxu2 %vm647_vm0, %v8473_v16 }
 0x15a   : > { %6601 = vmatmul.msk.bf16.gmra.mxu3 %vm647_vm0, %v8473_v16 }
 0x15c   : > { %v8971_v12 = vpop.f32.mrf.mxu2 }
 0x15d   : > { %12635 = vst [vmem:[#allocation66_spill] sm:$0xff] %v8971_v12  ;;  %v8973_v62 = vpop.f32.mrf.mxu3  ;;  %v8975_v59 = vpop.f32.mrf.mxu0 }
 0x15e   : > { %12636 = vst [vmem:[#allocation67_spill] sm:$0xff] %v8973_v62  ;;  %v8977_v58 = vpop.f32.mrf.mxu1 }
 0x15f   : > { %12637 = vst [vmem:[#allocation68_spill] sm:$0xff] %v8975_v59 }
 0x160   : > { %12638 = vst [vmem:[#allocation69_spill] sm:$0xff] %v8977_v58 }
 0x164   : > { %v8979_v14 = vpop.f32.mrf.mxu2 }
 0x165   : > { %12639 = vst [vmem:[#allocation70_spill] sm:$0xff] %v8979_v14  ;;  %v8981_v63 = vpop.f32.mrf.mxu3  ;;  %v8983_v27 = vpop.f32.mrf.mxu0 }
 0x166   : > { %12640 = vst [vmem:[#allocation71_spill] sm:$0xff] %v8981_v63  ;;  %v8985_v18 = vpop.f32.mrf.mxu1 }
 0x167   : > { %12641 = vst [vmem:[#allocation72_spill] sm:$0xff] %v8983_v27 }
 0x168   : > { %12642 = vst [vmem:[#allocation73_spill] sm:$0xff] %v8985_v18  ;;  %6494 = vmatmul.msk.bf16.gmra.mxu0 %vm647_vm0, %v8485_v19 }
 0x169   : > { %6510 = vmatmul.msk.bf16.gmra.mxu1 %vm647_vm0, %v8485_v19  ;;  %6586 = vmatmul.msk.bf16.gmra.mxu2 %vm647_vm0, %v8485_v19 }
 0x16a   : > { %6602 = vmatmul.msk.bf16.gmra.mxu3 %vm647_vm0, %v8485_v19 }
 0x16c   : > { %v8995_v59 = vpop.f32.mrf.mxu2 }
 0x16d   : > { %12643 = vst [vmem:[#allocation74_spill] sm:$0xff] %v8995_v59  ;;  %v8997_v58 = vpop.f32.mrf.mxu3  ;;  %v8999_v63 = vpop.f32.mrf.mxu0 }
 0x16e   : > { %12644 = vst [vmem:[#allocation75_spill] sm:$0xff] %v8997_v58  ;;  %v9001_v27 = vpop.f32.mrf.mxu1 }
 0x16f   : > { %12645 = vst [vmem:[#allocation76_spill] sm:$0xff] %v8999_v63  ;;  %v6669_v63 = vld [vmem:[%s12577_s1 + $0x1d0] sm:$0xf] }
 0x170   : > { %12646 = vst [vmem:[#allocation77_spill] sm:$0xff] %v9001_v27 }
 0x174   : > { %v9003_v18 = vpop.f32.mrf.mxu2 }
 0x175   : > { %12647 = vst [vmem:[#allocation78_spill] sm:$0xff] %v9003_v18  ;;  %v9005_v14 = vpop.f32.mrf.mxu3  ;;  %v9007_v62 = vpop.f32.mrf.mxu0 }
 0x176   : > { %12648 = vst [vmem:[#allocation79_spill] sm:$0xff] %v9005_v14  ;;  %v9009_v12 = vpop.f32.mrf.mxu1  ;;  %v6671_v14 = vld [vmem:[%s12577_s1 + $0x1d8] sm:$0xf0] }
 0x177   : > { %12649 = vst [vmem:[#allocation80_spill] sm:$0xff] %v9007_v62  ;;  %v7530_v62 = vld [vmem:[%s12577_s1 + $0x1d4] sm:$0xf0] }
 0x178   : > { %12650 = vst [vmem:[#allocation81_spill] sm:$0xff] %v9009_v12  ;;  %6495 = vmatmul.msk.bf16.gmra.mxu0 %vm647_vm0, %v8497_v22  ;;  %v7529_v12 = vld [vmem:[%s12577_s1 + $0x1d4] sm:$0xf]  ;;  %v6670_v27 = vor.u32 %v7530_v62, %v6669_v63 }
 0x179   : > { %6511 = vmatmul.msk.bf16.gmra.mxu1 %vm647_vm0, %v8497_v22  ;;  %6587 = vmatmul.msk.bf16.gmra.mxu2 %vm647_vm0, %v8497_v22  ;;  %v6674_v58 = vor.u32 %v7529_v12, %v6671_v14 }
 0x17a   : > { %6603 = vmatmul.msk.bf16.gmra.mxu3 %vm647_vm0, %v8497_v22  ;;  %1702 = vmatpush.bf16.msra.mxu0 %v6670_v27 }
 0x17b   : > { %1791 = vmatpush.bf16.msra.mxu1 %v6674_v58 }
 0x17c   : > { %v9031_v18 = vpop.f32.mrf.mxu2 }
 0x17d   : > { %12651 = vst [vmem:[#allocation82_spill] sm:$0xff] %v9031_v18  ;;  %v9033_v59 = vpop.f32.mrf.mxu3  ;;  %v9035_v52 = vpop.f32.mrf.mxu0 }
 0x17e   : > { %12652 = vst [vmem:[#allocation83_spill] sm:$0xff] %v9033_v59  ;;  %v9037_v20 = vpop.f32.mrf.mxu1 }
 0x17f   : > { %12653 = vst [vmem:[#allocation84_spill] sm:$0xff] %v9035_v52 }
 0x180   : > { %12654 = vst [vmem:[#allocation85_spill] sm:$0xff] %v9037_v20 }
 0x184   : > { %v9039_v51 = vpop.f32.mrf.mxu2 }
 0x185   : > { %12655 = vst [vmem:[#allocation86_spill] sm:$0xff] %v9039_v51  ;;  %v9041_v53 = vpop.f32.mrf.mxu3  ;;  %v9043_v62 = vpop.f32.mrf.mxu0 }
 0x186   : > { %12656 = vst [vmem:[#allocation87_spill] sm:$0xff] %v9041_v53  ;;  %v9045_v63 = vpop.f32.mrf.mxu1  ;;  %v7528_v53 = vld [vmem:[%s12577_s1 + $0x1c4] sm:$0xf0] }
 0x187   : > { %12657 = vst [vmem:[#allocation88_spill] sm:$0xff] %v9043_v62 }
 0x188   : > { %12658 = vst [vmem:[#allocation89_spill] sm:$0xff] %v9045_v63  ;;  %6496 = vmatmul.msk.bf16.gmra.mxu0 %vm647_vm0, %v8521_v31 }
 0x189   : > { %6512 = vmatmul.msk.bf16.gmra.mxu1 %vm647_vm0, %v8521_v31  ;;  %6588 = vmatmul.msk.bf16.gmra.mxu2 %vm647_vm0, %v8521_v31 }
 0x18a   : > { %6604 = vmatmul.msk.bf16.gmra.mxu3 %vm647_vm0, %v8521_v31 }
 0x18c   : > { %v9055_v58 = vpop.f32.mrf.mxu2 }
 0x18d   : > { %12659 = vst [vmem:[#allocation90_spill] sm:$0xff] %v9055_v58  ;;  %v9057_v12 = vpop.f32.mrf.mxu3  ;;  %v9059_v14 = vpop.f32.mrf.mxu0  ;;  %v6661_v58 = vld [vmem:[%s12577_s1 + $0x1c0] sm:$0xf] }
 0x18e   : > { %12660 = vst [vmem:[#allocation91_spill] sm:$0xff] %v9057_v12  ;;  %v9061_v27 = vpop.f32.mrf.mxu1 }
 0x18f   : > { %12661 = vst [vmem:[#allocation92_spill] sm:$0xff] %v9059_v14 }
 0x190   : > { %12662 = vst [vmem:[#allocation93_spill] sm:$0xff] %v9061_v27 }
 0x194   : > { %v9063_v62 = vpop.f32.mrf.mxu2 }
 0x195   : > { %12663 = vst [vmem:[#allocation94_spill] sm:$0xff] %v9063_v62  ;;  %v9065_v63 = vpop.f32.mrf.mxu3  ;;  %v9067_v52 = vpop.f32.mrf.mxu0 }
 0x196   : > { %12664 = vst [vmem:[#allocation95_spill] sm:$0xff] %v9065_v63  ;;  %v9069_v20 = vpop.f32.mrf.mxu1 }
 0x197   : > { %12665 = vst [vmem:[#allocation96_spill] sm:$0xff] %v9067_v52 }
 0x198   : > { %12666 = vst [vmem:[#allocation97_spill] sm:$0xff] %v9069_v20  ;;  %6497 = vmatmul.msk.bf16.gmra.mxu0 %vm647_vm0, %v8533_v34 }
 0x199   : > { %6513 = vmatmul.msk.bf16.gmra.mxu1 %vm647_vm0, %v8533_v34  ;;  %6589 = vmatmul.msk.bf16.gmra.mxu2 %vm647_vm0, %v8533_v34 }
 0x19a   : > { %6605 = vmatmul.msk.bf16.gmra.mxu3 %vm647_vm0, %v8533_v34 }
 0x19c   : > { %v9079_v14 = vpop.f32.mrf.mxu2 }
 0x19d   : > { %v9081_v27 = vpop.f32.mrf.mxu3  ;;  %v9083_v63 = vpop.f32.mrf.mxu0 }
 0x19e   : > { %12667 = vst [vmem:[#allocation98_spill] sm:$0xff] %v9083_v63  ;;  %v9085_v52 = vpop.f32.mrf.mxu1  ;;  %v7527_v63 = vld [vmem:[%s12577_s1 + $0x1c4] sm:$0xf] }
 0x19f   : > { %12668 = vst [vmem:[#allocation99_spill] sm:$0xff] %v9085_v52  ;;  %v6662_v52 = vor.u32 %v7528_v53, %v6661_v58 }
 0x1a1   : > { %1703 = vmatpush.bf16.msra.mxu0 %v6662_v52 }
 0x1a4   : > { %v9087_v20 = vpop.f32.mrf.mxu2 }
 0x1a5   : > { %v9089_v62 = vpop.f32.mrf.mxu3  ;;  %v9091_v12 = vpop.f32.mrf.mxu0 }
 0x1a6   : > { %12669 = vst [vmem:[#allocation100_spill] sm:$0xff] %v9089_v62  ;;  %v9102_v51 = vpop.f32.mrf.mxu1  ;;  %v6663_v62 = vld [vmem:[%s12577_s1 + $0x1c8] sm:$0xf0] }
 0x1a7   : > { %12670 = vst [vmem:[#allocation101_spill] sm:$0xff] %v9091_v12  ;;  %v6666_v12 = vor.u32 %v7527_v63, %v6663_v62 }
 0x1a8   : > { %12671 = vst [vmem:[#allocation102_spill] sm:$0xff] %v9102_v51  ;;  %6498 = vmatmul.msk.bf16.gmra.mxu0 %vm647_vm0, %v8545_v37 }
 0x1a9   : > { %6514 = vmatmul.msk.bf16.gmra.mxu1 %vm647_vm0, %v8545_v37  ;;  %6590 = vmatmul.msk.bf16.gmra.mxu2 %vm647_vm0, %v8545_v37 }
 0x1aa   : > { %6606 = vmatmul.msk.bf16.gmra.mxu3 %vm647_vm0, %v8545_v37  ;;  %1792 = vmatpush.bf16.msra.mxu1 %v6666_v12 }
 0x1ac   : > { %v9115_v53 = vpop.f32.mrf.mxu2 }
 0x1ad   : > { %12672 = vst [vmem:[#allocation103_spill] sm:$0xff] %v9115_v53  ;;  %v9117_v58 = vpop.f32.mrf.mxu3  ;;  %v9119_v51 = vpop.f32.mrf.mxu0 }
 0x1ae   : > { %12673 = vst [vmem:[#allocation104_spill] sm:$0xff] %v9117_v58  ;;  %v9121_v62 = vpop.f32.mrf.mxu1 }
 0x1af   : > { %12674 = vst [vmem:[#allocation105_spill] sm:$0xff] %v9119_v51 }
 0x1b0   : > { %12675 = vst [vmem:[#allocation106_spill] sm:$0xff] %v9121_v62 }
 0x1b4   : > { %v9123_v63 = vpop.f32.mrf.mxu2 }
 0x1b5   : > { %12676 = vst [vmem:[#allocation107_spill] sm:$0xff] %v9123_v63  ;;  %v9125_v59 = vpop.f32.mrf.mxu3  ;;  %v9127_v18 = vpop.f32.mrf.mxu0 }
 0x1b6   : > { %12677 = vst [vmem:[#allocation108_spill] sm:$0xff] %v9125_v59  ;;  %v9129_v48 = vpop.f32.mrf.mxu1 }
 0x1b7   : > { %12678 = vst [vmem:[#allocation109_spill] sm:$0xff] %v9129_v48  ;;  %v7526_v48 = vld [vmem:[%s12577_s1 + $0x1b4] sm:$0xf0] }
 0x1b8   : > { %6499 = vmatmul.msk.bf16.gmra.mxu0 %vm647_vm0, %v8569_v46 }
 0x1b9   : > { %6515 = vmatmul.msk.bf16.gmra.mxu1 %vm647_vm0, %v8569_v46  ;;  %6591 = vmatmul.msk.bf16.gmra.mxu2 %vm647_vm0, %v8569_v46 }
 0x1ba   : > { %6607 = vmatmul.msk.bf16.gmra.mxu3 %vm647_vm0, %v8569_v46 }
 0x1bc   : > { %v9139_v52 = vpop.f32.mrf.mxu2 }
 0x1bd   : > { %12679 = vst [vmem:[#allocation110_spill] sm:$0xff] %v9139_v52  ;;  %v9141_v12 = vpop.f32.mrf.mxu3  ;;  %v9143_v51 = vpop.f32.mrf.mxu0 }
 0x1be   : > { %12680 = vst [vmem:[#allocation111_spill] sm:$0xff] %v9141_v12  ;;  %v9145_v62 = vpop.f32.mrf.mxu1 }
 0x1bf   : > { %12681 = vst [vmem:[#allocation112_spill] sm:$0xff] %v9145_v62 }
 0x1c4   : > { %v9147_v59 = vpop.f32.mrf.mxu2 }
 0x1c5   : > { %12682 = vst [vmem:[#allocation113_spill] sm:$0xff] %v9147_v59  ;;  %v9149_v63 = vpop.f32.mrf.mxu3  ;;  %v9151_v58 = vpop.f32.mrf.mxu0 }
 0x1c6   : > { %12683 = vst [vmem:[#allocation114_spill] sm:$0xff] %v9149_v63  ;;  %v9153_v53 = vpop.f32.mrf.mxu1 }
 0x1c7   : > { %12684 = vst [vmem:[#allocation115_spill] sm:$0xff] %v9151_v58 }
 0x1c8   : > { %12685 = vst [vmem:[#allocation116_spill] sm:$0xff] %v9153_v53  ;;  %6500 = vmatmul.msk.bf16.gmra.mxu0 %vm647_vm0, %v8595_v56  ;;  %v6653_v53 = vld [vmem:[%s12577_s1 + $0x1b0] sm:$0xf] }
 0x1c9   : > { %6516 = vmatmul.msk.bf16.gmra.mxu1 %vm647_vm0, %v8595_v56  ;;  %6592 = vmatmul.msk.bf16.gmra.mxu2 %vm647_vm0, %v8595_v56  ;;  %v6654_v28 = vor.u32 %v7526_v48, %v6653_v53 }
 0x1ca   : > { %6608 = vmatmul.msk.bf16.gmra.mxu3 %vm647_vm0, %v8595_v56  ;;  %v7525_v56 = vld [vmem:[%s12577_s1 + $0x1b4] sm:$0xf] }
 0x1cb   : > { %1704 = vmatpush.bf16.msra.mxu0 %v6654_v28 }
 0x1cc   : > { %v9163_v52 = vpop.f32.mrf.mxu2 }
 0x1cd   : > { %12686 = vst [vmem:[#allocation117_spill] sm:$0xff] %v9163_v52  ;;  %v9165_v59 = vpop.f32.mrf.mxu3  ;;  %v9167_v63 = vpop.f32.mrf.mxu0  ;;  %v6655_v52 = vld [vmem:[%s12577_s1 + $0x1b8] sm:$0xf0] }
 0x1ce   : > { %12687 = vst [vmem:[#allocation118_spill] sm:$0xff] %v9165_v59  ;;  %v9169_v12 = vpop.f32.mrf.mxu1  ;;  %v6658_v59 = vor.u32 %v7525_v56, %v6655_v52 }
 0x1cf   : > { %12688 = vst [vmem:[#allocation119_spill] sm:$0xff] %v9167_v63 }
 0x1d0   : > { %12689 = vst [vmem:[#allocation120_spill] sm:$0xff] %v9169_v12  ;;  %1793 = vmatpush.bf16.msra.mxu1 %v6658_v59 }
 0x1d4   : > { %v9183_v12 = vpop.f32.mrf.mxu2 }
 0x1d5   : > { %12690 = vst [vmem:[#allocation121_spill] sm:$0xff] %v9183_v12  ;;  %v9185_v63 = vpop.f32.mrf.mxu3  ;;  %v9187_v47 = vpop.f32.mrf.mxu0 }
 0x1d6   : > { %12691 = vst [vmem:[#allocation122_spill] sm:$0xff] %v9185_v63  ;;  %v9189_v58 = vpop.f32.mrf.mxu1 }
 0x1d7   : > { %12692 = vst [vmem:[#allocation123_spill] sm:$0xff] %v9187_v47 }
 0x1d8   : > { %12693 = vst [vmem:[#allocation124_spill] sm:$0xff] %v9189_v58  ;;  %6501 = vmatmul.msk.bf16.gmra.mxu0 %vm647_vm0, %v8635_v9 }
 0x1d9   : > { %6517 = vmatmul.msk.bf16.gmra.mxu1 %vm647_vm0, %v8635_v9  ;;  %6593 = vmatmul.msk.bf16.gmra.mxu2 %vm647_vm0, %v8635_v9 }
 0x1da   : > { %6609 = vmatmul.msk.bf16.gmra.mxu3 %vm647_vm0, %v8635_v9 }
 0x1dc   : > { %v9199_v48 = vpop.f32.mrf.mxu2 }
 0x1dd   : > { %12694 = vst [vmem:[#allocation125_spill] sm:$0xff] %v9199_v48  ;;  %v9201_v56 = vpop.f32.mrf.mxu3  ;;  %v9203_v59 = vpop.f32.mrf.mxu0 }
 0x1de   : > { %12695 = vst [vmem:[#allocation126_spill] sm:$0xff] %v9201_v56  ;;  %v9205_v28 = vpop.f32.mrf.mxu1 }
 0x1df   : > { %12696 = vst [vmem:[#allocation127_spill] sm:$0xff] %v9203_v59 }
 0x1e0   : > { %12697 = vst [vmem:[#allocation128_spill] sm:$0xff] %v9205_v28 }
 0x1e4   : > { %v9207_v53 = vpop.f32.mrf.mxu2 }
 0x1e5   : > { %12698 = vst [vmem:[#allocation129_spill] sm:$0xff] %v9207_v53  ;;  %v9209_v52 = vpop.f32.mrf.mxu3  ;;  %v9211_v12 = vpop.f32.mrf.mxu0 }
 0x1e6   : > { %12699 = vst [vmem:[#allocation130_spill] sm:$0xff] %v9209_v52  ;;  %v9213_v63 = vpop.f32.mrf.mxu1 }
 0x1e7   : > { %12700 = vst [vmem:[#allocation131_spill] sm:$0xff] %v9211_v12 }
 0x1e8   : > { %12701 = vst [vmem:[#allocation132_spill] sm:$0xff] %v9213_v63  ;;  %6502 = vmatmul.msk.bf16.gmra.mxu0 %vm647_vm0, %v8663_v25 }
 0x1e9   : > { %6518 = vmatmul.msk.bf16.gmra.mxu1 %vm647_vm0, %v8663_v25  ;;  %6594 = vmatmul.msk.bf16.gmra.mxu2 %vm647_vm0, %v8663_v25 }
 0x1ea   : > { %6610 = vmatmul.msk.bf16.gmra.mxu3 %vm647_vm0, %v8663_v25 }
 0x1ec   : > { %v9223_v56 = vpop.f32.mrf.mxu2 }
 0x1ed   : > { %12702 = vst [vmem:[#allocation133_spill] sm:$0xff] %v9223_v56  ;;  %v9225_v53 = vpop.f32.mrf.mxu3  ;;  %v9227_v52 = vpop.f32.mrf.mxu0  ;;  %v7523_v56 = vld [vmem:[%s12577_s1 + $0x1a4] sm:$0xf] }
 0x1ee   : > { %12703 = vst [vmem:[#allocation134_spill] sm:$0xff] %v9225_v53  ;;  %v9229_v48 = vpop.f32.mrf.mxu1 }
 0x1ef   : > { %12704 = vst [vmem:[#allocation135_spill] sm:$0xff] %v9227_v52 }
 0x1f0   : > { %12705 = vst [vmem:[#allocation136_spill] sm:$0xff] %v9229_v48 }
 0x1f4   : > { %v9231_v63 = vpop.f32.mrf.mxu2 }
 0x1f5   : > { %12706 = vst [vmem:[#allocation137_spill] sm:$0xff] %v9231_v63  ;;  %v9233_v12 = vpop.f32.mrf.mxu3  ;;  %v9235_v9 = vpop.f32.mrf.mxu0  ;;  %v6645_v63 = vld [vmem:[%s12577_s1 + $0x1a0] sm:$0xf] }
 0x1f6   : > { %12707 = vst [vmem:[#allocation138_spill] sm:$0xff] %v9233_v12  ;;  %v9237_v28 = vpop.f32.mrf.mxu1  ;;  %v7524_v12 = vld [vmem:[%s12577_s1 + $0x1a4] sm:$0xf0] }
 0x1f7   : > { %12708 = vst [vmem:[#allocation139_spill] sm:$0xff] %v9235_v9  ;;  %v6646_v53 = vor.u32 %v7524_v12, %v6645_v63 }
 0x1f8   : > { %12709 = vst [vmem:[#allocation140_spill] sm:$0xff] %v9237_v28  ;;  %6503 = vmatmul.msk.bf16.gmra.mxu0 %vm647_vm0, %v8691_v39  ;;  %v6647_v28 = vld [vmem:[%s12577_s1 + $0x1a8] sm:$0xf0] }
 0x1f9   : > { %6519 = vmatmul.msk.bf16.gmra.mxu1 %vm647_vm0, %v8691_v39  ;;  %6595 = vmatmul.msk.bf16.gmra.mxu2 %vm647_vm0, %v8691_v39 }
 0x1fa   : > { %6611 = vmatmul.msk.bf16.gmra.mxu3 %vm647_vm0, %v8691_v39  ;;  %v6650_v39 = vor.u32 %v7523_v56, %v6647_v28  ;;  %1705 = vmatpush.bf16.msra.mxu0 %v6646_v53 }
 0x1fc   : > { %v9259_v9 = vpop.f32.mrf.mxu2  ;;  %1794 = vmatpush.bf16.msra.mxu1 %v6650_v39 }
 0x1fd   : > { %12710 = vst [vmem:[#allocation141_spill] sm:$0xff] %v9259_v9  ;;  %v9261_v25 = vpop.f32.mrf.mxu3  ;;  %v9263_v48 = vpop.f32.mrf.mxu0  ;;  %v7521_v9 = vld [vmem:[%s12577_s1 + $0x194] sm:$0xf] }
 0x1fe   : > { %12711 = vst [vmem:[#allocation142_spill] sm:$0xff] %v9261_v25  ;;  %v9265_v52 = vpop.f32.mrf.mxu1 }
 0x1ff   : > { %12712 = vst [vmem:[#allocation143_spill] sm:$0xff] %v9263_v48 }
 0x200   : > { %12713 = vst [vmem:[#allocation144_spill] sm:$0xff] %v9265_v52 }
 0x204   : > { %v9267_v59 = vpop.f32.mrf.mxu2 }
 0x205   : > { %12714 = vst [vmem:[#allocation145_spill] sm:$0xff] %v9267_v59  ;;  %v9269_v58 = vpop.f32.mrf.mxu3  ;;  %v9271_v63 = vpop.f32.mrf.mxu0  ;;  %v6637_v59 = vld [vmem:[%s12577_s1 + $0x190] sm:$0xf] }
 0x206   : > { %12715 = vst [vmem:[#allocation146_spill] sm:$0xff] %v9269_v58  ;;  %v9273_v12 = vpop.f32.mrf.mxu1  ;;  %v7522_v58 = vld [vmem:[%s12577_s1 + $0x194] sm:$0xf0] }
 0x207   : > { %12716 = vst [vmem:[#allocation147_spill] sm:$0xff] %v9271_v63  ;;  %v6638_v25 = vor.u32 %v7522_v58, %v6637_v59  ;;  %v7519_v58 = vld [vmem:[%s12577_s1 + $0x184] sm:$0xf] }
 0x208   : > { %12717 = vst [vmem:[#allocation148_spill] sm:$0xff] %v9273_v12  ;;  %6504 = vmatmul.msk.bf16.gmra.mxu0 %vm647_vm0, %v8743_v45 }
 0x209   : > { %6520 = vmatmul.msk.bf16.gmra.mxu1 %vm647_vm0, %v8743_v45  ;;  %6596 = vmatmul.msk.bf16.gmra.mxu2 %vm647_vm0, %v8743_v45 }
 0x20a   : > { %6612 = vmatmul.msk.bf16.gmra.mxu3 %vm647_vm0, %v8743_v45  ;;  %1706 = vmatpush.bf16.msra.mxu0 %v6638_v25  ;;  %v6631_v25 = vld [vmem:[%s12577_s1 + $0x188] sm:$0xf0] }
 0x20c   : > { %v9283_v39 = vpop.f32.mrf.mxu2 }
 0x20d   : > { %12718 = vst [vmem:[#allocation149_spill] sm:$0xff] %v9283_v39  ;;  %v9285_v56 = vpop.f32.mrf.mxu3  ;;  %v9287_v28 = vpop.f32.mrf.mxu0  ;;  %v6639_v39 = vld [vmem:[%s12577_s1 + $0x198] sm:$0xf0] }
 0x20e   : > { %12719 = vst [vmem:[#allocation150_spill] sm:$0xff] %v9285_v56  ;;  %v9289_v53 = vpop.f32.mrf.mxu1  ;;  %v6642_v56 = vor.u32 %v7521_v9, %v6639_v39 }
 0x20f   : > { %12720 = vst [vmem:[#allocation151_spill] sm:$0xff] %v9287_v28  ;;  %v7520_v28 = vld [vmem:[%s12577_s1 + $0x184] sm:$0xf0] }
 0x210   : > { %12721 = vst [vmem:[#allocation152_spill] sm:$0xff] %v9289_v53  ;;  %1795 = vmatpush.bf16.msra.mxu1 %v6642_v56  ;;  %v6629_v53 = vld [vmem:[%s12577_s1 + $0x180] sm:$0xf]  ;;  %v6634_v56 = vor.u32 %v7519_v58, %v6631_v25 }
 0x211   : > { %v6630_v9 = vor.u32 %v7520_v28, %v6629_v53 }
 0x213   : > { %1707 = vmatpush.bf16.msra.mxu0 %v6630_v9 }
 0x214   : > { %v9303_v45 = vpop.f32.mrf.mxu2  ;;  %1796 = vmatpush.bf16.msra.mxu1 %v6634_v56 }
 0x215   : > { %12722 = vst [vmem:[#allocation153_spill] sm:$0xff] %v9303_v45  ;;  %v9314_v59 = vpop.f32.mrf.mxu3  ;;  %v9316_v12 = vpop.f32.mrf.mxu0 }
 0x216   : > { %12723 = vst [vmem:[#allocation154_spill] sm:$0xff] %v9314_v59  ;;  %v9321_v39 = vpop.f32.mrf.mxu1 }
 0x218   : > { %6505 = vmatmul.msk.bf16.gmra.mxu0 %vm647_vm0, %v8831_v33 }
 0x219   : > { %6521 = vmatmul.msk.bf16.gmra.mxu1 %vm647_vm0, %v8831_v33  ;;  %6597 = vmatmul.msk.bf16.gmra.mxu2 %vm647_vm0, %v8831_v33 }
 0x21a   : > { %6613 = vmatmul.msk.bf16.gmra.mxu3 %vm647_vm0, %v8831_v33 }
 0x21c   : > { %v9331_v28 = vpop.f32.mrf.mxu2 }
 0x21d   : > { %12724 = vst [vmem:[#allocation155_spill] sm:$0xff] %v9331_v28  ;;  %v9333_v53 = vpop.f32.mrf.mxu3  ;;  %v9335_v45 = vpop.f32.mrf.mxu0 }
 0x21e   : > { %12725 = vst [vmem:[#allocation156_spill] sm:$0xff] %v9333_v53  ;;  %v9337_v58 = vpop.f32.mrf.mxu1 }
 0x224   : > { %v9339_v9 = vpop.f32.mrf.mxu2 }
 0x225   : > { %12726 = vst [vmem:[#allocation157_spill] sm:$0xff] %v9339_v9  ;;  %v9341_v25 = vpop.f32.mrf.mxu3  ;;  %v9343_v56 = vpop.f32.mrf.mxu0 }
 0x226   : > { %12727 = vst [vmem:[#allocation158_spill] sm:$0xff] %v9341_v25  ;;  %v9345_v59 = vpop.f32.mrf.mxu1 }
 0x227   : > { %12728 = vst [vmem:[#allocation159_spill] sm:$0xff] %v9345_v59 }
 0x228   : > { %6506 = vmatmul.msk.bf16.gmra.mxu0 %vm647_vm0, %v8883_v1 }
 0x229   : > { %6522 = vmatmul.msk.bf16.gmra.mxu1 %vm647_vm0, %v8883_v1  ;;  %6598 = vmatmul.msk.bf16.gmra.mxu2 %vm647_vm0, %v8883_v1 }
 0x22a   : > { %6614 = vmatmul.msk.bf16.gmra.mxu3 %vm647_vm0, %v8883_v1 }
 0x22c   : > { %v9355_v28 = vpop.f32.mrf.mxu2 }
 0x22d   : > { %12729 = vst [vmem:[#allocation160_spill] sm:$0xff] %v9355_v28  ;;  %v9357_v9 = vpop.f32.mrf.mxu3  ;;  %v9359_v25 = vpop.f32.mrf.mxu0 }
 0x22e   : > { %12730 = vst [vmem:[#allocation161_spill] sm:$0xff] %v9357_v9  ;;  %v9361_v53 = vpop.f32.mrf.mxu1 }
 0x22f   : > { %12731 = vst [vmem:[#allocation162_spill] sm:$0xff] %v9359_v25 }
 0x230   : > { %12732 = vst [vmem:[#allocation163_spill] sm:$0xff] %v9361_v53 }
 0x234   : > { %v9363_v59 = vpop.f32.mrf.mxu2 }
 0x235   : > { %12733 = vst [vmem:[#allocation164_spill] sm:$0xff] %v9363_v59  ;;  %v9365_v33 = vpop.f32.mrf.mxu3  ;;  %v9367_v63 = vpop.f32.mrf.mxu0 }
 0x236   : > { %12734 = vst [vmem:[#allocation165_spill] sm:$0xff] %v9365_v33  ;;  %v9369_v52 = vpop.f32.mrf.mxu1 }
 0x237   : > { %12735 = vst [vmem:[#allocation166_spill] sm:$0xff] %v9367_v63 }
 0x238   : > { %12736 = vst [vmem:[#allocation167_spill] sm:$0xff] %v9369_v52  ;;  %6675 = vmatmul.msk.bf16.vlgmr.msra.gmra.mxu0 %vm647_vm0, %v8449_v10 }
 0x239   : > { %6691 = vmatmul.msk.bf16.vlgmr.msra.gmra.mxu1 %vm647_vm0, %v8449_v10 }
 0x23c   : > { %v9375_v28 = vpop.f32.mrf.mxu2 }
 0x23d   : > { %v9377_v9 = vpop.f32.mrf.mxu3  ;;  %v1249_v1 = vpop.f32.mrf.mxu0 }
 0x23e   : > { %12737 = vst [vmem:[#allocation168_spill] sm:$0xff] %v9377_v9  ;;  %v1338_v53 = vpop.f32.mrf.mxu1  ;;  %v9380_v59 = vadd.f32 %v1249_v1, %v8593_v55 }
 0x23f   : > { %v9385_v63 = vadd.f32 %v1338_v53, %v8597_v57 }
 0x240   : > { %12738 = vst [vmem:[#allocation169_spill] sm:$0xff] %v9380_v59  ;;  %v12528_v9 = vrot.slane %v9380_v59, 1 }
 0x241   : > { %12739 = vst [vmem:[#allocation170_spill] sm:$0xff] %v9385_v63  ;;  %v12529_v55 = vrot.slane %v9385_v63, 1 }
 0x244   : > { %v9382_v33 = vpop.f32.mrf.mxu2 }
 0x245   : > { %v9387_v52 = vpop.f32.mrf.mxu3  ;;  %v1252_v25 = vpop.f32.mrf.mxu0 }
 0x246   : > { %v2272_v48 = vadd.f32 %v1252_v25, %v8611_v60  ;;  %v1341_v10 = vpop.f32.mrf.mxu1 }
 0x247   : > { %v2273_v47 = vadd.f32 %v1341_v10, %v8613_v61 }
 0x248   : > { %v2338_v62 = vrot.slane %v2272_v48, 1  ;;  %6676 = vmatmul.msk.bf16.gmra.mxu0 %vm647_vm0, %v8461_v13 }
 0x249   : > { %v2340_v1 = vrot.slane %v2273_v47, 1  ;;  %6692 = vmatmul.msk.bf16.gmra.mxu1 %vm647_vm0, %v8461_v13 }
 0x24a   : > { %v9400_v57 = vsel %vm1974_vm1, %v12528_v9, %v2338_v62 }
 0x24b   : > { %12740 = vst [vmem:[#allocation171_spill] sm:$0xff] %v9400_v57  ;;  %v9405_v60 = vsel %vm1974_vm1, %v12529_v55, %v2340_v1 }
 0x24c   : > { %12741 = vst [vmem:[#allocation172_spill] sm:$0xff] %v9405_v60  ;;  %v9407_v61 = vpop.f32.mrf.mxu2 }
 0x24d   : > { %12742 = vst [vmem:[#allocation173_spill] sm:$0xff] %v9407_v61  ;;  %v9409_v48 = vpop.f32.mrf.mxu3  ;;  %v1254_v53 = vpop.f32.mrf.mxu0 }
 0x24e   : > { %12743 = vst [vmem:[#allocation174_spill] sm:$0xff] %v9409_v48  ;;  %v2274_v47 = vadd.f32 %v1254_v53, %v8633_v8  ;;  %v1343_v25 = vpop.f32.mrf.mxu1 }
 0x24f   : > { %v2275_v13 = vadd.f32 %v1343_v25, %v8637_v11 }
 0x250   : > { %v2342_v10 = vrot.slane %v2274_v47, 1 }
 0x251   : > { %v2344_v59 = vrot.slane %v2275_v13, 1 }
 0x252   : > { %v9414_v9 = vsel %vm1974_vm1, %v2338_v62, %v2342_v10 }
 0x253   : > { %12744 = vst [vmem:[#allocation175_spill] sm:$0xff] %v9414_v9  ;;  %v9417_v57 = vsel %vm1974_vm1, %v2340_v1, %v2344_v59 }
 0x254   : > { %v9419_v55 = vpop.f32.mrf.mxu2 }
 0x255   : > { %v9421_v60 = vpop.f32.mrf.mxu3  ;;  %v1257_v63 = vpop.f32.mrf.mxu0 }
 0x256   : > { %v2276_v48 = vadd.f32 %v1257_v63, %v8651_v15  ;;  %v1346_v61 = vpop.f32.mrf.mxu1 }
 0x257   : > { %v2277_v8 = vadd.f32 %v1346_v61, %v8653_v17 }
 0x258   : > { %v2346_v53 = vrot.slane %v2276_v48, 1  ;;  %6677 = vmatmul.msk.bf16.gmra.mxu0 %vm647_vm0, %v8473_v16 }
 0x259   : > { %v2348_v11 = vrot.slane %v2277_v8, 1  ;;  %6693 = vmatmul.msk.bf16.gmra.mxu1 %vm647_vm0, %v8473_v16 }
 0x25a   : > { %v9430_v62 = vsel %vm1974_vm1, %v2342_v10, %v2346_v53 }
 0x25b   : > { %12745 = vst [vmem:[#allocation176_spill] sm:$0xff] %v9430_v62  ;;  %v9433_v1 = vsel %vm1974_vm1, %v2344_v59, %v2348_v11 }
 0x25c   : > { %12746 = vst [vmem:[#allocation177_spill] sm:$0xff] %v9433_v1  ;;  %v9435_v47 = vpop.f32.mrf.mxu2 }
 0x25d   : > { %v9437_v15 = vpop.f32.mrf.mxu3  ;;  %v1259_v63 = vpop.f32.mrf.mxu0 }
 0x25e   : > { %v2278_v17 = vadd.f32 %v1259_v63, %v8661_v24  ;;  %v1348_v61 = vpop.f32.mrf.mxu1 }
 0x25f   : > { %v2279_v48 = vadd.f32 %v1348_v61, %v8665_v26 }
 0x260   : > { %v2350_v25 = vrot.slane %v2278_v17, 1 }
 0x261   : > { %v2352_v13 = vrot.slane %v2279_v48, 1 }
 0x262   : > { %v9442_v16 = vsel %vm1974_vm1, %v2346_v53, %v2350_v25 }
 0x263   : > { %12747 = vst [vmem:[#allocation178_spill] sm:$0xff] %v9442_v16  ;;  %v9445_v10 = vsel %vm1974_vm1, %v2348_v11, %v2352_v13 }
 0x264   : > { %v9447_v59 = vpop.f32.mrf.mxu2 }
 0x265   : > { %v9449_v8 = vpop.f32.mrf.mxu3  ;;  %v1262_v1 = vpop.f32.mrf.mxu0 }
 0x266   : > { %v2280_v62 = vadd.f32 %v1262_v1, %v8679_v29  ;;  %v1351_v9 = vpop.f32.mrf.mxu1 }
 0x267   : > { %v2281_v24 = vadd.f32 %v1351_v9, %v8681_v30 }
 0x268   : > { %v2354_v63 = vrot.slane %v2280_v62, 1  ;;  %6678 = vmatmul.msk.bf16.gmra.mxu0 %vm647_vm0, %v8485_v19 }
 0x269   : > { %v2356_v26 = vrot.slane %v2281_v24, 1  ;;  %6694 = vmatmul.msk.bf16.gmra.mxu1 %vm647_vm0, %v8485_v19 }
 0x26a   : > { %v9458_v53 = vsel %vm1974_vm1, %v2350_v25, %v2354_v63 }
 0x26b   : > { %12748 = vst [vmem:[#allocation179_spill] sm:$0xff] %v9458_v53  ;;  %v9461_v11 = vsel %vm1974_vm1, %v2352_v13, %v2356_v26 }
 0x26c   : > { %12749 = vst [vmem:[#allocation180_spill] sm:$0xff] %v9461_v11  ;;  %v9463_v17 = vpop.f32.mrf.mxu2 }
 0x26d   : > { %v9465_v29 = vpop.f32.mrf.mxu3  ;;  %v1264_v1 = vpop.f32.mrf.mxu0 }
 0x26e   : > { %v2282_v30 = vadd.f32 %v1264_v1, %v8689_v38  ;;  %v1353_v9 = vpop.f32.mrf.mxu1 }
 0x26f   : > { %v2283_v62 = vadd.f32 %v1353_v9, %v8693_v40 }
 0x270   : > { %v2358_v61 = vrot.slane %v2282_v30, 1 }
 0x271   : > { %v2360_v48 = vrot.slane %v2283_v62, 1 }
 0x272   : > { %v9470_v19 = vsel %vm1974_vm1, %v2354_v63, %v2358_v61 }
 0x273   : > { %12750 = vst [vmem:[#allocation181_spill] sm:$0xff] %v9470_v19  ;;  %v9473_v25 = vsel %vm1974_vm1, %v2356_v26, %v2360_v48 }
 0x274   : > { %v9475_v13 = vpop.f32.mrf.mxu2 }
 0x275   : > { %v9477_v24 = vpop.f32.mrf.mxu3  ;;  %v1267_v53 = vpop.f32.mrf.mxu0 }
 0x276   : > { %v2284_v11 = vadd.f32 %v1267_v53, %v8719_v0  ;;  %v1356_v16 = vpop.f32.mrf.mxu1 }
 0x277   : > { %v2285_v38 = vadd.f32 %v1356_v16, %v8721_v2 }
 0x278   : > { %v2362_v1 = vrot.slane %v2284_v11, 1  ;;  %6679 = vmatmul.msk.bf16.gmra.mxu0 %vm647_vm0, %v8497_v22 }
 0x279   : > { %v2364_v40 = vrot.slane %v2285_v38, 1  ;;  %6695 = vmatmul.msk.bf16.gmra.mxu1 %vm647_vm0, %v8497_v22 }
 0x27a   : > { %v9486_v63 = vsel %vm1974_vm1, %v2358_v61, %v2362_v1 }
 0x27b   : > { %12751 = vst [vmem:[#allocation182_spill] sm:$0xff] %v9486_v63  ;;  %v9489_v26 = vsel %vm1974_vm1, %v2360_v48, %v2364_v40 }
 0x27c   : > { %12752 = vst [vmem:[#allocation183_spill] sm:$0xff] %v9489_v26  ;;  %v9491_v30 = vpop.f32.mrf.mxu2 }
 0x27d   : > { %v9493_v0 = vpop.f32.mrf.mxu3  ;;  %v1269_v53 = vpop.f32.mrf.mxu0 }
 0x27e   : > { %v2286_v2 = vadd.f32 %v1269_v53, %v8741_v44  ;;  %v1358_v16 = vpop.f32.mrf.mxu1 }
 0x27f   : > { %v2287_v11 = vadd.f32 %v1358_v16, %v8754_v5 }
 0x280   : > { %v2366_v9 = vrot.slane %v2286_v2, 1 }
 0x281   : > { %v2368_v62 = vrot.slane %v2287_v11, 1 }
 0x282   : > { %v9498_v22 = vsel %vm1974_vm1, %v2362_v1, %v2366_v9 }
 0x283   : > { %12753 = vst [vmem:[#allocation184_spill] sm:$0xff] %v9498_v22  ;;  %v9501_v61 = vsel %vm1974_vm1, %v2364_v40, %v2368_v62 }
 0x284   : > { %v9503_v48 = vpop.f32.mrf.mxu2 }
 0x285   : > { %v9505_v38 = vpop.f32.mrf.mxu3  ;;  %v1272_v63 = vpop.f32.mrf.mxu0 }
 0x286   : > { %v2288_v26 = vadd.f32 %v1272_v63, %v8783_v21  ;;  %v1361_v19 = vpop.f32.mrf.mxu1 }
 0x287   : > { %v2289_v44 = vadd.f32 %v1361_v19, %v8794_v49 }
 0x288   : > { %v2370_v53 = vrot.slane %v2288_v26, 1  ;;  %6680 = vmatmul.msk.bf16.gmra.mxu0 %vm647_vm0, %v8521_v31 }
 0x289   : > { %v2372_v5 = vrot.slane %v2289_v44, 1  ;;  %6696 = vmatmul.msk.bf16.gmra.mxu1 %vm647_vm0, %v8521_v31 }
 0x28a   : > { %v9514_v1 = vsel %vm1974_vm1, %v2366_v9, %v2370_v53 }
 0x28b   : > { %12754 = vst [vmem:[#allocation185_spill] sm:$0xff] %v9514_v1  ;;  %v9517_v40 = vsel %vm1974_vm1, %v2368_v62, %v2372_v5 }
 0x28c   : > { %12755 = vst [vmem:[#allocation186_spill] sm:$0xff] %v9517_v40  ;;  %v9519_v2 = vpop.f32.mrf.mxu2 }
 0x28d   : > { %v9521_v21 = vpop.f32.mrf.mxu3  ;;  %v1274_v63 = vpop.f32.mrf.mxu0 }
 0x28e   : > { %v2290_v49 = vadd.f32 %v1274_v63, %v8829_v41  ;;  %v1363_v19 = vpop.f32.mrf.mxu1 }
 0x28f   : > { %v2291_v26 = vadd.f32 %v1363_v19, %v8842_v36 }
 0x290   : > { %v2374_v16 = vrot.slane %v2290_v49, 1 }
 0x291   : > { %v2376_v11 = vrot.slane %v2291_v26, 1 }
 0x292   : > { %v9526_v31 = vsel %vm1974_vm1, %v2370_v53, %v2374_v16 }
 0x293   : > { %v9529_v9 = vsel %vm1974_vm1, %v2372_v5, %v2376_v11 }
 0x294   : > { %v9531_v62 = vpop.f32.mrf.mxu2 }
 0x295   : > { %v9533_v44 = vpop.f32.mrf.mxu3  ;;  %v1277_v1 = vpop.f32.mrf.mxu0 }
 0x296   : > { %v2292_v40 = vadd.f32 %v1277_v1, %v8871_v35  ;;  %v1366_v22 = vpop.f32.mrf.mxu1 }
 0x297   : > { %v2293_v41 = vadd.f32 %v1366_v22, %v8873_v42 }
 0x298   : > { %v2378_v63 = vrot.slane %v2292_v40, 1  ;;  %6681 = vmatmul.msk.bf16.gmra.mxu0 %vm647_vm0, %v8533_v34 }
 0x299   : > { %v2380_v36 = vrot.slane %v2293_v41, 1  ;;  %6697 = vmatmul.msk.bf16.gmra.mxu1 %vm647_vm0, %v8533_v34 }
 0x29a   : > { %v9542_v53 = vsel %vm1974_vm1, %v2374_v16, %v2378_v63 }
 0x29b   : > { %12756 = vst [vmem:[#allocation187_spill] sm:$0xff] %v9542_v53  ;;  %v9545_v5 = vsel %vm1974_vm1, %v2376_v11, %v2380_v36 }
 0x29c   : > { %12757 = vst [vmem:[#allocation188_spill] sm:$0xff] %v9545_v5  ;;  %v1528_v49 = vpop.f32.mrf.mxu2 }
 0x29d   : > { %v1617_v19 = vpop.f32.mrf.mxu3  ;;  %v1279_v35 = vpop.f32.mrf.mxu0  ;;  %v9553_v34 = vadd.f32 %v1528_v49, %v9316_v12 }
 0x29e   : > { %v2294_v1 = vadd.f32 %v1279_v35, %v8881_v23  ;;  %v1368_v42 = vpop.f32.mrf.mxu1  ;;  %v9559_v11 = vadd.f32 %v1617_v19, %v9321_v39  ;;  %v1902_v39 = vadd.f32 %v9079_v14, %v8844_v50 }
 0x29f   : > { %v2295_v22 = vadd.f32 %v1368_v42, %v8885_v32  ;;  %v12539_v12 = vrot.slane %v9553_v34, 1 }
 0x2a0   : > { %v2382_v40 = vrot.slane %v2294_v1, 1  ;;  %v12537_v19 = vrot.slane %v9559_v11, 1 }
 0x2a1   : > { %v2384_v26 = vrot.slane %v2295_v22, 1 }
 0x2a2   : > { %v9550_v41 = vsel %vm1974_vm1, %v2378_v63, %v2382_v40 }
 0x2a3   : > { %v9556_v16 = vsel %vm1974_vm1, %v2380_v36, %v2384_v26 }
 0x2a4   : > { %v1530_v53 = vpop.f32.mrf.mxu2 }
 0x2a5   : > { %v1936_v23 = vadd.f32 %v1530_v53, %v9335_v45  ;;  %v1619_v35 = vpop.f32.mrf.mxu3  ;;  %v1282_v5 = vpop.f32.mrf.mxu0 }
 0x2a6   : > { %v9563_v32 = vadd.f32 %v1619_v35, %v9337_v58  ;;  %v2296_v63 = vadd.f32 %v1282_v5, %v8899_v7  ;;  %v1371_v1 = vpop.f32.mrf.mxu1  ;;  %v1903_v7 = vadd.f32 %v9081_v27, %v8855_v54 }
 0x2a7   : > { %v2025_v49 = vrot.slane %v1936_v23, 1  ;;  %v2297_v36 = vadd.f32 %v1371_v1, %v8901_v43 }
 0x2a8   : > { %v12536_v45 = vrot.slane %v9563_v32, 1  ;;  %v2386_v53 = vrot.slane %v2296_v63, 1  ;;  %6682 = vmatmul.msk.bf16.gmra.mxu0 %vm647_vm0, %v8545_v37 }
 0x2a9   : > { %v2026_v58 = vsel %vm1974_vm1, %v12539_v12, %v2025_v49  ;;  %v2388_v5 = vrot.slane %v2297_v36, 1  ;;  %6698 = vmatmul.msk.bf16.gmra.mxu1 %vm647_vm0, %v8545_v37 }
 0x2aa   : > { %v2028_v50 = vsel %vm1974_vm1, %v12537_v19, %v12536_v45  ;;  %v9587_v43 = vsel %vm1974_vm1, %v2382_v40, %v2386_v53  ;;  %v9589_v14 = vadd.f32 %v2026_v58, %v1902_v39  ;;  %v12776_v45 = vld [vmem:[#allocation14_spill] sm:$0xff] }
 0x2ab   : > { %v9592_v54 = vsel %vm1974_vm1, %v2384_v26, %v2388_v5  ;;  %v9594_v27 = vadd.f32 %v2028_v50, %v1903_v7  ;;  %v1904_v26 = vadd.f32 %v9087_v20, %v8875_v4  ;;  %v1912_v20 = vadd.f32 %v9382_v33, %v9143_v51  ;;  %v12764_v33 = vld [vmem:[#allocation115_spill] sm:$0xff]  ;;  %v12765_v50 = vld [vmem:[#allocation173_spill] sm:$0xff]  ;;  %v12777_v19 = vld [vmem:[#allocation54_spill] sm:$0xff] }
 0x2ac   : > { %v1533_v42 = vpop.f32.mrf.mxu2 }
 0x2ad   : > { %v9597_v22 = vadd.f32 %v1533_v42, %v9343_v56  ;;  %v1284_v37 = vpop.f32.mrf.mxu0  ;;  %v1914_v42 = vadd.f32 %v12765_v50, %v12764_v33 }
 0x2ae   : > { %v9600_v23 = vadd.f32 %v1284_v37, %v8907_v6  ;;  %v1373_v35 = vpop.f32.mrf.mxu1  ;;  %v12767_v37 = vld [vmem:[#allocation50_spill] sm:$0xff] }
 0x2af   : > { %v12533_v63 = vrot.slane %v9597_v22, 1  ;;  %v9604_v40 = vadd.f32 %v1373_v35, %v8909_v3  ;;  %v1981_v33 = vrot.slane %v1914_v42, 1 }
 0x2b0   : > { %12758 = vst [vmem:[#allocation189_spill] sm:$0xff] %v9600_v23  ;;  %v12532_v1 = vrot.slane %v9600_v23, 1 }
 0x2b1   : > { %12759 = vst [vmem:[#allocation190_spill] sm:$0xff] %v9604_v40  ;;  %v2030_v56 = vsel %vm1974_vm1, %v2025_v49, %v12533_v63  ;;  %v12531_v36 = vrot.slane %v9604_v40, 1  ;;  %v9631_v49 = vadd.f32 %v9375_v28, %v9127_v18  ;;  %v12766_v28 = vld [vmem:[#allocation10_spill] sm:$0xff] }
 0x2b2   : > { %v9616_v6 = vsel %vm1974_vm1, %v2386_v53, %v12532_v1  ;;  %v9618_v39 = vadd.f32 %v2030_v56, %v1904_v26  ;;  %v1976_v53 = vrot.slane %v1912_v20, 1  ;;  %v1878_v35 = vadd.f32 %v12767_v37, %v12766_v28  ;;  %v12768_v26 = vld [vmem:[#allocation109_spill] sm:$0xff]  ;;  %v12769_v56 = vld [vmem:[#allocation168_spill] sm:$0xff] }
 0x2b3   : > { %v9623_v3 = vsel %vm1974_vm1, %v2388_v5, %v12531_v36  ;;  %12761 = vst [vmem:[#allocation192_spill] sm:$0xff] %v9631_v49  ;;  %v12534_v58 = vrot.slane %v9631_v49, 1  ;;  %v12763_v5 = vld [vmem:[#allocation112_spill] sm:$0xff]  ;;  %v9651_v20 = vadd.f32 %v12769_v56, %v12768_v26 }
 0x2b4   : > { %v1913_v51 = vadd.f32 %v9387_v52, %v12763_v5 }
 0x2b5   : > { %v9627_v4 = vpop.f32.mrf.mxu0  ;;  %v1977_v18 = vsel %vm1974_vm1, %v12534_v58, %v1976_v53  ;;  %12770 = vst [vmem:[#allocation112_spill] sm:$0xff] %v9651_v20  ;;  %v12538_v58 = vrot.slane %v9651_v20, 1  ;;  %v12778_v20 = vld [vmem:[#allocation16_spill] sm:$0xff] }
 0x2b6   : > { %12760 = vst [vmem:[#allocation191_spill] sm:$0xff] %v9627_v4  ;;  %v9633_v7 = vpop.f32.mrf.mxu1  ;;  %v12535_v36 = vrot.slane %v9627_v4, 2  ;;  %v1979_v5 = vrot.slane %v1913_v51, 1  ;;  %v2073_v63 = vadd.f32 %v1977_v18, %v1878_v35  ;;  %v12771_v51 = vld [vmem:[#allocation116_spill] sm:$0xff]  ;;  %v12772_v18 = vld [vmem:[#allocation174_spill] sm:$0xff]  ;;  %v12773_v35 = vld [vmem:[#allocation119_spill] sm:$0xff] }
 0x2b7   : > { %12762 = vst [vmem:[#allocation193_spill] sm:$0xff] %v9633_v7  ;;  %v1915_v42 = vadd.f32 %v12772_v18, %v12771_v51  ;;  %v1916_v56 = vadd.f32 %v9419_v55, %v12773_v35 }
 0x2b8   : > { %6683 = vmatmul.msk.bf16.gmra.mxu0 %vm647_vm0, %v8569_v46  ;;  %v1980_v26 = vsel %vm1974_vm1, %v12538_v58, %v1979_v5  ;;  %v1880_v58 = vadd.f32 %v12777_v19, %v12776_v45 }
 0x2b9   : > { %6699 = vmatmul.msk.bf16.gmra.mxu1 %vm647_vm0, %v8569_v46  ;;  %v1983_v55 = vrot.slane %v1915_v42, 1  ;;  %v1985_v35 = vrot.slane %v1916_v56, 1  ;;  %v12780_v42 = vld [vmem:[#allocation123_spill] sm:$0xff] }
 0x2bb   : > { %v1986_v56 = vsel %vm1974_vm1, %v1981_v33, %v1985_v35 }
 0x2bd   : > { %v1711_v46 = vpop.f32.mrf.mxu0 }
 0x2be   : > { %v2139_v1 = vrot.slane %v1711_v46, 2  ;;  %v1800_v52 = vpop.f32.mrf.mxu1  ;;  %v12544_v46 = vrot.slane %v9633_v7, 2 }
 0x2bf   : > { %v2142_v37 = vrot.slane %v1800_v52, 2  ;;  %v12775_v52 = vld [vmem:[#allocation51_spill] sm:$0xff] }
 0x2c0   : > { %v2140_v50 = vsel %vm2137_vm2, %v12535_v36, %v2139_v1 }
 0x2c1   : > { %v9658_v28 = vadd.f32 %v2140_v50, %v2073_v63  ;;  %v1982_v63 = vsel %vm1974_vm1, %v1976_v53, %v1981_v33  ;;  %v12774_v50 = vld [vmem:[#allocation11_spill] sm:$0xff]  ;;  %v2143_v51 = vsel %vm2137_vm2, %v12544_v46, %v2142_v37 }
 0x2c2   : > { %v1879_v36 = vadd.f32 %v12775_v52, %v12774_v50  ;;  %v2075_v4 = vadd.f32 %v1982_v63, %v1880_v58  ;;  %v12779_v58 = vld [vmem:[#allocation120_spill] sm:$0xff]  ;;  %v12782_v63 = vld [vmem:[#allocation55_spill] sm:$0xff]  ;;  %v12783_v50 = vld [vmem:[#allocation17_spill] sm:$0xff] }
 0x2c3   : > { %2688 = vrot.lane.b32.xlu0 %v9658_v28, %s8154_s30 }
 0x2c4   : > { %v2074_v18 = vadd.f32 %v1980_v26, %v1879_v36  ;;  %v1984_v36 = vsel %vm1974_vm1, %v1979_v5, %v1983_v55  ;;  %v1917_v26 = vadd.f32 %v9421_v60, %v12779_v58 }
 0x2c5   : > { %v1714_v12 = vpop.f32.mrf.mxu0 }
 0x2c6   : > { %v2144_v40 = vrot.slane %v1714_v12, 2  ;;  %v1803_v23 = vpop.f32.mrf.mxu1  ;;  %v2237_v19 = vadd.f32 %v2143_v51, %v2074_v18  ;;  %v12785_v51 = vld [vmem:[#allocation124_spill] sm:$0xff]  ;;  %v1987_v7 = vrot.slane %v1917_v26, 1 }
 0x2c7   : > { %v2146_v12 = vrot.slane %v1803_v23, 2  ;;  %v12784_v23 = vld [vmem:[#allocation58_spill] sm:$0xff]  ;;  %v1919_v18 = vadd.f32 %v9437_v15, %v12785_v51 }
 0x2c8   : > { %6684 = vmatmul.msk.bf16.gmra.mxu0 %vm647_vm0, %v12778_v20  ;;  %v2145_v53 = vsel %vm2137_vm2, %v2139_v1, %v2144_v40  ;;  %v1918_v1 = vadd.f32 %v9435_v47, %v12780_v42  ;;  %v1882_v52 = vadd.f32 %v12784_v23, %v12783_v50  ;;  %v1988_v15 = vsel %vm1974_vm1, %v1983_v55, %v1987_v7 }
 0x2c9   : > { %6700 = vmatmul.msk.bf16.gmra.mxu1 %vm647_vm0, %v12778_v20  ;;  %v9683_v45 = vadd.f32 %v2145_v53, %v2075_v4  ;;  %v12781_v20 = vld [vmem:[#allocation15_spill] sm:$0xff]  ;;  %v2147_v46 = vsel %vm2137_vm2, %v2142_v37, %v2146_v12  ;;  %v1991_v42 = vrot.slane %v1919_v18, 1  ;;  %v12792_v18 = vld [vmem:[#allocation20_spill] sm:$0xff] }
 0x2ca   : > { %v1881_v4 = vadd.f32 %v12782_v63, %v12781_v20  ;;  %v2077_v58 = vadd.f32 %v1986_v56, %v1882_v52  ;;  %v1989_v47 = vrot.slane %v1918_v1, 1  ;;  %v12787_v1 = vld [vmem:[#allocation18_spill] sm:$0xff]  ;;  %v12788_v56 = vld [vmem:[#allocation59_spill] sm:$0xff]  ;;  %v12791_v52 = vld [vmem:[#allocation128_spill] sm:$0xff] }
 0x2cb   : > { %2690 = vrot.lane.b32.xlu0 %v2237_v19, %s8154_s30  ;;  %2692 = vrot.lane.b32.xlu1 %v9683_v45, %s8154_s30  ;;  %v1992_v23 = vsel %vm1974_vm1, %v1987_v7, %v1991_v42 }
 0x2cc   : > { %v2076_v60 = vadd.f32 %v1984_v36, %v1881_v4  ;;  %v1990_v37 = vsel %vm1974_vm1, %v1985_v35, %v1989_v47  ;;  %v12786_v36 = vld [vmem:[#allocation127_spill] sm:$0xff] }
 0x2cd   : > { %v1716_v53 = vpop.f32.mrf.mxu0  ;;  %v1920_v26 = vadd.f32 %v9447_v59, %v12786_v36  ;;  %v12789_v4 = vld [vmem:[#allocation19_spill] sm:$0xff] }
 0x2ce   : > { %v2148_v19 = vrot.slane %v1716_v53, 2  ;;  %v1805_v5 = vpop.f32.mrf.mxu1  ;;  %v2239_v49 = vadd.f32 %v2147_v46, %v2076_v60  ;;  %v12790_v46 = vld [vmem:[#allocation62_spill] sm:$0xff]  ;;  %v12793_v53 = vld [vmem:[#allocation63_spill] sm:$0xff] }
 0x2cf   : > { %v2150_v63 = vrot.slane %v1805_v5, 2  ;;  %v1884_v50 = vadd.f32 %v12790_v46, %v12789_v4  ;;  %v1885_v55 = vadd.f32 %v12793_v53, %v12792_v18  ;;  %v1993_v36 = vrot.slane %v1920_v26, 1  ;;  %v12796_v26 = vld [vmem:[#allocation22_spill] sm:$0xff]  ;;  %v12799_v18 = vld [vmem:[#allocation23_spill] sm:$0xff] }
 0x2d0   : > { %v2149_v33 = vsel %vm2137_vm2, %v2144_v40, %v2148_v19  ;;  %v1883_v40 = vadd.f32 %v12788_v56, %v12787_v1  ;;  %v12794_v1 = vld [vmem:[#allocation21_spill] sm:$0xff]  ;;  %v12800_v53 = vld [vmem:[#allocation67_spill] sm:$0xff] }
 0x2d1   : > { %v9702_v20 = vadd.f32 %v2149_v33, %v2077_v58  ;;  %v2151_v60 = vsel %vm2137_vm2, %v2146_v12, %v2150_v63  ;;  %v2079_v33 = vadd.f32 %v1990_v37, %v1884_v50  ;;  %v2080_v56 = vadd.f32 %v1992_v23, %v1885_v55  ;;  %v12795_v37 = vld [vmem:[#allocation131_spill] sm:$0xff]  ;;  %v12798_v23 = vld [vmem:[#allocation132_spill] sm:$0xff] }
 0x2d2   : > { %v2078_v58 = vadd.f32 %v1988_v15, %v1883_v40  ;;  %v1994_v15 = vsel %vm1974_vm1, %v1989_v47, %v1993_v36  ;;  %v12797_v40 = vld [vmem:[#allocation66_spill] sm:$0xff]  ;;  %v1887_v55 = vadd.f32 %v12800_v53, %v12799_v18 }
 0x2d3   : > { %2694 = vrot.lane.b32.xlu1 %v2239_v49, %s8154_s30  ;;  %2696 = vrot.lane.b32.xlu2 %v9702_v20, %s8154_s30  ;;  %v1921_v49 = vadd.f32 %v9449_v8, %v12791_v52  ;;  %v1886_v50 = vadd.f32 %v12797_v40, %v12796_v26  ;;  %v12804_v26 = vld [vmem:[#allocation136_spill] sm:$0xff] }
 0x2d4   : > { %v2241_v46 = vadd.f32 %v2151_v60, %v2078_v58 }
 0x2d5   : > { %v1719_v51 = vpop.f32.mrf.mxu0  ;;  %v1995_v4 = vrot.slane %v1921_v49, 1  ;;  %v1923_v49 = vadd.f32 %v9465_v29, %v12798_v23  ;;  %v2081_v58 = vadd.f32 %v1994_v15, %v1886_v50  ;;  %v12802_v15 = vld [vmem:[#allocation24_spill] sm:$0xff]  ;;  %v12805_v50 = vld [vmem:[#allocation25_spill] sm:$0xff] }
 0x2d6   : > { %v2152_v5 = vrot.slane %v1719_v51, 2  ;;  %v1808_v35 = vpop.f32.mrf.mxu1 }
 0x2d7   : > { %v2154_v59 = vrot.slane %v1808_v35, 2 }
 0x2d8   : > { %6685 = vmatmul.msk.bf16.gmra.mxu0 %vm647_vm0, %v12794_v1  ;;  %v2153_v7 = vsel %vm2137_vm2, %v2148_v19, %v2152_v5  ;;  %v1922_v19 = vadd.f32 %v9463_v17, %v12795_v37  ;;  %v12803_v37 = vld [vmem:[#allocation70_spill] sm:$0xff] }
 0x2d9   : > { %6701 = vmatmul.msk.bf16.gmra.mxu1 %vm647_vm0, %v12794_v1  ;;  %v2155_v8 = vsel %vm2137_vm2, %v2150_v63, %v2154_v59  ;;  %v9727_v52 = vadd.f32 %v2153_v7, %v2079_v33  ;;  %v1996_v63 = vsel %vm1974_vm1, %v1991_v42, %v1995_v4 }
 0x2da   : > { %v2243_v12 = vadd.f32 %v2155_v8, %v2080_v56  ;;  %v1997_v33 = vrot.slane %v1922_v19, 1  ;;  %v2082_v17 = vadd.f32 %v1996_v63, %v1887_v55  ;;  %v1999_v56 = vrot.slane %v1923_v49, 1  ;;  %v12806_v63 = vld [vmem:[#allocation71_spill] sm:$0xff] }
 0x2db   : > { %2698 = vrot.lane.b32.xlu2 %v2241_v46, %s8154_s30  ;;  %2700 = vrot.lane.b32.xlu0 %v9727_v52, %s8154_s30  ;;  %v12801_v46 = vld [vmem:[#allocation135_spill] sm:$0xff]  ;;  %v1888_v19 = vadd.f32 %v12803_v37, %v12802_v15  ;;  %v1889_v23 = vadd.f32 %v12806_v63, %v12805_v50  ;;  %v12811_v15 = vld [vmem:[#allocation140_spill] sm:$0xff] }
 0x2dc   : > { %2702 = vrot.lane.b32.xlu1 %v2243_v12, %s8154_s30  ;;  %v1998_v29 = vsel %vm1974_vm1, %v1993_v36, %v1997_v33  ;;  %v1924_v12 = vadd.f32 %v9475_v13, %v12801_v46  ;;  %v12807_v13 = vld [vmem:[#allocation26_spill] sm:$0xff] }
 0x2dd   : > { %v1721_v51 = vpop.f32.mrf.mxu0  ;;  %v2083_v18 = vadd.f32 %v1998_v29, %v1888_v19  ;;  %v12810_v29 = vld [vmem:[#allocation74_spill] sm:$0xff]  ;;  %v12812_v19 = vld [vmem:[#allocation28_spill] sm:$0xff] }
 0x2de   : > { %v2156_v35 = vrot.slane %v1721_v51, 2  ;;  %v1810_v60 = vpop.f32.mrf.mxu1  ;;  %v2001_v53 = vrot.slane %v1924_v12, 1 }
 0x2df   : > { %v2158_v47 = vrot.slane %v1810_v60, 2 }
 0x2e0   : > { %v2157_v1 = vsel %vm2137_vm2, %v2152_v5, %v2156_v35  ;;  %v2000_v5 = vsel %vm1974_vm1, %v1995_v4, %v1999_v56 }
 0x2e1   : > { %v2159_v7 = vsel %vm2137_vm2, %v2154_v59, %v2158_v47  ;;  %v9745_v8 = vadd.f32 %v2157_v1, %v2081_v58  ;;  %v1925_v59 = vadd.f32 %v9477_v24, %v12804_v26  ;;  %v2084_v55 = vadd.f32 %v2000_v5, %v1889_v23  ;;  %v12813_v5 = vld [vmem:[#allocation75_spill] sm:$0xff] }
 0x2e2   : > { %v2245_v42 = vadd.f32 %v2159_v7, %v2082_v17  ;;  %v2002_v1 = vsel %vm1974_vm1, %v1997_v33, %v2001_v53  ;;  %v12808_v7 = vld [vmem:[#allocation139_spill] sm:$0xff]  ;;  %v1891_v26 = vadd.f32 %v12813_v5, %v12812_v19 }
 0x2e3   : > { %2704 = vrot.lane.b32.xlu2 %v9745_v8, %s8154_s30  ;;  %v2003_v58 = vrot.slane %v1925_v59, 1 }
 0x2e4   : > { %2706 = vrot.lane.b32.xlu0 %v2245_v42, %s8154_s30  ;;  %v1926_v42 = vadd.f32 %v9491_v30, %v12808_v7  ;;  %v12817_v7 = vld [vmem:[#allocation144_spill] sm:$0xff] }
 0x2e5   : > { %v1724_v40 = vpop.f32.mrf.mxu0  ;;  %v2004_v12 = vsel %vm1974_vm1, %v1999_v56, %v2003_v58 }
 0x2e6   : > { %v2160_v49 = vrot.slane %v1724_v40, 2  ;;  %v1813_v51 = vpop.f32.mrf.mxu1  ;;  %v2005_v63 = vrot.slane %v1926_v42, 1  ;;  %v2086_v30 = vadd.f32 %v2004_v12, %v1891_v26 }
 0x2e7   : > { %v2162_v36 = vrot.slane %v1813_v51, 2 }
 0x2e8   : > { %6686 = vmatmul.msk.bf16.gmra.mxu0 %vm647_vm0, %v12807_v13  ;;  %v2161_v60 = vsel %vm2137_vm2, %v2156_v35, %v2160_v49  ;;  %v12809_v35 = vld [vmem:[#allocation27_spill] sm:$0xff] }
 0x2e9   : > { %6702 = vmatmul.msk.bf16.gmra.mxu1 %vm647_vm0, %v12807_v13  ;;  %v2163_v24 = vsel %vm2137_vm2, %v2158_v47, %v2162_v36  ;;  %v9766_v4 = vadd.f32 %v2161_v60, %v2083_v18  ;;  %v1890_v46 = vadd.f32 %v12810_v29, %v12809_v35  ;;  %v1927_v47 = vadd.f32 %v9493_v0, %v12811_v15  ;;  %v12818_v35 = vld [vmem:[#allocation30_spill] sm:$0xff]  ;;  %v12819_v29 = vld [vmem:[#allocation79_spill] sm:$0xff] }
 0x2ea   : > { %v2247_v17 = vadd.f32 %v2163_v24, %v2084_v55  ;;  %v2006_v0 = vsel %vm1974_vm1, %v2001_v53, %v2005_v63  ;;  %v12814_v55 = vld [vmem:[#allocation143_spill] sm:$0xff]  ;;  %v12815_v24 = vld [vmem:[#allocation29_spill] sm:$0xff] }
 0x2eb   : > { %2708 = vrot.lane.b32.xlu2 %v9766_v4, %s8154_s30  ;;  %v2085_v50 = vadd.f32 %v2002_v1, %v1890_v46  ;;  %v2007_v51 = vrot.slane %v1927_v47, 1  ;;  %v1928_v60 = vadd.f32 %v9503_v48, %v12814_v55  ;;  %v1893_v46 = vadd.f32 %v12819_v29, %v12818_v35  ;;  %v12820_v48 = vld [vmem:[#allocation31_spill] sm:$0xff]  ;;  %v12824_v55 = vld [vmem:[#allocation148_spill] sm:$0xff] }
 0x2ec   : > { %2710 = vrot.lane.b32.xlu0 %v2247_v17, %s8154_s30  ;;  %v12816_v17 = vld [vmem:[#allocation78_spill] sm:$0xff] }
 0x2ed   : > { %v1726_v37 = vpop.f32.mrf.mxu0  ;;  %v1892_v1 = vadd.f32 %v12816_v17, %v12815_v24  ;;  %v12825_v24 = vld [vmem:[#allocation33_spill] sm:$0xff]  ;;  %v12826_v17 = vld [vmem:[#allocation83_spill] sm:$0xff] }
 0x2ee   : > { %v2164_v59 = vrot.slane %v1726_v37, 2  ;;  %v1815_v40 = vpop.f32.mrf.mxu1  ;;  %v2009_v37 = vrot.slane %v1928_v60, 1 }
 0x2ef   : > { %v2166_v33 = vrot.slane %v1815_v40, 2  ;;  %v2087_v47 = vadd.f32 %v2006_v0, %v1892_v1  ;;  %v1895_v1 = vadd.f32 %v12826_v17, %v12825_v24 }
 0x2f0   : > { %v2165_v23 = vsel %vm2137_vm2, %v2160_v49, %v2164_v59  ;;  %v2008_v49 = vsel %vm1974_vm1, %v2003_v58, %v2007_v51 }
 0x2f1   : > { %v2167_v18 = vsel %vm2137_vm2, %v2162_v36, %v2166_v33  ;;  %v9783_v13 = vadd.f32 %v2165_v23, %v2085_v50  ;;  %v1929_v36 = vadd.f32 %v9505_v38, %v12817_v7  ;;  %v2088_v19 = vadd.f32 %v2008_v49, %v1893_v46 }
 0x2f2   : > { %v2249_v56 = vadd.f32 %v2167_v18, %v2086_v30  ;;  %v2010_v50 = vsel %vm1974_vm1, %v2005_v63, %v2009_v37  ;;  %v12821_v30 = vld [vmem:[#allocation147_spill] sm:$0xff]  ;;  %v12823_v18 = vld [vmem:[#allocation82_spill] sm:$0xff] }
 0x2f3   : > { %2712 = vrot.lane.b32.xlu1 %v9783_v13, %s8154_s30  ;;  %v2011_v26 = vrot.slane %v1929_v36, 1  ;;  %v1930_v23 = vadd.f32 %v9519_v2, %v12821_v30  ;;  %v12831_v30 = vld [vmem:[#allocation35_spill] sm:$0xff] }
 0x2f4   : > { %2714 = vrot.lane.b32.xlu2 %v2249_v56, %s8154_s30 }
 0x2f5   : > { %v1729_v42 = vpop.f32.mrf.mxu0  ;;  %v2012_v0 = vsel %vm1974_vm1, %v2007_v51, %v2011_v26 }
 0x2f6   : > { %v2168_v12 = vrot.slane %v1729_v42, 2  ;;  %v1818_v15 = vpop.f32.mrf.mxu1  ;;  %v2013_v42 = vrot.slane %v1930_v23, 1  ;;  %v2090_v2 = vadd.f32 %v2012_v0, %v1895_v1  ;;  %v12832_v23 = vld [vmem:[#allocation87_spill] sm:$0xff] }
 0x2f7   : > { %v2170_v53 = vrot.slane %v1818_v15, 2 }
 0x2f8   : > { %6687 = vmatmul.msk.bf16.gmra.mxu0 %vm647_vm0, %v12820_v48  ;;  %v2169_v5 = vsel %vm2137_vm2, %v2164_v59, %v2168_v12  ;;  %v12822_v59 = vld [vmem:[#allocation32_spill] sm:$0xff] }
 0x2f9   : > { %6703 = vmatmul.msk.bf16.gmra.mxu1 %vm647_vm0, %v12820_v48  ;;  %v2171_v38 = vsel %vm2137_vm2, %v2166_v33, %v2170_v53  ;;  %v9804_v58 = vadd.f32 %v2169_v5, %v2087_v47  ;;  %v1894_v56 = vadd.f32 %v12823_v18, %v12822_v59  ;;  %v1931_v33 = vadd.f32 %v9521_v21, %v12824_v55  ;;  %v12827_v47 = vld [vmem:[#allocation151_spill] sm:$0xff]  ;;  %v12829_v5 = vld [vmem:[#allocation86_spill] sm:$0xff] }
 0x2fa   : > { %v2251_v40 = vadd.f32 %v2171_v38, %v2088_v19  ;;  %v2014_v21 = vsel %vm1974_vm1, %v2009_v37, %v2013_v42  ;;  %v1932_v48 = vadd.f32 %v9531_v62, %v12827_v47  ;;  %v12828_v19 = vld [vmem:[#allocation34_spill] sm:$0xff]  ;;  %v1897_v59 = vadd.f32 %v12832_v23, %v12831_v30  ;;  %v12833_v62 = vld [vmem:[#allocation36_spill] sm:$0xff] }
 0x2fb   : > { %2716 = vrot.lane.b32.xlu1 %v9804_v58, %s8154_s30  ;;  %v2089_v36 = vadd.f32 %v2010_v50, %v1894_v56  ;;  %v2015_v29 = vrot.slane %v1931_v33, 1  ;;  %v1896_v38 = vadd.f32 %v12829_v5, %v12828_v19  ;;  %v12841_v30 = vld [vmem:[#allocation94_spill] sm:$0xff] }
 0x2fc   : > { %2718 = vrot.lane.b32.xlu2 %v2251_v40, %s8154_s30  ;;  %v12830_v40 = vld [vmem:[#allocation152_spill] sm:$0xff]  ;;  %v2017_v55 = vrot.slane %v1932_v48, 1 }
 0x2fd   : > { %v1731_v60 = vpop.f32.mrf.mxu0  ;;  %v2091_v0 = vadd.f32 %v2014_v21, %v1896_v38 }
 0x2fe   : > { %v2172_v49 = vrot.slane %v1731_v60, 2  ;;  %v1820_v7 = vpop.f32.mrf.mxu1  ;;  %v2018_v1 = vsel %vm1974_vm1, %v2013_v42, %v2017_v55 }
 0x2ff   : > { %v2174_v63 = vrot.slane %v1820_v7, 2  ;;  %v12834_v7 = vld [vmem:[#allocation37_spill] sm:$0xff] }
 0x300   : > { %v2173_v35 = vsel %vm2137_vm2, %v2168_v12, %v2172_v49  ;;  %v2016_v12 = vsel %vm1974_vm1, %v2011_v26, %v2015_v29 }
 0x301   : > { %v2175_v46 = vsel %vm2137_vm2, %v2170_v53, %v2174_v63  ;;  %v9821_v15 = vadd.f32 %v2173_v35, %v2089_v36  ;;  %v1933_v53 = vadd.f32 %v9533_v44, %v12830_v40  ;;  %v2092_v33 = vadd.f32 %v2016_v12, %v1897_v59  ;;  %v12835_v36 = vld [vmem:[#allocation90_spill] sm:$0xff] }
 0x302   : > { %v2253_v51 = vadd.f32 %v2175_v46, %v2090_v2  ;;  %v1898_v2 = vadd.f32 %v12835_v36, %v12834_v7  ;;  %v12836_v46 = vld [vmem:[#allocation38_spill] sm:$0xff]  ;;  %v12842_v59 = vrot.slane %v9559_v11, 1 }
 0x303   : > { %2720 = vrot.lane.b32.xlu0 %v9821_v15, %s8154_s30  ;;  %v2019_v24 = vrot.slane %v1933_v53, 1 }
 0x304   : > { %2722 = vrot.lane.b32.xlu1 %v2253_v51, %s8154_s30  ;;  %v12837_v51 = vld [vmem:[#allocation91_spill] sm:$0xff]  ;;  %v2093_v19 = vadd.f32 %v2018_v1, %v1898_v2  ;;  %v12845_v1 = vld [vmem:[#allocation41_spill] sm:$0xff] }
 0x305   : > { %v1734_v50 = vpop.f32.mrf.mxu0  ;;  %v1899_v21 = vadd.f32 %v12837_v51, %v12836_v46  ;;  %v12847_v2 = vld [vmem:[#allocation159_spill] sm:$0xff] }
 0x306   : > { %v2176_v18 = vrot.slane %v1734_v50, 2  ;;  %v1823_v56 = vpop.f32.mrf.mxu1  ;;  %v12840_v50 = vld [vmem:[#allocation39_spill] sm:$0xff] }
 0x307   : > { %v2178_v37 = vrot.slane %v1823_v56, 2  ;;  %v1900_v23 = vadd.f32 %v12841_v30, %v12840_v50  ;;  %v12852_v30 = vld [vmem:[#allocation163_spill] sm:$0xff] }
 0x308   : > { %6688 = vmatmul.msk.bf16.gmra.mxu0 %vm647_vm0, %v12833_v62  ;;  %v2177_v60 = vsel %vm2137_vm2, %v2172_v49, %v2176_v18  ;;  %v2020_v49 = vsel %vm1974_vm1, %v2015_v29, %v2019_v24  ;;  %v12839_v29 = vrot.slane %v9553_v34, 1  ;;  %v1622_v34 = vpop.f32.mrf.mxu3 }
 0x309   : > { %6704 = vmatmul.msk.bf16.gmra.mxu1 %vm647_vm0, %v12833_v62  ;;  %v2179_v44 = vsel %vm2137_vm2, %v2174_v63, %v2178_v37  ;;  %v9842_v26 = vadd.f32 %v2177_v60, %v2091_v0  ;;  %v2094_v5 = vadd.f32 %v2020_v49, %v1899_v21  ;;  %v12844_v0 = vld [vmem:[#allocation95_spill] sm:$0xff]  ;;  %v1939_v49 = vadd.f32 %v1622_v34, %v12847_v2 }
 0x30a   : > { %v2255_v17 = vadd.f32 %v2179_v44, %v2092_v33  ;;  %v2022_v53 = vsel %vm1974_vm1, %v2017_v55, %v12839_v29 }
 0x30b   : > { %2724 = vrot.lane.b32.xlu2 %v9842_v26, %s8154_s30 }
 0x30c   : > { %2726 = vrot.lane.b32.xlu0 %v2255_v17, %s8154_s30  ;;  %v2095_v17 = vadd.f32 %v2022_v53, %v1900_v23  ;;  %v12851_v53 = vrot.slane %v9563_v32, 1 }
 0x30d   : > { %v1736_v35 = vpop.f32.mrf.mxu0 }
 0x30e   : > { %v2180_v63 = vrot.slane %v1736_v35, 2  ;;  %v1825_v47 = vpop.f32.mrf.mxu1 }
 0x30f   : > { %v2182_v48 = vrot.slane %v1825_v47, 2  ;;  %v2031_v47 = vrot.slane %v1939_v49, 1 }
 0x310   : > { %v2181_v38 = vsel %vm2137_vm2, %v2176_v18, %v2180_v63  ;;  %v2024_v18 = vsel %vm1974_vm1, %v2019_v24, %v12842_v59 }
 0x311   : > { %v2183_v42 = vsel %vm2137_vm2, %v2178_v37, %v2182_v48  ;;  %v9855_v12 = vadd.f32 %v2181_v38, %v2093_v19  ;;  %v12843_v37 = vld [vmem:[#allocation40_spill] sm:$0xff]  ;;  %v1535_v19 = vpop.f32.mrf.mxu2  ;;  %v1624_v38 = vpop.f32.mrf.mxu3  ;;  %v2032_v50 = vsel %vm1974_vm1, %v12851_v53, %v2031_v47 }
 0x312   : > { %v2257_v40 = vadd.f32 %v2183_v42, %v2094_v5  ;;  %v1901_v62 = vadd.f32 %v12844_v0, %v12843_v37  ;;  %v9897_v23 = vadd.f32 %v1624_v38, %v12852_v30 }
 0x313   : > { %12838 = vst [vmem:[#allocation115_spill] sm:$0xff] %v9855_v12  ;;  %2728 = vrot.lane.b32.xlu1 %v9855_v12, %s8154_s30  ;;  %v12921_v12 = vld [vmem:[#allocation146_spill] sm:$0xff] }
 0x314   : > { %2730 = vrot.lane.b32.xlu2 %v2257_v40, %s8154_s30  ;;  %v2096_v55 = vadd.f32 %v2024_v18, %v1901_v62  ;;  %v12849_v40 = vld [vmem:[#allocation162_spill] sm:$0xff]  ;;  %12853 = vst [vmem:[#allocation109_spill] sm:$0xff] %v9897_v23 }
 0x315   : > { %v1739_v56 = vpop.f32.mrf.mxu0  ;;  %v9891_v29 = vadd.f32 %v1535_v19, %v12849_v40  ;;  %v12854_v18 = vld [vmem:[#allocation42_spill] sm:$0xff] }
 0x316   : > { %v2184_v33 = vrot.slane %v1739_v56, 2  ;;  %v1828_v60 = vpop.f32.mrf.mxu1 }
 0x317   : > { %v2186_v44 = vrot.slane %v1828_v60, 2  ;;  %12850 = vst [vmem:[#allocation50_spill] sm:$0xff] %v9891_v29 }
 0x318   : > { %6689 = vmatmul.msk.bf16.gmra.mxu0 %vm647_vm0, %v12845_v1  ;;  %v2185_v7 = vsel %vm2137_vm2, %v2180_v63, %v2184_v33 }
 0x319   : > { %6705 = vmatmul.msk.bf16.gmra.mxu1 %vm647_vm0, %v12845_v1  ;;  %v2187_v11 = vsel %vm2137_vm2, %v2182_v48, %v2186_v44  ;;  %v9876_v24 = vadd.f32 %v2185_v7, %v2095_v17 }
 0x31a   : > { %v2259_v36 = vadd.f32 %v2187_v11, %v2096_v55  ;;  %v12857_v55 = vrot.slane %v9597_v22, 1  ;;  %v12858_v11 = vld [vmem:[#allocation44_spill] sm:$0xff] }
 0x31b   : > { %12846 = vst [vmem:[#allocation173_spill] sm:$0xff] %v9876_v24  ;;  %2732 = vrot.lane.b32.xlu0 %v9876_v24, %s8154_s30 }
 0x31c   : > { %2734 = vrot.lane.b32.xlu1 %v2259_v36, %s8154_s30  ;;  %v12859_v36 = vld [vmem:[#allocation103_spill] sm:$0xff] }
 0x31d   : > { %v1741_v35 = vpop.f32.mrf.mxu0  ;;  %v1906_v2 = vadd.f32 %v12859_v36, %v12858_v11 }
 0x31e   : > { %v2188_v46 = vrot.slane %v1741_v35, 2  ;;  %v1830_v51 = vpop.f32.mrf.mxu1 }
 0x31f   : > { %v2190_v21 = vrot.slane %v1830_v51, 2  ;;  %v12862_v51 = vld [vmem:[#allocation104_spill] sm:$0xff] }
 0x320   : > { %v2189_v63 = vsel %vm2137_vm2, %v2184_v33, %v2188_v46  ;;  %v12856_v33 = vld [vmem:[#allocation43_spill] sm:$0xff] }
 0x321   : > { %v9884_v48 = vadd.f32 %v2189_v63, %v9589_v14  ;;  %v2191_v5 = vsel %vm2137_vm2, %v2186_v44, %v2190_v21  ;;  %v12855_v14 = vld [vmem:[#allocation100_spill] sm:$0xff]  ;;  %v12553_v44 = vrot.slane %v9897_v23, 1 }
 0x322   : > { %v9888_v42 = vadd.f32 %v2191_v5, %v9594_v27  ;;  %v1905_v56 = vadd.f32 %v12855_v14, %v12854_v18  ;;  %v12554_v27 = vrot.slane %v9891_v29, 1  ;;  %v12933_v29 = vld [vmem:[#allocation154_spill] sm:$0xff] }
 0x323   : > { %12848 = vst [vmem:[#allocation10_spill] sm:$0xff] %v9884_v48  ;;  %v2036_v49 = vsel %vm1974_vm1, %v2031_v47, %v12553_v44 }
 0x324   : > { %v2100_v60 = vadd.f32 %v2032_v50, %v1905_v56  ;;  %v2034_v7 = vsel %vm1974_vm1, %v12857_v55, %v12554_v27  ;;  %v12870_v55 = vld [vmem:[#allocation111_spill] sm:$0xff] }
 0x325   : > { %v1744_v59 = vpop.f32.mrf.mxu0  ;;  %v2101_v5 = vadd.f32 %v2034_v7, %v1906_v2 }
 0x326   : > { %v2192_v37 = vrot.slane %v1744_v59, 2  ;;  %v1833_v0 = vpop.f32.mrf.mxu1 }
 0x327   : > { %v2194_v62 = vrot.slane %v1833_v0, 2  ;;  %v12864_v0 = vld [vmem:[#allocation13_spill] sm:$0xff] }
 0x328   : > { %6690 = vmatmul.msk.bf16.gmra.mxu0 %vm647_vm0, %v12856_v33  ;;  %v2193_v32 = vsel %vm2137_vm2, %v2188_v46, %v2192_v37 }
 0x329   : > { %6706 = vmatmul.msk.bf16.gmra.mxu1 %vm647_vm0, %v12856_v33  ;;  %v2195_v17 = vsel %vm2137_vm2, %v2190_v21, %v2194_v62  ;;  %v9910_v34 = vadd.f32 %v2193_v32, %v9618_v39  ;;  %v12861_v39 = vld [vmem:[#allocation45_spill] sm:$0xff]  ;;  %v12865_v33 = vld [vmem:[#allocation167_spill] sm:$0xff]  ;;  %v12868_v32 = vld [vmem:[#allocation166_spill] sm:$0xff] }
 0x32a   : > { %v9912_v1 = vadd.f32 %v2195_v17, %v2100_v60  ;;  %v1907_v21 = vadd.f32 %v12862_v51, %v12861_v39  ;;  %v12867_v60 = vld [vmem:[#allocation12_spill] sm:$0xff] }
 0x32b   : > { %v9951_v17 = vadd.f32 %v12868_v32, %v12867_v60 }
 0x32c   : > { %v2102_v40 = vadd.f32 %v2036_v49, %v1907_v21  ;;  %v12872_v49 = vld [vmem:[#allocation110_spill] sm:$0xff] }
 0x32d   : > { %v2697_v35 = vpop.permute.xlu2 %2696  ;;  %v9924_v46 = vpop.f32.mrf.mxu0  ;;  %12869 = vst [vmem:[#allocation119_spill] sm:$0xff] %v9951_v17  ;;  %v12550_v2 = vrot.slane %v9951_v17, 1  ;;  %v12874_v21 = vld [vmem:[#allocation170_spill] sm:$0xff] }
 0x32e   : > { %12860 = vst [vmem:[#allocation168_spill] sm:$0xff] %v9924_v46  ;;  %v9928_v63 = vpop.f32.mrf.mxu1  ;;  %v12552_v19 = vrot.slane %v9924_v46, 2 }
 0x32f   : > { %12863 = vst [vmem:[#allocation116_spill] sm:$0xff] %v9928_v63  ;;  %v12551_v22 = vrot.slane %v9928_v63, 2  ;;  %v12915_v63 = vld [vmem:[#allocation142_spill] sm:$0xff] }
 0x330   : > { %v2197_v38 = vsel %vm2137_vm2, %v2192_v37, %v12552_v19  ;;  %v9947_v37 = vadd.f32 %v12865_v33, %v12864_v0  ;;  %v12879_v33 = vld [vmem:[#allocation113_spill] sm:$0xff] }
 0x331   : > { %v9935_v53 = vadd.f32 %v2197_v38, %v2101_v5  ;;  %v2199_v47 = vsel %vm2137_vm2, %v2194_v62, %v12551_v22  ;;  %v12875_v5 = vrot.slane %v12874_v21, 1 }
 0x332   : > { %v9940_v50 = vadd.f32 %v2199_v47, %v2102_v40  ;;  %12866 = vst [vmem:[#allocation174_spill] sm:$0xff] %v9947_v37  ;;  %v12547_v62 = vrot.slane %v9947_v37, 1  ;;  %v12876_v40 = vld [vmem:[#allocation114_spill] sm:$0xff] }
 0x334   : > { %v2337_v38 = vsel %vm1974_vm1, %v12547_v62, %v12875_v5  ;;  %v12881_v5 = vld [vmem:[#allocation48_spill] sm:$0xff] }
 0x335   : > { %v2689_v30 = vpop.permute.xlu0 %2688  ;;  %v2699_v59 = vpop.permute.xlu2 %2698 }
 0x336   : > { %v1838_v18 = vpop.f32.mrf.mxu1  ;;  %v9943_v14 = vsel %vm2752_vm3, %v2697_v35, %v2699_v59  ;;  %v1749_v56 = vpop.f32.mrf.mxu0 }
 0x337   : > { %v9955_v7 = vadd.f32 %v1838_v18, %v12870_v55  ;;  %v9959_v35 = vadd.f32 %v1749_v56, %v12872_v49  ;;  %v12877_v18 = vld [vmem:[#allocation169_spill] sm:$0xff] }
 0x338   : > { %v12878_v0 = vrot.slane %v12877_v18, 1  ;;  %v12880_v49 = vld [vmem:[#allocation49_spill] sm:$0xff] }
 0x339   : > { %12871 = vst [vmem:[#allocation11_spill] sm:$0xff] %v9955_v7  ;;  %v12548_v55 = vrot.slane %v9959_v35, 2  ;;  %v2431_v21 = vadd.f32 %v2337_v38, %v12880_v49  ;;  %v12882_v38 = vld [vmem:[#allocation118_spill] sm:$0xff]  ;;  %v12883_v49 = vld [vmem:[#allocation117_spill] sm:$0xff] }
 0x33a   : > { %12873 = vst [vmem:[#allocation51_spill] sm:$0xff] %v9959_v35  ;;  %v2334_v56 = vsel %vm1974_vm1, %v12550_v2, %v12878_v0  ;;  %v12886_v2 = vld [vmem:[#allocation52_spill] sm:$0xff] }
 0x33d   : > { %v2691_v11 = vpop.permute.xlu0 %2690  ;;  %v2693_v36 = vpop.permute.xlu1 %2692 }
 0x33e   : > { %v1840_v39 = vpop.f32.mrf.mxu1  ;;  %v9962_v51 = vsel %vm2752_vm3, %v2689_v30, %v2691_v11  ;;  %v1751_v59 = vpop.f32.mrf.mxu0  ;;  %v12549_v30 = vrot.slane %v9955_v7, 2 }
 0x33f   : > { %v2465_v47 = vadd.f32 %v1840_v39, %v12876_v40  ;;  %v2464_v60 = vadd.f32 %v1751_v59, %v12879_v33  ;;  %v2430_v40 = vadd.f32 %v2334_v56, %v12881_v5  ;;  %v2705_v27 = vpop.permute.xlu2 %2704 }
 0x341   : > { %v2530_v32 = vrot.slane %v2465_v47, 2  ;;  %v2527_v11 = vrot.slane %v2464_v60, 2 }
 0x343   : > { %v2531_v39 = vsel %vm2137_vm2, %v12549_v30, %v2530_v32  ;;  %v2528_v0 = vsel %vm2137_vm2, %v12548_v55, %v2527_v11  ;;  %v12884_v55 = vld [vmem:[#allocation53_spill] sm:$0xff]  ;;  %v12885_v30 = vld [vmem:[#allocation172_spill] sm:$0xff] }
 0x344   : > { %v2625_v18 = vadd.f32 %v2531_v39, %v2431_v21  ;;  %v9986_v33 = vadd.f32 %v2528_v0, %v2430_v40  ;;  %v2433_v40 = vadd.f32 %v12885_v30, %v12884_v55  ;;  %v12889_v30 = vld [vmem:[#allocation121_spill] sm:$0xff] }
 0x345   : > { %v2695_v59 = vpop.permute.xlu1 %2694 }
 0x346   : > { %v1843_v47 = vpop.f32.mrf.mxu1  ;;  %v9989_v62 = vsel %vm2752_vm3, %v2693_v36, %v2695_v59  ;;  %2835 = vrot.lane.b32.xlu1 %v2625_v18, %s8154_s30  ;;  %2833 = vrot.lane.b32.xlu0 %v9986_v33, %s8154_s30  ;;  %v1754_v56 = vpop.f32.mrf.mxu0  ;;  %v12887_v36 = vld [vmem:[#allocation171_spill] sm:$0xff] }
 0x347   : > { %v2467_v60 = vadd.f32 %v1843_v47, %v12882_v38  ;;  %v2466_v21 = vadd.f32 %v1754_v56, %v12883_v49  ;;  %v2432_v59 = vadd.f32 %v12887_v36, %v12886_v2  ;;  %v12888_v56 = vld [vmem:[#allocation122_spill] sm:$0xff]  ;;  %v12891_v36 = vld [vmem:[#allocation56_spill] sm:$0xff] }
 0x349   : > { %v2534_v39 = vrot.slane %v2467_v60, 2  ;;  %v2532_v5 = vrot.slane %v2466_v21, 2  ;;  %v12890_v21 = vld [vmem:[#allocation57_spill] sm:$0xff] }
 0x34b   : > { %v2535_v0 = vsel %vm2137_vm2, %v2530_v32, %v2534_v39  ;;  %v2533_v18 = vsel %vm2137_vm2, %v2527_v11, %v2532_v5 }
 0x34c   : > { %v2627_v22 = vadd.f32 %v2535_v0, %v2433_v40  ;;  %v10002_v38 = vadd.f32 %v2533_v18, %v2432_v59  ;;  %v2435_v40 = vadd.f32 %v9417_v57, %v12890_v21 }
 0x34d   : > { %v2701_v47 = vpop.permute.xlu0 %2700 }
 0x34e   : > { %v1845_v19 = vpop.f32.mrf.mxu1  ;;  %v2703_v44 = vpop.permute.xlu1 %2702  ;;  %2839 = vrot.lane.b32.xlu0 %v2627_v22, %s8154_s30  ;;  %2837 = vrot.lane.b32.xlu2 %v10002_v38, %s8154_s30 }
 0x34f   : > { %v2469_v60 = vadd.f32 %v1845_v19, %v12888_v56  ;;  %v10006_v49 = vsel %vm2752_vm3, %v2701_v47, %v2703_v44  ;;  %v1756_v2 = vpop.f32.mrf.mxu0  ;;  %v12892_v19 = vld [vmem:[#allocation175_spill] sm:$0xff] }
 0x350   : > { %v2468_v32 = vadd.f32 %v1756_v2, %v12889_v30  ;;  %v2434_v59 = vadd.f32 %v12892_v19, %v12891_v36  ;;  %v2709_v2 = vpop.permute.xlu2 %2708  ;;  %v12894_v30 = vld [vmem:[#allocation126_spill] sm:$0xff] }
 0x351   : > { %v2538_v55 = vrot.slane %v2469_v60, 2 }
 0x352   : > { %v2536_v11 = vrot.slane %v2468_v32, 2 }
 0x353   : > { %v2539_v0 = vsel %vm2137_vm2, %v2534_v39, %v2538_v55  ;;  %v12893_v39 = vld [vmem:[#allocation125_spill] sm:$0xff] }
 0x354   : > { %v2629_v44 = vadd.f32 %v2539_v0, %v2435_v40  ;;  %v2537_v18 = vsel %vm2137_vm2, %v2532_v5, %v2536_v11  ;;  %v12895_v5 = vld [vmem:[#allocation60_spill] sm:$0xff] }
 0x355   : > { %v10018_v22 = vadd.f32 %v2537_v18, %v2434_v59  ;;  %v12896_v40 = vld [vmem:[#allocation176_spill] sm:$0xff]  ;;  %v12897_v18 = vld [vmem:[#allocation130_spill] sm:$0xff] }
 0x356   : > { %v1848_v47 = vpop.f32.mrf.mxu1  ;;  %v2707_v56 = vpop.permute.xlu0 %2706  ;;  %2843 = vrot.lane.b32.xlu2 %v2629_v44, %s8154_s30  ;;  %v2436_v0 = vadd.f32 %v12896_v40, %v12895_v5 }
 0x357   : > { %v10021_v24 = vsel %vm2752_vm3, %v2705_v27, %v2707_v56  ;;  %2841 = vrot.lane.b32.xlu1 %v10018_v22, %s8154_s30  ;;  %v1759_v57 = vpop.f32.mrf.mxu0  ;;  %v2471_v32 = vadd.f32 %v1848_v47, %v12894_v30 }
 0x358   : > { %v2470_v60 = vadd.f32 %v1759_v57, %v12893_v39  ;;  %v12898_v57 = vld [vmem:[#allocation129_spill] sm:$0xff]  ;;  %v2715_v40 = vpop.permute.xlu2 %2714 }
 0x359   : > { %v2542_v27 = vrot.slane %v2471_v32, 2  ;;  %v12899_v32 = vld [vmem:[#allocation65_spill] sm:$0xff] }
 0x35a   : > { %v2540_v21 = vrot.slane %v2470_v60, 2  ;;  %v2439_v5 = vadd.f32 %v9445_v10, %v12899_v32  ;;  %v12904_v10 = vld [vmem:[#allocation134_spill] sm:$0xff] }
 0x35b   : > { %v2543_v30 = vsel %vm2137_vm2, %v2538_v55, %v2542_v27 }
 0x35c   : > { %v2541_v36 = vsel %vm2137_vm2, %v2536_v11, %v2540_v21 }
 0x35d   : > { %v10031_v19 = vadd.f32 %v2541_v36, %v2436_v0  ;;  %v12900_v0 = vld [vmem:[#allocation61_spill] sm:$0xff] }
 0x35e   : > { %v1850_v59 = vpop.f32.mrf.mxu1  ;;  %v2711_v44 = vpop.permute.xlu0 %2710  ;;  %2736 = vrot.lane.b32.xlu2 %v9884_v48, %s8154_s30 }
 0x35f   : > { %v2473_v56 = vadd.f32 %v1850_v59, %v12897_v18  ;;  %v10035_v35 = vsel %vm2752_vm3, %v2709_v2, %v2711_v44  ;;  %2845 = vrot.lane.b32.xlu1 %v10031_v19, %s8154_s30  ;;  %v1761_v47 = vpop.f32.mrf.mxu0  ;;  %v12901_v2 = vld [vmem:[#allocation177_spill] sm:$0xff]  ;;  %v12902_v44 = vld [vmem:[#allocation64_spill] sm:$0xff]  ;;  %v12903_v18 = vld [vmem:[#allocation178_spill] sm:$0xff] }
 0x360   : > { %v2472_v39 = vadd.f32 %v1761_v47, %v12898_v57  ;;  %v2437_v36 = vadd.f32 %v12901_v2, %v12900_v0  ;;  %v2438_v48 = vadd.f32 %v12903_v18, %v12902_v44 }
 0x361   : > { %v2546_v11 = vrot.slane %v2473_v56, 2 }
 0x362   : > { %v2544_v60 = vrot.slane %v2472_v39, 2  ;;  %v2631_v56 = vadd.f32 %v2543_v30, %v2437_v36  ;;  %v12908_v36 = vld [vmem:[#allocation68_spill] sm:$0xff] }
 0x363   : > { %v2547_v59 = vsel %vm2137_vm2, %v2542_v27, %v2546_v11 }
 0x364   : > { %v2633_v7 = vadd.f32 %v2547_v59, %v2439_v5  ;;  %v2545_v37 = vsel %vm2137_vm2, %v2540_v21, %v2544_v60  ;;  %v12905_v5 = vld [vmem:[#allocation133_spill] sm:$0xff]  ;;  %v12909_v59 = vld [vmem:[#allocation179_spill] sm:$0xff] }
 0x365   : > { %v2713_v47 = vpop.permute.xlu1 %2712  ;;  %v10051_v57 = vadd.f32 %v2545_v37, %v2438_v48  ;;  %v12906_v48 = vld [vmem:[#allocation69_spill] sm:$0xff]  ;;  %v12907_v37 = vld [vmem:[#allocation180_spill] sm:$0xff]  ;;  %v2440_v44 = vadd.f32 %v12909_v59, %v12908_v36 }
 0x366   : > { %v1853_v55 = vpop.f32.mrf.mxu1  ;;  %v10054_v39 = vsel %vm2752_vm3, %v2713_v47, %v2715_v40  ;;  %2847 = vrot.lane.b32.xlu2 %v2631_v56, %s8154_s30  ;;  %v2441_v2 = vadd.f32 %v12907_v37, %v12906_v48  ;;  %v12913_v59 = vld [vmem:[#allocation72_spill] sm:$0xff] }
 0x367   : > { %v2475_v32 = vadd.f32 %v1853_v55, %v12904_v10  ;;  %2851 = vrot.lane.b32.xlu1 %v2633_v7, %s8154_s30  ;;  %v1764_v27 = vpop.f32.mrf.mxu0  ;;  %2849 = vrot.lane.b32.xlu0 %v10051_v57, %s8154_s30  ;;  %v2719_v7 = vpop.permute.xlu2 %2718 }
 0x368   : > { %v2474_v21 = vadd.f32 %v1764_v27, %v12905_v5 }
 0x369   : > { %v2550_v0 = vrot.slane %v2475_v32, 2  ;;  %v12910_v32 = vld [vmem:[#allocation138_spill] sm:$0xff] }
 0x36a   : > { %v2548_v30 = vrot.slane %v2474_v21, 2 }
 0x36b   : > { %v2551_v40 = vsel %vm2137_vm2, %v2546_v11, %v2550_v0  ;;  %v12911_v11 = vld [vmem:[#allocation137_spill] sm:$0xff] }
 0x36c   : > { %v2635_v18 = vadd.f32 %v2551_v40, %v2441_v2  ;;  %v2549_v47 = vsel %vm2137_vm2, %v2544_v60, %v2548_v30  ;;  %v12912_v2 = vld [vmem:[#allocation73_spill] sm:$0xff] }
 0x36d   : > { %v2717_v56 = vpop.permute.xlu1 %2716  ;;  %v10068_v55 = vadd.f32 %v2549_v47, %v2440_v44  ;;  %v2443_v40 = vadd.f32 %v9473_v25, %v12912_v2  ;;  %v12914_v44 = vld [vmem:[#allocation181_spill] sm:$0xff] }
 0x36e   : > { %v1855_v10 = vpop.f32.mrf.mxu1  ;;  %v10071_v27 = vsel %vm2752_vm3, %v2717_v56, %v2719_v7  ;;  %v2442_v47 = vadd.f32 %v12914_v44, %v12913_v59  ;;  %v12917_v2 = vld [vmem:[#allocation77_spill] sm:$0xff] }
 0x36f   : > { %v2477_v5 = vadd.f32 %v1855_v10, %v12910_v32  ;;  %2855 = vrot.lane.b32.xlu1 %v2635_v18, %s8154_s30  ;;  %v1766_v21 = vpop.f32.mrf.mxu0  ;;  %2853 = vrot.lane.b32.xlu0 %v10068_v55, %s8154_s30  ;;  %v2725_v59 = vpop.permute.xlu2 %2724 }
 0x370   : > { %v2476_v48 = vadd.f32 %v1766_v21, %v12911_v11 }
 0x371   : > { %v2554_v37 = vrot.slane %v2477_v5, 2 }
 0x372   : > { %v2552_v60 = vrot.slane %v2476_v48, 2 }
 0x373   : > { %v2555_v36 = vsel %vm2137_vm2, %v2550_v0, %v2554_v37  ;;  %v12916_v0 = vld [vmem:[#allocation141_spill] sm:$0xff] }
 0x374   : > { %v2637_v7 = vadd.f32 %v2555_v36, %v2443_v40  ;;  %v2553_v56 = vsel %vm2137_vm2, %v2548_v30, %v2552_v60  ;;  %v12918_v40 = vld [vmem:[#allocation183_spill] sm:$0xff] }
 0x375   : > { %v2721_v18 = vpop.permute.xlu0 %2720  ;;  %v10084_v10 = vadd.f32 %v2553_v56, %v2442_v47  ;;  %v2445_v36 = vadd.f32 %v12918_v40, %v12917_v2  ;;  %v12920_v47 = vld [vmem:[#allocation182_spill] sm:$0xff] }
 0x376   : > { %v1858_v32 = vpop.f32.mrf.mxu1  ;;  %v2723_v17 = vpop.permute.xlu1 %2722 }
 0x377   : > { %v2479_v21 = vadd.f32 %v1858_v32, %v12915_v63  ;;  %v10088_v5 = vsel %vm2752_vm3, %v2721_v18, %v2723_v17  ;;  %2857 = vrot.lane.b32.xlu2 %v10084_v10, %s8154_s30  ;;  %v1769_v25 = vpop.f32.mrf.mxu0  ;;  %2859 = vrot.lane.b32.xlu0 %v2637_v7, %s8154_s30  ;;  %v12919_v63 = vld [vmem:[#allocation76_spill] sm:$0xff] }
 0x378   : > { %v2478_v11 = vadd.f32 %v1769_v25, %v12916_v0  ;;  %v2444_v17 = vadd.f32 %v12920_v47, %v12919_v63  ;;  %v12924_v63 = vld [vmem:[#allocation80_spill] sm:$0xff] }
 0x379   : > { %v2558_v48 = vrot.slane %v2479_v21, 2 }
 0x37a   : > { %v2556_v30 = vrot.slane %v2478_v11, 2 }
 0x37b   : > { %v2559_v44 = vsel %vm2137_vm2, %v2554_v37, %v2558_v48  ;;  %v12922_v37 = vld [vmem:[#allocation145_spill] sm:$0xff] }
 0x37c   : > { %v2639_v56 = vadd.f32 %v2559_v44, %v2445_v36  ;;  %v2557_v18 = vsel %vm2137_vm2, %v2552_v60, %v2556_v30  ;;  %v12923_v60 = vld [vmem:[#allocation81_spill] sm:$0xff] }
 0x37d   : > { %v10100_v32 = vadd.f32 %v2557_v18, %v2444_v17  ;;  %v2447_v36 = vadd.f32 %v9501_v61, %v12923_v60  ;;  %v2731_v17 = vpop.permute.xlu2 %2730 }
 0x37e   : > { %v1860_v46 = vpop.f32.mrf.mxu1  ;;  %v2727_v7 = vpop.permute.xlu0 %2726 }
 0x37f   : > { %v2481_v25 = vadd.f32 %v1860_v46, %v12921_v12  ;;  %v10104_v21 = vsel %vm2752_vm3, %v2725_v59, %v2727_v7  ;;  %2861 = vrot.lane.b32.xlu2 %v10100_v32, %s8154_s30  ;;  %v1771_v0 = vpop.f32.mrf.mxu0  ;;  %2863 = vrot.lane.b32.xlu0 %v2639_v56, %s8154_s30  ;;  %v12925_v12 = vld [vmem:[#allocation184_spill] sm:$0xff] }
 0x380   : > { %v2480_v11 = vadd.f32 %v1771_v0, %v12922_v37  ;;  %v2446_v46 = vadd.f32 %v12925_v12, %v12924_v63 }
 0x381   : > { %v2562_v2 = vrot.slane %v2481_v25, 2  ;;  %v12927_v25 = vld [vmem:[#allocation150_spill] sm:$0xff] }
 0x382   : > { %v2560_v40 = vrot.slane %v2480_v11, 2 }
 0x383   : > { %v2563_v44 = vsel %vm2137_vm2, %v2558_v48, %v2562_v2  ;;  %v12928_v48 = vld [vmem:[#allocation149_spill] sm:$0xff] }
 0x384   : > { %v2641_v59 = vadd.f32 %v2563_v44, %v2447_v36  ;;  %v2561_v47 = vsel %vm2137_vm2, %v2556_v30, %v2560_v40  ;;  %v12929_v36 = vld [vmem:[#allocation85_spill] sm:$0xff]  ;;  %v12930_v44 = vld [vmem:[#allocation186_spill] sm:$0xff] }
 0x385   : > { %v2729_v18 = vpop.permute.xlu1 %2728  ;;  %v10116_v7 = vadd.f32 %v2561_v47, %v2446_v46  ;;  %v2449_v63 = vadd.f32 %v12930_v44, %v12929_v36  ;;  %v12931_v46 = vld [vmem:[#allocation84_spill] sm:$0xff]  ;;  %v12932_v47 = vld [vmem:[#allocation185_spill] sm:$0xff] }
 0x386   : > { %v1863_v56 = vpop.f32.mrf.mxu1  ;;  %v10119_v0 = vsel %vm2752_vm3, %v2729_v18, %v2731_v17  ;;  %v2448_v17 = vadd.f32 %v12932_v47, %v12931_v46  ;;  %v12935_v44 = vld [vmem:[#allocation89_spill] sm:$0xff]  ;;  %v12936_v46 = vld [vmem:[#allocation88_spill] sm:$0xff] }
 0x387   : > { %12926 = vst [vmem:[#allocation14_spill] sm:$0xff] %v10119_v0  ;;  %v2483_v37 = vadd.f32 %v1863_v56, %v12927_v25  ;;  %2867 = vrot.lane.b32.xlu2 %v2641_v59, %s8154_s30  ;;  %2865 = vrot.lane.b32.xlu1 %v10116_v7, %s8154_s30  ;;  %v1774_v61 = vpop.f32.mrf.mxu0 }
 0x388   : > { %v2482_v11 = vadd.f32 %v1774_v61, %v12928_v48  ;;  %v12934_v48 = vld [vmem:[#allocation153_spill] sm:$0xff] }
 0x389   : > { %v2566_v60 = vrot.slane %v2483_v37, 2 }
 0x38a   : > { %v2564_v30 = vrot.slane %v2482_v11, 2 }
 0x38b   : > { %v2567_v12 = vsel %vm2137_vm2, %v2562_v2, %v2566_v60 }
 0x38c   : > { %v2643_v18 = vadd.f32 %v2567_v12, %v2449_v63  ;;  %v2565_v56 = vsel %vm2137_vm2, %v2560_v40, %v2564_v30  ;;  %v2451_v63 = vadd.f32 %v9529_v9, %v12935_v44  ;;  %v12938_v9 = vld [vmem:[#allocation155_spill] sm:$0xff]  ;;  %v12941_v44 = vld [vmem:[#allocation92_spill] sm:$0xff] }
 0x38d   : > { %v2733_v59 = vpop.permute.xlu0 %2732  ;;  %v10132_v25 = vadd.f32 %v2565_v56, %v2448_v17 }
 0x38e   : > { %v1865_v0 = vpop.f32.mrf.mxu1  ;;  %v2735_v23 = vpop.permute.xlu1 %2734 }
 0x38f   : > { %v2485_v61 = vadd.f32 %v1865_v0, %v12933_v29  ;;  %v10136_v37 = vsel %vm2752_vm3, %v2733_v59, %v2735_v23  ;;  %2871 = vrot.lane.b32.xlu1 %v2643_v18, %s8154_s30  ;;  %2869 = vrot.lane.b32.xlu0 %v10132_v25, %s8154_s30  ;;  %v1776_v2 = vpop.f32.mrf.mxu0  ;;  %v2450_v29 = vadd.f32 %v9526_v31, %v12936_v46  ;;  %v12937_v18 = vld [vmem:[#allocation156_spill] sm:$0xff] }
 0x390   : > { %v2484_v11 = vadd.f32 %v1776_v2, %v12934_v48  ;;  %v12939_v48 = vld [vmem:[#allocation93_spill] sm:$0xff]  ;;  %v12940_v31 = vld [vmem:[#allocation188_spill] sm:$0xff] }
 0x391   : > { %v2570_v36 = vrot.slane %v2485_v61, 2 }
 0x392   : > { %v2568_v40 = vrot.slane %v2484_v11, 2  ;;  %v2453_v11 = vadd.f32 %v12940_v31, %v12939_v48  ;;  %v12946_v31 = vld [vmem:[#allocation96_spill] sm:$0xff] }
 0x393   : > { %v2571_v12 = vsel %vm2137_vm2, %v2566_v60, %v2570_v36 }
 0x394   : > { %v2645_v23 = vadd.f32 %v2571_v12, %v2451_v63  ;;  %v2569_v0 = vsel %vm2137_vm2, %v2564_v30, %v2568_v40  ;;  %v12942_v63 = vld [vmem:[#allocation187_spill] sm:$0xff] }
 0x395   : > { %v10148_v47 = vadd.f32 %v2569_v0, %v2450_v29  ;;  %v2452_v12 = vadd.f32 %v12942_v63, %v12941_v44 }
 0x396   : > { %v1868_v17 = vpop.f32.mrf.mxu1 }
 0x397   : > { %v2487_v56 = vadd.f32 %v1868_v17, %v12937_v18  ;;  %2875 = vrot.lane.b32.xlu0 %v2645_v23, %s8154_s30  ;;  %2873 = vrot.lane.b32.xlu2 %v10148_v47, %s8154_s30  ;;  %v1779_v59 = vpop.f32.mrf.mxu0  ;;  %v12943_v17 = vld [vmem:[#allocation158_spill] sm:$0xff] }
 0x398   : > { %v2486_v61 = vadd.f32 %v1779_v59, %v12938_v9  ;;  %v12944_v59 = vld [vmem:[#allocation157_spill] sm:$0xff] }
 0x399   : > { %v2574_v60 = vrot.slane %v2487_v56, 2 }
 0x39a   : > { %v2572_v2 = vrot.slane %v2486_v61, 2 }
 0x39b   : > { %v2575_v30 = vsel %vm2137_vm2, %v2570_v36, %v2574_v60 }
 0x39c   : > { %v2647_v46 = vadd.f32 %v2575_v30, %v2453_v11  ;;  %v2573_v29 = vsel %vm2137_vm2, %v2568_v40, %v2572_v2  ;;  %v12945_v40 = vld [vmem:[#allocation97_spill] sm:$0xff]  ;;  %v2454_v11 = vadd.f32 %v9550_v41, %v12946_v31  ;;  %v10199_v31 = vld [vmem:[%s12494_s2] ss:$0 sm:$0xff] }
 0x39d   : > { %v10161_v23 = vadd.f32 %v2573_v29, %v2452_v12  ;;  %v2455_v48 = vadd.f32 %v9556_v16, %v12945_v40  ;;  %v2785_v40 = vmax.f32 %v9658_v28, %v9962_v51 }
 0x39e   : > { %v1870_v0 = vpop.f32.mrf.mxu1 }
 0x39f   : > { %v10164_v18 = vadd.f32 %v1870_v0, %v12943_v17  ;;  %2879 = vrot.lane.b32.xlu2 %v2647_v46, %s8154_s30  ;;  %2877 = vrot.lane.b32.xlu1 %v10161_v23, %s8154_s30  ;;  %v1781_v56 = vpop.f32.mrf.mxu0 }
 0x3a0   : > { %v10170_v36 = vadd.f32 %v1781_v56, %v12944_v59 }
 0x3a1   : > { %v2578_v9 = vrot.slane %v10164_v18, 2 }
 0x3a2   : > { %v2576_v61 = vrot.slane %v10170_v36, 2 }
 0x3a3   : > { %v2579_v30 = vsel %vm2137_vm2, %v2574_v60, %v2578_v9  ;;  %v2786_v60 = vmax.f32 %v9683_v45, %v9989_v62  ;;  %v2787_v62 = vmax.f32 %v9702_v20, %v9943_v14  ;;  %v2788_v20 = vmax.f32 %v9727_v52, %v10006_v49 }
 0x3a4   : > { %v2577_v44 = vsel %vm2137_vm2, %v2572_v2, %v2576_v61  ;;  %v10184_v63 = vadd.f32 %v2579_v30, %v2455_v48 }
 0x3a5   : > { %v10186_v12 = vadd.f32 %v2577_v44, %v2454_v11 }
 0x3a8   : > { %v2838_v46 = vpop.permute.xlu2 %2837 }
 0x3b0   : > { %v2844_v17 = vpop.permute.xlu2 %2843 }
 0x3b8   : > { %v2834_v29 = vpop.permute.xlu0 %2833  ;;  %v2836_v0 = vpop.permute.xlu1 %2835 }
 0x3b9   : > { %v2897_v16 = vsel %vm2752_vm3, %v2834_v29, %v2836_v0  ;;  %v10201_v30 = vpop.permute.xlu2 %2736 }
 0x3ba   : > { %v2929_v41 = vmax.f32 %v9986_v33, %v2897_v16 }
 0x3bc   : > { %v2945_v11 = vmax.f32 %v2785_v40, %v2929_v41 }
 0x3c0   : > { %v2840_v56 = vpop.permute.xlu0 %2839 }
 0x3c1   : > { %v2898_v59 = vsel %vm2752_vm3, %v2838_v46, %v2840_v56  ;;  %v2965_v46 = vadd.f32 %v10199_v31, %v2945_v11  ;;  %v2848_v56 = vpop.permute.xlu2 %2847 }
 0x3c2   : > { %v2930_v2 = vmax.f32 %v10002_v38, %v2898_v59 }
 0x3c3   : > { %v10211_v29 = vmax.f32 %v2965_v46, 0.0 }
 0x3c4   : > { %v2946_v48 = vmax.f32 %v2786_v60, %v2930_v2 }
 0x3c5   : > { %v3047_v40 = vrot.slane %v10211_v29, 2 }
 0x3c6   : > { %v2966_v33 = vadd.f32 %v10199_v31, %v2946_v48 }
 0x3c8   : > { %v10209_v51 = vmax.f32 %v2966_v33, 0.0 }
 0x3c9   : > { %v2842_v44 = vpop.permute.xlu1 %2841 }
 0x3ca   : > { %v2899_v45 = vsel %vm2752_vm3, %v2842_v44, %v2844_v17  ;;  %v3014_v16 = vrot.slane %v10209_v51, 1  ;;  %v3048_v17 = vrot.slane %v10209_v51, 2 }
 0x3cb   : > { %v2931_v28 = vmax.f32 %v10018_v22, %v2899_v45  ;;  %v3013_v22 = vrot.slane %v10211_v29, 1 }
 0x3cc   : > { %v3049_v52 = vsel %vm2137_vm2, %v3047_v40, %v3048_v17 }
 0x3cd   : > { %v2947_v38 = vmax.f32 %v2787_v62, %v2931_v28  ;;  %v3015_v11 = vsel %vm1974_vm1, %v3013_v22, %v3014_v16 }
 0x3cf   : > { %v2967_v0 = vadd.f32 %v10199_v31, %v2947_v38 }
 0x3d1   : > { %v10215_v41 = vmax.f32 %v2967_v0, 0.0  ;;  %v2846_v59 = vpop.permute.xlu1 %2845  ;;  %v2789_v0 = vmax.f32 %v9745_v8, %v10021_v24  ;;  %v2790_v24 = vmax.f32 %v9766_v4, %v10035_v35  ;;  %v7538_v35 = vld [vmem:[%s12495_s3 + $0x38] sm:$0xff] }
 0x3d2   : > { %v2900_v14 = vsel %vm2752_vm3, %v2846_v59, %v2848_v56  ;;  %3726 = vmatpush.bf16.msra.mxu2 %v7538_v35 }
 0x3d3   : > { %v2932_v60 = vmax.f32 %v10031_v19, %v2900_v14  ;;  %v3016_v2 = vrot.slane %v10215_v41, 1  ;;  %v3050_v48 = vrot.slane %v10215_v41, 2 }
 0x3d5   : > { %v2948_v33 = vmax.f32 %v2788_v20, %v2932_v60  ;;  %v3017_v44 = vsel %vm1974_vm1, %v3014_v16, %v3016_v2  ;;  %v3051_v49 = vsel %vm2137_vm2, %v3048_v17, %v3050_v48 }
 0x3d6   : > { %v7765_v19 = vpack.i.bf16 %v3017_v44, %v3015_v11  ;;  %v7770_v46 = vpack.i.bf16 %v3051_v49, %v3049_v52 }
 0x3d7   : > { %v2968_v45 = vadd.f32 %v10199_v31, %v2948_v33 }
 0x3d8   : > { %7766 = vrot.lane.b32.xlu0 %v7765_v19, %s12566_s25  ;;  %7771 = vrot.lane.b32.xlu1 %v7770_v46, %s8156_s20 }
 0x3d9   : > { %v2852_v62 = vpop.permute.xlu1 %2851  ;;  %v2850_v28 = vpop.permute.xlu0 %2849  ;;  %v10241_v56 = vmax.f32 %v2968_v45, 0.0 }
 0x3da   : > { %v2901_v38 = vsel %vm2752_vm3, %v2850_v28, %v2852_v62 }
 0x3db   : > { %v2933_v16 = vmax.f32 %v10051_v57, %v2901_v38  ;;  %v3052_v14 = vrot.slane %v10241_v56, 2  ;;  %v3018_v33 = vrot.slane %v10241_v56, 1 }
 0x3dd   : > { %v2949_v59 = vmax.f32 %v2789_v0, %v2933_v16  ;;  %v3053_v49 = vsel %vm2137_vm2, %v3050_v48, %v3052_v14  ;;  %v3019_v45 = vsel %vm1974_vm1, %v3016_v2, %v3018_v33  ;;  %v2791_v0 = vmax.f32 %v9783_v13, %v10054_v39 }
 0x3df   : > { %v2969_v17 = vadd.f32 %v10199_v31, %v2949_v59 }
 0x3e0   : > { %2738 = vrot.lane.b32.xlu0 %v9888_v42, %s8154_s30  ;;  %v2858_v42 = vpop.permute.xlu2 %2857 }
 0x3e1   : > { %v2856_v20 = vpop.permute.xlu1 %2855  ;;  %v10247_v60 = vmax.f32 %v2969_v17, 0.0  ;;  %v2854_v11 = vpop.permute.xlu0 %2853 }
 0x3e2   : > { %v2902_v8 = vsel %vm2752_vm3, %v2854_v11, %v2856_v20  ;;  %v1784_v17 = vpop.f32.mrf.mxu0  ;;  %v1873_v20 = vpop.f32.mrf.mxu1 }
 0x3e3   : > { %v2934_v57 = vmax.f32 %v10068_v55, %v2902_v8  ;;  %v3054_v44 = vrot.slane %v10247_v60, 2  ;;  %v3020_v52 = vrot.slane %v10247_v60, 1  ;;  %v7546_v55 = vld [vmem:[%s12495_s3 + $0x78] sm:$0xff] }
 0x3e4   : > { %3775 = vmatpush.bf16.msra.mxu3 %v7546_v55 }
 0x3e5   : > { %v2950_v19 = vmax.f32 %v2790_v24, %v2934_v57  ;;  %v3055_v46 = vsel %vm2137_vm2, %v3052_v14, %v3054_v44  ;;  %v3021_v62 = vsel %vm1974_vm1, %v3018_v33, %v3020_v52  ;;  %v2792_v24 = vmax.f32 %v9804_v58, %v10071_v27 }
 0x3e6   : > { %v7780_v28 = vpack.i.bf16 %v3055_v46, %v3053_v49  ;;  %v7775_v38 = vpack.i.bf16 %v3021_v62, %v3019_v45  ;;  %v12948_v46 = vld [vmem:[#allocation161_spill] sm:$0xff] }
 0x3e7   : > { %v2970_v4 = vadd.f32 %v10199_v31, %v2950_v19  ;;  %v2491_v45 = vadd.f32 %v1873_v20, %v12948_v46 }
 0x3e8   : > { %2881 = vrot.lane.b32.xlu0 %v10186_v12, %s8154_s30  ;;  %7781 = vrot.lane.b32.xlu2 %v7780_v28, %s8156_s20  ;;  %v2862_v11 = vpop.permute.xlu2 %2861 }
 0x3e9   : > { %7776 = vrot.lane.b32.xlu1 %v7775_v38, %s12566_s25  ;;  %v2860_v2 = vpop.permute.xlu0 %2859  ;;  %v10275_v59 = vmax.f32 %v2970_v4, 0.0 }
 0x3ea   : > { %v2903_v48 = vsel %vm2752_vm3, %v2858_v42, %v2860_v2  ;;  %v12947_v42 = vld [vmem:[#allocation160_spill] sm:$0xff]  ;;  %v1786_v55 = vpop.f32.mrf.mxu0  ;;  %v1875_v2 = vpop.f32.mrf.mxu1 }
 0x3eb   : > { %v2935_v16 = vmax.f32 %v10084_v10, %v2903_v48  ;;  %v3022_v13 = vrot.slane %v10275_v59, 1  ;;  %v3056_v8 = vrot.slane %v10275_v59, 2  ;;  %v2490_v49 = vadd.f32 %v1784_v17, %v12947_v42 }
 0x3ec   : > { %v2582_v48 = vrot.slane %v2491_v45, 2  ;;  %v2793_v17 = vmax.f32 %v9821_v15, %v10088_v5  ;;  %v12951_v15 = vld [vmem:[#allocation98_spill] sm:$0xff] }
 0x3ed   : > { %v2951_v14 = vmax.f32 %v2791_v0, %v2935_v16  ;;  %v3023_v62 = vsel %vm1974_vm1, %v3020_v52, %v3022_v13  ;;  %v3057_v4 = vsel %vm2137_vm2, %v3054_v44, %v3056_v8  ;;  %v2456_v5 = vadd.f32 %v9587_v43, %v12951_v15 }
 0x3ef   : > { %v2971_v33 = vadd.f32 %v10199_v31, %v2951_v14  ;;  %v12949_v14 = vld [vmem:[#allocation164_spill] sm:$0xff] }
 0x3f0   : > { %2744 = vrot.lane.b32.xlu0 %v9935_v53, %s8154_s30  ;;  %2742 = vrot.lane.b32.xlu2 %v9912_v1, %s8154_s30  ;;  %v2868_v0 = vpop.permute.xlu2 %2867 }
 0x3f1   : > { %2883 = vrot.lane.b32.xlu1 %v10184_v63, %s8154_s30  ;;  %v10285_v39 = vmax.f32 %v2971_v33, 0.0  ;;  %v2864_v10 = vpop.permute.xlu0 %2863  ;;  %v12950_v33 = vld [vmem:[#allocation165_spill] sm:$0xff] }
 0x3f2   : > { %v2904_v57 = vsel %vm2752_vm3, %v2862_v11, %v2864_v10  ;;  %v10312_v11 = vadd.f32 %v1786_v55, %v12949_v14  ;;  %v12953_v55 = vld [vmem:[#allocation101_spill] sm:$0xff] }
 0x3f3   : > { %v2936_v19 = vmax.f32 %v10100_v32, %v2904_v57  ;;  %v3024_v1 = vrot.slane %v10285_v39, 1  ;;  %v3058_v63 = vrot.slane %v10285_v39, 2  ;;  %v2580_v32 = vrot.slane %v2490_v49, 2 }
 0x3f4   : > { %v2583_v57 = vsel %vm2137_vm2, %v2578_v9, %v2582_v48  ;;  %v2584_v36 = vrot.slane %v10312_v11, 2  ;;  %v7537_v9 = vld [vmem:[%s12495_s3 + $0x30] sm:$0xff] }
 0x3f5   : > { %v2952_v28 = vmax.f32 %v2792_v24, %v2936_v19  ;;  %v3025_v38 = vsel %vm1974_vm1, %v3022_v13, %v3024_v1  ;;  %v3059_v58 = vsel %vm2137_vm2, %v3056_v8, %v3058_v63  ;;  %v10315_v13 = vadd.f32 %v1875_v2, %v12950_v33  ;;  %3727 = vmatpush.bf16.msra.mxu2 %v7537_v9  ;;  %v12955_v33 = vld [vmem:[#allocation46_spill] sm:$0xff] }
 0x3f6   : > { %v7785_v27 = vpack.i.bf16 %v3025_v38, %v3023_v62  ;;  %v7790_v35 = vpack.i.bf16 %v3059_v58, %v3057_v4  ;;  %v2581_v10 = vsel %vm2137_vm2, %v2576_v61, %v2580_v32  ;;  %v7545_v62 = vld [vmem:[%s12495_s3 + $0x70] sm:$0xff]  ;;  %v7536_v58 = vld [vmem:[%s12495_s3 + $0x28] sm:$0xff] }
 0x3f7   : > { %v2972_v16 = vadd.f32 %v10199_v31, %v2952_v28  ;;  %v10330_v19 = vadd.f32 %v2581_v10, %v2456_v5  ;;  %v2586_v61 = vrot.slane %v10315_v13, 2  ;;  %3776 = vmatpush.bf16.msra.mxu3 %v7545_v62  ;;  %v12956_v10 = vld [vmem:[#allocation107_spill] sm:$0xff]  ;;  %v12959_v5 = vld [vmem:[#allocation50_spill] sm:$0xff] }
 0x3f8   : > { %7786 = vrot.lane.b32.xlu2 %v7785_v27, %s12566_s25  ;;  %7791 = vrot.lane.b32.xlu0 %v7790_v35, %s8156_s20  ;;  %v7544_v27 = vld [vmem:[%s12495_s3 + $0x68] sm:$0xff] }
 0x3f9   : > { %2740 = vrot.lane.b32.xlu1 %v9910_v34, %s8154_s30  ;;  %v2866_v52 = vpop.permute.xlu1 %2865  ;;  %v10320_v8 = vmax.f32 %v2972_v16, 0.0  ;;  %v2587_v35 = vsel %vm2137_vm2, %v2582_v48, %v2586_v61  ;;  %v12954_v16 = vld [vmem:[#allocation102_spill] sm:$0xff]  ;;  %3728 = vmatpush.bf16.msra.mxu2 %v7536_v58 }
 0x3fa   : > { %v2905_v44 = vsel %vm2752_vm3, %v2866_v52, %v2868_v0  ;;  %v2459_v52 = vadd.f32 %v9623_v3, %v12954_v16 }
 0x3fb   : > { %v2937_v20 = vmax.f32 %v10116_v7, %v2905_v44  ;;  %v12952_v7 = vld [vmem:[#allocation99_spill] sm:$0xff]  ;;  %3777 = vmatpush.bf16.msra.mxu3 %v7544_v27 }
 0x3fc   : > { %v2457_v42 = vadd.f32 %v9592_v54, %v12952_v7  ;;  %v3026_v54 = vrot.slane %v10320_v8, 1  ;;  %v12960_v7 = vrot.slane %v12959_v5, 1  ;;  %v7534_v27 = vld [vmem:[%s12495_s3 + $0x18] sm:$0xff] }
 0x3fd   : > { %v2953_v24 = vmax.f32 %v2793_v17, %v2937_v20  ;;  %v2653_v17 = vadd.f32 %v2587_v35, %v2459_v52  ;;  %v2874_v20 = vpop.permute.xlu2 %2873  ;;  %v7542_v35 = vld [vmem:[%s12495_s3 + $0x58] sm:$0xff] }
 0x3fe   : > { %v2651_v46 = vadd.f32 %v2583_v57, %v2457_v42  ;;  %v3027_v2 = vsel %vm1974_vm1, %v3024_v1, %v3026_v54  ;;  %v7543_v1 = vld [vmem:[%s12495_s3 + $0x60] sm:$0xff] }
 0x3ff   : > { %v2973_v49 = vadd.f32 %v10199_v31, %v2953_v24  ;;  %v1908_v24 = vadd.f32 %v12956_v10, %v12955_v33  ;;  %v12957_v57 = vld [vmem:[#allocation192_spill] sm:$0xff]  ;;  %3778 = vmatpush.bf16.msra.mxu3 %v7543_v1 }
 0x400   : > { %2885 = vrot.lane.b32.xlu2 %v10330_v19, %s8154_s30  ;;  %2887 = vrot.lane.b32.xlu0 %v2651_v46, %s8154_s30  ;;  %v12958_v15 = vrot.slane %v12957_v57, 1  ;;  %v3060_v46 = vrot.slane %v10320_v8, 2 }
 0x401   : > { %v10334_v45 = vmax.f32 %v2973_v49, 0.0  ;;  %2746 = vrot.lane.b32.xlu1 %v9940_v50, %s8154_s30  ;;  %v2872_v43 = vpop.permute.xlu1 %2871  ;;  %v2870_v18 = vpop.permute.xlu0 %2869  ;;  %v2794_v50 = vmax.f32 %v9842_v26, %v10104_v21  ;;  %v2458_v26 = vadd.f32 %v9616_v6, %v12953_v55  ;;  %v2585_v21 = vsel %vm2137_vm2, %v2580_v32, %v2584_v36  ;;  %v7535_v6 = vld [vmem:[%s12495_s3 + $0x20] sm:$0xff]  ;;  %v12967_v55 = vld [vmem:[#allocation47_spill] sm:$0xff] }
 0x402   : > { %v2906_v28 = vsel %vm2752_vm3, %v2870_v18, %v2872_v43  ;;  %v2071_v42 = vsel %vm1974_vm1, %v12960_v7, %v12958_v15  ;;  %v12961_v43 = vld [vmem:[#allocation112_spill] sm:$0xff]  ;;  %3729 = vmatpush.bf16.msra.mxu2 %v7535_v6  ;;  %v12973_v6 = vld [vmem:[#allocation193_spill] sm:$0xff]  ;;  %v3061_v15 = vsel %vm2137_vm2, %v3058_v63, %v3060_v46 }
 0x403   : > { %v2938_v38 = vmax.f32 %v10132_v25, %v2906_v28  ;;  %v3028_v4 = vrot.slane %v10334_v45, 1  ;;  %v10373_v48 = vadd.f32 %v2585_v21, %v2458_v26  ;;  %v3062_v32 = vrot.slane %v10334_v45, 2  ;;  %v12965_v28 = vld [vmem:[#allocation14_spill] sm:$0xff]  ;;  %v12968_v26 = vld [vmem:[#allocation108_spill] sm:$0xff]  ;;  %3779 = vmatpush.bf16.msra.mxu3 %v7542_v35  ;;  %v12979_v63 = vld [vmem:[#allocation189_spill] sm:$0xff] }
 0x404   : > { %v12962_v18 = vrot.slane %v12961_v43, 1  ;;  %v1909_v21 = vadd.f32 %v12968_v26, %v12967_v55  ;;  %v12974_v1 = vrot.slane %v12973_v6, 2  ;;  %v2103_v10 = vadd.f32 %v2071_v42, %v1908_v24  ;;  %v12977_v42 = vld [vmem:[#allocation119_spill] sm:$0xff] }
 0x405   : > { %v2954_v25 = vmax.f32 %v2794_v50, %v2938_v38  ;;  %v3029_v0 = vsel %vm1974_vm1, %v3026_v54, %v3028_v4  ;;  %v12963_v54 = vld [vmem:[#allocation109_spill] sm:$0xff]  ;;  %v12966_v50 = vld [vmem:[#allocation115_spill] sm:$0xff] }
 0x406   : > { %v7795_v44 = vpack.i.bf16 %v3029_v0, %v3027_v2  ;;  %v12964_v9 = vrot.slane %v12963_v54, 1  ;;  %v2795_v38 = vmax.f32 %v12966_v50, %v12965_v28  ;;  %v12971_v0 = vld [vmem:[#allocation168_spill] sm:$0xff]  ;;  %3730 = vmatpush.bf16.msra.mxu2 %v7534_v27  ;;  %v12983_v28 = vld [vmem:[#allocation190_spill] sm:$0xff]  ;;  %v12985_v27 = vld [vmem:[#allocation11_spill] sm:$0xff] }
 0x407   : > { %v2974_v14 = vadd.f32 %v10199_v31, %v2954_v25  ;;  %v12969_v25 = vld [vmem:[#allocation191_spill] sm:$0xff]  ;;  %v12972_v16 = vrot.slane %v12971_v0, 2  ;;  %v12984_v50 = vrot.slane %v12983_v28, 1  ;;  %v12986_v35 = vrot.slane %v12985_v27, 2 }
 0x408   : > { %2891 = vrot.lane.b32.xlu2 %v2653_v17, %s8154_s30  ;;  %7796 = vrot.lane.b32.xlu0 %v7795_v44, %s12566_s25  ;;  %v2072_v62 = vsel %vm1974_vm1, %v12964_v9, %v12962_v18  ;;  %v12970_v2 = vrot.slane %v12969_v25, 2  ;;  %v12978_v18 = vrot.slane %v12977_v42, 1  ;;  %v12981_v9 = vld [vmem:[#allocation174_spill] sm:$0xff]  ;;  %v12987_v26 = vld [vmem:[#allocation51_spill] sm:$0xff] }
 0x409   : > { %2889 = vrot.lane.b32.xlu1 %v10373_v48, %s8154_s30  ;;  %v2876_v3 = vpop.permute.xlu0 %2875  ;;  %v10418_v44 = vmax.f32 %v2974_v14, 0.0  ;;  %v2104_v57 = vadd.f32 %v2072_v62, %v1909_v21  ;;  %v12982_v62 = vrot.slane %v12981_v9, 1  ;;  %v2623_v55 = vsel %vm2137_vm2, %v2586_v61, %v12986_v35 }
 0x40a   : > { %v2907_v49 = vsel %vm2752_vm3, %v2874_v20, %v2876_v3  ;;  %v2234_v52 = vsel %vm2137_vm2, %v12972_v16, %v12970_v2  ;;  %v12975_v20 = vld [vmem:[#allocation116_spill] sm:$0xff]  ;;  %v12988_v21 = vrot.slane %v12987_v26, 2  ;;  %v12989_v16 = vld [vmem:[#allocation106_spill] sm:$0xff] }
 0x40b   : > { %v2939_v58 = vmax.f32 %v10148_v47, %v2907_v49  ;;  %v3063_v47 = vsel %vm2137_vm2, %v3060_v46, %v3062_v32  ;;  %v12976_v3 = vrot.slane %v12975_v20, 2  ;;  %v10429_v7 = vadd.f32 %v2234_v52, %v2103_v10  ;;  %v7532_v10 = vld [vmem:[%s12495_s3 + $0x8] sm:$0xff] }
 0x40c   : > { %v7800_v49 = vpack.i.bf16 %v3063_v47, %v3061_v15  ;;  %v3030_v24 = vrot.slane %v10418_v44, 1  ;;  %v12980_v46 = vrot.slane %v12979_v63, 1  ;;  %v2622_v25 = vsel %vm2137_vm2, %v2584_v36, %v12988_v21  ;;  %v12990_v47 = vld [vmem:[#allocation105_spill] sm:$0xff]  ;;  %v7539_v15 = vld [vmem:[%s12495_s3 + $0x40] sm:$0xff] }
 0x40d   : > { %v2955_v17 = vmax.f32 %v2795_v38, %v2939_v58  ;;  %v2235_v33 = vsel %vm2137_vm2, %v12976_v3, %v12974_v1  ;;  %v2429_v38 = vsel %vm1974_vm1, %v12984_v50, %v12982_v62  ;;  %v3064_v36 = vrot.slane %v10418_v44, 2  ;;  %v7533_v3 = vld [vmem:[%s12495_s3 + $0x10] sm:$0xff] }
 0x40e   : > { %v2267_v14 = vadd.f32 %v2235_v33, %v2104_v57  ;;  %v2428_v54 = vsel %vm1974_vm1, %v12980_v46, %v12978_v18  ;;  %v3031_v2 = vsel %vm1974_vm1, %v3028_v4, %v3030_v24  ;;  %v2461_v52 = vadd.f32 %v2429_v38, %v12989_v16  ;;  %v7541_v33 = vld [vmem:[%s12495_s3 + $0x50] sm:$0xff]  ;;  %3731 = vmatpush.bf16.msra.mxu2 %v7533_v3  ;;  %v7531_v57 = vld [vmem:[%s12495_s3] sm:$0xff] }
 0x40f   : > { %v2975_v5 = vadd.f32 %v10199_v31, %v2955_v17  ;;  %v2460_v13 = vadd.f32 %v2428_v54, %v12990_v47  ;;  %v3065_v1 = vsel %vm2137_vm2, %v3062_v32, %v3064_v36  ;;  %3780 = vmatpush.bf16.msra.mxu3 %v7541_v33  ;;  %v7540_v32 = vld [vmem:[%s12495_s3 + $0x48] sm:$0xff] }
 0x410   : > { %2748 = vrot.lane.b32.xlu2 %v10429_v7, %s8154_s30  ;;  %2750 = vrot.lane.b32.xlu0 %v2267_v14, %s8154_s30  ;;  %v2655_v61 = vadd.f32 %v2623_v55, %v2461_v52 }
 0x411   : > { %v10431_v43 = vmax.f32 %v2975_v5, 0.0  ;;  %7801 = vrot.lane.b32.xlu1 %v7800_v49, %s8156_s20  ;;  %v10467_v6 = vadd.f32 %v2622_v25, %v2460_v13  ;;  %v2878_v5 = vpop.permute.xlu1 %2877  ;;  %v2880_v49 = vpop.permute.xlu2 %2879 }
 0x412   : > { %3732 = vmatpush.bf16.msra.mxu2 %v7532_v10  ;;  %v2908_v55 = vsel %vm2752_vm3, %v2878_v5, %v2880_v49  ;;  %v12992_v5 = vld [vmem:[#allocation10_spill] sm:$0xff] }
 0x413   : > { %v3032_v58 = vrot.slane %v10431_v43, 1  ;;  %v3066_v11 = vrot.slane %v10431_v43, 2  ;;  %3781 = vmatpush.bf16.msra.mxu3 %v7540_v32  ;;  %v2940_v26 = vmax.f32 %v10161_v23, %v2908_v55 }
 0x415   : > { %v3033_v0 = vsel %vm1974_vm1, %v3030_v24, %v3032_v58  ;;  %v3067_v4 = vsel %vm2137_vm2, %v3064_v36, %v3066_v11 }
 0x416   : > { %v7805_v17 = vpack.i.bf16 %v3033_v0, %v3031_v2  ;;  %v7810_v20 = vpack.i.bf16 %v3067_v4, %v3065_v1  ;;  %3733 = vmatpush.bf16.msra.mxu2 %v7531_v57  ;;  %v12991_v2 = vld [vmem:[#allocation173_spill] sm:$0xff] }
 0x417   : > { %3782 = vmatpush.bf16.msra.mxu3 %v7539_v15  ;;  %v2796_v0 = vmax.f32 %v12991_v2, %v10136_v37 }
 0x418   : > { %2895 = vrot.lane.b32.xlu2 %v2655_v61, %s8154_s30  ;;  %7806 = vrot.lane.b32.xlu0 %v7805_v17, %s12566_s25  ;;  %s12993_s25 = smov 98  }
 0x419   : > { %2893 = vrot.lane.b32.xlu1 %v10467_v6, %s8154_s30  ;;  %v2956_v61 = vmax.f32 %v2796_v0, %v2940_v26  ;;  %s8160_s30 = smov 112  }
 0x41b   : > { %v2976_v3 = vadd.f32 %v10199_v31, %v2956_v61 }
 0x421   : > { %7811 = vrot.lane.b32.xlu1 %v7810_v20, %s8156_s20 }
 0x442   : > { %v10512_v27 = vpop.permute.xlu2 %7781 }
 0x443   : > { %v7784_v52 = vunpack.i.h.bf16 %v10512_v27  ;;  %v7783_v47 = vunpack.i.l.bf16 %v10512_v27 }
 0x44a   : > { %v7767_v14 = vpop.permute.xlu0 %7766  ;;  %v10498_v24 = vpop.permute.xlu1 %7771 }
 0x44b   : > { %v7769_v42 = vunpack.i.h.bf16 %v7767_v14  ;;  %v7768_v18 = vunpack.i.l.bf16 %v7767_v14  ;;  %v7774_v63 = vunpack.i.h.bf16 %v10498_v24  ;;  %v7773_v46 = vunpack.i.l.bf16 %v10498_v24  ;;  %v2743_v21 = vpop.permute.xlu2 %2742 }
 0x44d   : > { %v3349_v54 = vsel %vm3347_vm4, %v10209_v51, %v7769_v42  ;;  %v3348_v9 = vsel %vm3347_vm4, %v10211_v29, %v7768_v18  ;;  %v3366_v62 = vsel %vm3364_vm5, %v7769_v42, %v7774_v63  ;;  %v3365_v28 = vsel %vm3364_vm5, %v7768_v18, %v7773_v46 }
 0x44e   : > { %v3477_v50 = vpack.c.bf16 %v3349_v54, %v3348_v9  ;;  %v3478_v38 = vpack.c.bf16 %v3366_v62, %v3365_v28  ;;  %v10536_v42 = vmax.f32 %v2976_v3, 0.0 }
 0x450   : > { %3734 = vmatmul.bf16.vlgmr.msra.gmra.mxu2 %v3477_v50  ;;  %3783 = vmatmul.bf16.vlgmr.msra.gmra.mxu3 %v3478_v38  ;;  %v3068_v28 = vrot.slane %v10536_v42, 2  ;;  %v3034_v55 = vrot.slane %v10536_v42, 1 }
 0x452   : > { %v2739_v35 = vpop.permute.xlu0 %2738 }
 0x453   : > { %v2765_v33 = vsel %vm2752_vm3, %v10201_v30, %v2739_v35  ;;  %v7787_v32 = vpop.permute.xlu2 %7786 }
 0x454   : > { %v2797_v49 = vmax.f32 %v12992_v5, %v2765_v33  ;;  %v7789_v54 = vunpack.i.h.bf16 %v7787_v32  ;;  %v7788_v9 = vunpack.i.l.bf16 %v7787_v32 }
 0x456   : > { %v3352_v35 = vsel %vm3347_vm4, %v10247_v60, %v7788_v9 }
 0x45a   : > { %v2882_v25 = vpop.permute.xlu0 %2881 }
 0x45b   : > { %v7777_v16 = vpop.permute.xlu1 %7776  ;;  %v2886_v26 = vpop.permute.xlu2 %2885 }
 0x45c   : > { %v7779_v13 = vunpack.i.h.bf16 %v7777_v16  ;;  %v7778_v17 = vunpack.i.l.bf16 %v7777_v16  ;;  %v3069_v16 = vsel %vm2137_vm2, %v3066_v11, %v3068_v28 }
 0x45e   : > { %v3350_v36 = vsel %vm3347_vm4, %v10215_v41, %v7778_v17  ;;  %v3351_v4 = vsel %vm3347_vm4, %v10241_v56, %v7779_v13  ;;  %v3367_v23 = vsel %vm3364_vm5, %v7778_v17, %v7783_v47  ;;  %v3368_v37 = vsel %vm3364_vm5, %v7779_v13, %v7784_v52 }
 0x45f   : > { %v3481_v1 = vpack.c.bf16 %v3351_v4, %v3350_v36  ;;  %v3482_v20 = vpack.c.bf16 %v3368_v37, %v3367_v23 }
 0x461   : > { %3739 = vmatmul.bf16.gmra.mxu2 %v3481_v1  ;;  %3788 = vmatmul.bf16.gmra.mxu3 %v3482_v20  ;;  %v3035_v1 = vsel %vm1974_vm1, %v3032_v58, %v3034_v55 }
 0x462   : > { %v2745_v10 = vpop.permute.xlu0 %2744 }
 0x463   : > { %v2884_v57 = vpop.permute.xlu1 %2883  ;;  %v2892_v58 = vpop.permute.xlu2 %2891 }
 0x464   : > { %v2909_v15 = vsel %vm2752_vm3, %v2882_v25, %v2884_v57 }
 0x465   : > { %v2941_v14 = vmax.f32 %v10186_v12, %v2909_v15  ;;  %v3353_v12 = vsel %vm3347_vm4, %v10275_v59, %v7789_v54 }
 0x466   : > { %v3485_v17 = vpack.c.bf16 %v3353_v12, %v3352_v35 }
 0x467   : > { %v2957_v18 = vmax.f32 %v2797_v49, %v2941_v14 }
 0x469   : > { %v2977_v62 = vadd.f32 %v10199_v31, %v2957_v18 }
 0x46a   : > { %v10542_v38 = vpop.permute.xlu0 %7791 }
 0x46b   : > { %v10540_v50 = vmax.f32 %v2977_v62, 0.0  ;;  %v2741_v30 = vpop.permute.xlu1 %2740  ;;  %v7794_v25 = vunpack.i.h.bf16 %v10542_v38  ;;  %v7793_v2 = vunpack.i.l.bf16 %v10542_v38 }
 0x46c   : > { %v2766_v3 = vsel %vm2752_vm3, %v2741_v30, %v2743_v21 }
 0x46d   : > { %v3070_v0 = vrot.slane %v10540_v50, 2  ;;  %v3036_v13 = vrot.slane %v10540_v50, 1  ;;  %v3369_v61 = vsel %vm3364_vm5, %v7788_v9, %v7793_v2  ;;  %v3370_v36 = vsel %vm3364_vm5, %v7789_v54, %v7794_v25 }
 0x46e   : > { %v3486_v23 = vpack.c.bf16 %v3370_v36, %v3369_v61  ;;  %v2798_v15 = vmax.f32 %v9910_v34, %v2766_v3 }
 0x46f   : > { %v3071_v4 = vsel %vm2137_vm2, %v3068_v28, %v3070_v0  ;;  %v3037_v11 = vsel %vm1974_vm1, %v3034_v55, %v3036_v13 }
 0x470   : > { %v7820_v37 = vpack.i.bf16 %v3071_v4, %v3069_v16  ;;  %v7815_v20 = vpack.i.bf16 %v3037_v11, %v3035_v1 }
 0x471   : > { %3744 = vmatmul.bf16.gmra.mxu2 %v3485_v17  ;;  %3793 = vmatmul.bf16.gmra.mxu3 %v3486_v23 }
 0x472   : > { %7821 = vrot.lane.b32.xlu0 %v7820_v37, %s8156_s20  ;;  %7816 = vrot.lane.b32.xlu2 %v7815_v20, %s12993_s25  ;;  %v2888_v32 = vpop.permute.xlu0 %2887 }
 0x473   : > { %v2747_v33 = vpop.permute.xlu1 %2746  ;;  %v2910_v57 = vsel %vm2752_vm3, %v2886_v26, %v2888_v32  ;;  %v2749_v26 = vpop.permute.xlu2 %2748 }
 0x474   : > { %v2942_v5 = vmax.f32 %v10330_v19, %v2910_v57  ;;  %v2767_v14 = vsel %vm2752_vm3, %v2745_v10, %v2747_v33 }
 0x475   : > { %v2799_v62 = vmax.f32 %v9935_v53, %v2767_v14 }
 0x476   : > { %v2958_v49 = vmax.f32 %v2798_v15, %v2942_v5 }
 0x478   : > { %v2978_v18 = vadd.f32 %v10199_v31, %v2958_v49  ;;  %v3085_v49 = vrot.slane %v10215_v41, 3 }
 0x47a   : > { %v7797_v9 = vpop.permute.xlu0 %7796  ;;  %v10578_v12 = vmax.f32 %v2978_v18, 0.0 }
 0x47b   : > { %v2890_v54 = vpop.permute.xlu1 %2889  ;;  %v7799_v28 = vunpack.i.h.bf16 %v7797_v9  ;;  %v7798_v30 = vunpack.i.l.bf16 %v7797_v9  ;;  %v2896_v18 = vpop.permute.xlu2 %2895 }
 0x47c   : > { %v2911_v21 = vsel %vm2752_vm3, %v2890_v54, %v2892_v58  ;;  %v3072_v53 = vrot.slane %v10578_v12, 2 }
 0x47d   : > { %v2943_v35 = vmax.f32 %v10373_v48, %v2911_v21  ;;  %v3354_v19 = vsel %vm3347_vm4, %v10285_v39, %v7798_v30  ;;  %v3355_v10 = vsel %vm3347_vm4, %v10320_v8, %v7799_v28  ;;  %v3038_v48 = vrot.slane %v10578_v12, 1 }
 0x47e   : > { %v3489_v55 = vpack.c.bf16 %v3355_v10, %v3354_v19  ;;  %v3073_v3 = vsel %vm2137_vm2, %v3070_v0, %v3072_v53  ;;  %v3083_v0 = vrot.slane %v10209_v51, 3  ;;  %v3082_v21 = vrot.slane %v10211_v29, 3 }
 0x47f   : > { %v2959_v34 = vmax.f32 %v2799_v62, %v2943_v35  ;;  %v3039_v57 = vsel %vm1974_vm1, %v3036_v13, %v3038_v48 }
 0x480   : > { %v3086_v62 = vsel %vm3081_vm6, %v3083_v0, %v3085_v49 }
 0x481   : > { %v2979_v16 = vadd.f32 %v10199_v31, %v2959_v34  ;;  %3749 = vmatmul.bf16.gmra.mxu2 %v3489_v55 }
 0x482   : > { %v2751_v36 = vpop.permute.xlu0 %2750 }
 0x483   : > { %v10586_v17 = vmax.f32 %v2979_v16, 0.0  ;;  %v10588_v61 = vpop.permute.xlu1 %7801  ;;  %v2768_v14 = vsel %vm2752_vm3, %v2749_v26, %v2751_v36  ;;  %v3084_v26 = vsel %vm3081_vm6, %v3082_v21, %v3083_v0 }
 0x484   : > { %v7804_v4 = vunpack.i.h.bf16 %v10588_v61  ;;  %v7803_v23 = vunpack.i.l.bf16 %v10588_v61 }
 0x485   : > { %v3074_v37 = vrot.slane %v10586_v17, 2  ;;  %v3040_v1 = vrot.slane %v10586_v17, 1 }
 0x486   : > { %v3371_v11 = vsel %vm3364_vm5, %v7798_v30, %v7803_v23  ;;  %v3372_v20 = vsel %vm3364_vm5, %v7799_v28, %v7804_v4  ;;  %v2800_v28 = vmax.f32 %v10429_v7, %v2768_v14  ;;  %v3124_v7 = vrot.slane %v10247_v60, 4 }
 0x487   : > { %v3490_v33 = vpack.c.bf16 %v3372_v20, %v3371_v11  ;;  %v3075_v32 = vsel %vm2137_vm2, %v3072_v53, %v3074_v37  ;;  %v3041_v15 = vsel %vm1974_vm1, %v3038_v48, %v3040_v1  ;;  %v7845_v53 = vpack.i.bf16 %v3086_v62, %v3084_v26 }
 0x488   : > { %v7830_v5 = vpack.i.bf16 %v3075_v32, %v3073_v3  ;;  %v7825_v58 = vpack.i.bf16 %v3041_v15, %v3039_v57 }
 0x489   : > { %3798 = vmatmul.bf16.gmra.mxu3 %v3490_v33  ;;  %v3120_v33 = vrot.slane %v10215_v41, 4  ;;  %v3126_v41 = vrot.slane %v10275_v59, 4 }
 0x48a   : > { %7831 = vrot.lane.b32.xlu2 %v7830_v5, %s8156_s20  ;;  %7826 = vrot.lane.b32.xlu1 %v7825_v58, %s12993_s25  ;;  %v7807_v9 = vpop.permute.xlu0 %7806 }
 0x48b   : > { %v2894_v54 = vpop.permute.xlu1 %2893  ;;  %v7809_v30 = vunpack.i.h.bf16 %v7807_v9  ;;  %v7808_v35 = vunpack.i.l.bf16 %v7807_v9 }
 0x48c   : > { %v2912_v13 = vsel %vm2752_vm3, %v2894_v54, %v2896_v18 }
 0x48d   : > { %v2944_v34 = vmax.f32 %v10467_v6, %v2912_v13  ;;  %v3356_v10 = vsel %vm3347_vm4, %v10334_v45, %v7808_v35  ;;  %v3357_v55 = vsel %vm3347_vm4, %v10418_v44, %v7809_v30  ;;  %v3122_v6 = vrot.slane %v10241_v56, 4 }
 0x48e   : > { %v3493_v16 = vpack.c.bf16 %v3357_v55, %v3356_v10 }
 0x48f   : > { %v2960_v19 = vmax.f32 %v2800_v28, %v2944_v34  ;;  %v3123_v58 = vsel %vm3116_vm7, %v3120_v33, %v3122_v6 }
 0x491   : > { %v2980_v48 = vadd.f32 %v10199_v31, %v2960_v19  ;;  %3754 = vmatmul.bf16.gmra.mxu2 %v3493_v16  ;;  %v3125_v31 = vsel %vm3116_vm7, %v3122_v6, %v3124_v7  ;;  %v3128_v6 = vrot.slane %v10285_v39, 4 }
 0x492   : > { %7846 = vrot.lane.b32.xlu2 %v7845_v53, %s8157_s17  ;;  %v7860_v9 = vpack.i.bf16 %v3125_v31, %v3123_v58  ;;  %v3132_v31 = vrot.slane %v10334_v45, 4 }
 0x493   : > { %v10628_v36 = vmax.f32 %v2980_v48, 0.0  ;;  %v10630_v11 = vpop.permute.xlu1 %7811  ;;  %v3136_v48 = vrot.slane %v10431_v43, 4 }
 0x494   : > { %v7814_v20 = vunpack.i.h.bf16 %v10630_v11  ;;  %v7813_v3 = vunpack.i.l.bf16 %v10630_v11 }
 0x495   : > { %v3076_v32 = vrot.slane %v10628_v36, 2  ;;  %v3042_v57 = vrot.slane %v10628_v36, 1 }
 0x496   : > { %v3373_v15 = vsel %vm3364_vm5, %v7808_v35, %v7813_v3  ;;  %v3374_v5 = vsel %vm3364_vm5, %v7809_v30, %v7814_v20  ;;  %v3097_v30 = vrot.slane %v10334_v45, 3  ;;  %v3089_v35 = vrot.slane %v10247_v60, 3 }
 0x497   : > { %v3494_v14 = vpack.c.bf16 %v3374_v5, %v3373_v15  ;;  %v3077_v0 = vsel %vm2137_vm2, %v3074_v37, %v3076_v32  ;;  %v3080_v18 = vsel %vm2137_vm2, %v3076_v32, %v3047_v40  ;;  %v3043_v54 = vsel %vm1974_vm1, %v3040_v1, %v3042_v57 }
 0x498   : > { %v7840_v13 = vpack.i.bf16 %v3080_v18, %v3077_v0  ;;  %v3046_v62 = vsel %vm1974_vm1, %v3042_v57, %v3013_v22  ;;  %v3095_v40 = vrot.slane %v10320_v8, 3  ;;  %v3087_v37 = vrot.slane %v10241_v56, 3 }
 0x499   : > { %3803 = vmatmul.bf16.gmra.mxu3 %v3494_v14  ;;  %v7835_v28 = vpack.i.bf16 %v3046_v62, %v3043_v54  ;;  %v3118_v1 = vrot.slane %v10209_v51, 4  ;;  %v3093_v22 = vrot.slane %v10285_v39, 3  ;;  %v3117_v60 = vrot.slane %v10211_v29, 4 }
 0x49a   : > { %7861 = vrot.lane.b32.xlu2 %v7860_v9, %s8158_s23  ;;  %7841 = vrot.lane.b32.xlu1 %v7840_v13, %s8156_s20  ;;  %v3098_v34 = vsel %vm3081_vm6, %v3095_v40, %v3097_v30  ;;  %v3090_v19 = vsel %vm3081_vm6, %v3087_v37, %v3089_v35  ;;  %v3088_v26 = vsel %vm3081_vm6, %v3085_v49, %v3087_v37  ;;  %v3091_v49 = vrot.slane %v10275_v59, 3  ;;  %s486_s20 = sand.u32 1, %s8144_s19  }
 0x49b   : > { %7836 = vrot.lane.b32.xlu0 %v7835_v28, %s12993_s25  ;;  %v3121_v10 = vsel %vm3116_vm7, %v3118_v1, %v3120_v33  ;;  %v3096_v55 = vsel %vm3081_vm6, %v3093_v22, %v3095_v40  ;;  %v7855_v56 = vpack.i.bf16 %v3090_v19, %v3088_v26  ;;  %v3119_v51 = vsel %vm3116_vm7, %v3117_v60, %v3118_v1  ;;  %s6225_s16 = sshll.u32 %s486_s20, 3  ;;  %s6147_s22 = scalar_lea.sflag [#allocation3], %s486_s20 }
 0x49c   : > { %v7875_v16 = vpack.i.bf16 %v3098_v34, %v3096_v55  ;;  %v7850_v53 = vpack.i.bf16 %v3121_v10, %v3119_v51  ;;  %v3134_v33 = vrot.slane %v10418_v44, 4  ;;  %v3129_v57 = vsel %vm3116_vm7, %v3126_v41, %v3128_v6 }
 0x49d   : > { %v3094_v39 = vsel %vm3081_vm6, %v3091_v49, %v3093_v22  ;;  %v3127_v5 = vsel %vm3116_vm7, %v3124_v7, %v3126_v41  ;;  %v3092_v0 = vsel %vm3081_vm6, %v3089_v35, %v3091_v49  ;;  %v3109_v54 = vrot.slane %v10586_v17, 3 }
 0x49e   : > { %v3137_v32 = vsel %vm3116_vm7, %v3134_v33, %v3136_v48  ;;  %v3135_v15 = vsel %vm3116_vm7, %v3132_v31, %v3134_v33  ;;  %v7870_v14 = vpack.i.bf16 %v3129_v57, %v3127_v5  ;;  %v7865_v18 = vpack.i.bf16 %v3094_v39, %v3092_v0 }
 0x49f   : > { %v7890_v58 = vpack.i.bf16 %v3137_v32, %v3135_v15  ;;  %v3101_v59 = vrot.slane %v10431_v43, 3  ;;  %v3107_v45 = vrot.slane %v10578_v12, 3  ;;  %v3099_v9 = vrot.slane %v10418_v44, 3 }
 0x4a0   : > { %v3130_v7 = vrot.slane %v10320_v8, 4  ;;  %v3105_v13 = vrot.slane %v10540_v50, 3  ;;  %v3146_v44 = vrot.slane %v10628_v36, 4  ;;  %v3140_v8 = vrot.slane %v10540_v50, 4 }
 0x4a1   : > { %v3110_v62 = vsel %vm3081_vm6, %v3107_v45, %v3109_v54  ;;  %v3102_v28 = vsel %vm3081_vm6, %v3099_v9, %v3101_v59  ;;  %v3100_v37 = vsel %vm3081_vm6, %v3097_v30, %v3099_v9  ;;  %v3144_v10 = vrot.slane %v10586_v17, 4 }
 0x4a2   : > { %7876 = vrot.lane.b32.xlu2 %v7875_v16, %s8157_s17  ;;  %7856 = vrot.lane.b32.xlu1 %v7855_v56, %s8157_s17  ;;  %v3133_v35 = vsel %vm3116_vm7, %v3130_v7, %v3132_v31  ;;  %v3108_v40 = vsel %vm3081_vm6, %v3105_v13, %v3107_v45  ;;  %v7885_v22 = vpack.i.bf16 %v3102_v28, %v3100_v37  ;;  %v3138_v55 = vrot.slane %v10536_v42, 4 }
 0x4a3   : > { %7851 = vrot.lane.b32.xlu0 %v7850_v53, %s8158_s23  ;;  %v7905_v1 = vpack.i.bf16 %v3110_v62, %v3108_v40  ;;  %v3131_v34 = vsel %vm3116_vm7, %v3128_v6, %v3130_v7  ;;  %v3103_v30 = vrot.slane %v10536_v42, 3  ;;  %v3147_v26 = vsel %vm3116_vm7, %v3144_v10, %v3146_v44 }
 0x4a4   : > { %v7880_v19 = vpack.i.bf16 %v3133_v35, %v3131_v34  ;;  %v3150_v16 = vsel %vm3116_vm7, %v3146_v44, %v3117_v60  ;;  %v3141_v56 = vsel %vm3116_vm7, %v3138_v55, %v3140_v8  ;;  %v3139_v53 = vsel %vm3116_vm7, %v3136_v48, %v3138_v55  ;;  %v7553_v44 = vld [vmem:[%s12495_s3 + $0xb0] sm:$0xff] }
 0x4a5   : > { %v3106_v51 = vsel %vm3081_vm6, %v3103_v30, %v3105_v13  ;;  %v7920_v6 = vpack.i.bf16 %v3150_v16, %v3147_v26  ;;  %v7900_v33 = vpack.i.bf16 %v3141_v56, %v3139_v53  ;;  %v3104_v41 = vsel %vm3081_vm6, %v3101_v59, %v3103_v30  ;;  %v7552_v56 = vld [vmem:[%s12495_s3 + $0xa8] sm:$0xff] }
 0x4a6   : > { %v7895_v49 = vpack.i.bf16 %v3106_v51, %v3104_v41  ;;  %v3111_v31 = vrot.slane %v10628_v36, 3  ;;  %v3142_v60 = vrot.slane %v10578_v12, 4  ;;  %v7560_v51 = vld [vmem:[%s12495_s3 + $0xe8] sm:$0xff]  ;;  %v7551_v41 = vld [vmem:[%s12495_s3 + $0xa0] sm:$0xff] }
 0x4a8   : > { %v3112_v32 = vsel %vm3081_vm6, %v3109_v54, %v3111_v31  ;;  %v3115_v48 = vsel %vm3081_vm6, %v3111_v31, %v3082_v21  ;;  %v3145_v57 = vsel %vm3116_vm7, %v3142_v60, %v3144_v10  ;;  %v3143_v15 = vsel %vm3116_vm7, %v3140_v8, %v3142_v60  ;;  %v10735_v21 = vld [vmem:[%s12496_s4] ss:$0 sm:$0xff]  ;;  %v7550_v31 = vld [vmem:[%s12495_s3 + $0x98] sm:$0xff] }
 0x4a9   : > { %v7915_v39 = vpack.i.bf16 %v3115_v48, %v3112_v32  ;;  %v7910_v5 = vpack.i.bf16 %v3145_v57, %v3143_v15  ;;  %v7558_v60 = vld [vmem:[%s12495_s3 + $0xd8] sm:$0xff] }
 0x4aa   : > { %7891 = vrot.lane.b32.xlu2 %v7890_v58, %s8158_s23  ;;  %7871 = vrot.lane.b32.xlu1 %v7870_v14, %s8158_s23 }
 0x4ab   : > { %7866 = vrot.lane.b32.xlu0 %v7865_v18, %s8157_s17 }
 0x4b2   : > { %7906 = vrot.lane.b32.xlu2 %v7905_v1, %s8157_s17  ;;  %7886 = vrot.lane.b32.xlu1 %v7885_v22, %s8157_s17  ;;  %v6829_v1 = vld [vmem:[%s12495_s3 + $0xf0] sm:$0xf]  ;;  %v7561_v22 = vld [vmem:[%s12495_s3 + $0xf0] sm:$0x10] }
 0x4b3   : > { %7881 = vrot.lane.b32.xlu0 %v7880_v19, %s8158_s23  ;;  %v6830_v10 = vor.u32 %v7561_v22, %v6829_v1  ;;  %v7547_v1 = vld [vmem:[%s12495_s3 + $0x80] sm:$0xff] }
 0x4b4   : > { %v7555_v22 = vld [vmem:[%s12495_s3 + $0xc0] sm:$0xff] }
 0x4b5   : > { %v3724_v16 = vsel %vm3081_vm6, %v6830_v10, 0 }
 0x4b6   : > { %3874 = vmatpush.bf16.msrb.mxu3 %v3724_v16 }
 0x4ba   : > { %7921 = vrot.lane.b32.xlu2 %v7920_v6, %s8158_s23  ;;  %7901 = vrot.lane.b32.xlu1 %v7900_v33, %s8158_s23 }
 0x4bb   : > { %7896 = vrot.lane.b32.xlu0 %v7895_v49, %s8157_s17  ;;  %3875 = vmatpush.bf16.msrb.mxu3 %v7560_v51  ;;  %v7559_v49 = vld [vmem:[%s12495_s3 + $0xe0] sm:$0xff] }
 0x4bf   : > { %3876 = vmatpush.bf16.msrb.mxu3 %v7559_v49 }
 0x4c2   : > { %7916 = vrot.lane.b32.xlu1 %v7915_v39, %s8157_s17  ;;  %s8167_s17 = smov 24  }
 0x4c3   : > { %7911 = vrot.lane.b32.xlu0 %v7910_v5, %s8158_s23  ;;  %3877 = vmatpush.bf16.msrb.mxu3 %v7558_v60  ;;  %v7549_v5 = vld [vmem:[%s12495_s3 + $0x90] sm:$0xff]  ;;  %s8168_s23 = smov 126  }
 0x4cc   : > { %v7817_v58 = vpop.permute.xlu2 %7816 }
 0x4cd   : > { %v7819_v14 = vunpack.i.h.bf16 %v7817_v58  ;;  %v7818_v0 = vunpack.i.l.bf16 %v7817_v58  ;;  %v7557_v58 = vld [vmem:[%s12495_s3 + $0xd0] sm:$0xff] }
 0x4ce   : > { %3878 = vmatpush.bf16.msrb.mxu3 %v7557_v58 }
 0x4cf   : > { %v3358_v18 = vsel %vm3347_vm4, %v10431_v43, %v7818_v0  ;;  %v3359_v29 = vsel %vm3347_vm4, %v10536_v42, %v7819_v14  ;;  %v7554_v43 = vld [vmem:[%s12495_s3 + $0xb8] sm:$0xff] }
 0x4d0   : > { %v3497_v54 = vpack.c.bf16 %v3359_v29, %v3358_v18  ;;  %3824 = vmatpush.bf16.msrb.mxu2 %v7554_v43 }
 0x4d2   : > { %3759 = vmatmul.bf16.gmra.mxu2 %v3497_v54 }
 0x4d3   : > { %v3735_v59 = vpop.f32.mrf.mxu2  ;;  %v3784_v45 = vpop.f32.mrf.mxu3 }
 0x4d4   : > { %v3736_v9 = vadd.f32 %v10735_v21, %v3735_v59  ;;  %3825 = vmatpush.bf16.msrb.mxu2 %v7553_v44 }
 0x4d6   : > { %v10738_v7 = vadd.f32 %v3784_v45, %v3736_v9 }
 0x4d8   : > { %3826 = vmatpush.bf16.msrb.mxu2 %v7552_v56 }
 0x4db   : > { %v10740_v13 = vpop.f32.mrf.mxu2  ;;  %v10742_v62 = vpop.f32.mrf.mxu3 }
 0x4dc   : > { %3827 = vmatpush.bf16.msrb.mxu2 %v7551_v41 }
 0x4e0   : > { %3828 = vmatpush.bf16.msrb.mxu2 %v7550_v31 }
 0x4e4   : > { %v3740_v42 = vpop.f32.mrf.mxu2  ;;  %v3789_v28 = vpop.f32.mrf.mxu3  ;;  %3829 = vmatpush.bf16.msrb.mxu2 %v7549_v5 }
 0x4e5   : > { %v3741_v35 = vadd.f32 %v10735_v21, %v3740_v42  ;;  %v10748_v40 = vpop.permute.xlu0 %7821  ;;  %v10750_v37 = vpop.permute.xlu2 %7831 }
 0x4e6   : > { %v7824_v34 = vunpack.i.h.bf16 %v10748_v40  ;;  %v7823_v19 = vunpack.i.l.bf16 %v10748_v40  ;;  %v7833_v54 = vunpack.i.l.bf16 %v10750_v37  ;;  %v7834_v43 = vunpack.i.h.bf16 %v10750_v37 }
 0x4e7   : > { %v10763_v8 = vadd.f32 %v3789_v28, %v3741_v35 }
 0x4e8   : > { %v3375_v55 = vsel %vm3364_vm5, %v7818_v0, %v7823_v19  ;;  %v3376_v30 = vsel %vm3364_vm5, %v7819_v14, %v7824_v34  ;;  %v7548_v14 = vld [vmem:[%s12495_s3 + $0x88] sm:$0xff] }
 0x4e9   : > { %v3498_v26 = vpack.c.bf16 %v3376_v30, %v3375_v55  ;;  %v7556_v0 = vld [vmem:[%s12495_s3 + $0xc8] sm:$0xff]  ;;  %3830 = vmatpush.bf16.msrb.mxu2 %v7548_v14 }
 0x4ea   : > { %3879 = vmatpush.bf16.msrb.mxu3 %v7556_v0 }
 0x4eb   : > { %3808 = vmatmul.bf16.gmra.mxu3 %v3498_v26 }
 0x4ec   : > { %v10778_v53 = vpop.f32.mrf.mxu2  ;;  %v10780_v6 = vpop.f32.mrf.mxu3 }
 0x4ed   : > { %v10782_v33 = vpop.permute.xlu2 %7846  ;;  %3831 = vmatpush.bf16.msrb.mxu2 %v7547_v1 }
 0x4ee   : > { %3880 = vmatpush.bf16.msrb.mxu3 %v7555_v22  ;;  %v7848_v22 = vunpack.i.l.bf16 %v10782_v33 }
 0x4f4   : > { %v3745_v32 = vpop.f32.mrf.mxu2  ;;  %v3794_v39 = vpop.f32.mrf.mxu3 }
 0x4f5   : > { %v3746_v48 = vadd.f32 %v10735_v21, %v3745_v32  ;;  %v10797_v57 = vpop.permute.xlu2 %7861 }
 0x4f6   : > { %v7863_v24 = vunpack.i.l.bf16 %v10797_v57 }
 0x4f7   : > { %v10799_v15 = vadd.f32 %v3794_v39, %v3746_v48 }
 0x4fc   : > { %v10813_v18 = vpop.f32.mrf.mxu2  ;;  %v7827_v29 = vpop.permute.xlu1 %7826 }
 0x4fd   : > { %v10816_v59 = vpop.permute.xlu2 %7876  ;;  %v7829_v45 = vunpack.i.h.bf16 %v7827_v29  ;;  %v7828_v9 = vunpack.i.l.bf16 %v7827_v29 }
 0x4ff   : > { %v3360_v42 = vsel %vm3347_vm4, %v10540_v50, %v7828_v9  ;;  %v3361_v28 = vsel %vm3347_vm4, %v10578_v12, %v7829_v45  ;;  %v3377_v35 = vsel %vm3364_vm5, %v7828_v9, %v7833_v54  ;;  %v3378_v37 = vsel %vm3364_vm5, %v7829_v45, %v7834_v43  ;;  %v10831_v50 = vpop.f32.mrf.mxu3 }
 0x500   : > { %v3501_v44 = vpack.c.bf16 %v3361_v28, %v3360_v42  ;;  %v3502_v10 = vpack.c.bf16 %v3378_v37, %v3377_v35 }
 0x502   : > { %3764 = vmatmul.bf16.gmra.mxu2 %v3501_v44  ;;  %3813 = vmatmul.bf16.gmra.mxu3 %v3502_v10 }
 0x504   : > { %v3750_v12 = vpop.f32.mrf.mxu2 }
 0x505   : > { %v10833_v55 = vpop.permute.xlu2 %7891  ;;  %v3751_v30 = vadd.f32 %v10735_v21, %v3750_v12 }
 0x50c   : > { %v10836_v26 = vpop.permute.xlu1 %7841  ;;  %v3799_v16 = vpop.f32.mrf.mxu3 }
 0x50d   : > { %v10838_v56 = vpop.permute.xlu2 %7906  ;;  %v7844_v51 = vunpack.i.h.bf16 %v10836_v26  ;;  %v7843_v41 = vunpack.i.l.bf16 %v10836_v26  ;;  %v10842_v49 = vadd.f32 %v3799_v16, %v3751_v30  ;;  %v10844_v31 = vpop.f32.mrf.mxu2 }
 0x50e   : > { %v7909_v60 = vunpack.i.h.bf16 %v10838_v56  ;;  %v7908_v32 = vunpack.i.l.bf16 %v10838_v56  ;;  %v7837_v48 = vpop.permute.xlu0 %7836 }
 0x50f   : > { %v7839_v39 = vunpack.i.h.bf16 %v7837_v48  ;;  %v7838_v5 = vunpack.i.l.bf16 %v7837_v48 }
 0x510   : > { %v10851_v58 = vsel %vm3381_vm8, %v7833_v54, %v7908_v32  ;;  %v10856_v14 = vsel %vm3381_vm8, %v7834_v43, %v7909_v60 }
 0x511   : > { %v3362_v0 = vsel %vm3347_vm4, %v10586_v17, %v7838_v5  ;;  %v3363_v29 = vsel %vm3347_vm4, %v10628_v36, %v7839_v39  ;;  %v3379_v45 = vsel %vm3364_vm5, %v7838_v5, %v7843_v41  ;;  %v3380_v9 = vsel %vm3364_vm5, %v7839_v39, %v7844_v51 }
 0x512   : > { %v3505_v42 = vpack.c.bf16 %v3363_v29, %v3362_v0  ;;  %v3506_v54 = vpack.c.bf16 %v3380_v9, %v3379_v45  ;;  %v3503_v28 = vpack.c.bf16 %v10856_v14, %v10851_v58  ;;  %v7849_v36 = vunpack.i.h.bf16 %v10782_v33 }
 0x513   : > { %v3382_v39 = vsel %vm3381_vm8, %v7773_v46, %v7848_v22 }
 0x514   : > { %3769 = vmatmul.bf16.gmra.mxu2 %v3505_v42  ;;  %3818 = vmatmul.bf16.gmra.mxu3 %v3506_v54  ;;  %v7857_v43 = vpop.permute.xlu1 %7856  ;;  %v10868_v35 = vpop.f32.mrf.mxu3  ;;  %v3383_v48 = vsel %vm3381_vm8, %v7774_v63, %v7849_v36  ;;  %v7864_v63 = vunpack.i.h.bf16 %v10797_v57 }
 0x515   : > { %v3755_v17 = vpop.f32.mrf.mxu2  ;;  %v3479_v0 = vpack.c.bf16 %v3383_v48, %v3382_v39  ;;  %v7859_v9 = vunpack.i.h.bf16 %v7857_v43  ;;  %v7858_v42 = vunpack.i.l.bf16 %v7857_v43 }
 0x516   : > { %v7852_v1 = vpop.permute.xlu0 %7851  ;;  %v3756_v44 = vadd.f32 %v10735_v21, %v3755_v17 }
 0x517   : > { %v7854_v37 = vunpack.i.h.bf16 %v7852_v1  ;;  %v7853_v10 = vunpack.i.l.bf16 %v7852_v1  ;;  %v3402_v46 = vsel %vm3398_vm9, %v7859_v9, %v7864_v63  ;;  %v3401_v17 = vsel %vm3398_vm9, %v7858_v42, %v7863_v24 }
 0x518   : > { %v3384_v1 = vsel %vm3381_vm8, %v7783_v47, %v7858_v42  ;;  %v7878_v42 = vunpack.i.l.bf16 %v10816_v59 }
 0x519   : > { %v3400_v5 = vsel %vm3398_vm9, %v7849_v36, %v7854_v37  ;;  %v3399_v33 = vsel %vm3398_vm9, %v7848_v22, %v7853_v10  ;;  %v3385_v36 = vsel %vm3381_vm8, %v7784_v52, %v7859_v9  ;;  %v3484_v22 = vpack.c.bf16 %v3402_v46, %v3401_v17 }
 0x51a   : > { %v3480_v29 = vpack.c.bf16 %v3400_v5, %v3399_v33  ;;  %v3483_v43 = vpack.c.bf16 %v3385_v36, %v3384_v1  ;;  %v3388_v38 = vsel %vm3381_vm8, %v7803_v23, %v7878_v42 }
 0x51c   : > { %v7872_v12 = vpop.permute.xlu1 %7871  ;;  %v3804_v30 = vpop.f32.mrf.mxu3 }
 0x51d   : > { %v10873_v16 = vadd.f32 %v3804_v30, %v3756_v44  ;;  %v7874_v39 = vunpack.i.h.bf16 %v7872_v12  ;;  %v7873_v5 = vunpack.i.l.bf16 %v7872_v12  ;;  %v7879_v12 = vunpack.i.h.bf16 %v10816_v59  ;;  %v10945_v23 = vpop.f32.mrf.mxu2 }
 0x51e   : > { %v7867_v10 = vpop.permute.xlu0 %7866 }
 0x51f   : > { %v7869_v30 = vunpack.i.h.bf16 %v7867_v10  ;;  %v7868_v48 = vunpack.i.l.bf16 %v7867_v10 }
 0x521   : > { %v3404_v33 = vsel %vm3398_vm9, %v7869_v30, %v7874_v39  ;;  %v3387_v26 = vsel %vm3381_vm8, %v7794_v25, %v7869_v30  ;;  %v3389_v25 = vsel %vm3381_vm8, %v7804_v4, %v7879_v12 }
 0x522   : > { %v3491_v1 = vpack.c.bf16 %v3389_v25, %v3388_v38 }
 0x524   : > { %3832 = vmatmul.bf16.vlgmr.msrb.gmra.mxu2 %v3479_v0  ;;  %6831 = vmatmul.msk.bf16.vlgmr.msrb.gmra.mxu3 %vm3698_vm10, %v3480_v29  ;;  %v7887_v45 = vpop.permute.xlu1 %7886  ;;  %v3403_v0 = vsel %vm3398_vm9, %v7868_v48, %v7873_v5 }
 0x525   : > { %v7889_v59 = vunpack.i.h.bf16 %v7887_v45  ;;  %v7888_v36 = vunpack.i.l.bf16 %v7887_v45 }
 0x526   : > { %v7882_v9 = vpop.permute.xlu0 %7881 }
 0x527   : > { %v7884_v63 = vunpack.i.h.bf16 %v7882_v9  ;;  %v7883_v24 = vunpack.i.l.bf16 %v7882_v9  ;;  %v3390_v61 = vsel %vm3381_vm8, %v7813_v3, %v7888_v36  ;;  %v3391_v4 = vsel %vm3381_vm8, %v7814_v20, %v7889_v59 }
 0x528   : > { %v3495_v45 = vpack.c.bf16 %v3391_v4, %v3390_v61 }
 0x529   : > { %v3406_v46 = vsel %vm3398_vm9, %v7879_v12, %v7884_v63 }
 0x52c   : > { %v10884_v54 = vpop.permute.xlu1 %7901 }
 0x52d   : > { %v7903_v3 = vunpack.i.l.bf16 %v10884_v54 }
 0x52e   : > { %v7897_v39 = vpop.permute.xlu0 %7896 }
 0x52f   : > { %v7899_v5 = vunpack.i.h.bf16 %v7897_v39 }
 0x531   : > { %v3393_v12 = vsel %vm3381_vm8, %v7824_v34, %v7899_v5 }
 0x534   : > { %3837 = vmatmul.bf16.gmra.mxu2 %v3483_v43  ;;  %6832 = vmatmul.msk.bf16.gmra.mxu3 %vm3698_vm10, %v3484_v22  ;;  %v10897_v44 = vpop.permute.xlu1 %7916  ;;  %v7894_v22 = vunpack.i.h.bf16 %v10833_v55  ;;  %v7893_v43 = vunpack.i.l.bf16 %v10833_v55  ;;  %v10948_v55 = vpop.f32.mrf.mxu3 }
 0x535   : > { %v7919_v57 = vunpack.i.h.bf16 %v10897_v44  ;;  %v7918_v37 = vunpack.i.l.bf16 %v10897_v44 }
 0x536   : > { %v3408_v10 = vsel %vm3398_vm9, %v7889_v59, %v7894_v22  ;;  %v3407_v30 = vsel %vm3398_vm9, %v7888_v36, %v7893_v43  ;;  %v7922_v22 = vpop.permute.xlu2 %7921 }
 0x537   : > { %v10904_v47 = vsel %vm3381_vm8, %v7843_v41, %v7918_v37  ;;  %v10911_v27 = vsel %vm3381_vm8, %v7844_v51, %v7919_v57  ;;  %v3386_v41 = vsel %vm3381_vm8, %v7793_v2, %v7868_v48  ;;  %v3488_v51 = vpack.c.bf16 %v3404_v33, %v3403_v0 }
 0x538   : > { %v3507_v52 = vpack.c.bf16 %v10911_v27, %v10904_v47  ;;  %v3487_v29 = vpack.c.bf16 %v3387_v26, %v3386_v41  ;;  %v3405_v2 = vsel %vm3398_vm9, %v7878_v42, %v7883_v24  ;;  %v3496_v48 = vpack.c.bf16 %v3408_v10, %v3407_v30  ;;  %v7569_v24 = vld [vmem:[%s12497_s5 + $0x38] sm:$0xff] }
 0x539   : > { %v3492_v17 = vpack.c.bf16 %v3406_v46, %v3405_v2  ;;  %v7904_v33 = vunpack.i.h.bf16 %v10884_v54  ;;  %v7898_v41 = vunpack.i.l.bf16 %v7897_v39  ;;  %v7912_v54 = vpop.permute.xlu0 %7911  ;;  %4725 = vmatpush.bf16.msrb.mxu0 %v7569_v24  ;;  %v7924_v43 = vunpack.i.h.bf16 %v7922_v22 }
 0x53a   : > { %v7914_v46 = vunpack.i.h.bf16 %v7912_v54  ;;  %v7913_v2 = vunpack.i.l.bf16 %v7912_v54  ;;  %v3738_v27 = vadd.f32 %v10735_v21, %v10740_v13 }
 0x53b   : > { %v3410_v20 = vsel %vm3398_vm9, %v7899_v5, %v7904_v33  ;;  %v3392_v9 = vsel %vm3381_vm8, %v7823_v19, %v7898_v41 }
 0x53c   : > { %v3499_v63 = vpack.c.bf16 %v3393_v12, %v3392_v9  ;;  %v3412_v40 = vsel %vm3398_vm9, %v7909_v60, %v7914_v46  ;;  %v3411_v34 = vsel %vm3398_vm9, %v7908_v32, %v7913_v2  ;;  %v7923_v60 = vunpack.i.l.bf16 %v7922_v22 }
 0x53d   : > { %v3504_v25 = vpack.c.bf16 %v3412_v40, %v3411_v34  ;;  %v3414_v32 = vsel %vm3398_vm9, %v7919_v57, %v7924_v43  ;;  %v7568_v57 = vld [vmem:[%s12497_s5 + $0x30] sm:$0xff] }
 0x53e   : > { %v3413_v58 = vsel %vm3398_vm9, %v7918_v37, %v7923_v60  ;;  %4726 = vmatpush.bf16.msrb.mxu0 %v7568_v57 }
 0x53f   : > { %v3508_v14 = vpack.c.bf16 %v3414_v32, %v3413_v58 }
 0x544   : > { %3842 = vmatmul.bf16.gmra.mxu2 %v3487_v29  ;;  %6833 = vmatmul.msk.bf16.gmra.mxu3 %vm3698_vm10, %v3488_v51  ;;  %v3409_v51 = vsel %vm3398_vm9, %v7898_v41, %v7903_v3 }
 0x545   : > { %v3500_v42 = vpack.c.bf16 %v3410_v20, %v3409_v51  ;;  %v3743_v51 = vadd.f32 %v10735_v21, %v10778_v53 }
 0x554   : > { %3847 = vmatmul.bf16.gmra.mxu2 %v3491_v1  ;;  %6834 = vmatmul.msk.bf16.gmra.mxu3 %vm3698_vm10, %v3492_v17 }
 0x555   : > { %v3760_v0 = vpop.f32.mrf.mxu2 }
 0x556   : > { %v3761_v11 = vadd.f32 %v10735_v21, %v3760_v0 }
 0x55d   : > { %v10967_v38 = vpop.f32.mrf.mxu2 }
 0x564   : > { %3852 = vmatmul.bf16.gmra.mxu2 %v3495_v45  ;;  %6835 = vmatmul.msk.bf16.gmra.mxu3 %vm3698_vm10, %v3496_v48 }
 0x56e   : > { %v3809_v26 = vpop.f32.mrf.mxu3 }
 0x56f   : > { %v10955_v29 = vadd.f32 %v3809_v26, %v3761_v11 }
 0x574   : > { %3857 = vmatmul.bf16.gmra.mxu2 %v3499_v63  ;;  %6836 = vmatmul.msk.bf16.gmra.mxu3 %vm3698_vm10, %v3500_v42  ;;  %v3792_v42 = vadd.f32 %v10780_v6, %v3743_v51 }
 0x576   : > { %v10969_v19 = vpop.f32.mrf.mxu3 }
 0x584   : > { %3862 = vmatmul.bf16.gmra.mxu2 %v3503_v28  ;;  %6837 = vmatmul.msk.bf16.gmra.mxu3 %vm3698_vm10, %v3504_v25 }
 0x585   : > { %v3765_v17 = vpop.f32.mrf.mxu2  ;;  %v3814_v59 = vpop.f32.mrf.mxu3 }
 0x586   : > { %v3766_v1 = vadd.f32 %v10735_v21, %v3765_v17 }
 0x588   : > { %v10982_v36 = vadd.f32 %v3814_v59, %v3766_v1  ;;  %v3748_v59 = vadd.f32 %v10735_v21, %v10813_v18 }
 0x58a   : > { %v3797_v32 = vadd.f32 %v10831_v50, %v3748_v59 }
 0x58d   : > { %v10984_v10 = vpop.f32.mrf.mxu2  ;;  %v10986_v56 = vpop.f32.mrf.mxu3 }
 0x594   : > { %3867 = vmatmul.bf16.gmra.mxu2 %v3507_v52  ;;  %6838 = vmatmul.msk.bf16.gmra.mxu3 %vm3698_vm10, %v3508_v14  ;;  %v3787_v52 = vadd.f32 %v10742_v62, %v3738_v27 }
 0x597   : > { %v3770_v28 = vpop.f32.mrf.mxu2  ;;  %v3819_v30 = vpop.f32.mrf.mxu3 }
 0x598   : > { %v3771_v61 = vadd.f32 %v10735_v21, %v3770_v28 }
 0x59a   : > { %v10999_v4 = vadd.f32 %v3819_v30, %v3771_v61 }
 0x59f   : > { %v11004_v44 = vpop.f32.mrf.mxu2  ;;  %v11006_v37 = vpop.f32.mrf.mxu3 }
 0x5a7   : > { %v3833_v48 = vpop.f32.mrf.mxu2  ;;  %v3882_v47 = vpop.f32.mrf.mxu3 }
 0x5a8   : > { %v3834_v33 = vadd.f32 %v3833_v48, %v10738_v7  ;;  %v7567_v7 = vld [vmem:[%s12497_s5 + $0x28] sm:$0xff] }
 0x5a9   : > { %4727 = vmatpush.bf16.msrb.mxu0 %v7567_v7 }
 0x5aa   : > { %v3883_v41 = vadd.f32 %v3882_v47, %v3834_v33  ;;  %v7566_v33 = vld [vmem:[%s12497_s5 + $0x20] sm:$0xff] }
 0x5ac   : > { %v11017_v9 = vmax.f32 %v3883_v41, 0.0 }
 0x5ad   : > { %4728 = vmatpush.bf16.msrb.mxu0 %v7566_v33 }
 0x5ae   : > { %v3954_v63 = vrot.slane %v11017_v9, 1 }
 0x5af   : > { %v3835_v45 = vpop.f32.mrf.mxu2  ;;  %v3884_v39 = vpop.f32.mrf.mxu3 }
 0x5b0   : > { %v3836_v5 = vadd.f32 %v3835_v45, %v3787_v52  ;;  %v3753_v45 = vadd.f32 %v10735_v21, %v10844_v31 }
 0x5b2   : > { %v3885_v0 = vadd.f32 %v3884_v39, %v3836_v5 }
 0x5b4   : > { %v11012_v20 = vmax.f32 %v3885_v0, 0.0  ;;  %v3802_v0 = vadd.f32 %v10868_v35, %v3753_v45 }
 0x5b6   : > { %v3955_v12 = vrot.slane %v11012_v20, 1 }
 0x5b7   : > { %v3838_v3 = vpop.f32.mrf.mxu2  ;;  %v3887_v11 = vpop.f32.mrf.mxu3 }
 0x5b8   : > { %v3839_v26 = vadd.f32 %v3838_v3, %v10763_v8  ;;  %v3956_v46 = vsel %vm1974_vm1, %v3954_v63, %v3955_v12 }
 0x5ba   : > { %v3888_v13 = vadd.f32 %v3887_v11, %v3839_v26 }
 0x5bc   : > { %v11019_v62 = vmax.f32 %v3888_v13, 0.0 }
 0x5be   : > { %v3957_v8 = vrot.slane %v11019_v62, 1 }
 0x5bf   : > { %v3840_v54 = vpop.f32.mrf.mxu2  ;;  %v3889_v53 = vpop.f32.mrf.mxu3 }
 0x5c0   : > { %v3841_v24 = vadd.f32 %v3840_v54, %v3792_v42  ;;  %v3958_v2 = vsel %vm1974_vm1, %v3955_v12, %v3957_v8  ;;  %v3758_v54 = vadd.f32 %v10735_v21, %v10945_v23  ;;  %v7577_v23 = vld [vmem:[%s12497_s5 + $0x78] sm:$0xff] }
 0x5c1   : > { %v7925_v40 = vpack.i.bf16 %v3958_v2, %v3956_v46  ;;  %4774 = vmatpush.bf16.msrb.mxu1 %v7577_v23  ;;  %v3773_v23 = vadd.f32 %v10735_v21, %v11004_v44 }
 0x5c2   : > { %v3890_v34 = vadd.f32 %v3889_v53, %v3841_v24  ;;  %v3807_v46 = vadd.f32 %v10948_v55, %v3758_v54  ;;  %v3989_v54 = vrot.slane %v11012_v20, 2 }
 0x5c3   : > { %7926 = vrot.lane.b32.xlu0 %v7925_v40, %s8159_s26 }
 0x5c4   : > { %v11033_v17 = vmax.f32 %v3890_v34, 0.0 }
 0x5c6   : > { %v3959_v60 = vrot.slane %v11033_v17, 1 }
 0x5c7   : > { %v3843_v6 = vpop.f32.mrf.mxu2  ;;  %v3892_v25 = vpop.f32.mrf.mxu3 }
 0x5c8   : > { %v3844_v1 = vadd.f32 %v3843_v6, %v10799_v15  ;;  %v3960_v61 = vsel %vm1974_vm1, %v3957_v8, %v3959_v60 }
 0x5ca   : > { %v3893_v22 = vadd.f32 %v3892_v25, %v3844_v1 }
 0x5cc   : > { %v11038_v43 = vmax.f32 %v3893_v22, 0.0 }
 0x5ce   : > { %v3961_v58 = vrot.slane %v11038_v43, 1 }
 0x5cf   : > { %v3845_v14 = vpop.f32.mrf.mxu2  ;;  %v3894_v28 = vpop.f32.mrf.mxu3 }
 0x5d0   : > { %v3846_v30 = vadd.f32 %v3845_v14, %v3797_v32  ;;  %v3962_v57 = vsel %vm1974_vm1, %v3959_v60, %v3961_v58  ;;  %v3763_v14 = vadd.f32 %v10735_v21, %v10967_v38 }
 0x5d1   : > { %v7930_v15 = vpack.i.bf16 %v3962_v57, %v3960_v61  ;;  %v7565_v61 = vld [vmem:[%s12497_s5 + $0x18] sm:$0xff] }
 0x5d2   : > { %v3895_v18 = vadd.f32 %v3894_v28, %v3846_v30  ;;  %v3812_v57 = vadd.f32 %v10969_v19, %v3763_v14  ;;  %4729 = vmatpush.bf16.msrb.mxu0 %v7565_v61  ;;  %v3822_v14 = vadd.f32 %v11006_v37, %v3773_v23 }
 0x5d3   : > { %7931 = vrot.lane.b32.xlu1 %v7930_v15, %s8159_s26 }
 0x5d4   : > { %v11046_v27 = vmax.f32 %v3895_v18, 0.0 }
 0x5d6   : > { %v3963_v5 = vrot.slane %v11046_v27, 1 }
 0x5d7   : > { %v3848_v48 = vpop.f32.mrf.mxu2  ;;  %v3897_v47 = vpop.f32.mrf.mxu3 }
 0x5d8   : > { %v3849_v52 = vadd.f32 %v3848_v48, %v10842_v49  ;;  %v3964_v26 = vsel %vm1974_vm1, %v3961_v58, %v3963_v5 }
 0x5da   : > { %v3898_v50 = vadd.f32 %v3897_v47, %v3849_v52 }
 0x5dc   : > { %v11051_v39 = vmax.f32 %v3898_v50, 0.0 }
 0x5de   : > { %v3965_v41 = vrot.slane %v11051_v39, 1  ;;  %v3999_v37 = vrot.slane %v11051_v39, 2 }
 0x5df   : > { %v3850_v3 = vpop.f32.mrf.mxu2  ;;  %v3899_v11 = vpop.f32.mrf.mxu3 }
 0x5e0   : > { %v3851_v49 = vadd.f32 %v3850_v3, %v3802_v0  ;;  %v3966_v31 = vsel %vm1974_vm1, %v3963_v5, %v3965_v41  ;;  %v3768_v0 = vadd.f32 %v10735_v21, %v10984_v10 }
 0x5e1   : > { %v7935_v51 = vpack.i.bf16 %v3966_v31, %v3964_v26 }
 0x5e2   : > { %v3900_v13 = vadd.f32 %v3899_v11, %v3851_v49  ;;  %v7564_v49 = vld [vmem:[%s12497_s5 + $0x10] sm:$0xff]  ;;  %v3817_v26 = vadd.f32 %v10986_v56, %v3768_v0  ;;  %v4022_v0 = vrot.slane %v11017_v9, 3 }
 0x5e3   : > { %7936 = vrot.lane.b32.xlu2 %v7935_v51, %s8159_s26  ;;  %4730 = vmatpush.bf16.msrb.mxu0 %v7564_v49 }
 0x5e4   : > { %v11062_v42 = vmax.f32 %v3900_v13, 0.0 }
 0x5e6   : > { %v3967_v24 = vrot.slane %v11062_v42, 1 }
 0x5e7   : > { %v3853_v12 = vpop.f32.mrf.mxu2  ;;  %v3902_v7 = vpop.f32.mrf.mxu3 }
 0x5e8   : > { %v3854_v35 = vadd.f32 %v3853_v12, %v10873_v16  ;;  %v3968_v25 = vsel %vm1974_vm1, %v3965_v41, %v3967_v24 }
 0x5ea   : > { %v3903_v8 = vadd.f32 %v3902_v7, %v3854_v35  ;;  %v3991_v35 = vrot.slane %v11019_v62, 2 }
 0x5ec   : > { %v11067_v53 = vmax.f32 %v3903_v8, 0.0  ;;  %v7563_v8 = vld [vmem:[%s12497_s5 + $0x8] sm:$0xff] }
 0x5ed   : > { %4731 = vmatpush.bf16.msrb.mxu0 %v7563_v8  ;;  %v4027_v8 = vrot.slane %v11033_v17, 3 }
 0x5ee   : > { %v3969_v2 = vrot.slane %v11067_v53, 1 }
 0x5ef   : > { %v3855_v40 = vpop.f32.mrf.mxu2  ;;  %v3904_v34 = vpop.f32.mrf.mxu3 }
 0x5f0   : > { %v3856_v6 = vadd.f32 %v3855_v40, %v3807_v46  ;;  %v3970_v1 = vsel %vm1974_vm1, %v3967_v24, %v3969_v2  ;;  %v3988_v24 = vrot.slane %v11017_v9, 2  ;;  %v3992_v46 = vsel %vm2137_vm2, %v3989_v54, %v3991_v35 }
 0x5f1   : > { %v7940_v16 = vpack.i.bf16 %v3970_v1, %v3968_v25 }
 0x5f2   : > { %v3905_v59 = vadd.f32 %v3904_v34, %v3856_v6  ;;  %v7562_v34 = vld [vmem:[%s12497_s5] sm:$0xff]  ;;  %v3990_v1 = vsel %vm2137_vm2, %v3988_v24, %v3989_v54  ;;  %v4056_v54 = vrot.slane %v11017_v9, 4 }
 0x5f3   : > { %7941 = vrot.lane.b32.xlu0 %v7940_v16, %s8159_s26  ;;  %v7960_v16 = vpack.i.bf16 %v3992_v46, %v3990_v1  ;;  %4732 = vmatpush.bf16.msrb.mxu0 %v7562_v34 }
 0x5f4   : > { %v11078_v60 = vmax.f32 %v3905_v59, 0.0  ;;  %v7576_v59 = vld [vmem:[%s12497_s5 + $0x70] sm:$0xff] }
 0x5f5   : > { %4775 = vmatpush.bf16.msrb.mxu1 %v7576_v59 }
 0x5f6   : > { %v3971_v30 = vrot.slane %v11078_v60, 1 }
 0x5f7   : > { %v3858_v22 = vpop.f32.mrf.mxu2  ;;  %v3907_v55 = vpop.f32.mrf.mxu3 }
 0x5f8   : > { %v3859_v32 = vadd.f32 %v3858_v22, %v10955_v29  ;;  %v3972_v47 = vsel %vm1974_vm1, %v3969_v2, %v3971_v30 }
 0x5fa   : > { %v3908_v58 = vadd.f32 %v3907_v55, %v3859_v32  ;;  %v3995_v55 = vrot.slane %v11038_v43, 2 }
 0x5fc   : > { %v11083_v28 = vmax.f32 %v3908_v58, 0.0  ;;  %v3993_v58 = vrot.slane %v11033_v17, 2 }
 0x5fe   : > { %v3973_v15 = vrot.slane %v11083_v28, 1  ;;  %v3996_v61 = vsel %vm2137_vm2, %v3993_v58, %v3995_v55 }
 0x5ff   : > { %v3860_v18 = vpop.f32.mrf.mxu2  ;;  %v3909_v48 = vpop.f32.mrf.mxu3 }
 0x600   : > { %v3861_v29 = vadd.f32 %v3860_v18, %v3812_v57  ;;  %v3974_v38 = vsel %vm1974_vm1, %v3971_v30, %v3973_v15  ;;  %v3994_v18 = vsel %vm2137_vm2, %v3991_v35, %v3993_v58  ;;  %v4057_v35 = vrot.slane %v11012_v20, 4 }
 0x601   : > { %v7945_v52 = vpack.i.bf16 %v3974_v38, %v3972_v47  ;;  %v7980_v47 = vpack.i.bf16 %v3996_v61, %v3994_v18  ;;  %v4061_v58 = vrot.slane %v11033_v17, 4  ;;  %v4031_v61 = vrot.slane %v11046_v27, 3 }
 0x602   : > { %v3910_v50 = vadd.f32 %v3909_v48, %v3861_v29  ;;  %v4058_v34 = vsel %vm3116_vm7, %v4056_v54, %v4057_v35 }
 0x603   : > { %7946 = vrot.lane.b32.xlu1 %v7945_v52, %s8159_s26  ;;  %v4025_v52 = vrot.slane %v11019_v62, 3 }
 0x604   : > { %v11094_v33 = vmax.f32 %v3910_v50, 0.0 }
 0x606   : > { %v3975_v11 = vrot.slane %v11094_v33, 1 }
 0x607   : > { %v3863_v45 = vpop.f32.mrf.mxu2  ;;  %v3912_v5 = vpop.f32.mrf.mxu3 }
 0x608   : > { %v3864_v19 = vadd.f32 %v3863_v45, %v10982_v36  ;;  %v3976_v12 = vsel %vm1974_vm1, %v3973_v15, %v3975_v11  ;;  %v4023_v45 = vrot.slane %v11012_v20, 3 }
 0x60a   : > { %v3913_v41 = vadd.f32 %v3912_v5, %v3864_v19  ;;  %v3997_v5 = vrot.slane %v11046_v27, 2 }
 0x60c   : > { %v11099_v3 = vmax.f32 %v3913_v41, 0.0  ;;  %v4026_v41 = vsel %vm3081_vm6, %v4023_v45, %v4025_v52 }
 0x60e   : > { %v3977_v31 = vrot.slane %v11099_v3, 1 }
 0x60f   : > { %v3865_v51 = vpop.f32.mrf.mxu2  ;;  %v3914_v13 = vpop.f32.mrf.mxu3 }
 0x610   : > { %v3866_v36 = vadd.f32 %v3865_v51, %v3817_v26  ;;  %v3978_v10 = vsel %vm1974_vm1, %v3975_v11, %v3977_v31  ;;  %v4000_v11 = vsel %vm2137_vm2, %v3997_v5, %v3999_v37 }
 0x611   : > { %v7950_v7 = vpack.i.bf16 %v3978_v10, %v3976_v12  ;;  %v4059_v10 = vrot.slane %v11019_v62, 4 }
 0x612   : > { %v3915_v56 = vadd.f32 %v3914_v13, %v3866_v36  ;;  %v3998_v36 = vsel %vm2137_vm2, %v3995_v55, %v3997_v5  ;;  %v4033_v55 = vrot.slane %v11051_v39, 3 }
 0x613   : > { %7951 = vrot.lane.b32.xlu2 %v7950_v7, %s8159_s26  ;;  %v7995_v12 = vpack.i.bf16 %v4000_v11, %v3998_v36  ;;  %v4029_v7 = vrot.slane %v11038_v43, 3  ;;  %v4060_v46 = vsel %vm3116_vm7, %v4057_v35, %v4059_v10  ;;  %v4067_v11 = vrot.slane %v11051_v39, 4 }
 0x614   : > { %v11120_v6 = vmax.f32 %v3915_v56, 0.0  ;;  %v4001_v56 = vrot.slane %v11062_v42, 2  ;;  %v7975_v1 = vpack.i.bf16 %v4060_v46, %v4058_v34  ;;  %v4034_v18 = vsel %vm3081_vm6, %v4031_v61, %v4033_v55 }
 0x615   : > { %v4071_v46 = vrot.slane %v11067_v53, 4  ;;  %v4069_v34 = vrot.slane %v11062_v42, 4 }
 0x616   : > { %v3979_v32 = vrot.slane %v11120_v6, 1  ;;  %v4002_v59 = vsel %vm2137_vm2, %v3999_v37, %v4001_v56 }
 0x617   : > { %v3868_v2 = vpop.f32.mrf.mxu2  ;;  %v3917_v40 = vpop.f32.mrf.mxu3 }
 0x618   : > { %v3869_v25 = vadd.f32 %v3868_v2, %v10999_v4  ;;  %v3980_v57 = vsel %vm1974_vm1, %v3977_v31, %v3979_v32  ;;  %v4024_v31 = vsel %vm3081_vm6, %v4022_v0, %v4023_v45  ;;  %v4030_v2 = vsel %vm3081_vm6, %v4027_v8, %v4029_v7 }
 0x619   : > { %v7965_v13 = vpack.i.bf16 %v4026_v41, %v4024_v31  ;;  %v4032_v45 = vsel %vm3081_vm6, %v4029_v7, %v4031_v61  ;;  %v4035_v31 = vrot.slane %v11062_v42, 3 }
 0x61a   : > { %v3918_v22 = vadd.f32 %v3917_v40, %v3869_v25  ;;  %v4028_v25 = vsel %vm3081_vm6, %v4025_v52, %v4027_v8 }
 0x61b   : > { %7961 = vrot.lane.b32.xlu2 %v7960_v16, %s8160_s30  ;;  %v7985_v16 = vpack.i.bf16 %v4030_v2, %v4028_v25  ;;  %v4041_v2 = vrot.slane %v11083_v28, 3 }
 0x61c   : > { %v11133_v4 = vmax.f32 %v3918_v22, 0.0  ;;  %v4063_v22 = vrot.slane %v11038_v43, 4 }
 0x61e   : > { %v3981_v30 = vrot.slane %v11133_v4, 1 }
 0x61f   : > { %v3870_v21 = vpop.f32.mrf.mxu2  ;;  %v3919_v48 = vpop.f32.mrf.mxu3 }
 0x620   : > { %v3871_v44 = vadd.f32 %v3870_v21, %v3822_v14  ;;  %v3982_v15 = vsel %vm1974_vm1, %v3979_v32, %v3981_v30  ;;  %v4007_v32 = vrot.slane %v11083_v28, 2  ;;  %v7575_v14 = vld [vmem:[%s12497_s5 + $0x68] sm:$0xff]  ;;  %v4005_v21 = vrot.slane %v11078_v60, 2 }
 0x621   : > { %v7955_v29 = vpack.i.bf16 %v3982_v15, %v3980_v57  ;;  %v4064_v15 = vsel %vm3116_vm7, %v4061_v58, %v4063_v22  ;;  %4776 = vmatpush.bf16.msrb.mxu1 %v7575_v14 }
 0x622   : > { %v3920_v38 = vadd.f32 %v3919_v48, %v3871_v44  ;;  %v4008_v48 = vsel %vm2137_vm2, %v4005_v21, %v4007_v32 }
 0x623   : > { %7956 = vrot.lane.b32.xlu0 %v7955_v29, %s8159_s26  ;;  %7981 = vrot.lane.b32.xlu2 %v7980_v47, %s8160_s30 }
 0x624   : > { %v11147_v50 = vmax.f32 %v3920_v38, 0.0  ;;  %v4062_v38 = vsel %vm3116_vm7, %v4059_v10, %v4061_v58 }
 0x625   : > { %v7990_v37 = vpack.i.bf16 %v4064_v15, %v4062_v38 }
 0x626   : > { %v3983_v19 = vrot.slane %v11147_v50, 1 }
 0x628   : > { %v3984_v49 = vsel %vm1974_vm1, %v3981_v30, %v3983_v19  ;;  %v3987_v26 = vsel %vm1974_vm1, %v3983_v19, %v3954_v63  ;;  %v4003_v63 = vrot.slane %v11067_v53, 2  ;;  %v8000_v19 = vpack.i.bf16 %v4034_v18, %v4032_v45 }
 0x629   : > { %v7970_v51 = vpack.i.bf16 %v3987_v26, %v3984_v49  ;;  %v4011_v49 = vrot.slane %v11099_v3, 2  ;;  %v4065_v26 = vrot.slane %v11046_v27, 4  ;;  %v4073_v45 = vrot.slane %v11078_v60, 4 }
 0x62a   : > { %v4004_v40 = vsel %vm2137_vm2, %v4001_v56, %v4003_v63  ;;  %v4006_v5 = vsel %vm2137_vm2, %v4003_v63, %v4005_v21  ;;  %v4036_v63 = vsel %vm3081_vm6, %v4033_v55, %v4035_v31  ;;  %v7574_v55 = vld [vmem:[%s12497_s5 + $0x60] sm:$0xff]  ;;  %v4070_v21 = vsel %vm3116_vm7, %v4067_v11, %v4069_v34 }
 0x62b   : > { %7971 = vrot.lane.b32.xlu1 %v7970_v51, %s8159_s26  ;;  %7966 = vrot.lane.b32.xlu0 %v7965_v13, %s8161_s27  ;;  %v8010_v23 = vpack.i.bf16 %v4004_v40, %v4002_v59  ;;  %s8162_s26 = smov 96   ;;  %v8025_v41 = vpack.i.bf16 %v4008_v48, %v4006_v5  ;;  %v4009_v51 = vrot.slane %v11094_v33, 2  ;;  %v4068_v13 = vsel %vm3116_vm7, %v4065_v26, %v4067_v11 }
 0x62c   : > { %7996 = vrot.lane.b32.xlu2 %v7995_v12, %s8160_s30  ;;  %v4066_v10 = vsel %vm3116_vm7, %v4063_v22, %v4065_v26  ;;  %v4015_v40 = vrot.slane %v11133_v4, 2  ;;  %v4072_v22 = vsel %vm3116_vm7, %v4069_v34, %v4071_v46  ;;  %4777 = vmatpush.bf16.msrb.mxu1 %v7574_v55  ;;  %v4043_v5 = vrot.slane %v11094_v33, 3 }
 0x62d   : > { %v4012_v12 = vsel %vm2137_vm2, %v4009_v51, %v4011_v49  ;;  %v8005_v7 = vpack.i.bf16 %v4068_v13, %v4066_v10  ;;  %v4010_v35 = vsel %vm2137_vm2, %v4007_v32, %v4009_v51  ;;  %v8020_v18 = vpack.i.bf16 %v4072_v22, %v4070_v21  ;;  %v7585_v21 = vld [vmem:[%s12497_s5 + $0xb8] sm:$0xff] }
 0x62e   : > { %v8040_v56 = vpack.i.bf16 %v4012_v12, %v4010_v35  ;;  %v4044_v13 = vsel %vm3081_vm6, %v4041_v2, %v4043_v5  ;;  %v7571_v12 = vld [vmem:[%s12497_s5 + $0x48] sm:$0xff]  ;;  %4823 = vmatpush.bf16.msra.mxu2 %v7585_v21 }
 0x633   : > { %7976 = vrot.lane.b32.xlu1 %v7975_v1, %s8162_s26  ;;  %7986 = vrot.lane.b32.xlu0 %v7985_v16, %s8161_s27  ;;  %v4039_v1 = vrot.slane %v11078_v60, 3  ;;  %v4013_v16 = vrot.slane %v11120_v6, 2 }
 0x634   : > { %8011 = vrot.lane.b32.xlu2 %v8010_v23, %s8160_s30 }
 0x635   : > { %v11191_v30 = vpop.permute.xlu0 %7926  ;;  %v4042_v32 = vsel %vm3081_vm6, %v4039_v1, %v4041_v2  ;;  %v4016_v58 = vsel %vm2137_vm2, %v4013_v16, %v4015_v40 }
 0x636   : > { %v7929_v44 = vunpack.i.h.bf16 %v11191_v30  ;;  %v7928_v57 = vunpack.i.l.bf16 %v11191_v30  ;;  %v7579_v30 = vld [vmem:[%s12497_s5 + $0x88] sm:$0xff] }
 0x638   : > { %v4288_v29 = vsel %vm4286_vm11, %v11012_v20, %v7929_v44  ;;  %v4287_v47 = vsel %vm4286_vm11, %v11017_v9, %v7928_v57  ;;  %v4037_v20 = vrot.slane %v11067_v53, 3  ;;  %v7583_v9 = vld [vmem:[%s12497_s5 + $0xa8] sm:$0xff] }
 0x639   : > { %v4428_v52 = vpack.c.bf16 %v4288_v29, %v4287_v47  ;;  %v4014_v29 = vsel %vm2137_vm2, %v4011_v49, %v4013_v16  ;;  %v7570_v16 = vld [vmem:[%s12497_s5 + $0x40] sm:$0xff] }
 0x63a   : > { %v4038_v36 = vsel %vm3081_vm6, %v4035_v31, %v4037_v20  ;;  %v4040_v48 = vsel %vm3081_vm6, %v4037_v20, %v4039_v1  ;;  %v8055_v38 = vpack.i.bf16 %v4016_v58, %v4014_v29  ;;  %v4074_v31 = vsel %vm3116_vm7, %v4071_v46, %v4073_v45 }
 0x63b   : > { %4733 = vmatmul.bf16.vlgmr.msrb.gmra.mxu0 %v4428_v52  ;;  %7991 = vrot.lane.b32.xlu1 %v7990_v37, %s8162_s26  ;;  %v8015_v8 = vpack.i.bf16 %v4038_v36, %v4036_v63  ;;  %v8030_v47 = vpack.i.bf16 %v4042_v32, %v4040_v48  ;;  %v4075_v52 = vrot.slane %v11083_v28, 4  ;;  %v7573_v37 = vld [vmem:[%s12497_s5 + $0x58] sm:$0xff]  ;;  %v4079_v36 = vrot.slane %v11099_v3, 4 }
 0x63c   : > { %8001 = vrot.lane.b32.xlu0 %v8000_v19, %s8161_s27  ;;  %8026 = vrot.lane.b32.xlu2 %v8025_v41, %s8160_s30  ;;  %v7572_v41 = vld [vmem:[%s12497_s5 + $0x50] sm:$0xff] }
 0x63d   : > { %4778 = vmatpush.bf16.msrb.mxu1 %v7573_v37  ;;  %v4076_v19 = vsel %vm3116_vm7, %v4073_v45, %v4075_v52  ;;  %v11271_v11 = vpop.permute.xlu2 %7936  ;;  %v7584_v45 = vld [vmem:[%s12497_s5 + $0xb0] sm:$0xff] }
 0x63e   : > { %v8035_v51 = vpack.i.bf16 %v4076_v19, %v4074_v31  ;;  %v7939_v10 = vunpack.i.h.bf16 %v11271_v11  ;;  %4824 = vmatpush.bf16.msra.mxu2 %v7584_v45  ;;  %v7591_v31 = vld [vmem:[%s12497_s5 + $0xe8] sm:$0xff]  ;;  %v7597_v45 = vld [vmem:[%s12497_s5 + $0x118] sm:$0xff] }
 0x641   : > { %4779 = vmatpush.bf16.msrb.mxu1 %v7572_v41 }
 0x642   : > { %4825 = vmatpush.bf16.msra.mxu2 %v7583_v9  ;;  %v7595_v9 = vld [vmem:[%s12497_s5 + $0x108] sm:$0xff] }
 0x643   : > { %8006 = vrot.lane.b32.xlu1 %v8005_v7, %s8162_s26  ;;  %v7938_v7 = vunpack.i.l.bf16 %v11271_v11  ;;  %v7596_v11 = vld [vmem:[%s12497_s5 + $0x110] sm:$0xff] }
 0x644   : > { %8016 = vrot.lane.b32.xlu0 %v8015_v8, %s8161_s27  ;;  %8041 = vrot.lane.b32.xlu2 %v8040_v56, %s8160_s30  ;;  %v4077_v8 = vrot.slane %v11094_v33, 4  ;;  %v4047_v56 = vrot.slane %v11120_v6, 3 }
 0x645   : > { %v11233_v25 = vpop.permute.xlu1 %7931  ;;  %4780 = vmatpush.bf16.msrb.mxu1 %v7571_v12  ;;  %v4291_v2 = vsel %vm4286_vm11, %v11038_v43, %v7938_v7  ;;  %v4083_v43 = vrot.slane %v11133_v4, 4 }
 0x646   : > { %v7934_v59 = vunpack.i.h.bf16 %v11233_v25  ;;  %v7933_v23 = vunpack.i.l.bf16 %v11233_v25  ;;  %v4080_v46 = vsel %vm3116_vm7, %v4077_v8, %v4079_v36  ;;  %v4078_v1 = vsel %vm3116_vm7, %v4075_v52, %v4077_v8  ;;  %v7590_v8 = vld [vmem:[%s12497_s5 + $0xe0] sm:$0xff]  ;;  %v7587_v25 = vld [vmem:[%s12497_s5 + $0xc8] sm:$0xff] }
 0x647   : > { %v8050_v22 = vpack.i.bf16 %v4080_v46, %v4078_v1 }
 0x648   : > { %v4289_v14 = vsel %vm4286_vm11, %v11019_v62, %v7933_v23  ;;  %v4290_v61 = vsel %vm4286_vm11, %v11033_v17, %v7934_v59  ;;  %v4045_v62 = vrot.slane %v11099_v3, 3  ;;  %v4017_v17 = vrot.slane %v11147_v50, 2 }
 0x649   : > { %v4433_v15 = vpack.c.bf16 %v4290_v61, %v4289_v14  ;;  %4781 = vmatpush.bf16.msrb.mxu1 %v7570_v16  ;;  %v4081_v14 = vrot.slane %v11120_v6, 4 }
 0x64a   : > { %v4046_v20 = vsel %vm3081_vm6, %v4043_v5, %v4045_v62  ;;  %v4018_v49 = vsel %vm2137_vm2, %v4015_v40, %v4017_v17  ;;  %v4021_v26 = vsel %vm2137_vm2, %v4017_v17, %v3988_v24  ;;  %v4049_v24 = vrot.slane %v11133_v4, 3 }
 0x64b   : > { %4738 = vmatmul.bf16.gmra.mxu0 %v4433_v15  ;;  %8021 = vrot.lane.b32.xlu1 %v8020_v18, %s8162_s26  ;;  %v8045_v63 = vpack.i.bf16 %v4046_v20, %v4044_v13  ;;  %v8070_v35 = vpack.i.bf16 %v4021_v26, %v4018_v49  ;;  %v4292_v40 = vsel %vm4286_vm11, %v11046_v27, %v7939_v10  ;;  %v4051_v27 = vrot.slane %v11147_v50, 3  ;;  %v7592_v49 = vld [vmem:[%s12497_s5 + $0xf0] sm:$0xff]  ;;  %v7581_v26 = vld [vmem:[%s12497_s5 + $0x98] sm:$0xff] }
 0x64c   : > { %8031 = vrot.lane.b32.xlu0 %v8030_v47, %s8161_s27  ;;  %8056 = vrot.lane.b32.xlu2 %v8055_v38, %s8160_s30  ;;  %v4050_v34 = vsel %vm3081_vm6, %v4047_v56, %v4049_v24  ;;  %v4048_v55 = vsel %vm3081_vm6, %v4045_v62, %v4047_v56  ;;  %v4438_v32 = vpack.c.bf16 %v4292_v40, %v4291_v2  ;;  %v4085_v38 = vrot.slane %v11147_v50, 4 }
 0x64d   : > { %v8060_v58 = vpack.i.bf16 %v4050_v34, %v4048_v55  ;;  %v4084_v61 = vsel %vm3116_vm7, %v4081_v14, %v4083_v43  ;;  %v4052_v15 = vsel %vm3081_vm6, %v4049_v24, %v4051_v27  ;;  %v4055_v18 = vsel %vm3081_vm6, %v4051_v27, %v4022_v0  ;;  %v7580_v24 = vld [vmem:[%s12497_s5 + $0x90] sm:$0xff]  ;;  %v7578_v27 = vld [vmem:[%s12497_s5 + $0x80] sm:$0xff] }
 0x64e   : > { %v4082_v48 = vsel %vm3116_vm7, %v4079_v36, %v4081_v14  ;;  %v8075_v47 = vpack.i.bf16 %v4055_v18, %v4052_v15  ;;  %v4086_v37 = vsel %vm3116_vm7, %v4083_v43, %v4085_v38  ;;  %v4089_v0 = vsel %vm3116_vm7, %v4085_v38, %v4056_v54  ;;  %v7593_v54 = vld [vmem:[%s12497_s5 + $0xf8] sm:$0xff]  ;;  %v7588_v14 = vld [vmem:[%s12497_s5 + $0xd0] sm:$0xff]  ;;  %v7598_v38 = vld [vmem:[%s12497_s5 + $0x120] sm:$0xff] }
 0x64f   : > { %v8065_v29 = vpack.i.bf16 %v4084_v61, %v4082_v48  ;;  %v8080_v41 = vpack.i.bf16 %v4089_v0, %v4086_v37  ;;  %4872 = vmatpush.bf16.msra.mxu3 %v7593_v54 }
 0x653   : > { %8036 = vrot.lane.b32.xlu1 %v8035_v51, %s8162_s26  ;;  %4873 = vmatpush.bf16.msra.mxu3 %v7592_v49 }
 0x654   : > { %8046 = vrot.lane.b32.xlu0 %v8045_v63, %s8161_s27  ;;  %8071 = vrot.lane.b32.xlu2 %v8070_v35, %s8160_s30 }
 0x657   : > { %4874 = vmatpush.bf16.msra.mxu3 %v7591_v31  ;;  %v7594_v31 = vld [vmem:[%s12497_s5 + $0x100] sm:$0xff] }
 0x65b   : > { %8051 = vrot.lane.b32.xlu1 %v8050_v22, %s8162_s26  ;;  %4743 = vmatmul.bf16.gmra.mxu0 %v4438_v32 }
 0x65c   : > { %8061 = vrot.lane.b32.xlu0 %v8060_v58, %s8161_s27  ;;  %4875 = vmatpush.bf16.msra.mxu3 %v7590_v8 }
 0x663   : > { %8066 = vrot.lane.b32.xlu1 %v8065_v29, %s8162_s26 }
 0x664   : > { %8076 = vrot.lane.b32.xlu0 %v8075_v47, %s8161_s27  ;;  %v7586_v47 = vld [vmem:[%s12497_s5 + $0xc0] sm:$0xff]  ;;  %s8165_s27 = smov 76  }
 0x665   : > { %v11324_v52 = vpop.permute.xlu0 %7941 }
 0x666   : > { %v7944_v62 = vunpack.i.h.bf16 %v11324_v52  ;;  %v7943_v17 = vunpack.i.l.bf16 %v11324_v52 }
 0x668   : > { %v4293_v5 = vsel %vm4286_vm11, %v11051_v39, %v7943_v17  ;;  %v4294_v19 = vsel %vm4286_vm11, %v11062_v42, %v7944_v62  ;;  %v7582_v42 = vld [vmem:[%s12497_s5 + $0xa0] sm:$0xff] }
 0x669   : > { %v4443_v20 = vpack.c.bf16 %v4294_v19, %v4293_v5  ;;  %4826 = vmatpush.bf16.msra.mxu2 %v7582_v42 }
 0x66b   : > { %8081 = vrot.lane.b32.xlu1 %v8080_v41, %s8162_s26  ;;  %4748 = vmatmul.bf16.gmra.mxu0 %v4443_v20  ;;  %s8166_s26 = smov 50  }
 0x66d   : > { %v11350_v39 = vpop.permute.xlu2 %7951  ;;  %4827 = vmatpush.bf16.msra.mxu2 %v7581_v26 }
 0x66e   : > { %v7953_v21 = vunpack.i.l.bf16 %v11350_v39 }
 0x670   : > { %v4297_v15 = vsel %vm4286_vm11, %v11083_v28, %v7953_v21 }
 0x671   : > { %4828 = vmatpush.bf16.msra.mxu2 %v7580_v24 }
 0x675   : > { %v11364_v51 = vpop.permute.xlu1 %7946  ;;  %v11366_v13 = vpop.permute.xlu2 %7961  ;;  %4829 = vmatpush.bf16.msra.mxu2 %v7579_v30 }
 0x676   : > { %v7949_v36 = vunpack.i.h.bf16 %v11364_v51  ;;  %v7948_v12 = vunpack.i.l.bf16 %v11364_v51  ;;  %v7964_v63 = vunpack.i.h.bf16 %v11366_v13  ;;  %v7963_v35 = vunpack.i.l.bf16 %v11366_v13 }
 0x678   : > { %v4305_v56 = vsel %vm4303_vm12, %v7929_v44, %v7964_v63  ;;  %v4304_v46 = vsel %vm4303_vm12, %v7928_v57, %v7963_v35  ;;  %v4295_v2 = vsel %vm4286_vm11, %v11067_v53, %v7948_v12  ;;  %v4296_v40 = vsel %vm4286_vm11, %v11078_v60, %v7949_v36  ;;  %v7589_v44 = vld [vmem:[%s12497_s5 + $0xd8] sm:$0xff]  ;;  %v4427_v53 = vld [vmem:[%s12497_s5 + $0x128] sm:$0xf] }
 0x679   : > { %v4429_v34 = vpack.c.bf16 %v4305_v56, %v4304_v46  ;;  %v4448_v1 = vpack.c.bf16 %v4296_v40, %v4295_v2  ;;  %v4621_v57 = vunpack.c.l.b16 %v4427_v53  ;;  %4876 = vmatpush.bf16.msra.mxu3 %v7589_v44  ;;  %4830 = vmatpush.bf16.msra.mxu2 %v7578_v27 }
 0x67b   : > { %4753 = vmatmul.bf16.gmra.mxu0 %v4448_v1  ;;  %4782 = vmatmul.bf16.vlgmr.msrb.gmra.mxu1 %v4429_v34  ;;  %v4659_v55 = vpack.c.b16 %v4621_v57, %v4621_v57 }
 0x67d   : > { %v11405_v60 = vpop.permute.xlu2 %7981  ;;  %v4723_v43 = vsel %vm3116_vm7, %v4659_v55, 0  ;;  %4877 = vmatpush.bf16.msra.mxu3 %v7588_v14 }
 0x67e   : > { %v7984_v16 = vunpack.i.h.bf16 %v11405_v60  ;;  %v7983_v22 = vunpack.i.l.bf16 %v11405_v60  ;;  %4923 = vmatpush.bf16.msra.mxu0 %v4723_v43 }
 0x680   : > { %v4306_v32 = vsel %vm4303_vm12, %v7933_v23, %v7983_v22  ;;  %v4307_v58 = vsel %vm4303_vm12, %v7934_v59, %v7984_v16  ;;  %v7954_v23 = vunpack.i.h.bf16 %v11350_v39 }
 0x681   : > { %v4434_v61 = vpack.c.bf16 %v4307_v58, %v4306_v32  ;;  %4878 = vmatpush.bf16.msra.mxu3 %v7587_v25 }
 0x682   : > { %v4298_v18 = vsel %vm4286_vm11, %v11094_v33, %v7954_v23  ;;  %4924 = vmatpush.bf16.msra.mxu0 %v7598_v38 }
 0x683   : > { %v4453_v37 = vpack.c.bf16 %v4298_v18, %v4297_v15 }
 0x685   : > { %4879 = vmatpush.bf16.msra.mxu3 %v7586_v47 }
 0x686   : > { %v11431_v59 = vpop.permute.xlu2 %7996  ;;  %4925 = vmatpush.bf16.msra.mxu0 %v7597_v45 }
 0x687   : > { %v7999_v48 = vunpack.i.h.bf16 %v11431_v59  ;;  %v7998_v29 = vunpack.i.l.bf16 %v11431_v59 }
 0x689   : > { %v4308_v28 = vsel %vm4303_vm12, %v7938_v7, %v7998_v29  ;;  %v4309_v33 = vsel %vm4303_vm12, %v7939_v10, %v7999_v48 }
 0x68a   : > { %v4439_v0 = vpack.c.bf16 %v4309_v33, %v4308_v28  ;;  %4926 = vmatpush.bf16.msra.mxu0 %v7596_v11 }
 0x68b   : > { %4758 = vmatmul.bf16.gmra.mxu0 %v4453_v37  ;;  %4787 = vmatmul.bf16.gmra.mxu1 %v4434_v61 }
 0x68e   : > { %v11458_v5 = vpop.permute.xlu2 %8011  ;;  %4927 = vmatpush.bf16.msra.mxu0 %v7595_v9 }
 0x68f   : > { %v8014_v7 = vunpack.i.h.bf16 %v11458_v5  ;;  %v8013_v19 = vunpack.i.l.bf16 %v11458_v5 }
 0x691   : > { %v4310_v10 = vsel %vm4303_vm12, %v7943_v17, %v8013_v19  ;;  %v4311_v41 = vsel %vm4303_vm12, %v7944_v62, %v8014_v7 }
 0x692   : > { %v4444_v20 = vpack.c.bf16 %v4311_v41, %v4310_v10  ;;  %4928 = vmatpush.bf16.msra.mxu0 %v7594_v31 }
 0x695   : > { %v7957_v54 = vpop.permute.xlu0 %7956 }
 0x696   : > { %v7959_v39 = vunpack.i.h.bf16 %v7957_v54  ;;  %v7958_v42 = vunpack.i.l.bf16 %v7957_v54  ;;  %v11478_v49 = vpop.permute.xlu2 %8026 }
 0x697   : > { %v8029_v17 = vunpack.i.h.bf16 %v11478_v49  ;;  %v8028_v26 = vunpack.i.l.bf16 %v11478_v49 }
 0x698   : > { %v4299_v52 = vsel %vm4286_vm11, %v11099_v3, %v7958_v42  ;;  %v4300_v62 = vsel %vm4286_vm11, %v11120_v6, %v7959_v39 }
 0x699   : > { %v4458_v24 = vpack.c.bf16 %v4300_v62, %v4299_v52  ;;  %v11494_v8 = vsel %vm4303_vm12, %v7948_v12, %v8028_v26  ;;  %v11501_v3 = vsel %vm4303_vm12, %v7949_v36, %v8029_v17 }
 0x69a   : > { %v4449_v6 = vpack.c.bf16 %v11501_v3, %v11494_v8 }
 0x69b   : > { %4763 = vmatmul.bf16.gmra.mxu0 %v4458_v24  ;;  %4792 = vmatmul.bf16.gmra.mxu1 %v4439_v0 }
 0x69d   : > { %v7972_v56 = vpop.permute.xlu1 %7971  ;;  %v7967_v46 = vpop.permute.xlu0 %7966 }
 0x69e   : > { %v7969_v2 = vunpack.i.h.bf16 %v7967_v46  ;;  %v7968_v40 = vunpack.i.l.bf16 %v7967_v46  ;;  %v11505_v12 = vpop.permute.xlu2 %8041  ;;  %v7974_v57 = vunpack.i.h.bf16 %v7972_v56  ;;  %v7973_v55 = vunpack.i.l.bf16 %v7972_v56 }
 0x69f   : > { %v8044_v34 = vunpack.i.h.bf16 %v11505_v12  ;;  %v8043_v51 = vunpack.i.l.bf16 %v11505_v12 }
 0x6a0   : > { %v4321_v36 = vsel %vm4320_vm13, %v7963_v35, %v7968_v40  ;;  %v4322_v1 = vsel %vm4320_vm13, %v7964_v63, %v7969_v2  ;;  %v4301_v43 = vsel %vm4286_vm11, %v11133_v4, %v7973_v55  ;;  %v4302_v27 = vsel %vm4286_vm11, %v11147_v50, %v7974_v57 }
 0x6a1   : > { %v4430_v30 = vpack.c.bf16 %v4322_v1, %v4321_v36  ;;  %v11518_v44 = vsel %vm4303_vm12, %v7953_v21, %v8043_v51  ;;  %v11523_v53 = vsel %vm4303_vm12, %v7954_v23, %v8044_v34  ;;  %v4463_v18 = vpack.c.bf16 %v4302_v27, %v4301_v43 }
 0x6a2   : > { %v4454_v35 = vpack.c.bf16 %v11523_v53, %v11518_v44 }
 0x6a3   : > { %4831 = vmatmul.bf16.vlgmr.msra.gmra.mxu2 %v4430_v30 }
 0x6a5   : > { %v7977_v13 = vpop.permute.xlu1 %7976  ;;  %v7987_v14 = vpop.permute.xlu0 %7986 }
 0x6a6   : > { %v7979_v32 = vunpack.i.h.bf16 %v7977_v13  ;;  %v7978_v63 = vunpack.i.l.bf16 %v7977_v13  ;;  %v11527_v58 = vpop.permute.xlu2 %8056  ;;  %v7989_v50 = vunpack.i.h.bf16 %v7987_v14  ;;  %v7988_v38 = vunpack.i.l.bf16 %v7987_v14 }
 0x6a7   : > { %v8059_v61 = vunpack.i.h.bf16 %v11527_v58  ;;  %v8058_v23 = vunpack.i.l.bf16 %v11527_v58 }
 0x6a8   : > { %v4337_v21 = vsel %vm647_vm0, %v7968_v40, %v7978_v63  ;;  %v4338_v25 = vsel %vm647_vm0, %v7969_v2, %v7979_v32  ;;  %v4323_v33 = vsel %vm4320_vm13, %v7983_v22, %v7988_v38  ;;  %v4324_v0 = vsel %vm4320_vm13, %v7984_v16, %v7989_v50 }
 0x6a9   : > { %v4431_v15 = vpack.c.bf16 %v4338_v25, %v4337_v21  ;;  %v11540_v47 = vsel %vm4303_vm12, %v7958_v42, %v8058_v23  ;;  %v11545_v4 = vsel %vm4303_vm12, %v7959_v39, %v8059_v61  ;;  %v4435_v41 = vpack.c.bf16 %v4324_v0, %v4323_v33 }
 0x6aa   : > { %v4459_v37 = vpack.c.bf16 %v11545_v4, %v11540_v47  ;;  %v4432_v62 = vpack.c.bf16 %v7979_v32, %v7978_v63 }
 0x6ab   : > { %4768 = vmatmul.bf16.gmra.mxu0 %v4463_v18  ;;  %4797 = vmatmul.bf16.gmra.mxu1 %v4444_v20 }
 0x6ac   : > { %4880 = vmatmul.bf16.vlgmr.msra.gmra.mxu3 %v4431_v15 }
 0x6ad   : > { %v7992_v10 = vpop.permute.xlu1 %7991 }
 0x6ae   : > { %v11549_v28 = vpop.permute.xlu2 %8071  ;;  %v7994_v22 = vunpack.i.h.bf16 %v7992_v10  ;;  %v7993_v60 = vunpack.i.l.bf16 %v7992_v10  ;;  %v8002_v54 = vpop.permute.xlu0 %8001 }
 0x6af   : > { %v8074_v45 = vunpack.i.h.bf16 %v11549_v28  ;;  %v8073_v11 = vunpack.i.l.bf16 %v11549_v28  ;;  %v8004_v31 = vunpack.i.h.bf16 %v8002_v54  ;;  %v8003_v24 = vunpack.i.l.bf16 %v8002_v54 }
 0x6b0   : > { %v4339_v39 = vsel %vm647_vm0, %v7988_v38, %v7993_v60  ;;  %v4340_v42 = vsel %vm647_vm0, %v7989_v50, %v7994_v22  ;;  %v4437_v13 = vpack.c.bf16 %v7994_v22, %v7993_v60 }
 0x6b1   : > { %v11562_v20 = vsel %vm4303_vm12, %v7973_v55, %v8073_v11  ;;  %v11567_v9 = vsel %vm4303_vm12, %v7974_v57, %v8074_v45  ;;  %v4436_v56 = vpack.c.bf16 %v4340_v42, %v4339_v39  ;;  %v4325_v46 = vsel %vm4320_vm13, %v7998_v29, %v8003_v24 }
 0x6b2   : > { %v4464_v16 = vpack.c.bf16 %v11567_v9, %v11562_v20  ;;  %v4326_v2 = vsel %vm4320_vm13, %v7999_v48, %v8004_v31  ;;  %v11638_v20 = vld [vmem:[%s12498_s6] ss:$0 sm:$0xff]  ;;  %vm5613_vm12 = vcmask 1041408  }
 0x6b3   : > { %4836 = vmatmul.bf16.gmra.mxu2 %v4435_v41  ;;  %v4440_v1 = vpack.c.bf16 %v4326_v2, %v4325_v46 }
 0x6b5   : > { %v8007_v40 = vpop.permute.xlu1 %8006 }
 0x6b6   : > { %v8009_v30 = vunpack.i.h.bf16 %v8007_v40  ;;  %v8008_v57 = vunpack.i.l.bf16 %v8007_v40  ;;  %v8017_v8 = vpop.permute.xlu0 %8016 }
 0x6b7   : > { %v8019_v29 = vunpack.i.h.bf16 %v8017_v8  ;;  %v8018_v32 = vunpack.i.l.bf16 %v8017_v8 }
 0x6b8   : > { %v11573_v52 = vpop.f32.mrf.mxu0  ;;  %v4341_v3 = vsel %vm647_vm0, %v8003_v24, %v8008_v57  ;;  %v4442_v18 = vpack.c.bf16 %v8009_v30, %v8008_v57 }
 0x6b9   : > { %v4327_v48 = vsel %vm4320_vm13, %v8013_v19, %v8018_v32  ;;  %v4328_v63 = vsel %vm4320_vm13, %v8014_v7, %v8019_v29 }
 0x6ba   : > { %v4445_v14 = vpack.c.bf16 %v4328_v63, %v4327_v48 }
 0x6bb   : > { %4802 = vmatmul.bf16.gmra.mxu1 %v4449_v6  ;;  %6987 = vmatmul.msk.bf16.vlgmr.msra.gmra.mxu0 %vm4697_vm14, %v4432_v62  ;;  %v4342_v6 = vsel %vm647_vm0, %v8004_v31, %v8009_v30 }
 0x6bc   : > { %4885 = vmatmul.bf16.gmra.mxu3 %v4436_v56  ;;  %v4441_v59 = vpack.c.bf16 %v4342_v6, %v4341_v3  ;;  %v4735_v56 = vadd.f32 %v11638_v20, %v11573_v52 }
 0x6bd   : > { %v8022_v43 = vpop.permute.xlu1 %8021 }
 0x6be   : > { %v8024_v21 = vunpack.i.h.bf16 %v8022_v43  ;;  %v8023_v25 = vunpack.i.l.bf16 %v8022_v43  ;;  %v8032_v44 = vpop.permute.xlu0 %8031 }
 0x6bf   : > { %v8034_v19 = vunpack.i.h.bf16 %v8032_v44  ;;  %v8033_v50 = vunpack.i.l.bf16 %v8032_v44 }
 0x6c0   : > { %v11585_v36 = vpop.f32.mrf.mxu0  ;;  %v4343_v53 = vsel %vm647_vm0, %v8018_v32, %v8023_v25  ;;  %v4447_v54 = vpack.c.bf16 %v8024_v21, %v8023_v25 }
 0x6c1   : > { %v4329_v7 = vsel %vm4320_vm13, %v8028_v26, %v8033_v50  ;;  %v4330_v38 = vsel %vm4320_vm13, %v8029_v17, %v8034_v19 }
 0x6c2   : > { %v4450_v10 = vpack.c.bf16 %v4330_v38, %v4329_v7 }
 0x6c3   : > { %4841 = vmatmul.bf16.gmra.mxu2 %v4440_v1 }
 0x6c5   : > { %v8037_v33 = vpop.permute.xlu1 %8036 }
 0x6c6   : > { %v8039_v41 = vunpack.i.h.bf16 %v8037_v33  ;;  %v8038_v22 = vunpack.i.l.bf16 %v8037_v33  ;;  %v8047_v47 = vpop.permute.xlu0 %8046 }
 0x6c7   : > { %v8049_v26 = vunpack.i.h.bf16 %v8047_v47  ;;  %v8048_v39 = vunpack.i.l.bf16 %v8047_v47 }
 0x6c8   : > { %v11589_v55 = vpop.f32.mrf.mxu0  ;;  %v4345_v4 = vsel %vm647_vm0, %v8033_v50, %v8038_v22  ;;  %v4452_v40 = vpack.c.bf16 %v8039_v41, %v8038_v22 }
 0x6c9   : > { %v4331_v17 = vsel %vm4320_vm13, %v8043_v51, %v8048_v39  ;;  %v4332_v42 = vsel %vm4320_vm13, %v8044_v34, %v8049_v26  ;;  %v4740_v63 = vadd.f32 %v11638_v20, %v11589_v55 }
 0x6ca   : > { %v4455_v24 = vpack.c.bf16 %v4332_v42, %v4331_v17 }
 0x6cb   : > { %4807 = vmatmul.bf16.gmra.mxu1 %v4454_v35  ;;  %6988 = vmatmul.msk.bf16.gmra.mxu0 %vm4697_vm14, %v4437_v13  ;;  %v4344_v35 = vsel %vm647_vm0, %v8019_v29, %v8024_v21 }
 0x6cc   : > { %4890 = vmatmul.bf16.gmra.mxu3 %v4441_v59  ;;  %v4446_v5 = vpack.c.bf16 %v4344_v35, %v4343_v53 }
 0x6cd   : > { %v8052_v62 = vpop.permute.xlu1 %8051 }
 0x6ce   : > { %v8054_v9 = vunpack.i.h.bf16 %v8052_v62  ;;  %v8062_v51 = vpop.permute.xlu0 %8061 }
 0x6cf   : > { %v8064_v30 = vunpack.i.h.bf16 %v8062_v51  ;;  %v8063_v57 = vunpack.i.l.bf16 %v8062_v51 }
 0x6d0   : > { %v11601_v27 = vpop.f32.mrf.mxu0  ;;  %v4348_v34 = vsel %vm647_vm0, %v8049_v26, %v8054_v9 }
 0x6d1   : > { %v4333_v52 = vsel %vm4320_vm13, %v8058_v23, %v8063_v57  ;;  %v4334_v3 = vsel %vm4320_vm13, %v8059_v61, %v8064_v30 }
 0x6d2   : > { %v4460_v32 = vpack.c.bf16 %v4334_v3, %v4333_v52 }
 0x6d3   : > { %4846 = vmatmul.bf16.gmra.mxu2 %v4445_v14 }
 0x6d5   : > { %v8067_v6 = vpop.permute.xlu1 %8066 }
 0x6d6   : > { %v8069_v59 = vunpack.i.h.bf16 %v8067_v6  ;;  %v8068_v48 = vunpack.i.l.bf16 %v8067_v6  ;;  %v8077_v43 = vpop.permute.xlu0 %8076 }
 0x6d7   : > { %v8079_v44 = vunpack.i.h.bf16 %v8077_v43  ;;  %v8078_v53 = vunpack.i.l.bf16 %v8077_v43 }
 0x6d8   : > { %v11605_v15 = vpop.f32.mrf.mxu0  ;;  %v4349_v14 = vsel %vm647_vm0, %v8063_v57, %v8068_v48  ;;  %v4350_v23 = vsel %vm647_vm0, %v8064_v30, %v8069_v59  ;;  %v4462_v47 = vpack.c.bf16 %v8069_v59, %v8068_v48 }
 0x6d9   : > { %v4461_v35 = vpack.c.bf16 %v4350_v23, %v4349_v14  ;;  %v4335_v55 = vsel %vm4320_vm13, %v8073_v11, %v8078_v53 }
 0x6db   : > { %4812 = vmatmul.bf16.gmra.mxu1 %v4459_v37  ;;  %6989 = vmatmul.msk.bf16.gmra.mxu0 %vm4697_vm14, %v4442_v18  ;;  %v4346_v37 = vsel %vm647_vm0, %v8034_v19, %v8039_v41  ;;  %v4336_v18 = vsel %vm4320_vm13, %v8074_v45, %v8079_v44  ;;  %vm5126_vm13 = vcmask 834560  }
 0x6dc   : > { %4895 = vmatmul.bf16.gmra.mxu3 %v4446_v5  ;;  %v4451_v49 = vpack.c.bf16 %v4346_v37, %v4345_v4  ;;  %v4465_v7 = vpack.c.bf16 %v4336_v18, %v4335_v55 }
 0x6dd   : > { %v8082_v19 = vpop.permute.xlu1 %8081 }
 0x6de   : > { %v8084_v38 = vunpack.i.h.bf16 %v8082_v19  ;;  %v8083_v33 = vunpack.i.l.bf16 %v8082_v19 }
 0x6e0   : > { %v11617_v0 = vpop.f32.mrf.mxu0  ;;  %v4351_v41 = vsel %vm647_vm0, %v8078_v53, %v8083_v33  ;;  %v4352_v22 = vsel %vm647_vm0, %v8079_v44, %v8084_v38  ;;  %v4467_v42 = vpack.c.bf16 %v8084_v38, %v8083_v33 }
 0x6e1   : > { %v4466_v4 = vpack.c.bf16 %v4352_v22, %v4351_v41 }
 0x6e3   : > { %4851 = vmatmul.bf16.gmra.mxu2 %v4450_v10  ;;  %v4745_v10 = vadd.f32 %v11638_v20, %v11605_v15 }
 0x6e8   : > { %v11621_v60 = vpop.f32.mrf.mxu0 }
 0x6e9   : > { %v4750_v15 = vadd.f32 %v11638_v20, %v11621_v60 }
 0x6eb   : > { %4817 = vmatmul.bf16.gmra.mxu1 %v4464_v16  ;;  %6990 = vmatmul.msk.bf16.gmra.mxu0 %vm4697_vm14, %v4447_v54  ;;  %v8053_v16 = vunpack.i.l.bf16 %v8052_v62 }
 0x6ec   : > { %4900 = vmatmul.bf16.gmra.mxu3 %v4451_v49 }
 0x6ed   : > { %v4347_v12 = vsel %vm647_vm0, %v8048_v39, %v8053_v16  ;;  %v4457_v21 = vpack.c.bf16 %v8054_v9, %v8053_v16 }
 0x6ee   : > { %v4456_v8 = vpack.c.bf16 %v4348_v34, %v4347_v12 }
 0x6f0   : > { %v11633_v31 = vpop.f32.mrf.mxu0 }
 0x6f1   : > { %v4752_v9 = vadd.f32 %v11638_v20, %v11633_v31 }
 0x6f3   : > { %4856 = vmatmul.bf16.gmra.mxu2 %v4455_v24 }
 0x6f8   : > { %v11644_v46 = vpop.f32.mrf.mxu0  ;;  %v4783_v2 = vpop.f32.mrf.mxu1 }
 0x6f9   : > { %v4784_v1 = vadd.f32 %v4783_v2, %v4735_v56  ;;  %v4755_v60 = vadd.f32 %v11638_v20, %v11644_v46 }
 0x6fb   : > { %6991 = vmatmul.msk.bf16.gmra.mxu0 %vm4697_vm14, %v4452_v40 }
 0x6fc   : > { %4905 = vmatmul.bf16.gmra.mxu3 %v4456_v8  ;;  %v4737_v8 = vadd.f32 %v11638_v20, %v11585_v36  ;;  %v4742_v36 = vadd.f32 %v11638_v20, %v11601_v27  ;;  %v4747_v27 = vadd.f32 %v11638_v20, %v11617_v0 }
 0x700   : > { %v11653_v13 = vpop.f32.mrf.mxu0  ;;  %v11655_v29 = vpop.f32.mrf.mxu1 }
 0x701   : > { %v4786_v31 = vadd.f32 %v11655_v29, %v4737_v8 }
 0x703   : > { %4861 = vmatmul.bf16.gmra.mxu2 %v4460_v32 }
 0x708   : > { %v11661_v58 = vpop.f32.mrf.mxu0  ;;  %v4788_v61 = vpop.f32.mrf.mxu1 }
 0x709   : > { %v4789_v25 = vadd.f32 %v4788_v61, %v4740_v63 }
 0x70b   : > { %6992 = vmatmul.msk.bf16.gmra.mxu0 %vm4697_vm14, %v4457_v21 }
 0x70c   : > { %4910 = vmatmul.bf16.gmra.mxu3 %v4461_v35 }
 0x710   : > { %v11670_v50 = vpop.f32.mrf.mxu0  ;;  %v4790_v5 = vpop.f32.mrf.mxu1 }
 0x711   : > { %v4791_v29 = vadd.f32 %v4790_v5, %v4742_v36 }
 0x713   : > { %4866 = vmatmul.bf16.gmra.mxu2 %v4465_v7 }
 0x718   : > { %v11676_v11 = vpop.f32.mrf.mxu0  ;;  %v4793_v28 = vpop.f32.mrf.mxu1 }
 0x719   : > { %v4794_v45 = vadd.f32 %v4793_v28, %v4745_v10 }
 0x71b   : > { %6993 = vmatmul.msk.bf16.gmra.mxu0 %vm4697_vm14, %v4462_v47 }
 0x71c   : > { %4915 = vmatmul.bf16.gmra.mxu3 %v4466_v4 }
 0x720   : > { %v11679_v37 = vpop.f32.mrf.mxu0  ;;  %v4795_v54 = vpop.f32.mrf.mxu1 }
 0x721   : > { %v4796_v5 = vadd.f32 %v4795_v54, %v4747_v27 }
 0x726   : > { %v4832_v26 = vpop.f32.mrf.mxu2 }
 0x727   : > { %v4833_v39 = vadd.f32 %v4832_v26, %v4784_v1 }
 0x728   : > { %v11683_v49 = vpop.f32.mrf.mxu0  ;;  %v4798_v17 = vpop.f32.mrf.mxu1 }
 0x729   : > { %v4799_v62 = vadd.f32 %v4798_v17, %v4750_v15 }
 0x72b   : > { %6994 = vmatmul.msk.bf16.gmra.mxu0 %vm4697_vm14, %v4467_v42  ;;  %vm5128_vm14 = vcmask 621568  }
 0x72e   : > { %v4834_v24 = vpop.f32.mrf.mxu2 }
 0x72f   : > { %v4881_v16 = vpop.f32.mrf.mxu3  ;;  %v4835_v6 = vadd.f32 %v4834_v24, %v4786_v31 }
 0x730   : > { %v4882_v56 = vadd.f32 %v4881_v16, %v4833_v39  ;;  %v11688_v51 = vpop.f32.mrf.mxu0  ;;  %v4800_v12 = vpop.f32.mrf.mxu1 }
 0x731   : > { %v4801_v34 = vadd.f32 %v4800_v12, %v4752_v9 }
 0x736   : > { %v4837_v2 = vpop.f32.mrf.mxu2 }
 0x737   : > { %v4838_v40 = vadd.f32 %v4837_v2, %v4789_v25  ;;  %v4883_v1 = vpop.f32.mrf.mxu3 }
 0x738   : > { %v4803_v30 = vpop.f32.mrf.mxu1  ;;  %v4930_v57 = vpop.f32.mrf.mxu0  ;;  %v4884_v59 = vadd.f32 %v4883_v1, %v4835_v6 }
 0x739   : > { %v4804_v52 = vadd.f32 %v4803_v30, %v4755_v60  ;;  %v4931_v3 = vadd.f32 %v4930_v57, %v4882_v56 }
 0x73b   : > { %v4970_v23 = vmax.f32 %v4931_v3, 0.0 }
 0x73e   : > { %v4839_v32 = vpop.f32.mrf.mxu2 }
 0x73f   : > { %v4886_v48 = vpop.f32.mrf.mxu3  ;;  %v4840_v55 = vadd.f32 %v4839_v32, %v4791_v29 }
 0x740   : > { %v4887_v63 = vadd.f32 %v4886_v48, %v4838_v40  ;;  %v4932_v43 = vpop.f32.mrf.mxu0  ;;  %v11705_v3 = vpop.f32.mrf.mxu1 }
 0x741   : > { %v4933_v14 = vadd.f32 %v4932_v43, %v4884_v59 }
 0x743   : > { %v4971_v46 = vmax.f32 %v4933_v14, 0.0 }
 0x745   : > { %v11695_v61 = vpack.c.bf16 %v4971_v46, %v4970_v23 }
 0x746   : > { %v4842_v21 = vpop.f32.mrf.mxu2 }
 0x747   : > { %v4843_v25 = vadd.f32 %v4842_v21, %v4794_v45  ;;  %v4888_v44 = vpop.f32.mrf.mxu3 }
 0x748   : > { %v4935_v53 = vpop.f32.mrf.mxu0  ;;  %v4889_v19 = vadd.f32 %v4888_v44, %v4840_v55  ;;  %v4808_v43 = vpop.f32.mrf.mxu1 }
 0x749   : > { %v4936_v35 = vadd.f32 %v4935_v53, %v4887_v63 }
 0x74b   : > { %v4972_v41 = vmax.f32 %v4936_v35, 0.0 }
 0x74e   : > { %v4844_v18 = vpop.f32.mrf.mxu2 }
 0x74f   : > { %v4891_v7 = vpop.f32.mrf.mxu3  ;;  %v4845_v39 = vadd.f32 %v4844_v18, %v4796_v5 }
 0x750   : > { %v4892_v38 = vadd.f32 %v4891_v7, %v4843_v25  ;;  %v4937_v33 = vpop.f32.mrf.mxu0  ;;  %v4810_v25 = vpop.f32.mrf.mxu1 }
 0x751   : > { %v4938_v10 = vadd.f32 %v4937_v33, %v4889_v19  ;;  %v4765_v33 = vadd.f32 %v11638_v20, %v11676_v11 }
 0x753   : > { %v4973_v22 = vmax.f32 %v4938_v10, 0.0 }
 0x755   : > { %v11699_v28 = vpack.c.bf16 %v4973_v22, %v4972_v41  ;;  %v4767_v22 = vadd.f32 %v11638_v20, %v11679_v37 }
 0x756   : > { %v4847_v47 = vpop.f32.mrf.mxu2 }
 0x757   : > { %v4848_v45 = vadd.f32 %v4847_v47, %v4799_v62  ;;  %v4893_v4 = vpop.f32.mrf.mxu3 }
 0x758   : > { %v4940_v26 = vpop.f32.mrf.mxu0  ;;  %v4894_v42 = vadd.f32 %v4893_v4, %v4845_v39  ;;  %v4813_v29 = vpop.f32.mrf.mxu1 }
 0x759   : > { %v4941_v15 = vadd.f32 %v4940_v26, %v4892_v38  ;;  %v4814_v47 = vadd.f32 %v4813_v29, %v4765_v33 }
 0x75b   : > { %v4974_v2 = vmax.f32 %v4941_v15, 0.0 }
 0x75e   : > { %v4849_v17 = vpop.f32.mrf.mxu2 }
 0x75f   : > { %v4850_v24 = vadd.f32 %v4849_v17, %v4801_v34  ;;  %v4896_v9 = vpop.f32.mrf.mxu3 }
 0x760   : > { %v4897_v16 = vadd.f32 %v4896_v9, %v4848_v45  ;;  %v4942_v56 = vpop.f32.mrf.mxu0  ;;  %v4815_v7 = vpop.f32.mrf.mxu1 }
 0x761   : > { %v4943_v12 = vadd.f32 %v4942_v56, %v4894_v42  ;;  %v4816_v45 = vadd.f32 %v4815_v7, %v4767_v22 }
 0x763   : > { %v4975_v60 = vmax.f32 %v4943_v12, 0.0  ;;  %v4770_v12 = vadd.f32 %v11638_v20, %v11683_v49 }
 0x765   : > { %v11703_v40 = vpack.c.bf16 %v4975_v60, %v4974_v2  ;;  %v4772_v60 = vadd.f32 %v11638_v20, %v11688_v51 }
 0x766   : > { %v4852_v62 = vpop.f32.mrf.mxu2 }
 0x767   : > { %v4853_v1 = vadd.f32 %v4852_v62, %v4804_v52  ;;  %v4898_v30 = vpop.f32.mrf.mxu3 }
 0x768   : > { %v4899_v57 = vadd.f32 %v4898_v30, %v4850_v24  ;;  %v4945_v8 = vpop.f32.mrf.mxu0  ;;  %v4818_v15 = vpop.f32.mrf.mxu1 }
 0x769   : > { %v4946_v0 = vadd.f32 %v4945_v8, %v4897_v16  ;;  %v4819_v62 = vadd.f32 %v4818_v15, %v4770_v12  ;;  %v7055_v12 = vld [vmem:[%s12499_s7 + $0x50] sm:$0xf] }
 0x76b   : > { %v4976_v59 = vmax.f32 %v4946_v0, 0.0  ;;  %v4762_v0 = vadd.f32 %v11638_v20, %v11670_v50 }
 0x76e   : > { %v11707_v54 = vpop.f32.mrf.mxu2 }
 0x76f   : > { %v4901_v31 = vpop.f32.mrf.mxu3 }
 0x770   : > { %v4902_v34 = vadd.f32 %v4901_v31, %v4853_v1  ;;  %v4947_v6 = vpop.f32.mrf.mxu0  ;;  %v4820_v37 = vpop.f32.mrf.mxu1 }
 0x771   : > { %v4948_v32 = vadd.f32 %v4947_v6, %v4899_v57  ;;  %v4821_v30 = vadd.f32 %v4820_v37, %v4772_v60  ;;  %v4760_v6 = vadd.f32 %v11638_v20, %v11661_v58  ;;  %v7610_v37 = vld [vmem:[%s12499_s7 + $0x54] sm:$0xf0]  ;;  %v7119_v60 = vld [vmem:[%s12499_s7 + $0xd0] sm:$0xf] }
 0x773   : > { %v4977_v48 = vmax.f32 %v4948_v32, 0.0  ;;  %v4811_v32 = vadd.f32 %v4810_v25, %v4762_v0  ;;  %v7608_v0 = vld [vmem:[%s12499_s7 + $0x44] sm:$0xf0] }
 0x775   : > { %v11709_v63 = vpack.c.bf16 %v4977_v48, %v4976_v59  ;;  %v4757_v48 = vadd.f32 %v11638_v20, %v11653_v13 }
 0x776   : > { %v4857_v52 = vpop.f32.mrf.mxu2 }
 0x777   : > { %v11711_v14 = vpop.f32.mrf.mxu3 }
 0x778   : > { %v4950_v23 = vpop.f32.mrf.mxu0 }
 0x779   : > { %v11713_v46 = vadd.f32 %v4950_v23, %v4902_v34  ;;  %v4809_v23 = vadd.f32 %v4808_v43, %v4760_v6 }
 0x77b   : > { %v4858_v7 = vadd.f32 %v4857_v52, %v4809_v23  ;;  %v4978_v52 = vmax.f32 %v11713_v46, 0.0  ;;  %v7606_v23 = vld [vmem:[%s12499_s7 + $0x34] sm:$0xf0] }
 0x77e   : > { %v4859_v53 = vpop.f32.mrf.mxu2 }
 0x77f   : > { %v4906_v21 = vpop.f32.mrf.mxu3  ;;  %v4860_v29 = vadd.f32 %v4859_v53, %v4811_v32 }
 0x780   : > { %v11715_v44 = vpop.f32.mrf.mxu0 }
 0x786   : > { %v4862_v55 = vpop.f32.mrf.mxu2 }
 0x787   : > { %v4908_v36 = vpop.f32.mrf.mxu3  ;;  %v4863_v4 = vadd.f32 %v4862_v55, %v4814_v47 }
 0x788   : > { %v4955_v35 = vpop.f32.mrf.mxu0 }
 0x78e   : > { %v4864_v38 = vpop.f32.mrf.mxu2 }
 0x78f   : > { %v4911_v18 = vpop.f32.mrf.mxu3  ;;  %v4865_v26 = vadd.f32 %v4864_v38, %v4816_v45  ;;  %v4909_v38 = vadd.f32 %v4908_v36, %v4860_v29 }
 0x790   : > { %v4957_v19 = vpop.f32.mrf.mxu0  ;;  %v4912_v27 = vadd.f32 %v4911_v18, %v4863_v4  ;;  %v4806_v18 = vadd.f32 %v11705_v3, %v4757_v48 }
 0x791   : > { %v4958_v58 = vadd.f32 %v4957_v19, %v4909_v38  ;;  %v8163_v19 = vmov 1.0|1.0   ;;  %v7031_v38 = vld [vmem:[%s12499_s7 + $0x20] sm:$0xf] }
 0x793   : > { %v4981_v13 = vmax.f32 %v4958_v58, 0.0  ;;  %v7602_v58 = vld [vmem:[%s12499_s7 + $0x14] sm:$0xf0] }
 0x796   : > { %v4867_v17 = vpop.f32.mrf.mxu2 }
 0x797   : > { %v4913_v10 = vpop.f32.mrf.mxu3  ;;  %v4868_v57 = vadd.f32 %v4867_v17, %v4819_v62  ;;  %v7135_v17 = vld [vmem:[%s12499_s7 + $0xf0] sm:$0xf]  ;;  %v7626_v62 = vld [vmem:[%s12499_s7 + $0xd4] sm:$0xf0] }
 0x798   : > { %v4960_v41 = vpop.f32.mrf.mxu0  ;;  %v4914_v5 = vadd.f32 %v4913_v10, %v4865_v26  ;;  %v4855_v10 = vadd.f32 %v11707_v54, %v4806_v18  ;;  %v7120_v6 = vor.u32 %v7626_v62, %v7119_v60  ;;  %v7622_v18 = vld [vmem:[%s12499_s7 + $0xb4] sm:$0xf0]  ;;  %v7303_v60 = vld [vmem:[%s12499_s7 + $0x240] sm:$0xf]  ;;  %v7167_v62 = vld [vmem:[%s12499_s7 + $0x130] sm:$0xf] }
 0x799   : > { %v4961_v39 = vadd.f32 %v4960_v41, %v4912_v27  ;;  %v4907_v41 = vadd.f32 %v4906_v21, %v4858_v7  ;;  %v7063_v27 = vld [vmem:[%s12499_s7 + $0x60] sm:$0xf] }
 0x79a   : > { %v4904_v22 = vadd.f32 %v11711_v14, %v4855_v10  ;;  %v4986_v14 = vlaneseq }
 0x79b   : > { %v4982_v16 = vmax.f32 %v4961_v39, 0.0  ;;  %v4956_v47 = vadd.f32 %v4955_v35, %v4907_v41  ;;  %v7023_v41 = vld [vmem:[%s12499_s7 + $0x10] sm:$0xf] }
 0x79c   : > { %v4953_v20 = vadd.f32 %v11715_v44, %v4904_v22  ;;  %v4989_v44 = vshrl.u32 %v4986_v14, 7  ;;  %v4987_v46 = vand.u32 127, %v4986_v14 }
 0x79d   : > { %v4980_v43 = vmax.f32 %v4956_v47, 0.0 }
 0x79e   : > { %v4869_v1 = vpop.f32.mrf.mxu2  ;;  %v4979_v3 = vmax.f32 %v4953_v20, 0.0  ;;  %v4990_v53 = vmul.u32 16, %v4989_v44  ;;  %v7618_v44 = vld [vmem:[%s12499_s7 + $0x94] sm:$0xf0] }
 0x79f   : > { %v4916_v9 = vpop.f32.mrf.mxu3  ;;  %v4870_v31 = vadd.f32 %v4869_v1, %v4821_v30  ;;  %v5000_v54 = vpack.c.bf16 %v4981_v13, %v4980_v43  ;;  %v7056_v1 = vor.u32 %v7610_v37, %v7055_v12  ;;  %v7199_v30 = vld [vmem:[%s12499_s7 + $0x170] sm:$0xf] }
 0x7a0   : > { %v4962_v42 = vpop.f32.mrf.mxu0  ;;  %v4917_v34 = vadd.f32 %v4916_v9, %v4868_v57  ;;  %v4999_v21 = vpack.c.bf16 %v4979_v3, %v4978_v52  ;;  %v5016_v36 = vadd.s32 1, %v4990_v53  ;;  %v5034_v35 = vadd.s32 2, %v4990_v53  ;;  %v7646_v57 = vld [vmem:[%s12499_s7 + $0x174] sm:$0xf0]  ;;  %v7620_v52 = vld [vmem:[%s12499_s7 + $0xa4] sm:$0xf0] }
 0x7a1   : > { %v4963_v24 = vadd.f32 %v4962_v42, %v4914_v5  ;;  %vm4991_vm0 = vcmp.eq.s32.totalorder %v4987_v46, %v4990_v53  ;;  %v5052_v45 = vadd.s32 3, %v4990_v53  ;;  %v5070_v4 = vadd.s32 4, %v4990_v53  ;;  %v7612_v5 = vld [vmem:[%s12499_s7 + $0x64] sm:$0xf0]  ;;  %v7630_v42 = vld [vmem:[%s12499_s7 + $0xf4] sm:$0xf0] }
 0x7a2   : > { %vm5017_vm15 = vcmp.eq.s32.totalorder %v4987_v46, %v5016_v36  ;;  %vm5035_vm1 = vcmp.eq.s32.totalorder %v4987_v46, %v5034_v35  ;;  %vm6996_vm3 = vmpackc.low %vm4991_vm0, %vm4991_vm0  ;;  %v5088_v26 = vadd.s32 5, %v4990_v53  ;;  %v7064_v9 = vor.u32 %v7612_v5, %v7063_v27  ;;  %v7600_v36 = vld [vmem:[%s12499_s7 + $0x4] sm:$0xf0]  ;;  %v11869_v35 = vld [vmem:[%s12499_s7 + $0x260] sm:$0x33] }
 0x7a3   : > { %v4983_v56 = vmax.f32 %v4963_v24, 0.0  ;;  %vm6999_vm2 = vmpackc.low %vm5017_vm15, %vm5017_vm15  ;;  %vm5053_vm5 = vcmp.eq.s32.totalorder %v4987_v46, %v5052_v45  ;;  %vm5071_vm6 = vcmp.eq.s32.totalorder %v4987_v46, %v5070_v4  ;;  %v7191_v45 = vld [vmem:[%s12499_s7 + $0x160] sm:$0xf]  ;;  %v7644_v4 = vld [vmem:[%s12499_s7 + $0x164] sm:$0xf0]  ;;  %vm5609_vm15 = vcmask 818176  }
 0x7a4   : > { %vm7002_vm4 = vmpackc.low %vm5035_vm1, %vm5035_vm1  ;;  %vm5089_vm8 = vcmp.eq.s32.totalorder %v4987_v46, %v5088_v26  ;;  %v7015_v46 = vld [vmem:[%s12499_s7] sm:$0xf]  ;;  %v5453_v26 = vunpack.c.l.b16 %v11869_v35  ;;  %v7616_v27 = vld [vmem:[%s12499_s7 + $0x84] sm:$0xf0]  ;;  %vm5130_vm0 = vcmask 408576   ;;  %vm5132_vm1 = vcmask 195584  }
 0x7a5   : > { %v11721_v11 = vpack.c.bf16 %v4983_v56, %v4982_v16  ;;  %vm7005_vm9 = vmpackc.low %vm5053_vm5, %vm5053_vm5  ;;  %v7136_v16 = vor.u32 %v7630_v42, %v7135_v17  ;;  %v7127_v56 = vld [vmem:[%s12499_s7 + $0xe0] sm:$0xf]  ;;  %v7183_v5 = vld [vmem:[%s12499_s7 + $0x150] sm:$0xf]  ;;  %vm6127_vm5 = vcmask 1040384  }
 0x7a6   : > { %vm7008_vm10 = vmpackc.low %vm5071_vm6, %vm5071_vm6  ;;  %v7175_v42 = vld [vmem:[%s12499_s7 + $0x140] sm:$0xf]  ;;  %v7263_v37 = vld [vmem:[%s12499_s7 + $0x1f0] sm:$0xf]  ;;  %vm6144_vm6 = vcmask 80896  }
 0x7a7   : > { %v4918_v8 = vpop.f32.mrf.mxu3  ;;  %vm7011_vm11 = vmpackc.low %vm5089_vm8, %vm5089_vm8 }
 0x7a8   : > { %v4965_v2 = vpop.f32.mrf.mxu0  ;;  %v4919_v49 = vadd.f32 %v4918_v8, %v4870_v31  ;;  %v7047_v8 = vld [vmem:[%s12499_s7 + $0x40] sm:$0xf]  ;;  %v7200_v31 = vor.u32 %v7646_v57, %v7199_v30  ;;  %v7672_v57 = vld [vmem:[%s12499_s7 + $0x244] sm:$0xf0] }
 0x7a9   : > { %v4966_v59 = vadd.f32 %v4965_v2, %v4917_v34  ;;  %v7048_v48 = vor.u32 %v7608_v0, %v7047_v8  ;;  %v7255_v8 = vld [vmem:[%s12499_s7 + $0x1e0] sm:$0xf]  ;;  %v7660_v0 = vld [vmem:[%s12499_s7 + $0x1e4] sm:$0xf0] }
 0x7ab   : > { %v4984_v50 = vmax.f32 %v4966_v59, 0.0  ;;  %v7624_v59 = vld [vmem:[%s12499_s7 + $0xc4] sm:$0xf0] }
 0x7b0   : > { %v4967_v51 = vpop.f32.mrf.mxu0 }
 0x7b1   : > { %v4968_v55 = vadd.f32 %v4967_v51, %v4919_v49  ;;  %v7111_v49 = vld [vmem:[%s12499_s7 + $0xc0] sm:$0xf]  ;;  %v7039_v51 = vld [vmem:[%s12499_s7 + $0x30] sm:$0xf] }
 0x7b2   : > { %v7112_v29 = vor.u32 %v7624_v59, %v7111_v49  ;;  %v7040_v7 = vor.u32 %v7606_v23, %v7039_v51  ;;  %v7636_v49 = vld [vmem:[%s12499_s7 + $0x124] sm:$0xf0]  ;;  %v7295_v59 = vld [vmem:[%s12499_s7 + $0x230] sm:$0xf] }
 0x7b3   : > { %v4985_v33 = vmax.f32 %v4968_v55, 0.0  ;;  %v7103_v55 = vld [vmem:[%s12499_s7 + $0xb0] sm:$0xf] }
 0x7b5   : > { %v5002_v25 = vpack.c.bf16 %v4985_v33, %v4984_v50  ;;  %v7604_v50 = vld [vmem:[%s12499_s7 + $0x24] sm:$0xf0]  ;;  %v7104_v33 = vor.u32 %v7622_v18, %v7103_v55  ;;  %v7634_v55 = vld [vmem:[%s12499_s7 + $0x114] sm:$0xf0]  ;;  %v7287_v18 = vld [vmem:[%s12499_s7 + $0x220] sm:$0xf] }
 0x7b6   : > { %v7032_v10 = vor.u32 %v7604_v50, %v7031_v38  ;;  %v7645_v38 = vld [vmem:[%s12499_s7 + $0x174] sm:$0xf] }
 0x7b7   : > { %5003 = vmatpush.bf16.msra.mxu1 %v5002_v25  ;;  %5021 = vmatpush.bf16.msrb.mxu2 %v5002_v25 }
 0x7b8   : > { %5039 = vmatpush.bf16.msrb.mxu3 %v5002_v25 }
 0x7bb   : > { %5004 = vmatpush.bf16.msra.mxu1 %v11721_v11  ;;  %5022 = vmatpush.bf16.msrb.mxu2 %v11721_v11 }
 0x7bc   : > { %5040 = vmatpush.bf16.msrb.mxu3 %v11721_v11 }
 0x7bf   : > { %5005 = vmatpush.bf16.msra.mxu1 %v5000_v54  ;;  %5023 = vmatpush.bf16.msrb.mxu2 %v5000_v54 }
 0x7c0   : > { %5041 = vmatpush.bf16.msrb.mxu3 %v5000_v54 }
 0x7c3   : > { %5006 = vmatpush.bf16.msra.mxu1 %v4999_v21  ;;  %5024 = vmatpush.bf16.msrb.mxu2 %v4999_v21 }
 0x7c4   : > { %5042 = vmatpush.bf16.msrb.mxu3 %v4999_v21 }
 0x7c7   : > { %5007 = vmatpush.bf16.msra.mxu1 %v11709_v63  ;;  %5025 = vmatpush.bf16.msrb.mxu2 %v11709_v63 }
 0x7c8   : > { %5043 = vmatpush.bf16.msrb.mxu3 %v11709_v63 }
 0x7cb   : > { %5008 = vmatpush.bf16.msra.mxu1 %v11703_v40  ;;  %5026 = vmatpush.bf16.msrb.mxu2 %v11703_v40 }
 0x7cc   : > { %5044 = vmatpush.bf16.msrb.mxu3 %v11703_v40 }
 0x7cf   : > { %5009 = vmatpush.bf16.msra.mxu1 %v11699_v28  ;;  %5027 = vmatpush.bf16.msrb.mxu2 %v11699_v28 }
 0x7d0   : > { %5045 = vmatpush.bf16.msrb.mxu3 %v11699_v28 }
 0x7d3   : > { %5010 = vmatpush.bf16.msra.mxu1 %v11695_v61  ;;  %5028 = vmatpush.bf16.msrb.mxu2 %v11695_v61 }
 0x7d4   : > { %5046 = vmatpush.bf16.msrb.mxu3 %v11695_v61 }
 0x7d6   : > { %7000 = vmatmul.msk.bf16.vlgmr.msrb.gmra.mxu2 %vm6999_vm2, %v8163_v19  ;;  %6997 = vmatmul.msk.bf16.vlgmr.msra.gmra.mxu1 %vm6996_vm3, %v8163_v19  ;;  %vm5134_vm2 = vcmask 1031168   ;;  %vm6060_vm3 = vcmask 1042432  }
 0x7d7   : > { %5057 = vmatpush.bf16.msrb.mxu1 %v5002_v25  ;;  %5075 = vmatpush.bf16.msra.mxu2 %v5002_v25 }
 0x7d8   : > { %5093 = vmatpush.bf16.msra.mxu3 %v5002_v25  ;;  %v7024_v25 = vor.u32 %v7602_v58, %v7023_v41  ;;  %v7247_v41 = vld [vmem:[%s12499_s7 + $0x1d0] sm:$0xf]  ;;  %v7658_v58 = vld [vmem:[%s12499_s7 + $0x1d4] sm:$0xf0] }
 0x7d9   : > { %7003 = vmatmul.msk.bf16.vlgmr.msrb.gmra.mxu3 %vm7002_vm4, %v8163_v19  ;;  %vm6056_vm4 = vcmask 179200  }
 0x7db   : > { %5058 = vmatpush.bf16.msrb.mxu1 %v11721_v11  ;;  %5076 = vmatpush.bf16.msra.mxu2 %v11721_v11 }
 0x7dc   : > { %5094 = vmatpush.bf16.msra.mxu3 %v11721_v11  ;;  %v7628_v11 = vld [vmem:[%s12499_s7 + $0xe4] sm:$0xf0] }
 0x7dd   : > { %v7128_v2 = vor.u32 %v7628_v11, %v7127_v56  ;;  %v7674_v56 = vld [vmem:[%s12499_s7 + $0x254] sm:$0xf0] }
 0x7df   : > { %5059 = vmatpush.bf16.msrb.mxu1 %v5000_v54  ;;  %5077 = vmatpush.bf16.msra.mxu2 %v5000_v54 }
 0x7e0   : > { %5095 = vmatpush.bf16.msra.mxu3 %v5000_v54  ;;  %v7095_v54 = vld [vmem:[%s12499_s7 + $0xa0] sm:$0xf] }
 0x7e1   : > { %v7096_v14 = vor.u32 %v7620_v52, %v7095_v54  ;;  %v7143_v54 = vld [vmem:[%s12499_s7 + $0x100] sm:$0xf]  ;;  %v7632_v52 = vld [vmem:[%s12499_s7 + $0x104] sm:$0xf0] }
 0x7e3   : > { %5060 = vmatpush.bf16.msrb.mxu1 %v4999_v21  ;;  %5078 = vmatpush.bf16.msra.mxu2 %v4999_v21 }
 0x7e4   : > { %5096 = vmatpush.bf16.msra.mxu3 %v4999_v21  ;;  %v7087_v21 = vld [vmem:[%s12499_s7 + $0x90] sm:$0xf] }
 0x7e5   : > { %v7088_v53 = vor.u32 %v7618_v44, %v7087_v21  ;;  %v7144_v44 = vor.u32 %v7632_v52, %v7143_v54  ;;  %v7631_v52 = vld [vmem:[%s12499_s7 + $0x104] sm:$0xf] }
 0x7e7   : > { %5061 = vmatpush.bf16.msrb.mxu1 %v11709_v63  ;;  %5079 = vmatpush.bf16.msra.mxu2 %v11709_v63 }
 0x7e8   : > { %5097 = vmatpush.bf16.msra.mxu3 %v11709_v63  ;;  %v7614_v63 = vld [vmem:[%s12499_s7 + $0x74] sm:$0xf0] }
 0x7eb   : > { %5062 = vmatpush.bf16.msrb.mxu1 %v11703_v40  ;;  %5080 = vmatpush.bf16.msra.mxu2 %v11703_v40 }
 0x7ec   : > { %5098 = vmatpush.bf16.msra.mxu3 %v11703_v40 }
 0x7ef   : > { %5063 = vmatpush.bf16.msrb.mxu1 %v11699_v28  ;;  %5081 = vmatpush.bf16.msra.mxu2 %v11699_v28 }
 0x7f0   : > { %5099 = vmatpush.bf16.msra.mxu3 %v11699_v28  ;;  %v7071_v28 = vld [vmem:[%s12499_s7 + $0x70] sm:$0xf] }
 0x7f3   : > { %5064 = vmatpush.bf16.msrb.mxu1 %v11695_v61  ;;  %5082 = vmatpush.bf16.msra.mxu2 %v11695_v61 }
 0x7f4   : > { %5100 = vmatpush.bf16.msra.mxu3 %v11695_v61  ;;  %v7072_v61 = vor.u32 %v7614_v63, %v7071_v28  ;;  %v7192_v28 = vor.u32 %v7644_v4, %v7191_v45  ;;  %v7079_v63 = vld [vmem:[%s12499_s7 + $0x80] sm:$0xf] }
 0x7f5   : > { %v7271_v4 = vld [vmem:[%s12499_s7 + $0x200] sm:$0xf] }
 0x7f6   : > { %7006 = vmatmul.msk.bf16.vlgmr.msrb.gmra.mxu1 %vm7005_vm9, %v8163_v19  ;;  %7009 = vmatmul.msk.bf16.vlgmr.msra.gmra.mxu2 %vm7008_vm10, %v8163_v19 }
 0x7f7   : > { %7012 = vmatmul.msk.bf16.vlgmr.msra.gmra.mxu3 %vm7011_vm11, %v8163_v19  ;;  %5620 = vmatpush.bf16.msra.mxu1 %v7072_v61  ;;  %v7016_v19 = vor.u32 %v7600_v36, %v7015_v46  ;;  %v5531_v61 = vpack.c.b16 %v5453_v26, %v5453_v26  ;;  %v7073_v46 = vld [vmem:[%s12499_s7 + $0x78] sm:$0xf0]  ;;  %v7656_v36 = vld [vmem:[%s12499_s7 + $0x1c4] sm:$0xf0] }
 0x7f8   : > { %5633 = vmatpush.bf16.msrb.mxu2 %v7136_v16  ;;  %5646 = vmatpush.bf16.msrb.mxu3 %v7200_v31  ;;  %v7311_v16 = vld [vmem:[%s12499_s7 + $0x250] sm:$0xf]  ;;  %v7304_v31 = vor.u32 %v7672_v57, %v7303_v60  ;;  %v7664_v26 = vld [vmem:[%s12499_s7 + $0x204] sm:$0xf0] }
 0x7f9   : > { %v7312_v12 = vor.u32 %v7674_v56, %v7311_v16  ;;  %v7223_v56 = vld [vmem:[%s12499_s7 + $0x1a0] sm:$0xf] }
 0x7fb   : > { %5621 = vmatpush.bf16.msra.mxu1 %v7064_v9  ;;  %v5615_v9 = vsel %vm5613_vm12, %v5531_v61, 0  ;;  %v7065_v61 = vld [vmem:[%s12499_s7 + $0x68] sm:$0xf0] }
 0x7fc   : > { %5634 = vmatpush.bf16.msrb.mxu2 %v7128_v2  ;;  %5647 = vmatpush.bf16.msrb.mxu3 %v7192_v28  ;;  %v7662_v2 = vld [vmem:[%s12499_s7 + $0x1f4] sm:$0xf0]  ;;  %v7641_v28 = vld [vmem:[%s12499_s7 + $0x154] sm:$0xf] }
 0x7fd   : > { %v7264_v30 = vor.u32 %v7662_v2, %v7263_v37 }
 0x7ff   : > { %5622 = vmatpush.bf16.msra.mxu1 %v7056_v1  ;;  %v7638_v1 = vld [vmem:[%s12499_s7 + $0x134] sm:$0xf0] }
 0x800   : > { %5635 = vmatpush.bf16.msrb.mxu2 %v7120_v6  ;;  %v7168_v6 = vor.u32 %v7638_v1, %v7167_v62  ;;  %v7607_v62 = vld [vmem:[%s12499_s7 + $0x44] sm:$0xf] }
 0x801   : > { %v7639_v1 = vld [vmem:[%s12499_s7 + $0x144] sm:$0xf] }
 0x803   : > { %5623 = vmatpush.bf16.msra.mxu1 %v7048_v48  ;;  %v7670_v48 = vld [vmem:[%s12499_s7 + $0x234] sm:$0xf0] }
 0x804   : > { %5636 = vmatpush.bf16.msrb.mxu2 %v7112_v29  ;;  %v7296_v23 = vor.u32 %v7670_v48, %v7295_v59  ;;  %v7151_v29 = vld [vmem:[%s12499_s7 + $0x110] sm:$0xf]  ;;  %v7605_v59 = vld [vmem:[%s12499_s7 + $0x34] sm:$0xf] }
 0x805   : > { %v7152_v50 = vor.u32 %v7634_v55, %v7151_v29  ;;  %v7648_v29 = vld [vmem:[%s12499_s7 + $0x184] sm:$0xf0]  ;;  %v7635_v55 = vld [vmem:[%s12499_s7 + $0x124] sm:$0xf] }
 0x807   : > { %5624 = vmatpush.bf16.msra.mxu1 %v7040_v7  ;;  %v7668_v7 = vld [vmem:[%s12499_s7 + $0x224] sm:$0xf0] }
 0x808   : > { %5637 = vmatpush.bf16.msrb.mxu2 %v7104_v33  ;;  %v7288_v33 = vor.u32 %v7668_v7, %v7287_v18  ;;  %v7161_v18 = vld [vmem:[%s12499_s7 + $0x128] sm:$0xf0] }
 0x80b   : > { %5625 = vmatpush.bf16.msra.mxu1 %v7032_v10  ;;  %v7201_v10 = vld [vmem:[%s12499_s7 + $0x178] sm:$0xf0] }
 0x80c   : > { %5638 = vmatpush.bf16.msrb.mxu2 %v7096_v14  ;;  %v7239_v14 = vld [vmem:[%s12499_s7 + $0x1c0] sm:$0xf] }
 0x80d   : > { %v7240_v45 = vor.u32 %v7656_v36, %v7239_v14  ;;  %v7145_v14 = vld [vmem:[%s12499_s7 + $0x108] sm:$0xf0] }
 0x80f   : > { %5626 = vmatpush.bf16.msra.mxu1 %v7024_v25  ;;  %v7204_v25 = vor.u32 %v7645_v38, %v7201_v10  ;;  %v7033_v10 = vld [vmem:[%s12499_s7 + $0x28] sm:$0xf0] }
 0x810   : > { %5639 = vmatpush.bf16.msrb.mxu2 %v7088_v53  ;;  %v7613_v53 = vld [vmem:[%s12499_s7 + $0x74] sm:$0xf] }
 0x811   : > { %5711 = vmatpush.bf16.msrb.mxu0 %v7204_v25 }
 0x813   : > { %5627 = vmatpush.bf16.msra.mxu1 %v7016_v19  ;;  %v7076_v19 = vor.u32 %v7613_v53, %v7073_v46  ;;  %v7025_v53 = vld [vmem:[%s12499_s7 + $0x18] sm:$0xf0]  ;;  %v7657_v46 = vld [vmem:[%s12499_s7 + $0x1d4] sm:$0xf] }
 0x817   : > { %5659 = vmatpush.bf16.msrb.mxu1 %v7264_v30  ;;  %v7177_v30 = vld [vmem:[%s12499_s7 + $0x148] sm:$0xf0] }
 0x853   : > { %v11768_v40 = vpop.f32.mrf.mxu1 }
 0x859   : > { %v5030_v15 = vpop.f32.mrf.mxu2 }
 0x85a   : > { %5107 = vrot.lane.b32.xlu2 %v5030_v15, %s8164_s18  ;;  %v7080_v15 = vor.u32 %v7616_v27, %v7079_v63  ;;  %v7272_v63 = vor.u32 %v7664_v26, %v7271_v4  ;;  %v7185_v27 = vld [vmem:[%s12499_s7 + $0x158] sm:$0xf0]  ;;  %v5454_v4 = vunpack.c.h.b16 %v11869_v35  ;;  %v7599_v26 = vld [vmem:[%s12499_s7 + $0x4] sm:$0xf]  ;;  %s6157_s18 = scalar_lea.hbm %s12507_s15, %s7468_s24 }
 0x85b   : > { %v5014_v24 = vpop.f32.mrf.mxu1  ;;  %v7137_v35 = vld [vmem:[%s12499_s7 + $0xf8] sm:$0xf0] }
 0x85c   : > { %v5048_v39 = vpop.f32.mrf.mxu3  ;;  %v7640_v24 = vld [vmem:[%s12499_s7 + $0x144] sm:$0xf0]  ;;  %5640 = vmatpush.bf16.msrb.mxu2 %v7080_v15  ;;  %v7611_v15 = vld [vmem:[%s12499_s7 + $0x64] sm:$0xf] }
 0x85d   : > { %5111 = vrot.lane.b32.xlu0 %v5048_v39, %s8165_s27  ;;  %v7642_v39 = vld [vmem:[%s12499_s7 + $0x154] sm:$0xf0]  ;;  %v7176_v11 = vor.u32 %v7640_v24, %v7175_v42  ;;  %v7609_v24 = vld [vmem:[%s12499_s7 + $0x54] sm:$0xf]  ;;  %s6161_s27 = sshll.u32 %s6157_s18, 4  ;;  %s6162_s27 = int_to_ptr.hbm [resolvable:$true] %s6161_s27 }
 0x85e   : > { %v7184_v17 = vor.u32 %v7642_v39, %v7183_v5  ;;  %v7231_v5 = vld [vmem:[%s12499_s7 + $0x1b0] sm:$0xf]  ;;  %v7188_v39 = vor.u32 %v7641_v28, %v7185_v27  ;;  %v7654_v42 = vld [vmem:[%s12499_s7 + $0x1b4] sm:$0xf0]  ;;  %v7017_v28 = vld [vmem:[%s12499_s7 + $0x8] sm:$0xf0] }
 0x85f   : > { %v7232_v16 = vor.u32 %v7654_v42, %v7231_v5  ;;  %v7629_v27 = vld [vmem:[%s12499_s7 + $0xf4] sm:$0xf]  ;;  %v7241_v5 = vld [vmem:[%s12499_s7 + $0x1c8] sm:$0xf0]  ;;  %s8104_s0 = sshra.s32 %s6162_s27, 4  ;;  %s8105_s0 = int_to_ptr.hbm [resolvable:$true] %s8104_s0 }
 0x860   : > { %5673 = vmatpush.bf16.msra.mxu2 %v5615_v9  ;;  %5648 = vmatpush.bf16.msrb.mxu3 %v7184_v17  ;;  %v7068_v17 = vor.u32 %v7611_v15, %v7065_v61  ;;  %v7057_v9 = vld [vmem:[%s12499_s7 + $0x58] sm:$0xf0]  ;;  %v7020_v15 = vor.u32 %v7599_v26, %v7017_v28  ;;  %v5532_v61 = vpack.c.b16 %v5454_v4, %v5454_v4  ;;  %v7669_v4 = vld [vmem:[%s12499_s7 + $0x234] sm:$0xf]  ;;  %s8106_s1 = scalar_lea.hbm %s8105_s0, 8  ;;  %p8111_p0 = scmp.lt.s32.totalorder %s8105_s0, %s12507_s15 }
 0x861   : > { %v5032_v34 = vpop.f32.mrf.mxu2  ;;  %v7060_v2 = vor.u32 %v7609_v24, %v7057_v9  ;;  %v7140_v9 = vor.u32 %v7629_v27, %v7137_v35  ;;  %v7297_v26 = vld [vmem:[%s12499_s7 + $0x238] sm:$0xf0]  ;;  %v7289_v27 = vld [vmem:[%s12499_s7 + $0x228] sm:$0xf0]  ;;  %p8107_p11 = scmp.ne.s32.totalorder %s8105_s0, %s8106_s1 }
 0x862   : > { %v7256_v34 = vor.u32 %v7660_v0, %v7255_v8  ;;  %v7215_v8 = vld [vmem:[%s12499_s7 + $0x190] sm:$0xf]  ;;  %v7650_v0 = vld [vmem:[%s12499_s7 + $0x194] sm:$0xf0]  ;;  %v5618_v42 = vsel %vm5613_vm12, %v5532_v61, 0  ;;  %v7300_v28 = vor.u32 %v7669_v4, %v7297_v26 }
 0x863   : > { %v7281_v61 = vld [vmem:[%s12499_s7 + $0x218] sm:$0xf0]  ;;  %p8108_p12 = pnand %p8107_p11, %p8287_p5 }
 0x864   : > { %v5050_v32 = vpop.f32.mrf.mxu3  ;;  %5674 = vmatpush.bf16.msra.mxu2 %v7312_v12  ;;  %5649 = vmatpush.bf16.msrb.mxu3 %v7176_v11  ;;  %v7652_v11 = vld [vmem:[%s12499_s7 + $0x1a4] sm:$0xf0] }
 0x865   : > { %v7159_v32 = vld [vmem:[%s12499_s7 + $0x120] sm:$0xf]  ;;  %5660 = vmatpush.bf16.msrb.mxu1 %v7256_v34  ;;  %v7224_v60 = vor.u32 %v7652_v11, %v7223_v56  ;;  %v7637_v34 = vld [vmem:[%s12499_s7 + $0x134] sm:$0xf]  ;;  %v7233_v56 = vld [vmem:[%s12499_s7 + $0x1b8] sm:$0xf0]  ;;  %p8109_p13 = pneg %p8108_p12 }
 0x866   : > { %v7160_v51 = vor.u32 %v7636_v49, %v7159_v32  ;;  %v7216_v49 = vor.u32 %v7650_v0, %v7215_v8 }
 0x868   : > { %5675 = vmatpush.bf16.msra.mxu2 %v7304_v31  ;;  %5650 = vmatpush.bf16.msrb.mxu3 %v7168_v6  ;;  %v7180_v31 = vor.u32 %v7639_v1, %v7177_v30  ;;  %v7169_v6 = vld [vmem:[%s12499_s7 + $0x138] sm:$0xf0]  ;;  %v7225_v1 = vld [vmem:[%s12499_s7 + $0x1a8] sm:$0xf0]  ;;  %v7625_v30 = vld [vmem:[%s12499_s7 + $0xd4] sm:$0xf] }
 0x869   : > { %v7172_v48 = vor.u32 %v7637_v34, %v7169_v6  ;;  %v7217_v34 = vld [vmem:[%s12499_s7 + $0x198] sm:$0xf0]  ;;  %v7623_v6 = vld [vmem:[%s12499_s7 + $0xc4] sm:$0xf] }
 0x86c   : > { %5676 = vmatpush.bf16.msra.mxu2 %v7296_v23  ;;  %5651 = vmatpush.bf16.msrb.mxu3 %v7160_v51  ;;  %v7041_v51 = vld [vmem:[%s12499_s7 + $0x38] sm:$0xf0]  ;;  %v7207_v23 = vld [vmem:[%s12499_s7 + $0x180] sm:$0xf] }
 0x86d   : > { %v7044_v7 = vor.u32 %v7605_v59, %v7041_v51  ;;  %v7208_v38 = vor.u32 %v7648_v29, %v7207_v23  ;;  %v7647_v59 = vld [vmem:[%s12499_s7 + $0x184] sm:$0xf] }
 0x870   : > { %5677 = vmatpush.bf16.msra.mxu2 %v7288_v33  ;;  %5652 = vmatpush.bf16.msrb.mxu3 %v7152_v50  ;;  %v7603_v50 = vld [vmem:[%s12499_s7 + $0x24] sm:$0xf]  ;;  %v7164_v33 = vor.u32 %v7635_v55, %v7161_v18  ;;  %v7621_v55 = vld [vmem:[%s12499_s7 + $0xb4] sm:$0xf]  ;;  %v7105_v18 = vld [vmem:[%s12499_s7 + $0xb8] sm:$0xf0] }
 0x873   : > { %v5066_v22 = vpop.f32.mrf.mxu1 }
 0x874   : > { %5115 = vrot.lane.b32.xlu1 %v5066_v22, %s8166_s26  ;;  %v7248_v22 = vor.u32 %v7658_v58, %v7247_v41  ;;  %5653 = vmatpush.bf16.msrb.mxu3 %v7144_v44  ;;  %v7661_v41 = vld [vmem:[%s12499_s7 + $0x1f4] sm:$0xf]  ;;  %v7265_v58 = vld [vmem:[%s12499_s7 + $0x1f8] sm:$0xf0] }
 0x875   : > { %v7268_v25 = vor.u32 %v7661_v41, %v7265_v58  ;;  %v7601_v44 = vld [vmem:[%s12499_s7 + $0x14] sm:$0xf] }
 0x876   : > { %5661 = vmatpush.bf16.msrb.mxu1 %v7248_v22  ;;  %v7633_v22 = vld [vmem:[%s12499_s7 + $0x114] sm:$0xf]  ;;  %v7028_v36 = vor.u32 %v7601_v44, %v7025_v53 }
 0x877   : > { %v7617_v58 = vld [vmem:[%s12499_s7 + $0x94] sm:$0xf] }
 0x878   : > { %5685 = vmatpush.bf16.msra.mxu3 %v7076_v19  ;;  %v7249_v19 = vld [vmem:[%s12499_s7 + $0x1d8] sm:$0xf0] }
 0x879   : > { %v5084_v47 = vpop.f32.mrf.mxu2 }
 0x87a   : > { %v5102_v20 = vpop.f32.mrf.mxu3  ;;  %5119 = vrot.lane.b32.xlu0 %v5084_v47, %s8167_s17  ;;  %v7279_v47 = vld [vmem:[%s12499_s7 + $0x210] sm:$0xf]  ;;  %5662 = vmatpush.bf16.msrb.mxu1 %v7240_v45  ;;  %v7252_v45 = vor.u32 %v7657_v46, %v7249_v19  ;;  %s488_s17 = scalar_lea.vmem [#allocation2], %s6225_s16  ;;  %s8110_s16 = scalar_lea.hbm %s12507_s15, 16 }
 0x87b   : > { %5123 = vrot.lane.b32.xlu2 %v5102_v20, %s8168_s23  ;;  %v5068_v13 = vpop.f32.mrf.mxu1  ;;  %v7666_v20 = vld [vmem:[%s12499_s7 + $0x214] sm:$0xf0]  ;;  %s6159_s23 = sshll.u32 %s488_s17, 4  ;;  %p8112_p1 = scmp.lt.s32.totalorder %s8110_s16, %s8106_s1  ;;  %s6160_s23 = int_to_ptr.vmem [resolvable:$true] %s6159_s23 }
 0x87c   : > { %v7643_v13 = vld [vmem:[%s12499_s7 + $0x164] sm:$0xf]  ;;  %5686 = vmatpush.bf16.msra.mxu3 %v7068_v17 }
 0x87d   : > { %p8113_p2 = por %p8112_p1, %p8111_p0 }
 0x87e   : > { %5663 = vmatpush.bf16.msrb.mxu1 %v7232_v16  ;;  %v7653_v16 = vld [vmem:[%s12499_s7 + $0x1b4] sm:$0xf] }
 0x87f   : > { %p8114_p3 = pnand %p8113_p2, %p8109_p13 }
 0x880   : > { %5687 = vmatpush.bf16.msra.mxu3 %v7060_v2  ;;  %v7236_v2 = vor.u32 %v7653_v16, %v7233_v56  ;;  %v7689_v16 = vld [vmem:[%s12501_s9 + $0x74] sm:$0xf] }
 0x881   : > { %v5086_v43 = vpop.f32.mrf.mxu2 }
 0x882   : > { %v5104_v3 = vpop.f32.mrf.mxu3  ;;  %v7280_v43 = vor.u32 %v7666_v20, %v7279_v47  ;;  %5664 = vmatpush.bf16.msrb.mxu1 %v7224_v60  ;;  %v7153_v47 = vld [vmem:[%s12499_s7 + $0x118] sm:$0xf0] }
 0x883   : > { %v7193_v3 = vld [vmem:[%s12499_s7 + $0x168] sm:$0xf0]  ;;  %v7156_v20 = vor.u32 %v7633_v22, %v7153_v47 }
 0x884   : > { %v7196_v21 = vor.u32 %v7643_v13, %v7193_v3  ;;  %5678 = vmatpush.bf16.msra.mxu2 %v7280_v43  ;;  %v7036_v13 = vor.u32 %v7603_v50, %v7033_v10  ;;  %v7659_v43 = vld [vmem:[%s12499_s7 + $0x1e4] sm:$0xf]  ;;  %v7257_v3 = vld [vmem:[%s12499_s7 + $0x1e8] sm:$0xf0] }
 0x885   : > { %v7260_v54 = vor.u32 %v7659_v43, %v7257_v3  ;;  %v7619_v50 = vld [vmem:[%s12499_s7 + $0xa4] sm:$0xf] }
 0x886   : > { %5712 = vmatpush.bf16.msrb.mxu0 %v7196_v21  ;;  %5665 = vmatpush.bf16.msrb.mxu1 %v7216_v49  ;;  %v7148_v21 = vor.u32 %v7631_v52, %v7145_v14  ;;  %v7615_v3 = vld [vmem:[%s12499_s7 + $0x84] sm:$0xf] }
 0x887   : > { %v7671_v14 = vld [vmem:[%s12499_s7 + $0x244] sm:$0xf] }
 0x888   : > { %5679 = vmatpush.bf16.msra.mxu2 %v7272_v63  ;;  %v7655_v63 = vld [vmem:[%s12499_s7 + $0x1c4] sm:$0xf] }
 0x88a   : > { %5713 = vmatpush.bf16.msrb.mxu0 %v7188_v39  ;;  %5666 = vmatpush.bf16.msrb.mxu1 %v7208_v38  ;;  %v7244_v39 = vor.u32 %v7655_v63, %v7241_v5  ;;  %v7108_v38 = vor.u32 %v7621_v55, %v7105_v18  ;;  %v7667_v63 = vld [vmem:[%s12499_s7 + $0x224] sm:$0xf]  ;;  %v7345_v55 = vld [vmem:[%s12501_s9 + $0x30] sm:$0xf]  ;;  %v7682_v18 = vld [vmem:[%s12501_s9 + $0x34] sm:$0xf0] }
 0x88b   : > { %v7292_v35 = vor.u32 %v7667_v63, %v7289_v27 }
 0x88e   : > { %5714 = vmatpush.bf16.msrb.mxu0 %v7180_v31  ;;  %v7649_v31 = vld [vmem:[%s12499_s7 + $0x194] sm:$0xf] }
 0x88f   : > { %v7220_v49 = vor.u32 %v7649_v31, %v7217_v34  ;;  %v7363_v31 = vld [vmem:[%s12501_s9 + $0x58] sm:$0xf0] }
 0x892   : > { %5715 = vmatpush.bf16.msrb.mxu0 %v7172_v48  ;;  %v7209_v48 = vld [vmem:[%s12499_s7 + $0x188] sm:$0xf0] }
 0x893   : > { %v7212_v29 = vor.u32 %v7647_v59, %v7209_v48  ;;  %v7684_v59 = vld [vmem:[%s12501_s9 + $0x44] sm:$0xf0]  ;;  %v7683_v48 = vld [vmem:[%s12501_s9 + $0x44] sm:$0xf] }
 0x896   : > { %5716 = vmatpush.bf16.msrb.mxu0 %v7164_v33  ;;  %v7097_v33 = vld [vmem:[%s12499_s7 + $0xa8] sm:$0xf0] }
 0x897   : > { %v7100_v10 = vor.u32 %v7619_v50, %v7097_v33  ;;  %v7346_v50 = vor.u32 %v7682_v18, %v7345_v55  ;;  %v7691_v55 = vld [vmem:[%s12501_s9 + $0x84] sm:$0xf] }
 0x89a   : > { %5717 = vmatpush.bf16.msrb.mxu0 %v7156_v20  ;;  %v7673_v20 = vld [vmem:[%s12499_s7 + $0x254] sm:$0xf] }
 0x89e   : > { %5718 = vmatpush.bf16.msrb.mxu0 %v7148_v21  ;;  %v7305_v21 = vld [vmem:[%s12499_s7 + $0x248] sm:$0xf0] }
 0x89f   : > { %v7308_v19 = vor.u32 %v7671_v14, %v7305_v21  ;;  %v7321_v14 = vld [vmem:[%s12501_s9] sm:$0xf]  ;;  %v7676_v21 = vld [vmem:[%s12501_s9 + $0x4] sm:$0xf0] }
 0x8b4   : > { %v12029_v12 = vpop.permute.xlu2 %5107 }
 0x8b5   : > { %v5127_v37 = vsel %vm5126_vm13, %v11768_v40, %v12029_v12  ;;  %v7049_v40 = vld [vmem:[%s12499_s7 + $0x48] sm:$0xf0] }
 0x8b6   : > { %v12043_v57 = vpack.c.bf16 %v5127_v37, %v5127_v37  ;;  %v7052_v32 = vor.u32 %v7607_v62, %v7049_v40  ;;  %v7627_v37 = vld [vmem:[%s12499_s7 + $0xe4] sm:$0xf]  ;;  %v7121_v40 = vld [vmem:[%s12499_s7 + $0xd8] sm:$0xf0] }
 0x8b7   : > { %v7651_v62 = vld [vmem:[%s12499_s7 + $0x1a4] sm:$0xf]  ;;  %v7124_v0 = vor.u32 %v7625_v30, %v7121_v40  ;;  %v7361_v40 = vld [vmem:[%s12501_s9 + $0x50] sm:$0xf] }
 0x8b8   : > { %5628 = vmatmul.bf16.vlgmr.msra.gmra.mxu1 %v12043_v57  ;;  %5688 = vmatpush.bf16.msra.mxu3 %v7052_v32  ;;  %v7228_v8 = vor.u32 %v7651_v62, %v7225_v1  ;;  %v7113_v32 = vld [vmem:[%s12499_s7 + $0xc8] sm:$0xf0] }
 0x8b9   : > { %5724 = vmatpush.bf16.msra.mxu1 %v7268_v25  ;;  %v7116_v51 = vor.u32 %v7623_v6, %v7113_v32  ;;  %v7089_v25 = vld [vmem:[%s12499_s7 + $0x98] sm:$0xf0]  ;;  %v7371_v62 = vld [vmem:[%s12501_s9 + $0x68] sm:$0xf0] }
 0x8ba   : > { %v7092_v43 = vor.u32 %v7617_v58, %v7089_v25  ;;  %v7679_v58 = vld [vmem:[%s12501_s9 + $0x24] sm:$0xf] }
 0x8bc   : > { %5689 = vmatpush.bf16.msra.mxu3 %v7044_v7 }
 0x8bd   : > { %5725 = vmatpush.bf16.msra.mxu1 %v7260_v54  ;;  %v7081_v54 = vld [vmem:[%s12499_s7 + $0x88] sm:$0xf0] }
 0x8be   : > { %v7084_v53 = vor.u32 %v7615_v3, %v7081_v54  ;;  %v7331_v54 = vld [vmem:[%s12501_s9 + $0x18] sm:$0xf0] }
 0x8c0   : > { %5690 = vmatpush.bf16.msra.mxu3 %v7036_v13  ;;  %v7313_v13 = vld [vmem:[%s12499_s7 + $0x258] sm:$0xf0] }
 0x8c1   : > { %5726 = vmatpush.bf16.msra.mxu1 %v7252_v45  ;;  %v7316_v52 = vor.u32 %v7673_v20, %v7313_v13  ;;  %v7329_v20 = vld [vmem:[%s12501_s9 + $0x10] sm:$0xf]  ;;  %v7678_v13 = vld [vmem:[%s12501_s9 + $0x14] sm:$0xf0] }
 0x8c2   : > { %v7330_v3 = vor.u32 %v7678_v13, %v7329_v20 }
 0x8c4   : > { %5691 = vmatpush.bf16.msra.mxu3 %v7028_v36 }
 0x8c5   : > { %5727 = vmatpush.bf16.msra.mxu1 %v7244_v39  ;;  %v7663_v39 = vld [vmem:[%s12499_s7 + $0x204] sm:$0xf] }
 0x8c8   : > { %5692 = vmatpush.bf16.msra.mxu3 %v7020_v15  ;;  %v7665_v15 = vld [vmem:[%s12499_s7 + $0x214] sm:$0xf] }
 0x8c9   : > { %5728 = vmatpush.bf16.msra.mxu1 %v7236_v2  ;;  %v7284_v5 = vor.u32 %v7665_v15, %v7281_v61  ;;  %v5218_v61 = vld [vmem:[%s12500_s8] sm:$0x3] }
 0x8cd   : > { %5729 = vmatpush.bf16.msra.mxu1 %v7228_v8  ;;  %v7686_v8 = vld [vmem:[%s12501_s9 + $0x54] sm:$0xf0] }
 0x8ce   : > { %v7362_v34 = vor.u32 %v7686_v8, %v7361_v40  ;;  %v7393_v8 = vld [vmem:[%s12501_s9 + $0x90] sm:$0xf] }
 0x8cf   : > { %v5112_v17 = vpop.permute.xlu0 %5111 }
 0x8d0   : > { %v5129_v24 = vsel %vm5128_vm14, %v12029_v12, %v5112_v17  ;;  %v7129_v12 = vld [vmem:[%s12499_s7 + $0xe8] sm:$0xf0] }
 0x8d1   : > { %v12149_v11 = vpack.c.bf16 %v5129_v24, %v5129_v24  ;;  %v7132_v60 = vor.u32 %v7627_v37, %v7129_v12  ;;  %5730 = vmatpush.bf16.msra.mxu1 %v7220_v49  ;;  %v7369_v37 = vld [vmem:[%s12501_s9 + $0x60] sm:$0xf]  ;;  %v7688_v12 = vld [vmem:[%s12501_s9 + $0x64] sm:$0xf0] }
 0x8d2   : > { %v7370_v1 = vor.u32 %v7688_v12, %v7369_v37  ;;  %v7353_v49 = vld [vmem:[%s12501_s9 + $0x40] sm:$0xf]  ;;  %v7695_v37 = vld [vmem:[%s12501_s9 + $0xa4] sm:$0xf]  ;;  %v7403_v12 = vld [vmem:[%s12501_s9 + $0xa8] sm:$0xf0] }
 0x8d3   : > { %5641 = vmatmul.bf16.vlgmr.msrb.gmra.mxu2 %v12149_v11 }
 0x8d4   : > { %5698 = vmatpush.bf16.msrb.mxu2 %v7140_v9  ;;  %v7690_v9 = vld [vmem:[%s12501_s9 + $0x74] sm:$0xf0] }
 0x8d5   : > { %v5124_v23 = vpop.permute.xlu2 %5123  ;;  %5731 = vmatpush.bf16.msra.mxu1 %v7212_v29 }
 0x8d6   : > { %v5217_v7 = vpack.c.bf16 %v5124_v23, %v5124_v23 }
 0x8d8   : > { %5699 = vmatpush.bf16.msrb.mxu2 %v7132_v60  ;;  %v7687_v60 = vld [vmem:[%s12501_s9 + $0x64] sm:$0xf] }
 0x8d9   : > { %v7374_v30 = vor.u32 %v7687_v60, %v7371_v62 }
 0x8dc   : > { %5700 = vmatpush.bf16.msrb.mxu2 %v7124_v0  ;;  %v7685_v0 = vld [vmem:[%s12501_s9 + $0x54] sm:$0xf] }
 0x8dd   : > { %v7366_v32 = vor.u32 %v7685_v0, %v7363_v31  ;;  %v7694_v0 = vld [vmem:[%s12501_s9 + $0x94] sm:$0xf0]  ;;  %v7693_v31 = vld [vmem:[%s12501_s9 + $0x94] sm:$0xf] }
 0x8e0   : > { %5701 = vmatpush.bf16.msrb.mxu2 %v7116_v51  ;;  %v7355_v51 = vld [vmem:[%s12501_s9 + $0x48] sm:$0xf0] }
 0x8e1   : > { %v7358_v29 = vor.u32 %v7683_v48, %v7355_v51 }
 0x8e3   : > { %7317 = vmatmul.msk.bf16.vlgmr.msra.gmra.mxu2 %vm5609_vm15, %v5217_v7 }
 0x8e4   : > { %5702 = vmatpush.bf16.msrb.mxu2 %v7108_v38  ;;  %v7347_v38 = vld [vmem:[%s12501_s9 + $0x38] sm:$0xf0] }
 0x8e6   : > { %v5116_v41 = vpop.permute.xlu1 %5115 }
 0x8e7   : > { %v5131_v22 = vsel %vm5130_vm0, %v5112_v17, %v5116_v41  ;;  %v7273_v17 = vld [vmem:[%s12499_s7 + $0x208] sm:$0xf0] }
 0x8e8   : > { %v5215_v47 = vpack.c.bf16 %v5131_v22, %v5131_v22  ;;  %5703 = vmatpush.bf16.msrb.mxu2 %v7100_v10  ;;  %v7337_v10 = vld [vmem:[%s12501_s9 + $0x20] sm:$0xf]  ;;  %v7339_v22 = vld [vmem:[%s12501_s9 + $0x28] sm:$0xf0] }
 0x8ea   : > { %5654 = vmatmul.bf16.vlgmr.msrb.gmra.mxu3 %v5215_v47  ;;  %5719 = vmatmul.bf16.vlgmr.msrb.gmra.mxu0 %v5215_v47  ;;  %v7342_v47 = vor.u32 %v7679_v58, %v7339_v22 }
 0x8eb   : > { %5738 = vmatpush.bf16.msrb.mxu3 %v5618_v42  ;;  %v7276_v42 = vor.u32 %v7663_v39, %v7273_v17  ;;  %v7698_v39 = vld [vmem:[%s12501_s9 + $0xb4] sm:$0xf0]  ;;  %v7697_v17 = vld [vmem:[%s12501_s9 + $0xb4] sm:$0xf] }
 0x8ec   : > { %v5120_v44 = vpop.permute.xlu0 %5119  ;;  %5704 = vmatpush.bf16.msrb.mxu2 %v7092_v43  ;;  %v7677_v43 = vld [vmem:[%s12501_s9 + $0x14] sm:$0xf] }
 0x8ed   : > { %v5133_v46 = vsel %vm5132_vm1, %v5116_v41, %v5120_v44  ;;  %v7680_v41 = vld [vmem:[%s12501_s9 + $0x24] sm:$0xf0]  ;;  %v7675_v44 = vld [vmem:[%s12501_s9 + $0x4] sm:$0xf] }
 0x8ee   : > { %v5135_v36 = vsel %vm5134_vm2, %v5133_v46, %v5124_v23  ;;  %v7354_v23 = vor.u32 %v7684_v59, %v7353_v49  ;;  %v7338_v25 = vor.u32 %v7680_v41, %v7337_v10  ;;  %v7323_v46 = vld [vmem:[%s12501_s9 + $0x8] sm:$0xf0] }
 0x8ef   : > { %5739 = vmatpush.bf16.msrb.mxu3 %v7316_v52  ;;  %v5216_v45 = vpack.c.bf16 %v5135_v36, %v5135_v36  ;;  %v7334_v52 = vor.u32 %v7677_v43, %v7331_v54  ;;  %v7326_v36 = vor.u32 %v7675_v44, %v7323_v46 }
 0x8f0   : > { %5705 = vmatpush.bf16.msrb.mxu2 %v7084_v53  ;;  %v7322_v53 = vor.u32 %v7676_v21, %v7321_v14 }
 0x8f1   : > { %5667 = vmatmul.bf16.vlgmr.msrb.gmra.mxu1 %v5216_v45 }
 0x8f3   : > { %5740 = vmatpush.bf16.msrb.mxu3 %v7308_v19  ;;  %5706 = vmatmul.bf16.vlgmr.msrb.gmra.mxu2 %v12149_v11  ;;  %v7379_v11 = vld [vmem:[%s12501_s9 + $0x78] sm:$0xf0] }
 0x8f4   : > { %v7382_v2 = vor.u32 %v7689_v16, %v7379_v11  ;;  %v7696_v16 = vld [vmem:[%s12501_s9 + $0xa4] sm:$0xf0] }
 0x8f6   : > { %5946 = vmatpush.bf16.msra.mxu0 %v7382_v2 }
 0x8f7   : > { %5741 = vmatpush.bf16.msrb.mxu3 %v7300_v28 }
 0x8fa   : > { %5693 = vmatmul.bf16.vlgmr.msra.gmra.mxu3 %v12043_v57  ;;  %v7377_v57 = vld [vmem:[%s12501_s9 + $0x70] sm:$0xf]  ;;  %5947 = vmatpush.bf16.msra.mxu0 %v7374_v30 }
 0x8fb   : > { %5742 = vmatpush.bf16.msrb.mxu3 %v7292_v35  ;;  %v7378_v56 = vor.u32 %v7690_v9, %v7377_v57  ;;  %v7411_v57 = vld [vmem:[%s12501_s9 + $0xb8] sm:$0xf0]  ;;  %v7401_v9 = vld [vmem:[%s12501_s9 + $0xa0] sm:$0xf] }
 0x8fc   : > { %v7414_v11 = vor.u32 %v7697_v17, %v7411_v57  ;;  %v7402_v62 = vor.u32 %v7696_v16, %v7401_v9  ;;  %v7700_v57 = vld [vmem:[%s12503_s11 + $0x8] sm:$0xff]  ;;  %v7699_v16 = vld [vmem:[%s12503_s11] sm:$0xff] }
 0x8fd   : > { %5920 = vmatpush.bf16.msra.mxu2 %v7378_v56  ;;  %v5220_v56 = vperm.slane %v5218_v61, 0 }
 0x8fe   : > { %5948 = vmatpush.bf16.msra.mxu0 %v7366_v32 }
 0x8ff   : > { %5743 = vmatpush.bf16.msrb.mxu3 %v7284_v5  ;;  %v7409_v5 = vld [vmem:[%s12501_s9 + $0xb0] sm:$0xf] }
 0x901   : > { %5732 = vmatmul.bf16.vlgmr.msra.gmra.mxu1 %v5216_v45  ;;  %5921 = vmatpush.bf16.msra.mxu2 %v7370_v1  ;;  %v5776_v45 = vld [vmem:[%s12501_s9 + $0xc0] sm:$0xff]  ;;  %v7406_v1 = vor.u32 %v7695_v37, %v7403_v12 }
 0x902   : > { %5949 = vmatpush.bf16.msra.mxu0 %v7358_v29  ;;  %v5858_v4 = vunpack.c.l.b16 %v5776_v45  ;;  %v5859_v26 = vunpack.c.h.b16 %v5776_v45  ;;  %v7692_v29 = vld [vmem:[%s12501_s9 + $0x84] sm:$0xf0]  ;;  %v5779_v37 = vld [vmem:[%s12502_s10] sm:$0x3] }
 0x903   : > { %5744 = vmatpush.bf16.msrb.mxu3 %v7276_v42  ;;  %v7410_v42 = vor.u32 %v7698_v39, %v7409_v5  ;;  %v7701_v39 = vld [vmem:[%s12503_s11 + $0x10] sm:$0xff]  ;;  %v5782_v12 = vperm.slane %v5779_v37, 1 }
 0x904   : > { %v5884_v63 = vpack.c.b16 %v5858_v4, %v5858_v4  ;;  %v5885_v27 = vpack.c.b16 %v5859_v26, %v5859_v26  ;;  %v7706_v4 = vld [vmem:[%s12503_s11 + $0x38] sm:$0xff]  ;;  %v7705_v26 = vld [vmem:[%s12503_s11 + $0x30] sm:$0xff] }
 0x905   : > { %5922 = vmatpush.bf16.msra.mxu2 %v7362_v34 }
 0x906   : > { %v5915_v35 = vsel %vm3116_vm7, %v5884_v63, 0  ;;  %v5918_v15 = vsel %vm3116_vm7, %v5885_v27, 0  ;;  %vm5910_vm7 = vcmask 588800   ;;  %v7703_v63 = vld [vmem:[%s12503_s11 + $0x20] sm:$0xff]  ;;  %v7702_v27 = vld [vmem:[%s12503_s11 + $0x18] sm:$0xff] }
 0x907   : > { %5936 = vmatpush.bf16.msra.mxu3 %v5915_v35  ;;  %5962 = vmatpush.bf16.msrb.mxu1 %v5918_v15  ;;  %v5992_v35 = vld [vmem:[%s12503_s11 + $0x48] sm:$0x7] }
 0x908   : > { %v6036_v15 = vunpack.c.l.b16 %v5992_v35 }
 0x909   : > { %5923 = vmatpush.bf16.msra.mxu2 %v7354_v23  ;;  %v7385_v23 = vld [vmem:[%s12501_s9 + $0x80] sm:$0xf] }
 0x90a   : > { %7318 = vmatmul.msk.bf16.vlgmr.msrb.gmra.mxu3 %vm5609_vm15, %v5217_v7  ;;  %v7681_v7 = vld [vmem:[%s12501_s9 + $0x34] sm:$0xf] }
 0x90b   : > { %v7350_v33 = vor.u32 %v7681_v7, %v7347_v38  ;;  %5937 = vmatpush.bf16.msra.mxu3 %v7410_v42  ;;  %5963 = vmatpush.bf16.msrb.mxu1 %v7414_v11  ;;  %v7386_v7 = vor.u32 %v7692_v29, %v7385_v23  ;;  %v7387_v38 = vld [vmem:[%s12501_s9 + $0x88] sm:$0xf0]  ;;  %v7707_v42 = vld [vmem:[%s12503_s11 + $0x40] sm:$0xff]  ;;  %v7710_v23 = vld [vmem:[%s12505_s13 + $0x10] sm:$0xff] }
 0x90c   : > { %v7709_v29 = vld [vmem:[%s12505_s13 + $0x8] sm:$0xff] }
 0x90d   : > { %5924 = vmatpush.bf16.msra.mxu2 %v7346_v50  ;;  %5950 = vmatpush.bf16.msra.mxu0 %v7350_v33  ;;  %v7390_v33 = vor.u32 %v7691_v55, %v7387_v38  ;;  %v7708_v55 = vld [vmem:[%s12505_s13] sm:$0xff] }
 0x90e   : > { %v8088_v38 = vld [vmem:[%s12504_s12] ss:$0 sm:$0xff] }
 0x90f   : > { %5938 = vmatpush.bf16.msra.mxu3 %v7402_v62  ;;  %5964 = vmatpush.bf16.msrb.mxu1 %v7406_v1  ;;  %v5781_v62 = vperm.slane %v5779_v37, 0 }
 0x911   : > { %5925 = vmatpush.bf16.msra.mxu2 %v7338_v25  ;;  %5951 = vmatpush.bf16.msra.mxu0 %v7342_v47  ;;  %v5221_v47 = vperm.slane %v5218_v61, 1  ;;  %v6046_v61 = vpack.c.b16 %v6036_v15, %v6036_v15 }
 0x913   : > { %v6062_v5 = vsel %vm6060_vm3, %v6046_v61, 0 }
 0x915   : > { %5926 = vmatpush.bf16.msra.mxu2 %v7330_v3  ;;  %5952 = vmatpush.bf16.msra.mxu0 %v7334_v52 }
 0x919   : > { %5927 = vmatpush.bf16.msra.mxu2 %v7322_v53  ;;  %5953 = vmatpush.bf16.msra.mxu0 %v7326_v36 }
 0x935   : > { %v12253_v24 = vpop.f32.mrf.mxu1 }
 0x936   : > { %v5630_v30 = vadd.f32 %v12253_v24, %v5220_v56  ;;  %v7395_v24 = vld [vmem:[%s12501_s9 + $0x98] sm:$0xf0] }
 0x937   : > { %v7398_v49 = vor.u32 %v7693_v31, %v7395_v24 }
 0x939   : > { %5965 = vmatpush.bf16.msrb.mxu1 %v7398_v49  ;;  %v6097_v49 = vld [vmem:[%s12505_s13 + $0x18] sm:$0x1] }
 0x93d   : > { %v5631_v6 = vpop.f32.mrf.mxu1  ;;  %5966 = vmatpush.bf16.msrb.mxu1 %v7390_v33 }
 0x93e   : > { %v7394_v6 = vor.u32 %v7694_v0, %v7393_v8 }
 0x940   : > { %5939 = vmatpush.bf16.msra.mxu3 %v7394_v6 }
 0x941   : > { %6083 = vmatpush.bf16.msra.mxu1 %v6062_v5 }
 0x944   : > { %5940 = vmatpush.bf16.msra.mxu3 %v7386_v7 }
 0x945   : > { %6084 = vmatpush.bf16.msra.mxu1 %v7707_v42 }
 0x948   : > { %6064 = vmatpush.bf16.msrb.mxu3 %v7706_v4 }
 0x94c   : > { %6065 = vmatpush.bf16.msrb.mxu3 %v7705_v26 }
 0x956   : > { %v5642_v19 = vpop.f32.mrf.mxu2 }
 0x957   : > { %v5643_v40 = vadd.f32 %v5642_v19, %v5630_v30 }
 0x95e   : > { %v5644_v28 = vpop.f32.mrf.mxu2 }
 0x95f   : > { %v7704_v28 = vld [vmem:[%s12503_s11 + $0x28] sm:$0xff] }
 0x960   : > { %6066 = vmatpush.bf16.msrb.mxu3 %v7704_v28 }
 0x964   : > { %6067 = vmatpush.bf16.msrb.mxu3 %v7703_v63 }
 0x966   : > { %v5681_v2 = vpop.f32.mrf.mxu2 }
 0x967   : > { %v5720_v60 = vpop.f32.mrf.mxu0 }
 0x968   : > { %6068 = vmatpush.bf16.msrb.mxu3 %v7702_v27 }
 0x96c   : > { %6069 = vmatpush.bf16.msrb.mxu3 %v7701_v39 }
 0x96d   : > { %v5655_v34 = vpop.f32.mrf.mxu3 }
 0x96e   : > { %v5656_v32 = vadd.f32 %v5655_v34, %v5643_v40  ;;  %v5668_v59 = vpop.f32.mrf.mxu1  ;;  %v5683_v48 = vpop.f32.mrf.mxu2 }
 0x96f   : > { %v5722_v18 = vpop.f32.mrf.mxu0 }
 0x970   : > { %v5669_v51 = vadd.f32 %v5668_v59, %v5656_v32  ;;  %6070 = vmatpush.bf16.msrb.mxu3 %v7700_v57  ;;  %v6116_v59 = vunpack.c.l.b16 %v6097_v49 }
 0x972   : > { %v5682_v50 = vadd.f32 %v5681_v2, %v5669_v51  ;;  %v6120_v48 = vpack.c.b16 %v6116_v59, %v6116_v59 }
 0x974   : > { %v5750_v10 = vmax.f32 %v5682_v50, 0.0  ;;  %6071 = vmatpush.bf16.msrb.mxu3 %v7699_v16  ;;  %v6129_v51 = vsel %vm6127_vm5, %v6120_v48, 0 }
 0x975   : > { %v5657_v41 = vpop.f32.mrf.mxu3  ;;  %6135 = vmatpush.bf16.msrb.mxu2 %v6129_v51 }
 0x976   : > { %v5777_v58 = vpack.c.bf16 %v5750_v10, %v5750_v10  ;;  %v5670_v25 = vpop.f32.mrf.mxu1  ;;  %v5707_v22 = vpop.f32.mrf.mxu2 }
 0x978   : > { %5928 = vmatmul.bf16.vlgmr.msra.gmra.mxu2 %v5777_v58  ;;  %5954 = vmatmul.bf16.vlgmr.msra.gmra.mxu0 %v5777_v58 }
 0x979   : > { %6136 = vmatpush.bf16.msrb.mxu2 %v7710_v23 }
 0x97d   : > { %v5694_v20 = vpop.f32.mrf.mxu3  ;;  %6137 = vmatpush.bf16.msrb.mxu2 %v7709_v29 }
 0x97e   : > { %v5733_v13 = vpop.f32.mrf.mxu1  ;;  %v5709_v43 = vpop.f32.mrf.mxu2  ;;  %v5695_v3 = vadd.f32 %v5694_v20, %v5221_v47 }
 0x980   : > { %v5708_v54 = vadd.f32 %v5707_v22, %v5695_v3  ;;  %v8089_v22 = vld [vmem:[%s12506_s14] ss:$0 sm:$0xff] }
 0x981   : > { %6138 = vmatpush.bf16.msrb.mxu2 %v7708_v55 }
 0x982   : > { %v5721_v21 = vadd.f32 %v5720_v60, %v5708_v54 }
 0x984   : > { %v5734_v44 = vadd.f32 %v5733_v13, %v5721_v21 }
 0x985   : > { %v5696_v52 = vpop.f32.mrf.mxu3 }
 0x986   : > { %v5735_v14 = vpop.f32.mrf.mxu1 }
 0x98d   : > { %v5746_v53 = vpop.f32.mrf.mxu3 }
 0x98e   : > { %v5747_v46 = vadd.f32 %v5746_v53, %v5734_v44 }
 0x990   : > { %v5751_v36 = vmax.f32 %v5747_v46, 0.0 }
 0x992   : > { %v5778_v19 = vpack.c.bf16 %v5751_v36, %v5751_v36 }
 0x994   : > { %7415 = vmatmul.msk.bf16.vlgmr.msra.gmra.mxu3 %vm5910_vm7, %v5778_v19  ;;  %7416 = vmatmul.msk.bf16.vlgmr.msrb.gmra.mxu1 %vm5910_vm7, %v5778_v19 }
 0x995   : > { %v5748_v45 = vpop.f32.mrf.mxu3 }
 0x9f5   : > { %v5955_v17 = vpop.f32.mrf.mxu0 }
 0x9f6   : > { %v5956_v2 = vadd.f32 %v5955_v17, %v5782_v12 }
 0x9fb   : > { %v5929_v9 = vpop.f32.mrf.mxu2 }
 0x9fc   : > { %v5930_v40 = vadd.f32 %v5929_v9, %v5781_v62 }
 0x9fd   : > { %v5957_v56 = vpop.f32.mrf.mxu0 }
 0xa03   : > { %v5931_v11 = vpop.f32.mrf.mxu2 }
 0xa11   : > { %v5968_v60 = vpop.f32.mrf.mxu1 }
 0xa12   : > { %v5969_v1 = vadd.f32 %v5968_v60, %v5956_v2 }
 0xa14   : > { %v5973_v30 = vmax.f32 %v5969_v1, 0.0 }
 0xa16   : > { %v5994_v8 = vpack.c.bf16 %v5973_v30, %v5973_v30 }
 0xa17   : > { %v5942_v0 = vpop.f32.mrf.mxu3 }
 0xa18   : > { %v5943_v31 = vadd.f32 %v5942_v0, %v5930_v40  ;;  %7453 = vmatmul.msk.bf16.vlgmr.msra.gmra.mxu1 %vm6056_vm4, %v5994_v8 }
 0xa19   : > { %v5970_v34 = vpop.f32.mrf.mxu1 }
 0xa1a   : > { %v5972_v6 = vmax.f32 %v5943_v31, 0.0 }
 0xa1c   : > { %v5993_v24 = vpack.c.bf16 %v5972_v6, %v5972_v6 }
 0xa1e   : > { %6072 = vmatmul.bf16.vlgmr.msrb.gmra.mxu3 %v5993_v24 }
 0xa1f   : > { %v5944_v32 = vpop.f32.mrf.mxu3 }
 0xa95   : > { %v6086_v18 = vpop.f32.mrf.mxu1 }
 0xa9d   : > { %v6088_v7 = vpop.f32.mrf.mxu1 }
 0xaa1   : > { %v6073_v50 = vpop.f32.mrf.mxu3 }
 0xaa2   : > { %v6074_v33 = vadd.f32 %v8088_v38, %v6073_v50 }
 0xaa4   : > { %v6087_v10 = vadd.f32 %v6086_v18, %v6074_v33 }
 0xaa6   : > { %v6090_v41 = vmax.f32 %v6087_v10, 0.0 }
 0xaa8   : > { %v6098_v58 = vpack.c.bf16 %v6090_v41, %v6090_v41 }
 0xaa9   : > { %v6075_v25 = vpop.f32.mrf.mxu3 }
 0xaaa   : > { %7466 = vmatmul.msk.bf16.vlgmr.msrb.gmra.mxu2 %vm5130_vm0, %v6098_v58 }
 0xb2d   : > { %v6140_v47 = vpop.f32.mrf.mxu2 }
 0xb2e   : > { %v6141_v20 = vadd.f32 %v8089_v22, %v6140_v47 }
 0xb30   : > { %6145 = vst.msk [vmem:[%s488_s17] sm:$0xff] %vm6144_vm6, %v6141_v20 }
 0xb31   : > { %8117 = shalt.err (!%p8114_p3)
}
 0xb32   : > { %7711 = dma.vmem_to_hbm [thread:$0]  (%p8287_p5), %s6160_s23, 128, %s6162_s27, %s6147_s22  }
 0xb35   : > { %v6142_v13 = vpop.f32.mrf.mxu2 }
 0xb36 PF: > { %s12994_s20 = sld [smem:[#allocation5_spill]]  ;;  %p7717_p4 = scmp.ge.s32.totalorder %s8152_s21, 2 }
 0xb38   : > { %p7714_p7 = pnand %p7717_p4, %p8291_p6 }
 0xb3a   : > { %p7715_p8 = pneg %p7714_p7 }
 0xb3c   : > { %s6173_s26 = sand.u32 1, %s12994_s20  }
 0xb3d   : > { %s6174_s17 = scalar_lea.sflag [#allocation3], %s6173_s26 }
 0xb3e   : > { %8135 = dma.done.wait (%p7715_p8), %s6174_s17, 128  }
 0xb3f   : > { %8137 = vsyncadd (%p7715_p8), %s6174_s17, 4294967168  ;;  %s12996_s21 = sld [smem:[#allocation7_spill]]  ;;  %s12999_s18 = smov %s8144_s19 }
 0xb40   : > { %s12997_s0 = sld [smem:[#allocation6_spill]] }
 0xb41   : > { %s12998_s20 = sld [smem:[#allocation8_spill]] }
 0xb45   : > { %p25_p9 = scmp.ge.s32.totalorder %s12996_s21, 4  }
 0xb46   : > { %s13000_s19 = smov %s12997_s0 }
 0xb47   :  { %27 = sbr.rel (!%p25_p9) target bundleno = 6 (0x6), region = 150 }
 0xb4c   :  { %6180 = vsyncpa [#allocation3], 1 }
 0xb4d   :  { %6182 = vsyncpa [#allocation3 + $0x1], 1 }

</bundles_post_ra>
